<compile_context>
chip_gen: v7x
topology: tpu7x:2x2x1
jax: 0.10.0
libtpu: 0.0.40
codegen_flags: <defaults>
</compile_context>

<pallas_src>
import functools

import jax
import jax.numpy as jnp
from jax import lax
from jax.experimental import pallas as pl
from jax.experimental.pallas import tpu as pltpu


# ---------------------------------------------------------------------------
# Chip-dependent knobs (queried once; safe defaults if the query fails).
# ---------------------------------------------------------------------------
def _device_kind():
    try:
        return jax.devices()[0].device_kind.lower()
    except Exception:
        return ""


_KIND = _device_kind()
_IS_V7 = "v7" in _KIND
_NUM_TC = 2 if _IS_V7 else 1                         # v5e/v6e: 1 TC, v7x: 2 TCs
_TILE_BUDGET = (40 << 20) if _IS_V7 else (80 << 20)  # VMEM budget for live tiles
_VMEM_CAP = (48 << 20) if _IS_V7 else (96 << 20)     # scoped-VMEM hard cap


# ---------------------------------------------------------------------------
# In-kernel helpers
# ---------------------------------------------------------------------------
def _bn_relu_block(y, gamma, beta, m_true, eps):
    """Train-mode BatchNorm (biased var over the true M rows) + ReLU.

    Padded rows (row >= m_true) are masked out of the statistics and forced to
    zero in the result so they can never pollute a downstream fused stage.
    """
    mp = y.shape[0]
    inv_m = 1.0 / m_true
    row_ids = lax.broadcasted_iota(jnp.int32, (mp, 1), 0)
    valid = row_ids < m_true
    mean = jnp.sum(jnp.where(valid, y, 0.0), axis=0, keepdims=True) * inv_m
    centered = jnp.where(valid, y - mean, 0.0)
    var = jnp.sum(centered * centered, axis=0, keepdims=True) * inv_m
    inv_std = lax.rsqrt(var + eps)
    y_norm = centered * (inv_std * gamma) + beta
    return jnp.where(valid, jnp.maximum(y_norm, 0.0), 0.0)


def _conv_bn_relu_kernel(a_ref, b_ref, gamma_ref, beta_ref, o_ref, acc_ref, *,
                         m_true, eps):
    """Fused im2col-conv matmul + train BatchNorm2d + ReLU (one layer).

    Grid = (C_out tiles [parallel], K tiles [arbitrary]).  The f32 VMEM scratch
    accumulates across K; the bf16 output block is written only on finalize.
    """
    k = pl.program_id(1)

    @pl.when(k == 0)
    def _init():
        acc_ref[...] = jnp.zeros_like(acc_ref)

    # bf16 x bf16 -> f32 accumulation on the MXU.
    acc_ref[...] += jnp.dot(a_ref[...], b_ref[...],
                            preferred_element_type=jnp.float32)

    @pl.when(k == pl.num_programs(1) - 1)
    def _finalize():
        y = _bn_relu_block(acc_ref[...], gamma_ref[...], beta_ref[...],
                           m_true, eps)
        o_ref[...] = y.astype(o_ref.dtype)


def _fused_tail_kernel(cols_ref, w3_ref, g3_ref, b3_ref, w4_ref, g4_ref, b4_ref,
                       w5_ref, g5_ref, b5_ref, o_ref, *, m_true, eps):
    """Last three conv+BN+ReLU layers fused (spatial map is 1x1, so the two
    trailing 3x3/s1/p1 convs reduce to matmuls with their centre weight tap)."""
    y = jnp.dot(cols_ref[...], w3_ref[...], preferred_element_type=jnp.float32)
    y = _bn_relu_block(y, g3_ref[...], b3_ref[...], m_true, eps)
    y = jnp.dot(y.astype(jnp.bfloat16), w4_ref[...],
                preferred_element_type=jnp.float32)
    y = _bn_relu_block(y, g4_ref[...], b4_ref[...], m_true, eps)
    y = jnp.dot(y.astype(jnp.bfloat16), w5_ref[...],
                preferred_element_type=jnp.float32)
    y = _bn_relu_block(y, g5_ref[...], b5_ref[...], m_true, eps)
    o_ref[...] = y.astype(o_ref.dtype)


# ---------------------------------------------------------------------------
# Per-layer pallas_call wrapper
# ---------------------------------------------------------------------------
def _tile_bytes(mp, tk, tn):
    return (2 * mp * tk * 2       # bf16 patch block, double-buffered
            + 2 * tk * tn * 2     # bf16 weight block, double-buffered
            + 2 * mp * tn * 2     # bf16 output block (headroom for 2 buffers)
            + mp * tn * 4         # f32 accumulator scratch
            + 4 * 2 * tn * 4)     # gamma / beta blocks


def _pick_k_tile(K, mp, tn, budget):
    """Full-K single step when it fits the budget; else largest 128-multiple divisor."""
    if K % 128 != 0 or _tile_bytes(mp, K, tn) <= budget:
        return K
    for mult in range(K // 128, 0, -1):
        tk = mult * 128
        if K % tk == 0 and _tile_bytes(mp, tk, tn) <= budget:
            return tk
    return 128


def conv_bn_relu(cols, w_mat, gamma, beta, m_true, eps=1e-5):
    """cols: (Mp, K) bf16 zero-padded patches; w_mat: (K, Cout) bf16 (Cout % 128 == 0)."""
    Mp, K = cols.shape
    Cout = w_mat.shape[1]

    # Single Cout tile on 1-TC chips (patch block streamed once); exactly two
    # "parallel" Cout tiles on v7x when the layer is wide enough to split.
    if _NUM_TC >= 2 and Cout >= 256 and Cout % 256 == 0:
        tn = Cout // 2
    else:
        tn = Cout
    tk = _pick_k_tile(K, Mp, tn, _TILE_BUDGET)
    grid = (Cout // tn, K // tk)
    vmem_limit = int(min(_VMEM_CAP, max(32 << 20, 2 * _tile_bytes(Mp, tk, tn))))

    kernel = functools.partial(_conv_bn_relu_kernel,
                               m_true=int(m_true), eps=float(eps))

    return pl.pallas_call(
        kernel,
        out_shape=jax.ShapeDtypeStruct((Mp, Cout), jnp.bfloat16),
        grid_spec=pltpu.PrefetchScalarGridSpec(
            num_scalar_prefetch=0,
            grid=grid,
            in_specs=[
                pl.BlockSpec((Mp, tk), lambda j, k: (0, k)),    # patches (bf16)
                pl.BlockSpec((tk, tn), lambda j, k: (k, j)),    # weights (bf16)
                pl.BlockSpec((1, tn), lambda j, k: (0, j)),     # BN gamma (f32)
                pl.BlockSpec((1, tn), lambda j, k: (0, j)),     # BN beta  (f32)
            ],
            out_specs=pl.BlockSpec((Mp, tn), lambda j, k: (0, j)),
            scratch_shapes=[pltpu.VMEM((Mp, tn), jnp.float32)],
        ),
        compiler_params=pltpu.CompilerParams(
            dimension_semantics=("parallel", "arbitrary"),
            vmem_limit_bytes=vmem_limit),
    )(cols, w_mat, gamma.reshape(1, Cout), beta.reshape(1, Cout))


def fused_tail(cols, p3, p4, p5, c_out, m_true, eps=1e-5):
    """Fuse the last stride-2 conv layer with the two trailing 3x3 layers
    (valid only when the output spatial map is 1x1)."""
    Mp, K3 = cols.shape
    c_in4 = p4['w'].shape[0] // 9
    c_in5 = p5['w'].shape[0] // 9
    w4c = p4['w'][4 * c_in4:5 * c_in4, :]   # centre tap of the 3x3 kernel
    w5c = p5['w'][4 * c_in5:5 * c_in5, :]

    def g(p):
        return p['gamma'].reshape(1, c_out)

    def b(p):
        return p['beta'].reshape(1, c_out)

    vmem_bytes = 2 * (Mp * K3 * 2 + K3 * c_out * 2 + 2 * c_out * c_out * 2
                      + Mp * c_out * 2) + 6 * c_out * 4
    vmem_limit = int(min(_VMEM_CAP, max(32 << 20, 2 * vmem_bytes)))

    kernel = functools.partial(_fused_tail_kernel,
                               m_true=int(m_true), eps=float(eps))

    def full(shape):
        return pl.BlockSpec(shape, lambda i: (0, 0))

    return pl.pallas_call(
        kernel,
        out_shape=jax.ShapeDtypeStruct((Mp, c_out), jnp.bfloat16),
        grid_spec=pltpu.PrefetchScalarGridSpec(
            num_scalar_prefetch=0,
            grid=(1,),
            in_specs=[
                full((Mp, K3)),
                full((K3, c_out)), full((1, c_out)), full((1, c_out)),
                full((c_out, c_out)), full((1, c_out)), full((1, c_out)),
                full((c_out, c_out)), full((1, c_out)), full((1, c_out)),
            ],
            out_specs=full((Mp, c_out)),
        ),
        compiler_params=pltpu.CompilerParams(
            dimension_semantics=("arbitrary",),
            vmem_limit_bytes=vmem_limit),
    )(cols, p3['w'], g(p3), b(p3), w4c, g(p4), b(p4), w5c, g(p5), b(p5))


# ---------------------------------------------------------------------------
# Layout plumbing (plain JAX) + model definition
# ---------------------------------------------------------------------------
def _im2col(x_nhwc, kh, kw, stride, pad):
    """Patch extraction; runs on the (already bf16) activation."""
    N, H, W, C = x_nhwc.shape
    xp = jnp.pad(x_nhwc, ((0, 0), (pad, pad), (pad, pad), (0, 0)))
    Ho = (H + 2 * pad - kh) // stride + 1
    Wo = (W + 2 * pad - kw) // stride + 1
    patches = []
    for i in range(kh):
        for j in range(kw):
            patches.append(
                xp[:, i:i + stride * Ho:stride, j:j + stride * Wo:stride, :])
    cols = jnp.stack(patches, axis=3)            # (N, Ho, Wo, kh*kw, C)
    return cols.reshape(N * Ho * Wo, kh * kw * C), Ho, Wo


def build_layer_specs(in_channels, hidden_channels):
    """Replicates the layer construction loop of FeatureExtraction.__init__."""
    specs = []   # (c_in, c_out, kernel, stride, pad)
    c_in = in_channels
    for h in hidden_channels:
        specs.append((c_in, h, 4, 2, 1))
        if h == hidden_channels[-1]:
            specs.append((h, h, 3, 1, 1))
            specs.append((h, h, 3, 1, 1))
        else:
            c_in = h
    return specs


def init_params(key, specs):
    """init_weights(init_type='normal'): conv w ~ N(0,0.02), gamma ~ N(1,0.02), beta = 0.
    Conv weights are stored in bf16 (matmul operand dtype); BN params stay f32."""
    params = []
    for (c_in, c_out, k, _, _) in specs:
        key, kw_key, kg_key = jax.random.split(key, 3)
        w = 0.02 * jax.random.normal(kw_key, (c_out, c_in, k, k), jnp.float32)
        # (C_out, C_in, kh, kw) -> (kh, kw, C_in, C_out) -> (kh*kw*C_in, C_out)
        # to match the (kh, kw, C_in) ordering produced by _im2col.
        w_mat = jnp.transpose(w, (2, 3, 1, 0)).reshape(k * k * c_in, c_out)
        gamma = 1.0 + 0.02 * jax.random.normal(kg_key, (c_out,), jnp.float32)
        beta = jnp.zeros((c_out,), jnp.float32)
        params.append(dict(w=w_mat.astype(jnp.bfloat16), gamma=gamma, beta=beta))
    return params


def feature_extraction_forward(x_nchw, params, specs):
    # bf16 activations end-to-end: cast BEFORE im2col so the kh*kw-expanded
    # patch arrays (dominant HBM traffic) are materialized in bf16.
    x = jnp.transpose(x_nchw, (0, 2, 3, 1)).astype(jnp.bfloat16)  # NCHW -> NHWC
    N = x.shape[0]
    n_layers = len(specs)
    i = 0
    while i < n_layers:
        c_in, c_out, k, stride, pad = specs[i]
        cols, Ho, Wo = _im2col(x, k, k, stride, pad)
        M = cols.shape[0]
        Mp = max(16, -(-M // 16) * 16)            # pad rows for bf16 (16,128) tiles
        if Mp != M:
            cols = jnp.pad(cols, ((0, Mp - M), (0, 0)))

        # Fused VMEM-resident tail: last three layers in one pallas_call when
        # the spatial map has collapsed to 1x1.
        if (i == n_layers - 3 and Ho == 1 and Wo == 1
                and all(specs[j][2:] == (3, 1, 1)
                        and specs[j][0] == specs[j][1] == c_out
                        for j in (n_layers - 2, n_layers - 1))):
            y = fused_tail(cols, params[i], params[i + 1], params[i + 2],
                           c_out, m_true=M)
            x = y[:M, :c_out].reshape(N, Ho, Wo, c_out)
            i += 3
            continue

        # Generic single-layer path.  Pad C_out to a lane-dense multiple of 128
        # (zero weight cols, gamma=1 / beta=0 -> padded channels are exactly 0).
        p = params[i]
        cout_p = -(-c_out // 128) * 128
        w, gamma, beta = p['w'], p['gamma'], p['beta']
        if cout_p != c_out:
            w = jnp.pad(w, ((0, 0), (0, cout_p - c_out)))
            gamma = jnp.pad(gamma, (0, cout_p - c_out), constant_values=1.0)
            beta = jnp.pad(beta, (0, cout_p - c_out))
        y = conv_bn_relu(cols, w, gamma, beta, m_true=M)
        x = y[:M, :c_out].reshape(N, Ho, Wo, c_out)
        i += 1

    return jnp.transpose(x, (0, 3, 1, 2)).astype(jnp.float32)    # NHWC -> NCHW


if __name__ == "__main__":
    in_channels = 4
    hidden_channels = [64, 128, 256, 512]         # module defaults
    N, H, W = 2, 16, 16

    x = jax.random.normal(jax.random.PRNGKey(0),
                          (N, in_channels, H, W), dtype=jnp.float32)

    specs = build_layer_specs(in_channels, hidden_channels)
    params = init_params(jax.random.PRNGKey(1), specs)

    fwd = jax.jit(lambda xx: feature_extraction_forward(xx, params, specs))
    out = fwd(x)
    jax.block_until_ready(out)

    # 4 stride-2 convs: 16 -> 8 -> 4 -> 2 -> 1; two 3x3 s=1 convs keep spatial.
    assert out.shape == (N, hidden_channels[-1], H // 16, W // 16), out.shape
    assert bool(jnp.all(jnp.isfinite(out)))
    print("KERNEL_OK")
</pallas_src>

<mosaic_0001>
module attributes {stable_mosaic.version = 11 : i64} {
  func.func @_conv_bn_relu_kernel(%arg0: i32, %arg1: i32, %arg2: memref<128x64xbf16, #tpu.memory_space<vmem>>, %arg3: memref<64x128xbf16, #tpu.memory_space<vmem>>, %arg4: memref<1x128xf32, #tpu.memory_space<vmem>>, %arg5: memref<1x128xf32, #tpu.memory_space<vmem>>, %arg6: memref<128x128xbf16, #tpu.memory_space<vmem>>, %arg7: memref<128x128xf32, #tpu.memory_space<vmem>>) attributes {dimension_semantics = [#tpu.dimension_semantics<parallel>, #tpu.dimension_semantics<arbitrary>], iteration_bounds = array<i64: 1, 1>, scalar_prefetch = 0 : i64, scratch_operands = 1 : i64, tpu.core_type = #tpu.core_type<tc>, window_params = [{transform_indices = @transform_0, window_bounds = array<i64: 128, 64>}, {transform_indices = @transform_1, window_bounds = array<i64: 64, 128>}, {transform_indices = @transform_2, window_bounds = array<i64: 1, 128>}, {transform_indices = @transform_3, window_bounds = array<i64: 1, 128>}, {transform_indices = @transform_4, window_bounds = array<i64: 128, 128>}]} {
    %c0_i32 = arith.constant 0 : i32
    %0 = arith.cmpi eq, %arg1, %c0_i32 : i32
    %1 = arith.extui %0 : i1 to i32
    %c0_i32_0 = arith.constant 0 : i32
    %2 = arith.cmpi ne, %1, %c0_i32_0 : i32
    scf.if %2 {
      %cst_10 = arith.constant 0.000000e+00 : f32
      %12 = vector.broadcast %cst_10 : f32 to vector<128x128xf32>
      %c0_11 = arith.constant 0 : index
      %c0_12 = arith.constant 0 : index
      %13 = vector.load %arg7[%c0_11, %c0_12] : memref<128x128xf32, #tpu.memory_space<vmem>>, vector<128x128xf32>
      tpu.vector_store %arg7[%c0_11, %c0_12], %12 {strides = array<i32>} : memref<128x128xf32, #tpu.memory_space<vmem>>, vector<128x128xf32>,
    } else {
    }
    %c0 = arith.constant 0 : index
    %c0_1 = arith.constant 0 : index
    %3 = vector.load %arg7[%c0, %c0_1] : memref<128x128xf32, #tpu.memory_space<vmem>>, vector<128x128xf32>
    %c0_2 = arith.constant 0 : index
    %c0_3 = arith.constant 0 : index
    %4 = vector.load %arg2[%c0_2, %c0_3] : memref<128x64xbf16, #tpu.memory_space<vmem>>, vector<128x64xbf16>
    %c0_4 = arith.constant 0 : index
    %c0_5 = arith.constant 0 : index
    %5 = vector.load %arg3[%c0_4, %c0_5] : memref<64x128xbf16, #tpu.memory_space<vmem>>, vector<64x128xbf16>
    %cst = arith.constant dense<0.000000e+00> : vector<128x128xf32>
    %6 = tpu.matmul %4, %5, %cst {dimension_numbers = #tpu.dot_dimension_numbers<[1], [0], [0], [1], [0, 0, 1, 1], [], []>} : vector<128x64xbf16>, vector<64x128xbf16>, vector<128x128xf32> -> vector<128x128xf32>
    %7 = arith.addf %3, %6 : vector<128x128xf32>
    %c0_6 = arith.constant 0 : index
    %c0_7 = arith.constant 0 : index
    %8 = vector.load %arg7[%c0_6, %c0_7] : memref<128x128xf32, #tpu.memory_space<vmem>>, vector<128x128xf32>
    tpu.vector_store %arg7[%c0_6, %c0_7], %7 {strides = array<i32>} : memref<128x128xf32, #tpu.memory_space<vmem>>, vector<128x128xf32>,
    %c0_i32_8 = arith.constant 0 : i32
    %9 = arith.cmpi eq, %arg1, %c0_i32_8 : i32
    %10 = arith.extui %9 : i1 to i32
    %c0_i32_9 = arith.constant 0 : i32
    %11 = arith.cmpi ne, %10, %c0_i32_9 : i32
    scf.if %11 {
      %c0_10 = arith.constant 0 : index
      %c0_11 = arith.constant 0 : index
      %12 = vector.load %arg7[%c0_10, %c0_11] : memref<128x128xf32, #tpu.memory_space<vmem>>, vector<128x128xf32>
      %c0_12 = arith.constant 0 : index
      %c0_13 = arith.constant 0 : index
      %13 = vector.load %arg4[%c0_12, %c0_13] : memref<1x128xf32, #tpu.memory_space<vmem>>, vector<1x128xf32>
      %c0_14 = arith.constant 0 : index
      %c0_15 = arith.constant 0 : index
      %14 = vector.load %arg5[%c0_14, %c0_15] : memref<1x128xf32, #tpu.memory_space<vmem>>, vector<1x128xf32>
      %15 = tpu.iota {dimensions = array<i32: 0>} : vector<128x1xi32>
      %c128_i32 = arith.constant 128 : i32
      %16 = vector.broadcast %c128_i32 : i32 to vector<128x1xi32>
      %17 = arith.cmpi slt, %15, %16 : vector<128x1xi32>
      %cst_16 = arith.constant 0.000000e+00 : f32
      %18 = vector.shape_cast %17 : vector<128x1xi1> to vector<128x1xi1>
      %19 = vector.broadcast %18 : vector<128x1xi1> to vector<128x128xi1>
      %20 = vector.broadcast %cst_16 : f32 to vector<128x128xf32>
      %21 = arith.select %19, %12, %20 : vector<128x128xi1>, vector<128x128xf32>
      %cst_17 = arith.constant dense<0.000000e+00> : vector<128xf32>
      %22 = vector.multi_reduction <add>, %21, %cst_17 [0] : vector<128x128xf32> to vector<128xf32>
      %23 = vector.shape_cast %22 : vector<128xf32> to vector<1x128xf32>
      %cst_18 = arith.constant 7.812500e-03 : f32
      %24 = vector.broadcast %cst_18 : f32 to vector<1x128xf32>
      %25 = arith.mulf %23, %24 : vector<1x128xf32>
      %26 = vector.broadcast %25 : vector<1x128xf32> to vector<128x128xf32>
      %27 = arith.subf %12, %26 : vector<128x128xf32>
      %cst_19 = arith.constant 0.000000e+00 : f32
      %28 = vector.shape_cast %17 : vector<128x1xi1> to vector<128x1xi1>
      %29 = vector.broadcast %28 : vector<128x1xi1> to vector<128x128xi1>
      %30 = vector.broadcast %cst_19 : f32 to vector<128x128xf32>
      %31 = arith.select %29, %27, %30 : vector<128x128xi1>, vector<128x128xf32>
      %32 = arith.mulf %31, %31 : vector<128x128xf32>
      %cst_20 = arith.constant dense<0.000000e+00> : vector<128xf32>
      %33 = vector.multi_reduction <add>, %32, %cst_20 [0] : vector<128x128xf32> to vector<128xf32>
      %34 = vector.shape_cast %33 : vector<128xf32> to vector<1x128xf32>
      %cst_21 = arith.constant 7.812500e-03 : f32
      %35 = vector.broadcast %cst_21 : f32 to vector<1x128xf32>
      %36 = arith.mulf %34, %35 : vector<1x128xf32>
      %cst_22 = arith.constant 9.99999974E-6 : f32
      %37 = vector.broadcast %cst_22 : f32 to vector<1x128xf32>
      %38 = arith.addf %36, %37 : vector<1x128xf32>
      %39 = math.rsqrt %38 : vector<1x128xf32>
      %40 = arith.mulf %39, %13 : vector<1x128xf32>
      %41 = vector.broadcast %40 : vector<1x128xf32> to vector<128x128xf32>
      %42 = arith.mulf %31, %41 : vector<128x128xf32>
      %43 = vector.broadcast %14 : vector<1x128xf32> to vector<128x128xf32>
      %44 = arith.addf %42, %43 : vector<128x128xf32>
      %cst_23 = arith.constant 0.000000e+00 : f32
      %45 = vector.broadcast %cst_23 : f32 to vector<128x128xf32>
      %46 = arith.maximumf %44, %45 : vector<128x128xf32>
      %cst_24 = arith.constant 0.000000e+00 : f32
      %47 = vector.shape_cast %17 : vector<128x1xi1> to vector<128x1xi1>
      %48 = vector.broadcast %47 : vector<128x1xi1> to vector<128x128xi1>
      %49 = vector.broadcast %cst_24 : f32 to vector<128x128xf32>
      %50 = arith.select %48, %46, %49 : vector<128x128xi1>, vector<128x128xf32>
      %51 = arith.truncf %50 : vector<128x128xf32> to vector<128x128xbf16>
      %c0_25 = arith.constant 0 : index
      %c0_26 = arith.constant 0 : index
      %52 = vector.load %arg6[%c0_25, %c0_26] : memref<128x128xbf16, #tpu.memory_space<vmem>>, vector<128x128xbf16>
      tpu.vector_store %arg6[%c0_25, %c0_26], %51 {strides = array<i32>} : memref<128x128xbf16, #tpu.memory_space<vmem>>, vector<128x128xbf16>,
    } else {
    }
    return
  }
  func.func @transform_0(%arg0: i32, %arg1: i32) -> (i32, i32) {
    %c0_i32 = arith.constant 0 : i32
    %c0_i32_0 = arith.constant 0 : i32
    return %c0_i32, %arg1 : i32, i32
  }
  func.func @transform_1(%arg0: i32, %arg1: i32) -> (i32, i32) {
    %c0_i32 = arith.constant 0 : i32
    return %arg1, %arg0 : i32, i32
  }
  func.func @transform_2(%arg0: i32, %arg1: i32) -> (i32, i32) {
    %c0_i32 = arith.constant 0 : i32
    %c0_i32_0 = arith.constant 0 : i32
    return %c0_i32, %arg0 : i32, i32
  }
  func.func @transform_3(%arg0: i32, %arg1: i32) -> (i32, i32) {
    %c0_i32 = arith.constant 0 : i32
    %c0_i32_0 = arith.constant 0 : i32
    return %c0_i32, %arg0 : i32, i32
  }
  func.func @transform_4(%arg0: i32, %arg1: i32) -> (i32, i32) {
    %c0_i32 = arith.constant 0 : i32
    %c0_i32_0 = arith.constant 0 : i32
    return %c0_i32, %arg0 : i32, i32
  }
}

module attributes {stable_mosaic.version = 11 : i64} {
  func.func @_conv_bn_relu_kernel(%arg0: i32, %arg1: i32, %arg2: memref<32x1024xbf16, #tpu.memory_space<vmem>>, %arg3: memref<1024x128xbf16, #tpu.memory_space<vmem>>, %arg4: memref<1x128xf32, #tpu.memory_space<vmem>>, %arg5: memref<1x128xf32, #tpu.memory_space<vmem>>, %arg6: memref<32x128xbf16, #tpu.memory_space<vmem>>, %arg7: memref<32x128xf32, #tpu.memory_space<vmem>>) attributes {dimension_semantics = [#tpu.dimension_semantics<parallel>, #tpu.dimension_semantics<arbitrary>], iteration_bounds = array<i64: 1, 1>, scalar_prefetch = 0 : i64, scratch_operands = 1 : i64, tpu.core_type = #tpu.core_type<tc>, window_params = [{transform_indices = @transform_0, window_bounds = array<i64: 32, 1024>}, {transform_indices = @transform_1, window_bounds = array<i64: 1024, 128>}, {transform_indices = @transform_2, window_bounds = array<i64: 1, 128>}, {transform_indices = @transform_3, window_bounds = array<i64: 1, 128>}, {transform_indices = @transform_4, window_bounds = array<i64: 32, 128>}]} {
    %c0_i32 = arith.constant 0 : i32
    %0 = arith.cmpi eq, %arg1, %c0_i32 : i32
    %1 = arith.extui %0 : i1 to i32
    %c0_i32_0 = arith.constant 0 : i32
    %2 = arith.cmpi ne, %1, %c0_i32_0 : i32
    scf.if %2 {
      %cst_10 = arith.constant 0.000000e+00 : f32
      %12 = vector.broadcast %cst_10 : f32 to vector<32x128xf32>
      %c0_11 = arith.constant 0 : index
      %c0_12 = arith.constant 0 : index
      %13 = vector.load %arg7[%c0_11, %c0_12] : memref<32x128xf32, #tpu.memory_space<vmem>>, vector<32x128xf32>
      tpu.vector_store %arg7[%c0_11, %c0_12], %12 {strides = array<i32>} : memref<32x128xf32, #tpu.memory_space<vmem>>, vector<32x128xf32>,
    } else {
    }
    %c0 = arith.constant 0 : index
    %c0_1 = arith.constant 0 : index
    %3 = vector.load %arg7[%c0, %c0_1] : memref<32x128xf32, #tpu.memory_space<vmem>>, vector<32x128xf32>
    %c0_2 = arith.constant 0 : index
    %c0_3 = arith.constant 0 : index
    %4 = vector.load %arg2[%c0_2, %c0_3] : memref<32x1024xbf16, #tpu.memory_space<vmem>>, vector<32x1024xbf16>
    %c0_4 = arith.constant 0 : index
    %c0_5 = arith.constant 0 : index
    %5 = vector.load %arg3[%c0_4, %c0_5] : memref<1024x128xbf16, #tpu.memory_space<vmem>>, vector<1024x128xbf16>
    %cst = arith.constant dense<0.000000e+00> : vector<32x128xf32>
    %6 = tpu.matmul %4, %5, %cst {dimension_numbers = #tpu.dot_dimension_numbers<[1], [0], [0], [1], [0, 0, 1, 1], [], []>} : vector<32x1024xbf16>, vector<1024x128xbf16>, vector<32x128xf32> -> vector<32x128xf32>
    %7 = arith.addf %3, %6 : vector<32x128xf32>
    %c0_6 = arith.constant 0 : index
    %c0_7 = arith.constant 0 : index
    %8 = vector.load %arg7[%c0_6, %c0_7] : memref<32x128xf32, #tpu.memory_space<vmem>>, vector<32x128xf32>
    tpu.vector_store %arg7[%c0_6, %c0_7], %7 {strides = array<i32>} : memref<32x128xf32, #tpu.memory_space<vmem>>, vector<32x128xf32>,
    %c0_i32_8 = arith.constant 0 : i32
    %9 = arith.cmpi eq, %arg1, %c0_i32_8 : i32
    %10 = arith.extui %9 : i1 to i32
    %c0_i32_9 = arith.constant 0 : i32
    %11 = arith.cmpi ne, %10, %c0_i32_9 : i32
    scf.if %11 {
      %c0_10 = arith.constant 0 : index
      %c0_11 = arith.constant 0 : index
      %12 = vector.load %arg7[%c0_10, %c0_11] : memref<32x128xf32, #tpu.memory_space<vmem>>, vector<32x128xf32>
      %c0_12 = arith.constant 0 : index
      %c0_13 = arith.constant 0 : index
      %13 = vector.load %arg4[%c0_12, %c0_13] : memref<1x128xf32, #tpu.memory_space<vmem>>, vector<1x128xf32>
      %c0_14 = arith.constant 0 : index
      %c0_15 = arith.constant 0 : index
      %14 = vector.load %arg5[%c0_14, %c0_15] : memref<1x128xf32, #tpu.memory_space<vmem>>, vector<1x128xf32>
      %15 = tpu.iota {dimensions = array<i32: 0>} : vector<32x1xi32>
      %c32_i32 = arith.constant 32 : i32
      %16 = vector.broadcast %c32_i32 : i32 to vector<32x1xi32>
      %17 = arith.cmpi slt, %15, %16 : vector<32x1xi32>
      %cst_16 = arith.constant 0.000000e+00 : f32
      %18 = vector.shape_cast %17 : vector<32x1xi1> to vector<32x1xi1>
      %19 = vector.broadcast %18 : vector<32x1xi1> to vector<32x128xi1>
      %20 = vector.broadcast %cst_16 : f32 to vector<32x128xf32>
      %21 = arith.select %19, %12, %20 : vector<32x128xi1>, vector<32x128xf32>
      %cst_17 = arith.constant dense<0.000000e+00> : vector<128xf32>
      %22 = vector.multi_reduction <add>, %21, %cst_17 [0] : vector<32x128xf32> to vector<128xf32>
      %23 = vector.shape_cast %22 : vector<128xf32> to vector<1x128xf32>
      %cst_18 = arith.constant 3.125000e-02 : f32
      %24 = vector.broadcast %cst_18 : f32 to vector<1x128xf32>
      %25 = arith.mulf %23, %24 : vector<1x128xf32>
      %26 = vector.broadcast %25 : vector<1x128xf32> to vector<32x128xf32>
      %27 = arith.subf %12, %26 : vector<32x128xf32>
      %cst_19 = arith.constant 0.000000e+00 : f32
      %28 = vector.shape_cast %17 : vector<32x1xi1> to vector<32x1xi1>
      %29 = vector.broadcast %28 : vector<32x1xi1> to vector<32x128xi1>
      %30 = vector.broadcast %cst_19 : f32 to vector<32x128xf32>
      %31 = arith.select %29, %27, %30 : vector<32x128xi1>, vector<32x128xf32>
      %32 = arith.mulf %31, %31 : vector<32x128xf32>
      %cst_20 = arith.constant dense<0.000000e+00> : vector<128xf32>
      %33 = vector.multi_reduction <add>, %32, %cst_20 [0] : vector<32x128xf32> to vector<128xf32>
      %34 = vector.shape_cast %33 : vector<128xf32> to vector<1x128xf32>
      %cst_21 = arith.constant 3.125000e-02 : f32
      %35 = vector.broadcast %cst_21 : f32 to vector<1x128xf32>
      %36 = arith.mulf %34, %35 : vector<1x128xf32>
      %cst_22 = arith.constant 9.99999974E-6 : f32
      %37 = vector.broadcast %cst_22 : f32 to vector<1x128xf32>
      %38 = arith.addf %36, %37 : vector<1x128xf32>
      %39 = math.rsqrt %38 : vector<1x128xf32>
      %40 = arith.mulf %39, %13 : vector<1x128xf32>
      %41 = vector.broadcast %40 : vector<1x128xf32> to vector<32x128xf32>
      %42 = arith.mulf %31, %41 : vector<32x128xf32>
      %43 = vector.broadcast %14 : vector<1x128xf32> to vector<32x128xf32>
      %44 = arith.addf %42, %43 : vector<32x128xf32>
      %cst_23 = arith.constant 0.000000e+00 : f32
      %45 = vector.broadcast %cst_23 : f32 to vector<32x128xf32>
      %46 = arith.maximumf %44, %45 : vector<32x128xf32>
      %cst_24 = arith.constant 0.000000e+00 : f32
      %47 = vector.shape_cast %17 : vector<32x1xi1> to vector<32x1xi1>
      %48 = vector.broadcast %47 : vector<32x1xi1> to vector<32x128xi1>
      %49 = vector.broadcast %cst_24 : f32 to vector<32x128xf32>
      %50 = arith.select %48, %46, %49 : vector<32x128xi1>, vector<32x128xf32>
      %51 = arith.truncf %50 : vector<32x128xf32> to vector<32x128xbf16>
      %c0_25 = arith.constant 0 : index
      %c0_26 = arith.constant 0 : index
      %52 = vector.load %arg6[%c0_25, %c0_26] : memref<32x128xbf16, #tpu.memory_space<vmem>>, vector<32x128xbf16>
      tpu.vector_store %arg6[%c0_25, %c0_26], %51 {strides = array<i32>} : memref<32x128xbf16, #tpu.memory_space<vmem>>, vector<32x128xbf16>,
    } else {
    }
    return
  }
  func.func @transform_0(%arg0: i32, %arg1: i32) -> (i32, i32) {
    %c0_i32 = arith.constant 0 : i32
    %c0_i32_0 = arith.constant 0 : i32
    return %c0_i32, %arg1 : i32, i32
  }
  func.func @transform_1(%arg0: i32, %arg1: i32) -> (i32, i32) {
    %c0_i32 = arith.constant 0 : i32
    return %arg1, %arg0 : i32, i32
  }
  func.func @transform_2(%arg0: i32, %arg1: i32) -> (i32, i32) {
    %c0_i32 = arith.constant 0 : i32
    %c0_i32_0 = arith.constant 0 : i32
    return %c0_i32, %arg0 : i32, i32
  }
  func.func @transform_3(%arg0: i32, %arg1: i32) -> (i32, i32) {
    %c0_i32 = arith.constant 0 : i32
    %c0_i32_0 = arith.constant 0 : i32
    return %c0_i32, %arg0 : i32, i32
  }
  func.func @transform_4(%arg0: i32, %arg1: i32) -> (i32, i32) {
    %c0_i32 = arith.constant 0 : i32
    %c0_i32_0 = arith.constant 0 : i32
    return %c0_i32, %arg0 : i32, i32
  }
}

module attributes {stable_mosaic.version = 11 : i64} {
  func.func @_conv_bn_relu_kernel(%arg0: i32, %arg1: i32, %arg2: memref<16x2048xbf16, #tpu.memory_space<vmem>>, %arg3: memref<2048x256xbf16, #tpu.memory_space<vmem>>, %arg4: memref<1x256xf32, #tpu.memory_space<vmem>>, %arg5: memref<1x256xf32, #tpu.memory_space<vmem>>, %arg6: memref<16x256xbf16, #tpu.memory_space<vmem>>, %arg7: memref<16x256xf32, #tpu.memory_space<vmem>>) attributes {dimension_semantics = [#tpu.dimension_semantics<parallel>, #tpu.dimension_semantics<arbitrary>], iteration_bounds = array<i64: 1, 1>, scalar_prefetch = 0 : i64, scratch_operands = 1 : i64, tpu.core_type = #tpu.core_type<tc>, window_params = [{transform_indices = @transform_0, window_bounds = array<i64: 16, 2048>}, {transform_indices = @transform_1, window_bounds = array<i64: 2048, 256>}, {transform_indices = @transform_2, window_bounds = array<i64: 1, 256>}, {transform_indices = @transform_3, window_bounds = array<i64: 1, 256>}, {transform_indices = @transform_4, window_bounds = array<i64: 16, 256>}]} {
    %c0_i32 = arith.constant 0 : i32
    %0 = arith.cmpi eq, %arg1, %c0_i32 : i32
    %1 = arith.extui %0 : i1 to i32
    %c0_i32_0 = arith.constant 0 : i32
    %2 = arith.cmpi ne, %1, %c0_i32_0 : i32
    scf.if %2 {
      %cst_10 = arith.constant 0.000000e+00 : f32
      %12 = vector.broadcast %cst_10 : f32 to vector<16x256xf32>
      %c0_11 = arith.constant 0 : index
      %c0_12 = arith.constant 0 : index
      %13 = vector.load %arg7[%c0_11, %c0_12] : memref<16x256xf32, #tpu.memory_space<vmem>>, vector<16x256xf32>
      tpu.vector_store %arg7[%c0_11, %c0_12], %12 {strides = array<i32>} : memref<16x256xf32, #tpu.memory_space<vmem>>, vector<16x256xf32>,
    } else {
    }
    %c0 = arith.constant 0 : index
    %c0_1 = arith.constant 0 : index
    %3 = vector.load %arg7[%c0, %c0_1] : memref<16x256xf32, #tpu.memory_space<vmem>>, vector<16x256xf32>
    %c0_2 = arith.constant 0 : index
    %c0_3 = arith.constant 0 : index
    %4 = vector.load %arg2[%c0_2, %c0_3] : memref<16x2048xbf16, #tpu.memory_space<vmem>>, vector<16x2048xbf16>
    %c0_4 = arith.constant 0 : index
    %c0_5 = arith.constant 0 : index
    %5 = vector.load %arg3[%c0_4, %c0_5] : memref<2048x256xbf16, #tpu.memory_space<vmem>>, vector<2048x256xbf16>
    %cst = arith.constant dense<0.000000e+00> : vector<16x256xf32>
    %6 = tpu.matmul %4, %5, %cst {dimension_numbers = #tpu.dot_dimension_numbers<[1], [0], [0], [1], [0, 0, 1, 1], [], []>} : vector<16x2048xbf16>, vector<2048x256xbf16>, vector<16x256xf32> -> vector<16x256xf32>
    %7 = arith.addf %3, %6 : vector<16x256xf32>
    %c0_6 = arith.constant 0 : index
    %c0_7 = arith.constant 0 : index
    %8 = vector.load %arg7[%c0_6, %c0_7] : memref<16x256xf32, #tpu.memory_space<vmem>>, vector<16x256xf32>
    tpu.vector_store %arg7[%c0_6, %c0_7], %7 {strides = array<i32>} : memref<16x256xf32, #tpu.memory_space<vmem>>, vector<16x256xf32>,
    %c0_i32_8 = arith.constant 0 : i32
    %9 = arith.cmpi eq, %arg1, %c0_i32_8 : i32
    %10 = arith.extui %9 : i1 to i32
    %c0_i32_9 = arith.constant 0 : i32
    %11 = arith.cmpi ne, %10, %c0_i32_9 : i32
    scf.if %11 {
      %c0_10 = arith.constant 0 : index
      %c0_11 = arith.constant 0 : index
      %12 = vector.load %arg7[%c0_10, %c0_11] : memref<16x256xf32, #tpu.memory_space<vmem>>, vector<16x256xf32>
      %c0_12 = arith.constant 0 : index
      %c0_13 = arith.constant 0 : index
      %13 = vector.load %arg4[%c0_12, %c0_13] : memref<1x256xf32, #tpu.memory_space<vmem>>, vector<1x256xf32>
      %c0_14 = arith.constant 0 : index
      %c0_15 = arith.constant 0 : index
      %14 = vector.load %arg5[%c0_14, %c0_15] : memref<1x256xf32, #tpu.memory_space<vmem>>, vector<1x256xf32>
      %15 = tpu.iota {dimensions = array<i32: 0>} : vector<16x1xi32>
      %c8_i32 = arith.constant 8 : i32
      %16 = vector.broadcast %c8_i32 : i32 to vector<16x1xi32>
      %17 = arith.cmpi slt, %15, %16 : vector<16x1xi32>
      %cst_16 = arith.constant 0.000000e+00 : f32
      %18 = vector.shape_cast %17 : vector<16x1xi1> to vector<16x1xi1>
      %19 = vector.broadcast %18 : vector<16x1xi1> to vector<16x256xi1>
      %20 = vector.broadcast %cst_16 : f32 to vector<16x256xf32>
      %21 = arith.select %19, %12, %20 : vector<16x256xi1>, vector<16x256xf32>
      %cst_17 = arith.constant dense<0.000000e+00> : vector<256xf32>
      %22 = vector.multi_reduction <add>, %21, %cst_17 [0] : vector<16x256xf32> to vector<256xf32>
      %23 = vector.shape_cast %22 : vector<256xf32> to vector<1x256xf32>
      %cst_18 = arith.constant 1.250000e-01 : f32
      %24 = vector.broadcast %cst_18 : f32 to vector<1x256xf32>
      %25 = arith.mulf %23, %24 : vector<1x256xf32>
      %26 = vector.broadcast %25 : vector<1x256xf32> to vector<16x256xf32>
      %27 = arith.subf %12, %26 : vector<16x256xf32>
      %cst_19 = arith.constant 0.000000e+00 : f32
      %28 = vector.shape_cast %17 : vector<16x1xi1> to vector<16x1xi1>
      %29 = vector.broadcast %28 : vector<16x1xi1> to vector<16x256xi1>
      %30 = vector.broadcast %cst_19 : f32 to vector<16x256xf32>
      %31 = arith.select %29, %27, %30 : vector<16x256xi1>, vector<16x256xf32>
      %32 = arith.mulf %31, %31 : vector<16x256xf32>
      %cst_20 = arith.constant dense<0.000000e+00> : vector<256xf32>
      %33 = vector.multi_reduction <add>, %32, %cst_20 [0] : vector<16x256xf32> to vector<256xf32>
      %34 = vector.shape_cast %33 : vector<256xf32> to vector<1x256xf32>
      %cst_21 = arith.constant 1.250000e-01 : f32
      %35 = vector.broadcast %cst_21 : f32 to vector<1x256xf32>
      %36 = arith.mulf %34, %35 : vector<1x256xf32>
      %cst_22 = arith.constant 9.99999974E-6 : f32
      %37 = vector.broadcast %cst_22 : f32 to vector<1x256xf32>
      %38 = arith.addf %36, %37 : vector<1x256xf32>
      %39 = math.rsqrt %38 : vector<1x256xf32>
      %40 = arith.mulf %39, %13 : vector<1x256xf32>
      %41 = vector.broadcast %40 : vector<1x256xf32> to vector<16x256xf32>
      %42 = arith.mulf %31, %41 : vector<16x256xf32>
      %43 = vector.broadcast %14 : vector<1x256xf32> to vector<16x256xf32>
      %44 = arith.addf %42, %43 : vector<16x256xf32>
      %cst_23 = arith.constant 0.000000e+00 : f32
      %45 = vector.broadcast %cst_23 : f32 to vector<16x256xf32>
      %46 = arith.maximumf %44, %45 : vector<16x256xf32>
      %cst_24 = arith.constant 0.000000e+00 : f32
      %47 = vector.shape_cast %17 : vector<16x1xi1> to vector<16x1xi1>
      %48 = vector.broadcast %47 : vector<16x1xi1> to vector<16x256xi1>
      %49 = vector.broadcast %cst_24 : f32 to vector<16x256xf32>
      %50 = arith.select %48, %46, %49 : vector<16x256xi1>, vector<16x256xf32>
      %51 = arith.truncf %50 : vector<16x256xf32> to vector<16x256xbf16>
      %c0_25 = arith.constant 0 : index
      %c0_26 = arith.constant 0 : index
      %52 = vector.load %arg6[%c0_25, %c0_26] : memref<16x256xbf16, #tpu.memory_space<vmem>>, vector<16x256xbf16>
      tpu.vector_store %arg6[%c0_25, %c0_26], %51 {strides = array<i32>} : memref<16x256xbf16, #tpu.memory_space<vmem>>, vector<16x256xbf16>,
    } else {
    }
    return
  }
  func.func @transform_0(%arg0: i32, %arg1: i32) -> (i32, i32) {
    %c0_i32 = arith.constant 0 : i32
    %c0_i32_0 = arith.constant 0 : i32
    return %c0_i32, %arg1 : i32, i32
  }
  func.func @transform_1(%arg0: i32, %arg1: i32) -> (i32, i32) {
    %c0_i32 = arith.constant 0 : i32
    return %arg1, %arg0 : i32, i32
  }
  func.func @transform_2(%arg0: i32, %arg1: i32) -> (i32, i32) {
    %c0_i32 = arith.constant 0 : i32
    %c0_i32_0 = arith.constant 0 : i32
    return %c0_i32, %arg0 : i32, i32
  }
  func.func @transform_3(%arg0: i32, %arg1: i32) -> (i32, i32) {
    %c0_i32 = arith.constant 0 : i32
    %c0_i32_0 = arith.constant 0 : i32
    return %c0_i32, %arg0 : i32, i32
  }
  func.func @transform_4(%arg0: i32, %arg1: i32) -> (i32, i32) {
    %c0_i32 = arith.constant 0 : i32
    %c0_i32_0 = arith.constant 0 : i32
    return %c0_i32, %arg0 : i32, i32
  }
}

module attributes {stable_mosaic.version = 11 : i64} {
  func.func @_fused_tail_kernel(%arg0: i32, %arg1: memref<16x4096xbf16, #tpu.memory_space<vmem>>, %arg2: memref<4096x512xbf16, #tpu.memory_space<vmem>>, %arg3: memref<1x512xf32, #tpu.memory_space<vmem>>, %arg4: memref<1x512xf32, #tpu.memory_space<vmem>>, %arg5: memref<512x512xbf16, #tpu.memory_space<vmem>>, %arg6: memref<1x512xf32, #tpu.memory_space<vmem>>, %arg7: memref<1x512xf32, #tpu.memory_space<vmem>>, %arg8: memref<512x512xbf16, #tpu.memory_space<vmem>>, %arg9: memref<1x512xf32, #tpu.memory_space<vmem>>, %arg10: memref<1x512xf32, #tpu.memory_space<vmem>>, %arg11: memref<16x512xbf16, #tpu.memory_space<vmem>>) attributes {dimension_semantics = [#tpu.dimension_semantics<arbitrary>], iteration_bounds = array<i64: 1>, scalar_prefetch = 0 : i64, scratch_operands = 0 : i64, tpu.core_type = #tpu.core_type<tc>, window_params = [{pipeline_mode = #tpu.pipeline_mode<synchronous>, transform_indices = @transform_0, window_bounds = array<i64: 16, 4096>}, {pipeline_mode = #tpu.pipeline_mode<synchronous>, transform_indices = @transform_1, window_bounds = array<i64: 4096, 512>}, {pipeline_mode = #tpu.pipeline_mode<synchronous>, transform_indices = @transform_2, window_bounds = array<i64: 1, 512>}, {pipeline_mode = #tpu.pipeline_mode<synchronous>, transform_indices = @transform_3, window_bounds = array<i64: 1, 512>}, {pipeline_mode = #tpu.pipeline_mode<synchronous>, transform_indices = @transform_4, window_bounds = array<i64: 512, 512>}, {pipeline_mode = #tpu.pipeline_mode<synchronous>, transform_indices = @transform_5, window_bounds = array<i64: 1, 512>}, {pipeline_mode = #tpu.pipeline_mode<synchronous>, transform_indices = @transform_6, window_bounds = array<i64: 1, 512>}, {pipeline_mode = #tpu.pipeline_mode<synchronous>, transform_indices = @transform_7, window_bounds = array<i64: 512, 512>}, {pipeline_mode = #tpu.pipeline_mode<synchronous>, transform_indices = @transform_8, window_bounds = array<i64: 1, 512>}, {pipeline_mode = #tpu.pipeline_mode<synchronous>, transform_indices = @transform_9, window_bounds = array<i64: 1, 512>}, {pipeline_mode = #tpu.pipeline_mode<synchronous>, transform_indices = @transform_10, window_bounds = array<i64: 16, 512>}]} {
    %c0 = arith.constant 0 : index
    %c0_0 = arith.constant 0 : index
    %0 = vector.load %arg1[%c0, %c0_0] : memref<16x4096xbf16, #tpu.memory_space<vmem>>, vector<16x4096xbf16>
    %c0_1 = arith.constant 0 : index
    %c0_2 = arith.constant 0 : index
    %1 = vector.load %arg2[%c0_1, %c0_2] : memref<4096x512xbf16, #tpu.memory_space<vmem>>, vector<4096x512xbf16>
    %cst = arith.constant dense<0.000000e+00> : vector<16x512xf32>
    %2 = tpu.matmul %0, %1, %cst {dimension_numbers = #tpu.dot_dimension_numbers<[1], [0], [0], [1], [0, 0, 1, 1], [], []>} : vector<16x4096xbf16>, vector<4096x512xbf16>, vector<16x512xf32> -> vector<16x512xf32>
    %c0_3 = arith.constant 0 : index
    %c0_4 = arith.constant 0 : index
    %3 = vector.load %arg3[%c0_3, %c0_4] : memref<1x512xf32, #tpu.memory_space<vmem>>, vector<1x512xf32>
    %c0_5 = arith.constant 0 : index
    %c0_6 = arith.constant 0 : index
    %4 = vector.load %arg4[%c0_5, %c0_6] : memref<1x512xf32, #tpu.memory_space<vmem>>, vector<1x512xf32>
    %5 = tpu.iota {dimensions = array<i32: 0>} : vector<16x1xi32>
    %c2_i32 = arith.constant 2 : i32
    %6 = vector.broadcast %c2_i32 : i32 to vector<16x1xi32>
    %7 = arith.cmpi slt, %5, %6 : vector<16x1xi32>
    %cst_7 = arith.constant 0.000000e+00 : f32
    %8 = vector.shape_cast %7 : vector<16x1xi1> to vector<16x1xi1>
    %9 = vector.broadcast %8 : vector<16x1xi1> to vector<16x512xi1>
    %10 = vector.broadcast %cst_7 : f32 to vector<16x512xf32>
    %11 = arith.select %9, %2, %10 : vector<16x512xi1>, vector<16x512xf32>
    %cst_8 = arith.constant dense<0.000000e+00> : vector<512xf32>
    %12 = vector.multi_reduction <add>, %11, %cst_8 [0] : vector<16x512xf32> to vector<512xf32>
    %13 = vector.shape_cast %12 : vector<512xf32> to vector<1x512xf32>
    %cst_9 = arith.constant 5.000000e-01 : f32
    %14 = vector.broadcast %cst_9 : f32 to vector<1x512xf32>
    %15 = arith.mulf %13, %14 : vector<1x512xf32>
    %16 = vector.broadcast %15 : vector<1x512xf32> to vector<16x512xf32>
    %17 = arith.subf %2, %16 : vector<16x512xf32>
    %cst_10 = arith.constant 0.000000e+00 : f32
    %18 = vector.shape_cast %7 : vector<16x1xi1> to vector<16x1xi1>
    %19 = vector.broadcast %18 : vector<16x1xi1> to vector<16x512xi1>
    %20 = vector.broadcast %cst_10 : f32 to vector<16x512xf32>
    %21 = arith.select %19, %17, %20 : vector<16x512xi1>, vector<16x512xf32>
    %22 = arith.mulf %21, %21 : vector<16x512xf32>
    %cst_11 = arith.constant dense<0.000000e+00> : vector<512xf32>
    %23 = vector.multi_reduction <add>, %22, %cst_11 [0] : vector<16x512xf32> to vector<512xf32>
    %24 = vector.shape_cast %23 : vector<512xf32> to vector<1x512xf32>
    %cst_12 = arith.constant 5.000000e-01 : f32
    %25 = vector.broadcast %cst_12 : f32 to vector<1x512xf32>
    %26 = arith.mulf %24, %25 : vector<1x512xf32>
    %cst_13 = arith.constant 9.99999974E-6 : f32
    %27 = vector.broadcast %cst_13 : f32 to vector<1x512xf32>
    %28 = arith.addf %26, %27 : vector<1x512xf32>
    %29 = math.rsqrt %28 : vector<1x512xf32>
    %30 = arith.mulf %29, %3 : vector<1x512xf32>
    %31 = vector.broadcast %30 : vector<1x512xf32> to vector<16x512xf32>
    %32 = arith.mulf %21, %31 : vector<16x512xf32>
    %33 = vector.broadcast %4 : vector<1x512xf32> to vector<16x512xf32>
    %34 = arith.addf %32, %33 : vector<16x512xf32>
    %cst_14 = arith.constant 0.000000e+00 : f32
    %35 = vector.broadcast %cst_14 : f32 to vector<16x512xf32>
    %36 = arith.maximumf %34, %35 : vector<16x512xf32>
    %cst_15 = arith.constant 0.000000e+00 : f32
    %37 = vector.shape_cast %7 : vector<16x1xi1> to vector<16x1xi1>
    %38 = vector.broadcast %37 : vector<16x1xi1> to vector<16x512xi1>
    %39 = vector.broadcast %cst_15 : f32 to vector<16x512xf32>
    %40 = arith.select %38, %36, %39 : vector<16x512xi1>, vector<16x512xf32>
    %41 = arith.truncf %40 : vector<16x512xf32> to vector<16x512xbf16>
    %c0_16 = arith.constant 0 : index
    %c0_17 = arith.constant 0 : index
    %42 = vector.load %arg5[%c0_16, %c0_17] : memref<512x512xbf16, #tpu.memory_space<vmem>>, vector<512x512xbf16>
    %cst_18 = arith.constant dense<0.000000e+00> : vector<16x512xf32>
    %43 = tpu.matmul %41, %42, %cst_18 {dimension_numbers = #tpu.dot_dimension_numbers<[1], [0], [0], [1], [0, 0, 1, 1], [], []>} : vector<16x512xbf16>, vector<512x512xbf16>, vector<16x512xf32> -> vector<16x512xf32>
    %c0_19 = arith.constant 0 : index
    %c0_20 = arith.constant 0 : index
    %44 = vector.load %arg6[%c0_19, %c0_20] : memref<1x512xf32, #tpu.memory_space<vmem>>, vector<1x512xf32>
    %c0_21 = arith.constant 0 : index
    %c0_22 = arith.constant 0 : index
    %45 = vector.load %arg7[%c0_21, %c0_22] : memref<1x512xf32, #tpu.memory_space<vmem>>, vector<1x512xf32>
    %46 = tpu.iota {dimensions = array<i32: 0>} : vector<16x1xi32>
    %c2_i32_23 = arith.constant 2 : i32
    %47 = vector.broadcast %c2_i32_23 : i32 to vector<16x1xi32>
    %48 = arith.cmpi slt, %46, %47 : vector<16x1xi32>
    %cst_24 = arith.constant 0.000000e+00 : f32
    %49 = vector.shape_cast %48 : vector<16x1xi1> to vector<16x1xi1>
    %50 = vector.broadcast %49 : vector<16x1xi1> to vector<16x512xi1>
    %51 = vector.broadcast %cst_24 : f32 to vector<16x512xf32>
    %52 = arith.select %50, %43, %51 : vector<16x512xi1>, vector<16x512xf32>
    %cst_25 = arith.constant dense<0.000000e+00> : vector<512xf32>
    %53 = vector.multi_reduction <add>, %52, %cst_25 [0] : vector<16x512xf32> to vector<512xf32>
    %54 = vector.shape_cast %53 : vector<512xf32> to vector<1x512xf32>
    %cst_26 = arith.constant 5.000000e-01 : f32
    %55 = vector.broadcast %cst_26 : f32 to vector<1x512xf32>
    %56 = arith.mulf %54, %55 : vector<1x512xf32>
    %57 = vector.broadcast %56 : vector<1x512xf32> to vector<16x512xf32>
    %58 = arith.subf %43, %57 : vector<16x512xf32>
    %cst_27 = arith.constant 0.000000e+00 : f32
    %59 = vector.shape_cast %48 : vector<16x1xi1> to vector<16x1xi1>
    %60 = vector.broadcast %59 : vector<16x1xi1> to vector<16x512xi1>
    %61 = vector.broadcast %cst_27 : f32 to vector<16x512xf32>
    %62 = arith.select %60, %58, %61 : vector<16x512xi1>, vector<16x512xf32>
    %63 = arith.mulf %62, %62 : vector<16x512xf32>
    %cst_28 = arith.constant dense<0.000000e+00> : vector<512xf32>
    %64 = vector.multi_reduction <add>, %63, %cst_28 [0] : vector<16x512xf32> to vector<512xf32>
    %65 = vector.shape_cast %64 : vector<512xf32> to vector<1x512xf32>
    %cst_29 = arith.constant 5.000000e-01 : f32
    %66 = vector.broadcast %cst_29 : f32 to vector<1x512xf32>
    %67 = arith.mulf %65, %66 : vector<1x512xf32>
    %cst_30 = arith.constant 9.99999974E-6 : f32
    %68 = vector.broadcast %cst_30 : f32 to vector<1x512xf32>
    %69 = arith.addf %67, %68 : vector<1x512xf32>
    %70 = math.rsqrt %69 : vector<1x512xf32>
    %71 = arith.mulf %70, %44 : vector<1x512xf32>
    %72 = vector.broadcast %71 : vector<1x512xf32> to vector<16x512xf32>
    %73 = arith.mulf %62, %72 : vector<16x512xf32>
    %74 = vector.broadcast %45 : vector<1x512xf32> to vector<16x512xf32>
    %75 = arith.addf %73, %74 : vector<16x512xf32>
    %cst_31 = arith.constant 0.000000e+00 : f32
    %76 = vector.broadcast %cst_31 : f32 to vector<16x512xf32>
    %77 = arith.maximumf %75, %76 : vector<16x512xf32>
    %cst_32 = arith.constant 0.000000e+00 : f32
    %78 = vector.shape_cast %48 : vector<16x1xi1> to vector<16x1xi1>
    %79 = vector.broadcast %78 : vector<16x1xi1> to vector<16x512xi1>
    %80 = vector.broadcast %cst_32 : f32 to vector<16x512xf32>
    %81 = arith.select %79, %77, %80 : vector<16x512xi1>, vector<16x512xf32>
    %82 = arith.truncf %81 : vector<16x512xf32> to vector<16x512xbf16>
    %c0_33 = arith.constant 0 : index
    %c0_34 = arith.constant 0 : index
    %83 = vector.load %arg8[%c0_33, %c0_34] : memref<512x512xbf16, #tpu.memory_space<vmem>>, vector<512x512xbf16>
    %cst_35 = arith.constant dense<0.000000e+00> : vector<16x512xf32>
    %84 = tpu.matmul %82, %83, %cst_35 {dimension_numbers = #tpu.dot_dimension_numbers<[1], [0], [0], [1], [0, 0, 1, 1], [], []>} : vector<16x512xbf16>, vector<512x512xbf16>, vector<16x512xf32> -> vector<16x512xf32>
    %c0_36 = arith.constant 0 : index
    %c0_37 = arith.constant 0 : index
    %85 = vector.load %arg9[%c0_36, %c0_37] : memref<1x512xf32, #tpu.memory_space<vmem>>, vector<1x512xf32>
    %c0_38 = arith.constant 0 : index
    %c0_39 = arith.constant 0 : index
    %86 = vector.load %arg10[%c0_38, %c0_39] : memref<1x512xf32, #tpu.memory_space<vmem>>, vector<1x512xf32>
    %87 = tpu.iota {dimensions = array<i32: 0>} : vector<16x1xi32>
    %c2_i32_40 = arith.constant 2 : i32
    %88 = vector.broadcast %c2_i32_40 : i32 to vector<16x1xi32>
    %89 = arith.cmpi slt, %87, %88 : vector<16x1xi32>
    %cst_41 = arith.constant 0.000000e+00 : f32
    %90 = vector.shape_cast %89 : vector<16x1xi1> to vector<16x1xi1>
    %91 = vector.broadcast %90 : vector<16x1xi1> to vector<16x512xi1>
    %92 = vector.broadcast %cst_41 : f32 to vector<16x512xf32>
    %93 = arith.select %91, %84, %92 : vector<16x512xi1>, vector<16x512xf32>
    %cst_42 = arith.constant dense<0.000000e+00> : vector<512xf32>
    %94 = vector.multi_reduction <add>, %93, %cst_42 [0] : vector<16x512xf32> to vector<512xf32>
    %95 = vector.shape_cast %94 : vector<512xf32> to vector<1x512xf32>
    %cst_43 = arith.constant 5.000000e-01 : f32
    %96 = vector.broadcast %cst_43 : f32 to vector<1x512xf32>
    %97 = arith.mulf %95, %96 : vector<1x512xf32>
    %98 = vector.broadcast %97 : vector<1x512xf32> to vector<16x512xf32>
    %99 = arith.subf %84, %98 : vector<16x512xf32>
    %cst_44 = arith.constant 0.000000e+00 : f32
    %100 = vector.shape_cast %89 : vector<16x1xi1> to vector<16x1xi1>
    %101 = vector.broadcast %100 : vector<16x1xi1> to vector<16x512xi1>
    %102 = vector.broadcast %cst_44 : f32 to vector<16x512xf32>
    %103 = arith.select %101, %99, %102 : vector<16x512xi1>, vector<16x512xf32>
    %104 = arith.mulf %103, %103 : vector<16x512xf32>
    %cst_45 = arith.constant dense<0.000000e+00> : vector<512xf32>
    %105 = vector.multi_reduction <add>, %104, %cst_45 [0] : vector<16x512xf32> to vector<512xf32>
    %106 = vector.shape_cast %105 : vector<512xf32> to vector<1x512xf32>
    %cst_46 = arith.constant 5.000000e-01 : f32
    %107 = vector.broadcast %cst_46 : f32 to vector<1x512xf32>
    %108 = arith.mulf %106, %107 : vector<1x512xf32>
    %cst_47 = arith.constant 9.99999974E-6 : f32
    %109 = vector.broadcast %cst_47 : f32 to vector<1x512xf32>
    %110 = arith.addf %108, %109 : vector<1x512xf32>
    %111 = math.rsqrt %110 : vector<1x512xf32>
    %112 = arith.mulf %111, %85 : vector<1x512xf32>
    %113 = vector.broadcast %112 : vector<1x512xf32> to vector<16x512xf32>
    %114 = arith.mulf %103, %113 : vector<16x512xf32>
    %115 = vector.broadcast %86 : vector<1x512xf32> to vector<16x512xf32>
    %116 = arith.addf %114, %115 : vector<16x512xf32>
    %cst_48 = arith.constant 0.000000e+00 : f32
    %117 = vector.broadcast %cst_48 : f32 to vector<16x512xf32>
    %118 = arith.maximumf %116, %117 : vector<16x512xf32>
    %cst_49 = arith.constant 0.000000e+00 : f32
    %119 = vector.shape_cast %89 : vector<16x1xi1> to vector<16x1xi1>
    %120 = vector.broadcast %119 : vector<16x1xi1> to vector<16x512xi1>
    %121 = vector.broadcast %cst_49 : f32 to vector<16x512xf32>
    %122 = arith.select %120, %118, %121 : vector<16x512xi1>, vector<16x512xf32>
    %123 = arith.truncf %122 : vector<16x512xf32> to vector<16x512xbf16>
    %c0_50 = arith.constant 0 : index
    %c0_51 = arith.constant 0 : index
    %124 = vector.load %arg11[%c0_50, %c0_51] : memref<16x512xbf16, #tpu.memory_space<vmem>>, vector<16x512xbf16>
    tpu.vector_store %arg11[%c0_50, %c0_51], %123 {strides = array<i32>} : memref<16x512xbf16, #tpu.memory_space<vmem>>, vector<16x512xbf16>,
    return
  }
  func.func @transform_0(%arg0: i32) -> (i32, i32) {
    %c0_i32 = arith.constant 0 : i32
    %c0_i32_0 = arith.constant 0 : i32
    %c0_i32_1 = arith.constant 0 : i32
    return %c0_i32, %c0_i32_0 : i32, i32
  }
  func.func @transform_1(%arg0: i32) -> (i32, i32) {
    %c0_i32 = arith.constant 0 : i32
    %c0_i32_0 = arith.constant 0 : i32
    %c0_i32_1 = arith.constant 0 : i32
    return %c0_i32, %c0_i32_0 : i32, i32
  }
  func.func @transform_2(%arg0: i32) -> (i32, i32) {
    %c0_i32 = arith.constant 0 : i32
    %c0_i32_0 = arith.constant 0 : i32
    %c0_i32_1 = arith.constant 0 : i32
    return %c0_i32, %c0_i32_0 : i32, i32
  }
  func.func @transform_3(%arg0: i32) -> (i32, i32) {
    %c0_i32 = arith.constant 0 : i32
    %c0_i32_0 = arith.constant 0 : i32
    %c0_i32_1 = arith.constant 0 : i32
    return %c0_i32, %c0_i32_0 : i32, i32
  }
  func.func @transform_4(%arg0: i32) -> (i32, i32) {
    %c0_i32 = arith.constant 0 : i32
    %c0_i32_0 = arith.constant 0 : i32
    %c0_i32_1 = arith.constant 0 : i32
    return %c0_i32, %c0_i32_0 : i32, i32
  }
  func.func @transform_5(%arg0: i32) -> (i32, i32) {
    %c0_i32 = arith.constant 0 : i32
    %c0_i32_0 = arith.constant 0 : i32
    %c0_i32_1 = arith.constant 0 : i32
    return %c0_i32, %c0_i32_0 : i32, i32
  }
  func.func @transform_6(%arg0: i32) -> (i32, i32) {
    %c0_i32 = arith.constant 0 : i32
    %c0_i32_0 = arith.constant 0 : i32
    %c0_i32_1 = arith.constant 0 : i32
    return %c0_i32, %c0_i32_0 : i32, i32
  }
  func.func @transform_7(%arg0: i32) -> (i32, i32) {
    %c0_i32 = arith.constant 0 : i32
    %c0_i32_0 = arith.constant 0 : i32
    %c0_i32_1 = arith.constant 0 : i32
    return %c0_i32, %c0_i32_0 : i32, i32
  }
  func.func @transform_8(%arg0: i32) -> (i32, i32) {
    %c0_i32 = arith.constant 0 : i32
    %c0_i32_0 = arith.constant 0 : i32
    %c0_i32_1 = arith.constant 0 : i32
    return %c0_i32, %c0_i32_0 : i32, i32
  }
  func.func @transform_9(%arg0: i32) -> (i32, i32) {
    %c0_i32 = arith.constant 0 : i32
    %c0_i32_0 = arith.constant 0 : i32
    %c0_i32_1 = arith.constant 0 : i32
    return %c0_i32, %c0_i32_0 : i32, i32
  }
  func.func @transform_10(%arg0: i32) -> (i32, i32) {
    %c0_i32 = arith.constant 0 : i32
    %c0_i32_0 = arith.constant 0 : i32
    %c0_i32_1 = arith.constant 0 : i32
    return %c0_i32, %c0_i32_0 : i32, i32
  }
}

</mosaic_0001>

<bundles_post_ra>
// kernel: _lambda_.4
= control target key start
LH: loop header
LB: loop body
LE: loop exit
PB: predicated region body
PF: predicated region fallthrough
CT: control target
= control target key end

     0   :  { %9 = vsyncpa [#allocation4], 0  ;;  %s1081_s0 = inlined_call_operand.vmem [shape: bf16[128,64], index: 0, kind: input, shape index: {}]   ;;  %s1082_s1 = inlined_call_operand.hbm [shape: bf16[64,128], index: 1, kind: input, shape index: {}]   ;;  %s1083_s2 = inlined_call_operand.hbm [shape: f32[1,128], index: 2, kind: input, shape index: {}]   ;;  %s1084_s3 = inlined_call_operand.vmem [shape: f32[1,128], index: 3, kind: input, shape index: {}]   ;;  %s1085_s4 = inlined_call_operand.vmem [shape: bf16[128,128], index: 4, kind: output, shape index: {}]  }
   0x1   :  { %10 = vsyncpa [#allocation6], 0  ;;  %s889_s15 = smov [#allocation3]   ;;  %s841_s19 = scalar_lea.hbm %s1082_s1, 512 }
   0x2   :  { %s18_s16 = sshll.u32 %s889_s15, 4  ;;  %p842_p0 = scmp.ne.s32.totalorder %s1082_s1, %s841_s19  ;;  %s19_s16 = int_to_ptr.vmem [resolvable:$true] %s18_s16 }
   0x3   :  { %p845_p1 = scmp.lt.u32.totalorder %s841_s19, %s1082_s1 }
   0x5   :  { %p847_p2 = pnand %p845_p1, %p842_p0 }
   0x7   :  { %850 = shalt.err (!%p847_p2)
}
   0x8   :  { %s851_s24 = scalar_lea.vmem %s19_s16, 512  ;;  %p856_p4 = scmp.lt.s32.totalorder %s19_s16, %s19_s16 }
   0x9   :  { %p852_p3 = scmp.ne.s32.totalorder %s19_s16, %s851_s24  ;;  %p857_p5 = scmp.lt.s32.totalorder %s851_s24, %s851_s24 }
   0xb   :  { %p858_p6 = por %p857_p5, %p856_p4 }
   0xd   :  { %p859_p7 = pnand %p858_p6, %p852_p3 }
   0xf   :  { %862 = shalt.err (!%p859_p7)
}
  0x10   :  { %s890_s25 = smov 64   ;;  %s891_s26 = smov 4  }
  0x11   :  { %24 = dma.hbm_to_vmem [thread:$0]  %s1082_s1, 512, %s19_s16, [#allocation4], %s890_s25, %s890_s25, %s891_s26  }
  0x12   :  { %s892_s29 = smov [#allocation5]   ;;  %s863_s7 = scalar_lea.hbm %s1083_s2, 16 }
  0x13   :  { %s31_s30 = sshll.u32 %s892_s29, 4  ;;  %p864_p8 = scmp.ne.s32.totalorder %s1083_s2, %s863_s7  ;;  %s32_s30 = int_to_ptr.vmem [resolvable:$true] %s31_s30 }
  0x14   :  { %p867_p9 = scmp.lt.u32.totalorder %s863_s7, %s1083_s2 }
  0x16   :  { %p869_p10 = pnand %p867_p9, %p864_p8 }
  0x18   :  { %872 = shalt.err (!%p869_p10)
}
  0x19   :  { %s873_s12 = scalar_lea.vmem %s32_s30, 16  ;;  %s877_s1 = scalar_lea.vmem %s32_s30, 32 }
  0x1a   :  { %p874_p11 = scmp.ne.s32.totalorder %s32_s30, %s873_s12  ;;  %p878_p12 = scmp.lt.s32.totalorder %s32_s30, %s32_s30 }
  0x1b   :  { %p879_p13 = scmp.lt.s32.totalorder %s877_s1, %s873_s12 }
  0x1d   :  { %p880_p0 = por %p879_p13, %p878_p12 }
  0x1f   :  { %p881_p1 = pnand %p880_p0, %p874_p11 }
  0x21   :  { %884 = shalt.err (!%p881_p1)
}
  0x22   :  { %34 = dma.hbm_to_vmem [thread:$0]  %s1083_s2, 16, %s32_s30, [#allocation6]  }
  0x23   :  { %885 = dma.done.wait [#allocation4], 512  }
  0x24   :  { %886 = vsyncadd [#allocation4], 4294966784 }
  0x25   :  { %887 = dma.done.wait [#allocation6], 16  }
  0x26   :  { %888 = vsyncadd [#allocation6], 4294967280  ;;  %v827_v0 = vld [vmem:[#allocation3] sm:$0xff]   ;;  %v828_v1 = vld [vmem:[#allocation3 + $0x8] sm:$0xff]   ;;  %vm168_vm0 = vcmask 523264  }
  0x27   :  { %791 = vmatprep.subr.bf16.mxu0 %v827_v0  ;;  %815 = vmatprep.subr.bf16.mxu1 %v827_v0  ;;  %v829_v2 = vld [vmem:[#allocation3 + $0x10] sm:$0xff]   ;;  %v831_v3 = vld [vmem:[%s1081_s0] sm:$0xff]   ;;  %v830_v4 = vld [vmem:[#allocation3 + $0x18] sm:$0xff]  }
  0x28   :  { %792 = vmatpush3.bf16.msra.mxu0 %v827_v0  ;;  %819 = vmatpush3.bf16.msra.mxu1 %v827_v0  ;;  %v835_v5 = vld [vmem:[%s1081_s0 + $0x20] sm:$0xff]   ;;  %v832_v6 = vld [vmem:[%s1081_s0 + $0x8] sm:$0xff]   ;;  %v833_v8 = vld [vmem:[%s1081_s0 + $0x10] sm:$0xff]  }
  0x29   :  { %793 = vmatprep.subr.bf16.mxu0 %v828_v1  ;;  %816 = vmatprep.subr.bf16.mxu1 %v828_v1  ;;  %v836_v7 = vld [vmem:[%s1081_s0 + $0x28] sm:$0xff]   ;;  %v837_v9 = vld [vmem:[%s1081_s0 + $0x30] sm:$0xff]   ;;  %v834_v10 = vld [vmem:[%s1081_s0 + $0x18] sm:$0xff]  }
  0x2a   :  { %799 = vmatprep.mubr.msk.bf16.mxu0 %vm168_vm0, %v831_v3  ;;  %807 = vmatprep.mubr.msk.bf16.mxu1 %vm168_vm0, %v835_v5  ;;  %v838_v11 = vld [vmem:[%s1081_s0 + $0x38] sm:$0xff]  }
  0x2c   :  { %794 = vmatpush3.bf16.msra.mxu0 %v828_v1  ;;  %820 = vmatpush3.bf16.msra.mxu1 %v828_v1 }
  0x2d   :  { %795 = vmatprep.subr.bf16.mxu0 %v829_v2  ;;  %817 = vmatprep.subr.bf16.mxu1 %v829_v2 }
  0x30   :  { %796 = vmatpush3.bf16.msra.mxu0 %v829_v2  ;;  %821 = vmatpush3.bf16.msra.mxu1 %v829_v2 }
  0x31   :  { %797 = vmatprep.subr.bf16.mxu0 %v830_v4  ;;  %818 = vmatprep.subr.bf16.mxu1 %v830_v4 }
  0x34   :  { %798 = vmatpush3.bf16.msra.mxu0 %v830_v4  ;;  %822 = vmatpush3.bf16.msra.mxu1 %v830_v4 }
  0x37   :  { %800 = vmatmul.mubr.msk.bf16.vlgmr.msra.gmra.mrb[0].mxu0 %vm168_vm0, %v832_v6  ;;  %808 = vmatmul.mubr.msk.bf16.vlgmr.msra.gmra.mrb[0].mxu1 %vm168_vm0, %v836_v7 }
  0x38   :  { %803 = vmatprep.mubr.msk.bf16.mxu0 %vm168_vm0, %v833_v8  ;;  %811 = vmatprep.mubr.msk.bf16.mxu1 %vm168_vm0, %v837_v9 }
  0x3f   :  { %804 = vmatmul.mubr.msk.bf16.gmra.mrb[4].mxu0 %vm168_vm0, %v834_v10  ;;  %812 = vmatmul.mubr.msk.bf16.gmra.mrb[4].mxu1 %vm168_vm0, %v838_v11 }
 0x10a   :  { %v801_v12 = vpop.f32.mrb[0].mxu0  ;;  %v809_v13 = vpop.f32.mrb[0].mxu1 }
 0x10b   :  { %v227_v14 = vpop.f32.mrb[1].mxu0  ;;  %v259_v15 = vpop.f32.mrb[1].mxu1 }
 0x10c   :  { %v802_v16 = vpop.f32.mrb[2].mxu0  ;;  %v810_v17 = vpop.f32.mrb[2].mxu1 }
 0x10d   :  { %v230_v18 = vpop.f32.mrb[3].mxu0  ;;  %v262_v19 = vpop.f32.mrb[3].mxu1 }
 0x10e   :  { %v424_v20 = vadd.f32 %v230_v18, %v227_v14 }
 0x110   :  { %v425_v21 = vadd.f32 %v801_v12, %v424_v20 }
 0x112   :  { %v805_v22 = vpop.f32.mrb[4].mxu0  ;;  %v426_v23 = vadd.f32 %v802_v16, %v425_v21  ;;  %v813_v24 = vpop.f32.mrb[4].mxu1 }
 0x113   :  { %v243_v25 = vpop.f32.mrb[5].mxu0  ;;  %v275_v26 = vpop.f32.mrb[5].mxu1 }
 0x114   :  { %v427_v27 = vadd.f32 %v426_v23, %v243_v25  ;;  %v806_v28 = vpop.f32.mrb[6].mxu0  ;;  %v814_v29 = vpop.f32.mrb[6].mxu1 }
 0x115   :  { %v246_v30 = vpop.f32.mrb[7].mxu0  ;;  %v278_v31 = vpop.f32.mrb[7].mxu1 }
 0x116   :  { %v428_v32 = vadd.f32 %v427_v27, %v246_v30 }
 0x118   :  { %v429_v33 = vadd.f32 %v805_v22, %v428_v32 }
 0x11a   :  { %v430_v34 = vadd.f32 %v806_v28, %v429_v33 }
 0x11c   :  { %v431_v35 = vadd.f32 %v430_v34, %v259_v15 }
 0x11e   :  { %v432_v36 = vadd.f32 %v431_v35, %v262_v19 }
 0x120   :  { %v433_v37 = vadd.f32 %v809_v13, %v432_v36 }
 0x122   :  { %v434_v38 = vadd.f32 %v810_v17, %v433_v37 }
 0x124   :  { %v435_v39 = vadd.f32 %v434_v38, %v275_v26 }
 0x126   :  { %v436_v40 = vadd.f32 %v435_v39, %v278_v31 }
 0x128   :  { %v437_v41 = vadd.f32 %v813_v24, %v436_v40 }
 0x12a   :  { %v438_v42 = vadd.f32 %v814_v29, %v437_v41  ;;  %v519_v41 = vlaneseq }
 0x12c   :  { %v439_v43 = vrot.slane %v438_v42, 4 }
 0x12e   :  { %v440_v44 = vadd.f32 %v439_v43, %v438_v42  ;;  %v520_v42 = vshrl.u32 %v519_v41, 7  ;;  %v341_v43 = vld [vmem:[#allocation5] sm:$0x1] }
 0x130   :  { %v441_v45 = vrot.slane %v440_v44, 2 }
 0x132   :  { %v442_v46 = vadd.f32 %v441_v45, %v440_v44  ;;  %v521_v44 = vsub.s32 0, %v520_v42 }
 0x134   :  { %v443_v47 = vrot.slane %v442_v46, 1 }
 0x136   :  { %v444_v48 = vadd.f32 %v443_v47, %v442_v46 }
 0x138   :  { %v445_v49 = vmul.f32 0.0078125, %v444_v48 }
 0x13a   :  { %v974_v50 = vsub.f32 %v227_v14, %v445_v49  ;;  %v976_v51 = vsub.f32 %v230_v18, %v445_v49  ;;  %v978_v52 = vsub.f32 %v801_v12, %v445_v49  ;;  %v980_v53 = vsub.f32 %v802_v16, %v445_v49 }
 0x13b   :  { %v982_v54 = vsub.f32 %v243_v25, %v445_v49  ;;  %v984_v55 = vsub.f32 %v246_v30, %v445_v49  ;;  %v986_v56 = vsub.f32 %v805_v22, %v445_v49  ;;  %v988_v57 = vsub.f32 %v806_v28, %v445_v49 }
 0x13c   :  { %v990_v58 = vsub.f32 %v259_v15, %v445_v49  ;;  %v992_v59 = vsub.f32 %v262_v19, %v445_v49  ;;  %v994_v60 = vsub.f32 %v809_v13, %v445_v49  ;;  %v996_v61 = vsub.f32 %v810_v17, %v445_v49 }
 0x13d   :  { %v998_v62 = vsub.f32 %v275_v26, %v445_v49  ;;  %v1000_v63 = vsub.f32 %v278_v31, %v445_v49  ;;  %v1002_v0 = vsub.f32 %v813_v24, %v445_v49  ;;  %v1004_v1 = vsub.f32 %v814_v29, %v445_v49 }
 0x13e   :  { %v478_v2 = vmul.f32 %v974_v50, %v974_v50  ;;  %v479_v3 = vmul.f32 %v976_v51, %v976_v51  ;;  %v480_v4 = vmul.f32 %v978_v52, %v978_v52  ;;  %v481_v6 = vmul.f32 %v980_v53, %v980_v53 }
 0x13f   :  { %v482_v8 = vmul.f32 %v982_v54, %v982_v54  ;;  %v483_v10 = vmul.f32 %v984_v55, %v984_v55  ;;  %v484_v12 = vmul.f32 %v986_v56, %v986_v56  ;;  %v485_v14 = vmul.f32 %v988_v57, %v988_v57 }
 0x140   :  { %v494_v5 = vadd.f32 %v479_v3, %v478_v2  ;;  %v486_v16 = vmul.f32 %v990_v58, %v990_v58  ;;  %v487_v18 = vmul.f32 %v992_v59, %v992_v59  ;;  %v488_v20 = vmul.f32 %v994_v60, %v994_v60 }
 0x141   :  { %v489_v22 = vmul.f32 %v996_v61, %v996_v61  ;;  %v490_v24 = vmul.f32 %v998_v62, %v998_v62  ;;  %v491_v26 = vmul.f32 %v1000_v63, %v1000_v63  ;;  %v492_v28 = vmul.f32 %v1002_v0, %v1002_v0 }
 0x142   :  { %v495_v7 = vadd.f32 %v494_v5, %v480_v4  ;;  %v493_v30 = vmul.f32 %v1004_v1, %v1004_v1  ;;  %v699_v4 = vld [vmem:[%s1084_s3] ss:$0 sm:$0xff] }
 0x144   :  { %v496_v9 = vadd.f32 %v495_v7, %v481_v6 }
 0x146   :  { %v497_v11 = vadd.f32 %v496_v9, %v482_v8 }
 0x148   :  { %v498_v13 = vadd.f32 %v497_v11, %v483_v10 }
 0x14a   :  { %v499_v15 = vadd.f32 %v498_v13, %v484_v12 }
 0x14c   :  { %v500_v17 = vadd.f32 %v499_v15, %v485_v14 }
 0x14e   :  { %v501_v19 = vadd.f32 %v500_v17, %v486_v16 }
 0x150   :  { %v502_v21 = vadd.f32 %v501_v19, %v487_v18 }
 0x152   :  { %v503_v23 = vadd.f32 %v502_v21, %v488_v20 }
 0x154   :  { %v504_v25 = vadd.f32 %v503_v23, %v489_v22 }
 0x156   :  { %v505_v27 = vadd.f32 %v504_v25, %v490_v24 }
 0x158   :  { %v506_v29 = vadd.f32 %v505_v27, %v491_v26 }
 0x15a   :  { %v507_v31 = vadd.f32 %v506_v29, %v492_v28 }
 0x15c   :  { %v508_v32 = vadd.f32 %v507_v31, %v493_v30 }
 0x15e   :  { %v509_v33 = vrot.slane %v508_v32, 4 }
 0x160   :  { %v510_v34 = vadd.f32 %v509_v33, %v508_v32 }
 0x162   :  { %v511_v35 = vrot.slane %v510_v34, 2 }
 0x164   :  { %v512_v36 = vadd.f32 %v511_v35, %v510_v34 }
 0x166   :  { %v513_v37 = vrot.slane %v512_v36, 1 }
 0x168   :  { %v514_v38 = vadd.f32 %v513_v37, %v512_v36 }
 0x16a   :  { %v515_v39 = vmul.f32 0.0078125, %v514_v38 }
 0x16c   :  { %v516_v40 = vadd.f32 1e-05, %v515_v39 }
 0x16e   :  { %839 = vrsqrt.f32 %v516_v40 }
 0x178   :  { %v840_v45 = vpop.eup %839 }
 0x179   :  { %v518_v46 = vmul.f32 %v840_v45, %v341_v43 }
 0x17b   :  { %v522_v47 = vrot.slane %v518_v46, %v521_v44 }
 0x17d   :  { %v523_v48 = vmul.f32 %v522_v47, %v974_v50  ;;  %v524_v49 = vmul.f32 %v522_v47, %v976_v51  ;;  %v525_v2 = vmul.f32 %v522_v47, %v978_v52  ;;  %v526_v3 = vmul.f32 %v522_v47, %v980_v53 }
 0x17e   :  { %v527_v5 = vmul.f32 %v522_v47, %v982_v54  ;;  %v528_v6 = vmul.f32 %v522_v47, %v984_v55  ;;  %v529_v7 = vmul.f32 %v522_v47, %v986_v56  ;;  %v530_v8 = vmul.f32 %v522_v47, %v988_v57 }
 0x17f   :  { %v531_v50 = vmul.f32 %v522_v47, %v990_v58  ;;  %v532_v51 = vmul.f32 %v522_v47, %v992_v59  ;;  %v533_v52 = vmul.f32 %v522_v47, %v994_v60  ;;  %v534_v53 = vmul.f32 %v522_v47, %v996_v61 }
 0x180   :  { %v535_v9 = vmul.f32 %v522_v47, %v998_v62  ;;  %v536_v10 = vmul.f32 %v522_v47, %v1000_v63  ;;  %v537_v54 = vmul.f32 %v522_v47, %v1002_v0  ;;  %v538_v55 = vmul.f32 %v522_v47, %v1004_v1 }
 0x181   :  { %v545_v11 = vadd.f32 %v699_v4, %v523_v48  ;;  %v546_v56 = vadd.f32 %v699_v4, %v524_v49  ;;  %v547_v12 = vadd.f32 %v699_v4, %v525_v2  ;;  %v548_v57 = vadd.f32 %v699_v4, %v526_v3 }
 0x182   :  { %v549_v13 = vadd.f32 %v699_v4, %v527_v5  ;;  %v550_v58 = vadd.f32 %v699_v4, %v528_v6  ;;  %v551_v14 = vadd.f32 %v699_v4, %v529_v7  ;;  %v552_v59 = vadd.f32 %v699_v4, %v530_v8 }
 0x183   :  { %v553_v15 = vadd.f32 %v699_v4, %v531_v50  ;;  %v554_v60 = vadd.f32 %v699_v4, %v532_v51  ;;  %v555_v16 = vadd.f32 %v699_v4, %v533_v52  ;;  %v556_v61 = vadd.f32 %v699_v4, %v534_v53 }
 0x184   :  { %v557_v17 = vadd.f32 %v699_v4, %v535_v9  ;;  %v558_v62 = vadd.f32 %v699_v4, %v536_v10  ;;  %v559_v18 = vadd.f32 %v699_v4, %v537_v54  ;;  %v560_v63 = vadd.f32 %v699_v4, %v538_v55 }
 0x185   :  { %v561_v19 = vmax.f32 %v545_v11, 0.0  ;;  %v562_v0 = vmax.f32 %v546_v56, 0.0  ;;  %v563_v20 = vmax.f32 %v547_v12, 0.0  ;;  %v564_v1 = vmax.f32 %v548_v57, 0.0 }
 0x186   :  { %v565_v21 = vmax.f32 %v549_v13, 0.0  ;;  %v566_v22 = vmax.f32 %v550_v58, 0.0  ;;  %v567_v23 = vmax.f32 %v551_v14, 0.0  ;;  %v568_v24 = vmax.f32 %v552_v59, 0.0 }
 0x187   :  { %v569_v25 = vmax.f32 %v553_v15, 0.0  ;;  %v570_v26 = vmax.f32 %v554_v60, 0.0  ;;  %v571_v27 = vmax.f32 %v555_v16, 0.0  ;;  %v572_v28 = vmax.f32 %v556_v61, 0.0 }
 0x188   :  { %v573_v29 = vmax.f32 %v557_v17, 0.0  ;;  %v574_v30 = vmax.f32 %v558_v62, 0.0  ;;  %v575_v31 = vmax.f32 %v559_v18, 0.0  ;;  %v576_v32 = vmax.f32 %v560_v63, 0.0 }
 0x189   :  { %v735_v33 = vpack.c.bf16 %v562_v0, %v561_v19  ;;  %v740_v34 = vpack.c.bf16 %v564_v1, %v563_v20  ;;  %v745_v35 = vpack.c.bf16 %v566_v22, %v565_v21  ;;  %v750_v36 = vpack.c.bf16 %v568_v24, %v567_v23 }
 0x18a   :  { %v755_v37 = vpack.c.bf16 %v570_v26, %v569_v25  ;;  %v760_v38 = vpack.c.bf16 %v572_v28, %v571_v27  ;;  %v765_v39 = vpack.c.bf16 %v574_v30, %v573_v29  ;;  %v770_v40 = vpack.c.bf16 %v576_v32, %v575_v31 }
 0x18b   :  { %736 = vst [vmem:[%s1085_s4] sm:$0xff] %v735_v33   ;;  %772 = vst [vmem:[%s1085_s4 + $0x8] sm:$0xff] %v740_v34  }
 0x18c   :  { %773 = vst [vmem:[%s1085_s4 + $0x10] sm:$0xff] %v745_v35   ;;  %774 = vst [vmem:[%s1085_s4 + $0x18] sm:$0xff] %v750_v36  }
 0x18d   :  { %775 = vst [vmem:[%s1085_s4 + $0x20] sm:$0xff] %v755_v37   ;;  %776 = vst [vmem:[%s1085_s4 + $0x28] sm:$0xff] %v760_v38  }
 0x18e   :  { %777 = vst [vmem:[%s1085_s4 + $0x30] sm:$0xff] %v765_v39   ;;  %778 = vst [vmem:[%s1085_s4 + $0x38] sm:$0xff] %v770_v40  }
 0x18f   :  { %677 = vsyncpa [#allocation4], 1 }
 0x190   :  { %678 = vsyncpa [#allocation6], 1 }

// kernel: _lambda_.5
= control target key start
LH: loop header
LB: loop body
LE: loop exit
PB: predicated region body
PF: predicated region fallthrough
CT: control target
= control target key end

     0   :  { %9 = vsyncpa [#allocation4], 0  ;;  %s1425_s0 = inlined_call_operand.vmem [shape: bf16[32,1024], index: 0, kind: input, shape index: {}]   ;;  %s1426_s1 = inlined_call_operand.hbm [shape: bf16[1024,128], index: 1, kind: input, shape index: {}]   ;;  %s1427_s2 = inlined_call_operand.hbm [shape: f32[1,128], index: 2, kind: input, shape index: {}]   ;;  %s1428_s3 = inlined_call_operand.vmem [shape: f32[1,128], index: 3, kind: input, shape index: {}]   ;;  %s1429_s4 = inlined_call_operand.vmem [shape: bf16[32,128], index: 4, kind: output, shape index: {}]  }
   0x1   :  { %10 = vsyncpa [#allocation6], 0  ;;  %s1315_s15 = smov [#allocation3]   ;;  %s1267_s19 = scalar_lea.hbm %s1426_s1, 8192 }
   0x2   :  { %s18_s16 = sshll.u32 %s1315_s15, 4  ;;  %p1268_p0 = scmp.ne.s32.totalorder %s1426_s1, %s1267_s19  ;;  %s19_s16 = int_to_ptr.vmem [resolvable:$true] %s18_s16 }
   0x3   :  { %p1271_p1 = scmp.lt.u32.totalorder %s1267_s19, %s1426_s1 }
   0x5   :  { %p1273_p2 = pnand %p1271_p1, %p1268_p0 }
   0x7   :  { %1276 = shalt.err (!%p1273_p2)
}
   0x8   :  { %s1277_s24 = scalar_lea.vmem %s19_s16, 8192  ;;  %p1282_p4 = scmp.lt.s32.totalorder %s19_s16, %s19_s16 }
   0x9   :  { %p1278_p3 = scmp.ne.s32.totalorder %s19_s16, %s1277_s24  ;;  %p1283_p5 = scmp.lt.s32.totalorder %s1277_s24, %s1277_s24 }
   0xb   :  { %p1284_p6 = por %p1283_p5, %p1282_p4 }
   0xd   :  { %p1285_p7 = pnand %p1284_p6, %p1278_p3 }
   0xf   :  { %1288 = shalt.err (!%p1285_p7)
}
  0x10   :  { %s1316_s25 = smov 64   ;;  %s1317_s26 = smov 4  }
  0x11   :  { %24 = dma.hbm_to_vmem [thread:$0]  %s1426_s1, 8192, %s19_s16, [#allocation4], %s1316_s25, %s1316_s25, %s1317_s26  }
  0x12   :  { %s1318_s29 = smov [#allocation5]   ;;  %s1289_s7 = scalar_lea.hbm %s1427_s2, 16 }
  0x13   :  { %s31_s30 = sshll.u32 %s1318_s29, 4  ;;  %p1290_p8 = scmp.ne.s32.totalorder %s1427_s2, %s1289_s7  ;;  %s32_s30 = int_to_ptr.vmem [resolvable:$true] %s31_s30 }
  0x14   :  { %p1293_p9 = scmp.lt.u32.totalorder %s1289_s7, %s1427_s2 }
  0x16   :  { %p1295_p10 = pnand %p1293_p9, %p1290_p8 }
  0x18   :  { %1298 = shalt.err (!%p1295_p10)
}
  0x19   :  { %s1299_s12 = scalar_lea.vmem %s32_s30, 16  ;;  %s1303_s1 = scalar_lea.vmem %s32_s30, 32 }
  0x1a   :  { %p1300_p11 = scmp.ne.s32.totalorder %s32_s30, %s1299_s12  ;;  %p1304_p12 = scmp.lt.s32.totalorder %s32_s30, %s32_s30 }
  0x1b   :  { %p1305_p13 = scmp.lt.s32.totalorder %s1303_s1, %s1299_s12 }
  0x1d   :  { %p1306_p0 = por %p1305_p13, %p1304_p12 }
  0x1f   :  { %p1307_p1 = pnand %p1306_p0, %p1300_p11 }
  0x21   :  { %1310 = shalt.err (!%p1307_p1)
}
  0x22   :  { %34 = dma.hbm_to_vmem [thread:$0]  %s1427_s2, 16, %s32_s30, [#allocation6]  }
  0x23   :  { %1311 = dma.done.wait [#allocation4], 8192  }
  0x24   :  { %1312 = vsyncadd [#allocation4], 4294959104 }
  0x25   :  { %1313 = dma.done.wait [#allocation6], 16  }
  0x26   :  { %1314 = vsyncadd [#allocation6], 4294967280  ;;  %v1201_v0 = vld [vmem:[#allocation3 + $0x40] sm:$0xff]   ;;  %v1205_v4 = vld [vmem:[#allocation3 + $0x48] sm:$0xff]  }
  0x27   :  { %v1202_v1 = vld [vmem:[#allocation3 + $0xc0] sm:$0xff]   ;;  %1085 = vmatprep.subr.bf16.mxu0 %v1201_v0  ;;  %v1206_v5 = vld [vmem:[#allocation3 + $0xc8] sm:$0xff]   ;;  %v1209_v8 = vld [vmem:[#allocation3 + $0x50] sm:$0xff]  }
  0x28   :  { %v1203_v2 = vld [vmem:[#allocation3] sm:$0xff]   ;;  %1113 = vmatprep.subr.bf16.mxu1 %v1202_v1  ;;  %v1207_v6 = vld [vmem:[#allocation3 + $0x8] sm:$0xff]   ;;  %v1210_v9 = vld [vmem:[#allocation3 + $0xd0] sm:$0xff]  }
  0x29   :  { %v1204_v3 = vld [vmem:[#allocation3 + $0x80] sm:$0xff]   ;;  %1086 = vmatpush3.bf16.msra.mxu0 %v1203_v2  ;;  %v1208_v7 = vld [vmem:[#allocation3 + $0x88] sm:$0xff]   ;;  %v1211_v10 = vld [vmem:[#allocation3 + $0x10] sm:$0xff]  }
  0x2a   :  { %1114 = vmatpush3.bf16.msra.mxu1 %v1204_v3  ;;  %1087 = vmatprep.subr.bf16.mxu0 %v1205_v4  ;;  %v1212_v11 = vld [vmem:[#allocation3 + $0x90] sm:$0xff]   ;;  %v1213_v12 = vld [vmem:[#allocation3 + $0x58] sm:$0xff]   ;;  %v1217_v16 = vld [vmem:[#allocation3 + $0x60] sm:$0xff]  }
  0x2b   :  { %1115 = vmatprep.subr.bf16.mxu1 %v1206_v5  ;;  %v1214_v13 = vld [vmem:[#allocation3 + $0xd8] sm:$0xff]   ;;  %v1218_v17 = vld [vmem:[#allocation3 + $0xe0] sm:$0xff]   ;;  %v1221_v20 = vld [vmem:[#allocation3 + $0x68] sm:$0xff]  }
  0x2c   :  { %v1215_v14 = vld [vmem:[#allocation3 + $0x18] sm:$0xff]   ;;  %v1219_v18 = vld [vmem:[#allocation3 + $0x20] sm:$0xff]   ;;  %v1222_v21 = vld [vmem:[#allocation3 + $0xe8] sm:$0xff]  }
  0x2d   :  { %1088 = vmatpush3.bf16.msra.mxu0 %v1207_v6  ;;  %v1216_v15 = vld [vmem:[#allocation3 + $0x98] sm:$0xff]   ;;  %v1220_v19 = vld [vmem:[#allocation3 + $0xa0] sm:$0xff]   ;;  %v1223_v22 = vld [vmem:[#allocation3 + $0x28] sm:$0xff]  }
  0x2e   :  { %1116 = vmatpush3.bf16.msra.mxu1 %v1208_v7  ;;  %1089 = vmatprep.subr.bf16.mxu0 %v1209_v8  ;;  %v1224_v23 = vld [vmem:[#allocation3 + $0xa8] sm:$0xff]   ;;  %v1225_v24 = vld [vmem:[#allocation3 + $0x70] sm:$0xff]   ;;  %v1229_v28 = vld [vmem:[#allocation3 + $0x78] sm:$0xff]  }
  0x2f   :  { %1117 = vmatprep.subr.bf16.mxu1 %v1210_v9  ;;  %v1226_v25 = vld [vmem:[#allocation3 + $0xf0] sm:$0xff]   ;;  %v1230_v29 = vld [vmem:[#allocation3 + $0xf8] sm:$0xff]   ;;  %v56_v32 = vld [vmem:[%s1425_s0] sm:$0xff] }
  0x30   :  { %v1227_v26 = vld [vmem:[#allocation3 + $0x30] sm:$0xff]   ;;  %v1231_v30 = vld [vmem:[#allocation3 + $0x38] sm:$0xff]   ;;  %v60_v33 = vld [vmem:[%s1425_s0 + $0x20] sm:$0xff] }
  0x31   :  { %1090 = vmatpush3.bf16.msra.mxu0 %v1211_v10  ;;  %v1228_v27 = vld [vmem:[#allocation3 + $0xb0] sm:$0xff]   ;;  %v1232_v31 = vld [vmem:[#allocation3 + $0xb8] sm:$0xff]   ;;  %v57_v34 = vld [vmem:[%s1425_s0 + $0x8] sm:$0xff]  ;;  %v985_v35 = vcombine.low %v56_v32, %v60_v33  ;;  %v986_v36 = vcombine.high %v56_v32, %v60_v33 }
  0x32   :  { %1118 = vmatpush3.bf16.msra.mxu1 %v1212_v11  ;;  %1091 = vmatprep.subr.bf16.mxu0 %v1213_v12  ;;  %v61_v37 = vld [vmem:[%s1425_s0 + $0x28] sm:$0xff]  ;;  %v1233_v40 = vld [vmem:[#allocation3 + $0x140] sm:$0xff]   ;;  %v1241_v48 = vld [vmem:[#allocation3 + $0x150] sm:$0xff]  }
  0x33   :  { %1119 = vmatprep.subr.bf16.mxu1 %v1214_v13  ;;  %v987_v38 = vcombine.low %v57_v34, %v61_v37  ;;  %v988_v39 = vcombine.high %v57_v34, %v61_v37  ;;  %696 = vmatprep.mubr.bf16.mxu0 %v986_v36  ;;  %v1234_v41 = vld [vmem:[#allocation3 + $0x1c0] sm:$0xff]   ;;  %v1237_v44 = vld [vmem:[#allocation3 + $0x148] sm:$0xff]   ;;  %v1242_v49 = vld [vmem:[#allocation3 + $0x1d0] sm:$0xff]  }
  0x34   :  { %v1235_v42 = vld [vmem:[#allocation3 + $0x100] sm:$0xff]   ;;  %v1238_v45 = vld [vmem:[#allocation3 + $0x1c8] sm:$0xff]   ;;  %v1243_v50 = vld [vmem:[#allocation3 + $0x110] sm:$0xff]  }
  0x35   :  { %1092 = vmatpush3.bf16.msra.mxu0 %v1215_v14  ;;  %745 = vmatprep.mubr.bf16.mxu1 %v988_v39  ;;  %v1236_v43 = vld [vmem:[#allocation3 + $0x180] sm:$0xff]   ;;  %v1239_v46 = vld [vmem:[#allocation3 + $0x108] sm:$0xff]   ;;  %v1244_v51 = vld [vmem:[#allocation3 + $0x190] sm:$0xff]  }
  0x36   :  { %1120 = vmatpush3.bf16.msra.mxu1 %v1216_v15  ;;  %1093 = vmatprep.subr.bf16.mxu0 %v1217_v16  ;;  %v1240_v47 = vld [vmem:[#allocation3 + $0x188] sm:$0xff]   ;;  %v1245_v52 = vld [vmem:[#allocation3 + $0x158] sm:$0xff]   ;;  %v1249_v56 = vld [vmem:[#allocation3 + $0x160] sm:$0xff]  }
  0x37   :  { %1121 = vmatprep.subr.bf16.mxu1 %v1218_v17  ;;  %v1246_v53 = vld [vmem:[#allocation3 + $0x1d8] sm:$0xff]   ;;  %v1250_v57 = vld [vmem:[#allocation3 + $0x1e0] sm:$0xff]   ;;  %v65_v63 = vld [vmem:[%s1425_s0 + $0x48] sm:$0xff] }
  0x38   :  { %v1247_v54 = vld [vmem:[#allocation3 + $0x118] sm:$0xff]   ;;  %v1251_v58 = vld [vmem:[#allocation3 + $0x120] sm:$0xff]   ;;  %v69_v0 = vld [vmem:[%s1425_s0 + $0x68] sm:$0xff] }
  0x39   :  { %1094 = vmatpush3.bf16.msra.mxu0 %v1219_v18  ;;  %v1248_v55 = vld [vmem:[#allocation3 + $0x198] sm:$0xff]   ;;  %v1252_v59 = vld [vmem:[#allocation3 + $0x1a0] sm:$0xff]   ;;  %v996_v2 = vcombine.high %v65_v63, %v69_v0  ;;  %v1253_v3 = vld [vmem:[#allocation3 + $0x168] sm:$0xff]   ;;  %v995_v4 = vcombine.low %v65_v63, %v69_v0 }
  0x3a   :  { %1122 = vmatpush3.bf16.msra.mxu1 %v1220_v19  ;;  %1095 = vmatprep.subr.bf16.mxu0 %v1221_v20  ;;  %v64_v60 = vld [vmem:[%s1425_s0 + $0x40] sm:$0xff]  ;;  %v1254_v5 = vld [vmem:[#allocation3 + $0x1e8] sm:$0xff]   ;;  %v1257_v8 = vld [vmem:[#allocation3 + $0x170] sm:$0xff]  }
  0x3b   :  { %1123 = vmatprep.subr.bf16.mxu1 %v1222_v21  ;;  %v68_v61 = vld [vmem:[%s1425_s0 + $0x60] sm:$0xff]  ;;  %v1255_v6 = vld [vmem:[#allocation3 + $0x128] sm:$0xff]   ;;  %v1258_v9 = vld [vmem:[#allocation3 + $0x1f0] sm:$0xff]  }
  0x3c   :  { %v994_v62 = vcombine.high %v64_v60, %v68_v61  ;;  %v993_v1 = vcombine.low %v64_v60, %v68_v61  ;;  %v1256_v7 = vld [vmem:[#allocation3 + $0x1a8] sm:$0xff]   ;;  %v1259_v10 = vld [vmem:[#allocation3 + $0x130] sm:$0xff]   ;;  %v1261_v12 = vld [vmem:[#allocation3 + $0x178] sm:$0xff]  }
  0x3d   :  { %1096 = vmatpush3.bf16.msra.mxu0 %v1223_v22  ;;  %v1260_v11 = vld [vmem:[#allocation3 + $0x1b0] sm:$0xff]   ;;  %v1262_v13 = vld [vmem:[#allocation3 + $0x1f8] sm:$0xff]  }
  0x3e   :  { %1124 = vmatpush3.bf16.msra.mxu1 %v1224_v23  ;;  %1097 = vmatprep.subr.bf16.mxu0 %v1225_v24  ;;  %v1263_v14 = vld [vmem:[#allocation3 + $0x138] sm:$0xff]   ;;  %v58_v16 = vld [vmem:[%s1425_s0 + $0x10] sm:$0xff] }
  0x3f   :  { %1125 = vmatprep.subr.bf16.mxu1 %v1226_v25  ;;  %v1264_v15 = vld [vmem:[#allocation3 + $0x1b8] sm:$0xff]   ;;  %v62_v17 = vld [vmem:[%s1425_s0 + $0x30] sm:$0xff] }
  0x40   :  { %v59_v18 = vld [vmem:[%s1425_s0 + $0x18] sm:$0xff]  ;;  %v989_v20 = vcombine.low %v58_v16, %v62_v17  ;;  %v990_v21 = vcombine.high %v58_v16, %v62_v17  ;;  %v66_v24 = vld [vmem:[%s1425_s0 + $0x50] sm:$0xff] }
  0x41   :  { %1098 = vmatpush3.bf16.msra.mxu0 %v1227_v26  ;;  %v63_v19 = vld [vmem:[%s1425_s0 + $0x38] sm:$0xff]  ;;  %v70_v25 = vld [vmem:[%s1425_s0 + $0x70] sm:$0xff] }
  0x42   :  { %1126 = vmatpush3.bf16.msra.mxu1 %v1228_v27  ;;  %1099 = vmatprep.subr.bf16.mxu0 %v1229_v28  ;;  %v991_v22 = vcombine.low %v59_v18, %v63_v19  ;;  %v992_v23 = vcombine.high %v59_v18, %v63_v19  ;;  %v67_v26 = vld [vmem:[%s1425_s0 + $0x58] sm:$0xff]  ;;  %v998_v27 = vcombine.high %v66_v24, %v70_v25 }
  0x43   :  { %1127 = vmatprep.subr.bf16.mxu1 %v1230_v29  ;;  %v71_v28 = vld [vmem:[%s1425_s0 + $0x78] sm:$0xff] }
  0x44   :  { %v1000_v29 = vcombine.high %v67_v26, %v71_v28 }
  0x45   :  { %1100 = vmatpush3.bf16.msra.mxu0 %v1231_v30  ;;  %v997_v30 = vcombine.low %v66_v24, %v70_v25 }
  0x46   :  { %1128 = vmatpush3.bf16.msra.mxu1 %v1232_v31  ;;  %1141 = vmatprep.subr.bf16.mxu0 %v1233_v40  ;;  %v999_v31 = vcombine.low %v67_v26, %v71_v28 }
  0x47   :  { %1169 = vmatprep.subr.bf16.mxu1 %v1234_v41 }
  0x48   :  { %697 = vmatmul.mubr.bf16.vlgmr.msra.gmra.mrb[0].mxu0 %v985_v35 }
  0x49   :  { %746 = vmatmul.mubr.bf16.vlgmr.msra.gmra.mrb[0].mxu1 %v987_v38  ;;  %1142 = vmatpush3.bf16.msra.mxu0 %v1235_v42 }
  0x4a   :  { %1170 = vmatpush3.bf16.msra.mxu1 %v1236_v43  ;;  %1143 = vmatprep.subr.bf16.mxu0 %v1237_v44 }
  0x4b   :  { %1171 = vmatprep.subr.bf16.mxu1 %v1238_v45  ;;  %704 = vmatprep.mubr.bf16.mxu0 %v994_v62 }
  0x4c   :  { %753 = vmatprep.mubr.bf16.mxu1 %v996_v2 }
  0x4d   :  { %1144 = vmatpush3.bf16.msra.mxu0 %v1239_v46 }
  0x4e   :  { %1172 = vmatpush3.bf16.msra.mxu1 %v1240_v47  ;;  %1145 = vmatprep.subr.bf16.mxu0 %v1241_v48 }
  0x4f   :  { %1173 = vmatprep.subr.bf16.mxu1 %v1242_v49 }
  0x50   :  { %705 = vmatmul.mubr.bf16.gmra.mrb[4].mxu0 %v993_v1 }
  0x51   :  { %1146 = vmatpush3.bf16.msra.mxu0 %v1243_v50  ;;  %754 = vmatmul.mubr.bf16.gmra.mrb[4].mxu1 %v995_v4 }
  0x52   :  { %1174 = vmatpush3.bf16.msra.mxu1 %v1244_v51  ;;  %1147 = vmatprep.subr.bf16.mxu0 %v1245_v52 }
  0x53   :  { %1175 = vmatprep.subr.bf16.mxu1 %v1246_v53  ;;  %794 = vmatprep.mubr.bf16.mxu0 %v990_v21 }
  0x54   :  { %843 = vmatprep.mubr.bf16.mxu1 %v992_v23 }
  0x55   :  { %1148 = vmatpush3.bf16.msra.mxu0 %v1247_v54 }
  0x56   :  { %1176 = vmatpush3.bf16.msra.mxu1 %v1248_v55  ;;  %1149 = vmatprep.subr.bf16.mxu0 %v1249_v56 }
  0x57   :  { %1177 = vmatprep.subr.bf16.mxu1 %v1250_v57 }
  0x59   :  { %1150 = vmatpush3.bf16.msra.mxu0 %v1251_v58 }
  0x5a   :  { %1178 = vmatpush3.bf16.msra.mxu1 %v1252_v59  ;;  %1151 = vmatprep.subr.bf16.mxu0 %v1253_v3 }
  0x5b   :  { %1179 = vmatprep.subr.bf16.mxu1 %v1254_v5 }
  0x5d   :  { %1152 = vmatpush3.bf16.msra.mxu0 %v1255_v6 }
  0x5e   :  { %1180 = vmatpush3.bf16.msra.mxu1 %v1256_v7  ;;  %1153 = vmatprep.subr.bf16.mxu0 %v1257_v8 }
  0x5f   :  { %1181 = vmatprep.subr.bf16.mxu1 %v1258_v9 }
  0x61   :  { %1154 = vmatpush3.bf16.msra.mxu0 %v1259_v10 }
  0x62   :  { %1182 = vmatpush3.bf16.msra.mxu1 %v1260_v11  ;;  %1155 = vmatprep.subr.bf16.mxu0 %v1261_v12 }
  0x63   :  { %1183 = vmatprep.subr.bf16.mxu1 %v1262_v13 }
  0x65   :  { %1156 = vmatpush3.bf16.msra.mxu0 %v1263_v14 }
  0x66   :  { %1184 = vmatpush3.bf16.msra.mxu1 %v1264_v15 }
  0x68   :  { %795 = vmatmul.mubr.bf16.vlgmr.msra.gmra.mrb[8].mxu0 %v989_v20 }
  0x69   :  { %844 = vmatmul.mubr.bf16.vlgmr.msra.gmra.mrb[8].mxu1 %v991_v22  ;;  %802 = vmatprep.mubr.bf16.mxu0 %v998_v27 }
  0x6a   :  { %851 = vmatprep.mubr.bf16.mxu1 %v1000_v29 }
  0x70   :  { %803 = vmatmul.mubr.bf16.gmra.mrb[12].mxu0 %v997_v30 }
  0x71   :  { %852 = vmatmul.mubr.bf16.gmra.mrb[12].mxu1 %v999_v31 }
 0x11b   :  { %v1101_v32 = vpop.f32.mrb[0].mxu0 }
 0x11c   :  { %v1129_v33 = vpop.f32.mrb[0].mxu1  ;;  %v1102_v34 = vpop.f32.mrb[1].mxu0 }
 0x11d   :  { %v1103_v35 = vadd.f32 %v1102_v34, %v1101_v32  ;;  %v1130_v36 = vpop.f32.mrb[1].mxu1  ;;  %v1104_v37 = vpop.f32.mrb[2].mxu0 }
 0x11e   :  { %v1131_v38 = vadd.f32 %v1130_v36, %v1129_v33  ;;  %v1132_v39 = vpop.f32.mrb[2].mxu1  ;;  %v1105_v40 = vpop.f32.mrb[3].mxu0 }
 0x11f   :  { %v1106_v41 = vadd.f32 %v1105_v40, %v1104_v37  ;;  %v1133_v42 = vpop.f32.mrb[3].mxu1 }
 0x120   :  { %v748_v43 = vadd.f32 %v1131_v38, %v1103_v35  ;;  %v1134_v44 = vadd.f32 %v1133_v42, %v1132_v39 }
 0x122   :  { %v751_v45 = vadd.f32 %v1134_v44, %v1106_v41 }
 0x123   :  { %v1107_v46 = vpop.f32.mrb[4].mxu0 }
 0x124   :  { %v1135_v47 = vpop.f32.mrb[4].mxu1  ;;  %v1108_v48 = vpop.f32.mrb[5].mxu0 }
 0x125   :  { %v1109_v49 = vadd.f32 %v1108_v48, %v1107_v46  ;;  %v1136_v50 = vpop.f32.mrb[5].mxu1  ;;  %v1110_v51 = vpop.f32.mrb[6].mxu0 }
 0x126   :  { %v1137_v52 = vadd.f32 %v1136_v50, %v1135_v47  ;;  %v1138_v53 = vpop.f32.mrb[6].mxu1  ;;  %v1111_v54 = vpop.f32.mrb[7].mxu0 }
 0x127   :  { %v1112_v55 = vadd.f32 %v1111_v54, %v1110_v51  ;;  %v1139_v56 = vpop.f32.mrb[7].mxu1 }
 0x128   :  { %v756_v57 = vadd.f32 %v1137_v52, %v1109_v49  ;;  %v1140_v58 = vadd.f32 %v1139_v56, %v1138_v53 }
 0x12a   :  { %v759_v59 = vadd.f32 %v1140_v58, %v1112_v55 }
 0x13b   :  { %v1157_v60 = vpop.f32.mrb[8].mxu0 }
 0x13c   :  { %v1185_v61 = vpop.f32.mrb[8].mxu1  ;;  %v1158_v62 = vpop.f32.mrb[9].mxu0 }
 0x13d   :  { %v1186_v63 = vpop.f32.mrb[9].mxu1  ;;  %v1159_v0 = vadd.f32 %v1158_v62, %v1157_v60  ;;  %v1160_v2 = vpop.f32.mrb[10].mxu0 }
 0x13e   :  { %v1187_v1 = vadd.f32 %v1186_v63, %v1185_v61  ;;  %v1188_v3 = vpop.f32.mrb[10].mxu1  ;;  %v1161_v4 = vpop.f32.mrb[11].mxu0 }
 0x13f   :  { %v1189_v5 = vpop.f32.mrb[11].mxu1  ;;  %v797_v6 = vadd.f32 %v1159_v0, %v748_v43  ;;  %v1162_v7 = vadd.f32 %v1161_v4, %v1160_v2  ;;  %v1065_v0 = vld [vmem:[%s1428_s3] ss:$0 sm:$0xff] }
 0x140   :  { %v1190_v8 = vadd.f32 %v1189_v5, %v1188_v3 }
 0x141   :  { %v846_v9 = vadd.f32 %v1187_v1, %v797_v6  ;;  %v800_v10 = vadd.f32 %v1162_v7, %v751_v45 }
 0x143   :  { %v849_v11 = vadd.f32 %v1190_v8, %v800_v10  ;;  %v1163_v12 = vpop.f32.mrb[12].mxu0 }
 0x144   :  { %v1191_v13 = vpop.f32.mrb[12].mxu1  ;;  %v1164_v14 = vpop.f32.mrb[13].mxu0 }
 0x145   :  { %v1192_v15 = vpop.f32.mrb[13].mxu1  ;;  %v898_v16 = vadd.f32 %v849_v11, %v846_v9  ;;  %v1165_v17 = vadd.f32 %v1164_v14, %v1163_v12  ;;  %v1166_v19 = vpop.f32.mrb[14].mxu0 }
 0x146   :  { %v1193_v18 = vadd.f32 %v1192_v15, %v1191_v13  ;;  %v1194_v20 = vpop.f32.mrb[14].mxu1  ;;  %v1167_v21 = vpop.f32.mrb[15].mxu0 }
 0x147   :  { %v1195_v22 = vpop.f32.mrb[15].mxu1  ;;  %v805_v23 = vadd.f32 %v1165_v17, %v756_v57  ;;  %v1168_v24 = vadd.f32 %v1167_v21, %v1166_v19  ;;  %v933_v57 = vlaneseq }
 0x148   :  { %v1196_v25 = vadd.f32 %v1195_v22, %v1194_v20 }
 0x149   :  { %v854_v26 = vadd.f32 %v1193_v18, %v805_v23  ;;  %v808_v27 = vadd.f32 %v1168_v24, %v759_v59  ;;  %v934_v58 = vshrl.u32 %v933_v57, 7  ;;  %v875_v59 = vld [vmem:[#allocation5] sm:$0x1] }
 0x14b   :  { %v899_v28 = vadd.f32 %v898_v16, %v854_v26  ;;  %v857_v29 = vadd.f32 %v1196_v25, %v808_v27  ;;  %v935_v60 = vsub.s32 0, %v934_v58 }
 0x14d   :  { %v900_v30 = vadd.f32 %v899_v28, %v857_v29 }
 0x14f   :  { %v901_v31 = vrot.slane %v900_v30, 4 }
 0x151   :  { %v902_v32 = vadd.f32 %v901_v31, %v900_v30 }
 0x153   :  { %v903_v33 = vrot.slane %v902_v32, 2 }
 0x155   :  { %v904_v34 = vadd.f32 %v903_v33, %v902_v32 }
 0x157   :  { %v905_v35 = vrot.slane %v904_v34, 1 }
 0x159   :  { %v906_v36 = vadd.f32 %v905_v35, %v904_v34 }
 0x15b   :  { %v907_v37 = vmul.f32 0.03125, %v906_v36 }
 0x15d   :  { %v908_v38 = vsub.f32 %v846_v9, %v907_v37  ;;  %v909_v39 = vsub.f32 %v849_v11, %v907_v37  ;;  %v910_v40 = vsub.f32 %v854_v26, %v907_v37  ;;  %v911_v41 = vsub.f32 %v857_v29, %v907_v37 }
 0x15f   :  { %v916_v42 = vmul.f32 %v908_v38, %v908_v38  ;;  %v917_v43 = vmul.f32 %v909_v39, %v909_v39  ;;  %v918_v44 = vmul.f32 %v910_v40, %v910_v40  ;;  %v919_v46 = vmul.f32 %v911_v41, %v911_v41 }
 0x161   :  { %v920_v45 = vadd.f32 %v917_v43, %v916_v42 }
 0x163   :  { %v921_v47 = vadd.f32 %v920_v45, %v918_v44 }
 0x165   :  { %v922_v48 = vadd.f32 %v921_v47, %v919_v46 }
 0x167   :  { %v923_v49 = vrot.slane %v922_v48, 4 }
 0x169   :  { %v924_v50 = vadd.f32 %v923_v49, %v922_v48 }
 0x16b   :  { %v925_v51 = vrot.slane %v924_v50, 2 }
 0x16d   :  { %v926_v52 = vadd.f32 %v925_v51, %v924_v50 }
 0x16f   :  { %v927_v53 = vrot.slane %v926_v52, 1 }
 0x171   :  { %v928_v54 = vadd.f32 %v927_v53, %v926_v52 }
 0x173   :  { %v929_v55 = vmul.f32 0.03125, %v928_v54 }
 0x175   :  { %v930_v56 = vadd.f32 1e-05, %v929_v55 }
 0x177   :  { %1265 = vrsqrt.f32 %v930_v56 }
 0x181   :  { %v1266_v61 = vpop.eup %1265 }
 0x182   :  { %v932_v62 = vmul.f32 %v1266_v61, %v875_v59 }
 0x184   :  { %v936_v63 = vrot.slane %v932_v62, %v935_v60 }
 0x186   :  { %v937_v1 = vmul.f32 %v936_v63, %v908_v38  ;;  %v938_v2 = vmul.f32 %v936_v63, %v909_v39  ;;  %v939_v3 = vmul.f32 %v936_v63, %v910_v40  ;;  %v940_v4 = vmul.f32 %v936_v63, %v911_v41 }
 0x188   :  { %v947_v5 = vadd.f32 %v1065_v0, %v937_v1  ;;  %v948_v6 = vadd.f32 %v1065_v0, %v938_v2  ;;  %v949_v7 = vadd.f32 %v1065_v0, %v939_v3  ;;  %v950_v8 = vadd.f32 %v1065_v0, %v940_v4 }
 0x18a   :  { %v951_v9 = vmax.f32 %v947_v5, 0.0  ;;  %v952_v10 = vmax.f32 %v948_v6, 0.0  ;;  %v953_v11 = vmax.f32 %v949_v7, 0.0  ;;  %v954_v12 = vmax.f32 %v950_v8, 0.0 }
 0x18c   :  { %v1077_v13 = vpack.c.bf16 %v952_v10, %v951_v9  ;;  %v1082_v14 = vpack.c.bf16 %v954_v12, %v953_v11 }
 0x18e   :  { %1078 = vst [vmem:[%s1429_s4] sm:$0xff] %v1077_v13   ;;  %1084 = vst [vmem:[%s1429_s4 + $0x8] sm:$0xff] %v1082_v14  }
 0x18f   :  { %983 = vsyncpa [#allocation4], 1 }
 0x190   :  { %984 = vsyncpa [#allocation6], 1 }

// kernel: _lambda_.6
= control target key start
LH: loop header
LB: loop body
LE: loop exit
PB: predicated region body
PF: predicated region fallthrough
CT: control target
= control target key end

     0   :  { %s3742_s1 = inlined_call_operand.vmem [shape: bf16[2048,256], index: 1, kind: input, shape index: {}]   ;;  %s3743_s0 = inlined_call_operand.vmem [shape: bf16[16,2048], index: 0, kind: input, shape index: {}]   ;;  %s3744_s4 = inlined_call_operand.vmem [shape: bf16[16,256], index: 4, kind: output, shape index: {}]   ;;  %s3745_s2 = inlined_call_operand.vmem [shape: f32[1,256], index: 2, kind: input, shape index: {}]   ;;  %s3746_s3 = inlined_call_operand.vmem [shape: f32[1,256], index: 3, kind: input, shape index: {}]  }
   0x1   :  { %v2452_v0 = vld [vmem:[%s3742_s1 + $0x4] ss:$8 sps:$4 sm:$0xff]   ;;  %v2456_v2 = vld [vmem:[%s3742_s1] ss:$8 sps:$4 sm:$0xff]   ;;  %v2458_v4 = vld [vmem:[%s3742_s1 + $0x14] ss:$8 sps:$4 sm:$0xff]  }
   0x2   :  { %v2454_v1 = vld [vmem:[%s3742_s1 + $0x404] ss:$8 sps:$4 sm:$0xff]   ;;  %1661 = vmatprep.subr.bf16.mxu1 %v2452_v0  ;;  %v2457_v3 = vld [vmem:[%s3742_s1 + $0x400] ss:$8 sps:$4 sm:$0xff]   ;;  %v2460_v5 = vld [vmem:[%s3742_s1 + $0x414] ss:$8 sps:$4 sm:$0xff]  }
   0x3   :  { %1833 = vmatprep.subr.bf16.mxu0 %v2454_v1  ;;  %1662 = vmatpush1.bf16.msra.mxu1 %v2456_v2  ;;  %v2462_v6 = vld [vmem:[%s3742_s1 + $0x10] ss:$8 sps:$4 sm:$0xff]   ;;  %v2464_v8 = vld [vmem:[%s3742_s1 + $0x24] ss:$8 sps:$4 sm:$0xff]   ;;  %v2468_v10 = vld [vmem:[%s3742_s1 + $0x20] ss:$8 sps:$4 sm:$0xff]  }
   0x4   :  { %1834 = vmatpush1.bf16.msra.mxu0 %v2457_v3  ;;  %1663 = vmatprep.subr.bf16.mxu1 %v2458_v4  ;;  %v2463_v7 = vld [vmem:[%s3742_s1 + $0x410] ss:$8 sps:$4 sm:$0xff]   ;;  %v2466_v9 = vld [vmem:[%s3742_s1 + $0x424] ss:$8 sps:$4 sm:$0xff]   ;;  %v2469_v11 = vld [vmem:[%s3742_s1 + $0x420] ss:$8 sps:$4 sm:$0xff]  }
   0x5   :  { %1835 = vmatprep.subr.bf16.mxu0 %v2460_v5  ;;  %v2470_v12 = vld [vmem:[%s3742_s1 + $0x34] ss:$8 sps:$4 sm:$0xff]   ;;  %v2474_v14 = vld [vmem:[%s3742_s1 + $0x30] ss:$8 sps:$4 sm:$0xff]   ;;  %v2476_v16 = vld [vmem:[%s3742_s1 + $0x44] ss:$8 sps:$4 sm:$0xff]  }
   0x6   :  { %v2472_v13 = vld [vmem:[%s3742_s1 + $0x434] ss:$8 sps:$4 sm:$0xff]   ;;  %v2475_v15 = vld [vmem:[%s3742_s1 + $0x430] ss:$8 sps:$4 sm:$0xff]   ;;  %v2478_v17 = vld [vmem:[%s3742_s1 + $0x444] ss:$8 sps:$4 sm:$0xff]  }
   0x7   :  { %1664 = vmatpush1.bf16.msra.mxu1 %v2462_v6  ;;  %v2480_v18 = vld [vmem:[%s3742_s1 + $0x40] ss:$8 sps:$4 sm:$0xff]   ;;  %v2482_v20 = vld [vmem:[%s3742_s1 + $0x54] ss:$8 sps:$4 sm:$0xff]   ;;  %v2486_v22 = vld [vmem:[%s3742_s1 + $0x50] ss:$8 sps:$4 sm:$0xff]  }
   0x8   :  { %1836 = vmatpush1.bf16.msra.mxu0 %v2463_v7  ;;  %1665 = vmatprep.subr.bf16.mxu1 %v2464_v8  ;;  %v2481_v19 = vld [vmem:[%s3742_s1 + $0x440] ss:$8 sps:$4 sm:$0xff]   ;;  %v2484_v21 = vld [vmem:[%s3742_s1 + $0x454] ss:$8 sps:$4 sm:$0xff]   ;;  %v2487_v23 = vld [vmem:[%s3742_s1 + $0x450] ss:$8 sps:$4 sm:$0xff]  }
   0x9   :  { %1837 = vmatprep.subr.bf16.mxu0 %v2466_v9  ;;  %v2488_v24 = vld [vmem:[%s3742_s1 + $0x64] ss:$8 sps:$4 sm:$0xff]   ;;  %v2492_v26 = vld [vmem:[%s3742_s1 + $0x60] ss:$8 sps:$4 sm:$0xff]   ;;  %v2494_v28 = vld [vmem:[%s3742_s1 + $0x74] ss:$8 sps:$4 sm:$0xff]  }
   0xa   :  { %v2490_v25 = vld [vmem:[%s3742_s1 + $0x464] ss:$8 sps:$4 sm:$0xff]   ;;  %v2493_v27 = vld [vmem:[%s3742_s1 + $0x460] ss:$8 sps:$4 sm:$0xff]   ;;  %v2496_v29 = vld [vmem:[%s3742_s1 + $0x474] ss:$8 sps:$4 sm:$0xff]  }
   0xb   :  { %1666 = vmatpush1.bf16.msra.mxu1 %v2468_v10  ;;  %v2498_v30 = vld [vmem:[%s3742_s1 + $0x70] ss:$8 sps:$4 sm:$0xff]   ;;  %v2500_v32 = vld [vmem:[%s3742_s1 + $0x84] ss:$8 sps:$4 sm:$0xff]   ;;  %v2504_v34 = vld [vmem:[%s3742_s1 + $0x80] ss:$8 sps:$4 sm:$0xff]  }
   0xc   :  { %1838 = vmatpush1.bf16.msra.mxu0 %v2469_v11  ;;  %1667 = vmatprep.subr.bf16.mxu1 %v2470_v12  ;;  %v2499_v31 = vld [vmem:[%s3742_s1 + $0x470] ss:$8 sps:$4 sm:$0xff]   ;;  %v2502_v33 = vld [vmem:[%s3742_s1 + $0x484] ss:$8 sps:$4 sm:$0xff]   ;;  %v2505_v35 = vld [vmem:[%s3742_s1 + $0x480] ss:$8 sps:$4 sm:$0xff]  }
   0xd   :  { %1839 = vmatprep.subr.bf16.mxu0 %v2472_v13  ;;  %v2506_v36 = vld [vmem:[%s3742_s1 + $0x94] ss:$8 sps:$4 sm:$0xff]   ;;  %v2510_v38 = vld [vmem:[%s3742_s1 + $0x90] ss:$8 sps:$4 sm:$0xff]   ;;  %v2512_v40 = vld [vmem:[%s3742_s1 + $0xa4] ss:$8 sps:$4 sm:$0xff]  }
   0xe   :  { %v2508_v37 = vld [vmem:[%s3742_s1 + $0x494] ss:$8 sps:$4 sm:$0xff]   ;;  %v2511_v39 = vld [vmem:[%s3742_s1 + $0x490] ss:$8 sps:$4 sm:$0xff]   ;;  %v2514_v41 = vld [vmem:[%s3742_s1 + $0x4a4] ss:$8 sps:$4 sm:$0xff]  }
   0xf   :  { %1668 = vmatpush1.bf16.msra.mxu1 %v2474_v14  ;;  %v2516_v42 = vld [vmem:[%s3742_s1 + $0xa0] ss:$8 sps:$4 sm:$0xff]   ;;  %v2518_v44 = vld [vmem:[%s3742_s1 + $0xb4] ss:$8 sps:$4 sm:$0xff]   ;;  %v2522_v46 = vld [vmem:[%s3742_s1 + $0xb0] ss:$8 sps:$4 sm:$0xff]  }
  0x10   :  { %1840 = vmatpush1.bf16.msra.mxu0 %v2475_v15  ;;  %1669 = vmatprep.subr.bf16.mxu1 %v2476_v16  ;;  %v2517_v43 = vld [vmem:[%s3742_s1 + $0x4a0] ss:$8 sps:$4 sm:$0xff]   ;;  %v2520_v45 = vld [vmem:[%s3742_s1 + $0x4b4] ss:$8 sps:$4 sm:$0xff]   ;;  %v2523_v47 = vld [vmem:[%s3742_s1 + $0x4b0] ss:$8 sps:$4 sm:$0xff]  }
  0x11   :  { %1841 = vmatprep.subr.bf16.mxu0 %v2478_v17  ;;  %v29_v48 = vld [vmem:[%s3743_s0] sm:$0xff]  ;;  %v2530_v58 = vld [vmem:[%s3742_s1 + $0xd4] ss:$8 sps:$4 sm:$0xff]   ;;  %v2534_v60 = vld [vmem:[%s3742_s1 + $0xd0] ss:$8 sps:$4 sm:$0xff]  }
  0x12   :  { %v37_v49 = vld [vmem:[%s3743_s0 + $0x40] sm:$0xff]  ;;  %v2532_v59 = vld [vmem:[%s3742_s1 + $0x4d4] ss:$8 sps:$4 sm:$0xff]   ;;  %v2535_v61 = vld [vmem:[%s3742_s1 + $0x4d0] ss:$8 sps:$4 sm:$0xff]  }
  0x13   :  { %1670 = vmatpush1.bf16.msra.mxu1 %v2480_v18  ;;  %v2524_v50 = vld [vmem:[%s3742_s1 + $0xc4] ss:$8 sps:$4 sm:$0xff]   ;;  %v2150_v52 = vcombine.high %v29_v48, %v37_v49  ;;  %v2528_v56 = vld [vmem:[%s3742_s1 + $0xc0] ss:$8 sps:$4 sm:$0xff]   ;;  %v2542_v2 = vld [vmem:[%s3742_s1 + $0xf4] ss:$8 sps:$4 sm:$0xff]   ;;  %v2149_v8 = vcombine.low %v29_v48, %v37_v49 }
  0x14   :  { %1842 = vmatpush1.bf16.msra.mxu0 %v2481_v19  ;;  %1671 = vmatprep.subr.bf16.mxu1 %v2482_v20  ;;  %v2526_v51 = vld [vmem:[%s3742_s1 + $0x4c4] ss:$8 sps:$4 sm:$0xff]   ;;  %v2529_v57 = vld [vmem:[%s3742_s1 + $0x4c0] ss:$8 sps:$4 sm:$0xff]   ;;  %v2544_v3 = vld [vmem:[%s3742_s1 + $0x4f4] ss:$8 sps:$4 sm:$0xff]  }
  0x15   :  { %1843 = vmatprep.subr.bf16.mxu0 %v2484_v21  ;;  %v33_v53 = vld [vmem:[%s3743_s0 + $0x20] sm:$0xff]  ;;  %1693 = vmatprep.mubr.bf16.mxu1 %v2150_v52  ;;  %v2546_v4 = vld [vmem:[%s3742_s1 + $0xf0] ss:$8 sps:$4 sm:$0xff]   ;;  %v2556_v12 = vld [vmem:[%s3742_s1 + $0x114] ss:$8 sps:$4 sm:$0xff]  }
  0x16   :  { %v41_v54 = vld [vmem:[%s3743_s0 + $0x60] sm:$0xff]  ;;  %v2547_v5 = vld [vmem:[%s3742_s1 + $0x4f0] ss:$8 sps:$4 sm:$0xff]   ;;  %v2559_v13 = vld [vmem:[%s3742_s1 + $0x514] ss:$8 sps:$4 sm:$0xff]  }
  0x17   :  { %1672 = vmatpush1.bf16.msra.mxu1 %v2486_v22  ;;  %v2158_v55 = vcombine.high %v33_v53, %v41_v54  ;;  %v2536_v62 = vld [vmem:[%s3742_s1 + $0xe4] ss:$8 sps:$4 sm:$0xff]   ;;  %v2540_v0 = vld [vmem:[%s3742_s1 + $0xe0] ss:$8 sps:$4 sm:$0xff]   ;;  %v2157_v10 = vcombine.low %v33_v53, %v41_v54  ;;  %v2554_v14 = vld [vmem:[%s3742_s1 + $0x110] ss:$8 sps:$4 sm:$0xff]  }
  0x18   :  { %1844 = vmatpush1.bf16.msra.mxu0 %v2487_v23  ;;  %1673 = vmatprep.subr.bf16.mxu1 %v2488_v24  ;;  %v2538_v63 = vld [vmem:[%s3742_s1 + $0x4e4] ss:$8 sps:$4 sm:$0xff]   ;;  %v2541_v1 = vld [vmem:[%s3742_s1 + $0x4e0] ss:$8 sps:$4 sm:$0xff]   ;;  %v2557_v15 = vld [vmem:[%s3742_s1 + $0x510] ss:$8 sps:$4 sm:$0xff]  }
  0x19   :  { %1845 = vmatprep.subr.bf16.mxu0 %v2490_v25  ;;  %1865 = vmatprep.mubr.bf16.mxu0 %v2158_v55  ;;  %v2550_v6 = vld [vmem:[%s3742_s1 + $0x104] ss:$8 sps:$4 sm:$0xff]   ;;  %v2548_v9 = vld [vmem:[%s3742_s1 + $0x100] ss:$8 sps:$4 sm:$0xff]   ;;  %v2568_v20 = vld [vmem:[%s3742_s1 + $0x134] ss:$8 sps:$4 sm:$0xff]  }
  0x1a   :  { %v2553_v7 = vld [vmem:[%s3742_s1 + $0x504] ss:$8 sps:$4 sm:$0xff]   ;;  %v2551_v11 = vld [vmem:[%s3742_s1 + $0x500] ss:$8 sps:$4 sm:$0xff]   ;;  %v2571_v21 = vld [vmem:[%s3742_s1 + $0x534] ss:$8 sps:$4 sm:$0xff]  }
  0x1b   :  { %1674 = vmatpush1.bf16.msra.mxu1 %v2492_v26  ;;  %v2562_v16 = vld [vmem:[%s3742_s1 + $0x124] ss:$8 sps:$4 sm:$0xff]   ;;  %v2560_v18 = vld [vmem:[%s3742_s1 + $0x120] ss:$8 sps:$4 sm:$0xff]   ;;  %v2566_v22 = vld [vmem:[%s3742_s1 + $0x130] ss:$8 sps:$4 sm:$0xff]  }
  0x1c   :  { %1846 = vmatpush1.bf16.msra.mxu0 %v2493_v27  ;;  %1675 = vmatprep.subr.bf16.mxu1 %v2494_v28  ;;  %v2565_v17 = vld [vmem:[%s3742_s1 + $0x524] ss:$8 sps:$4 sm:$0xff]   ;;  %v2563_v19 = vld [vmem:[%s3742_s1 + $0x520] ss:$8 sps:$4 sm:$0xff]   ;;  %v2569_v23 = vld [vmem:[%s3742_s1 + $0x530] ss:$8 sps:$4 sm:$0xff]  }
  0x1d   :  { %1847 = vmatprep.subr.bf16.mxu0 %v2496_v29  ;;  %v2574_v24 = vld [vmem:[%s3742_s1 + $0x144] ss:$8 sps:$4 sm:$0xff]   ;;  %v2572_v26 = vld [vmem:[%s3742_s1 + $0x140] ss:$8 sps:$4 sm:$0xff]   ;;  %v2580_v28 = vld [vmem:[%s3742_s1 + $0x154] ss:$8 sps:$4 sm:$0xff]  }
  0x1e   :  { %v2577_v25 = vld [vmem:[%s3742_s1 + $0x544] ss:$8 sps:$4 sm:$0xff]   ;;  %v2575_v27 = vld [vmem:[%s3742_s1 + $0x540] ss:$8 sps:$4 sm:$0xff]   ;;  %v2583_v29 = vld [vmem:[%s3742_s1 + $0x554] ss:$8 sps:$4 sm:$0xff]  }
  0x1f   :  { %1676 = vmatpush1.bf16.msra.mxu1 %v2498_v30  ;;  %v2578_v30 = vld [vmem:[%s3742_s1 + $0x150] ss:$8 sps:$4 sm:$0xff]   ;;  %v2596_v48 = vld [vmem:[%s3742_s1 + $0x180] ss:$8 sps:$4 sm:$0xff]   ;;  %v2610_v54 = vld [vmem:[%s3742_s1 + $0x1a4] ss:$8 sps:$4 sm:$0xff]  }
  0x20   :  { %1848 = vmatpush1.bf16.msra.mxu0 %v2499_v31  ;;  %1677 = vmatprep.subr.bf16.mxu1 %v2500_v32  ;;  %v2581_v31 = vld [vmem:[%s3742_s1 + $0x550] ss:$8 sps:$4 sm:$0xff]   ;;  %v2586_v32 = vld [vmem:[%s3742_s1 + $0x164] ss:$8 sps:$4 sm:$0xff]   ;;  %v2599_v49 = vld [vmem:[%s3742_s1 + $0x580] ss:$8 sps:$4 sm:$0xff]  }
  0x21   :  { %1849 = vmatprep.subr.bf16.mxu0 %v2502_v33  ;;  %v2589_v33 = vld [vmem:[%s3742_s1 + $0x564] ss:$8 sps:$4 sm:$0xff]   ;;  %v2602_v52 = vld [vmem:[%s3742_s1 + $0x190] ss:$8 sps:$4 sm:$0xff]  }
  0x22   :  { %v2605_v53 = vld [vmem:[%s3742_s1 + $0x590] ss:$8 sps:$4 sm:$0xff]   ;;  %v2613_v55 = vld [vmem:[%s3742_s1 + $0x5a4] ss:$8 sps:$4 sm:$0xff]  }
  0x23   :  { %1678 = vmatpush1.bf16.msra.mxu1 %v2504_v34  ;;  %v2584_v34 = vld [vmem:[%s3742_s1 + $0x160] ss:$8 sps:$4 sm:$0xff]  }
  0x24   :  { %1850 = vmatpush1.bf16.msra.mxu0 %v2505_v35  ;;  %1679 = vmatprep.subr.bf16.mxu1 %v2506_v36  ;;  %v2587_v35 = vld [vmem:[%s3742_s1 + $0x560] ss:$8 sps:$4 sm:$0xff]  }
  0x25   :  { %1851 = vmatprep.subr.bf16.mxu0 %v2508_v37  ;;  %v3157_v36 = vld [vmem:[%s3743_s0 + $0x8] sm:$0xff] }
  0x26   :  { %v3162_v37 = vld [vmem:[%s3743_s0 + $0x48] sm:$0xff] }
  0x27   :  { %1680 = vmatpush1.bf16.msra.mxu1 %v2510_v38  ;;  %v2592_v38 = vld [vmem:[%s3742_s1 + $0x174] ss:$8 sps:$4 sm:$0xff]  }
  0x28   :  { %1852 = vmatpush1.bf16.msra.mxu0 %v2511_v39  ;;  %1681 = vmatprep.subr.bf16.mxu1 %v2512_v40  ;;  %v2595_v39 = vld [vmem:[%s3742_s1 + $0x574] ss:$8 sps:$4 sm:$0xff]   ;;  %v2152_v40 = vcombine.high %v3157_v36, %v3162_v37 }
  0x29   :  { %1853 = vmatprep.subr.bf16.mxu0 %v2514_v41  ;;  %v3175_v41 = vld [vmem:[%s3743_s0 + $0x28] sm:$0xff] }
  0x2b   :  { %1682 = vmatpush1.bf16.msra.mxu1 %v2516_v42  ;;  %v3180_v42 = vld [vmem:[%s3743_s0 + $0x68] sm:$0xff] }
  0x2c   :  { %1854 = vmatpush1.bf16.msra.mxu0 %v2517_v43  ;;  %1683 = vmatprep.subr.bf16.mxu1 %v2518_v44  ;;  %v2160_v43 = vcombine.high %v3175_v41, %v3180_v42  ;;  %v2590_v44 = vld [vmem:[%s3742_s1 + $0x170] ss:$8 sps:$4 sm:$0xff]  }
  0x2d   :  { %1855 = vmatprep.subr.bf16.mxu0 %v2520_v45  ;;  %v2593_v45 = vld [vmem:[%s3742_s1 + $0x570] ss:$8 sps:$4 sm:$0xff]  }
  0x2f   :  { %1684 = vmatpush1.bf16.msra.mxu1 %v2522_v46  ;;  %v2598_v46 = vld [vmem:[%s3742_s1 + $0x184] ss:$8 sps:$4 sm:$0xff]  }
  0x30   :  { %1856 = vmatpush1.bf16.msra.mxu0 %v2523_v47  ;;  %1685 = vmatprep.subr.bf16.mxu1 %v2524_v50  ;;  %v2601_v47 = vld [vmem:[%s3742_s1 + $0x584] ss:$8 sps:$4 sm:$0xff]   ;;  %v2604_v50 = vld [vmem:[%s3742_s1 + $0x194] ss:$8 sps:$4 sm:$0xff]  }
  0x31   :  { %1857 = vmatprep.subr.bf16.mxu0 %v2526_v51  ;;  %v2607_v51 = vld [vmem:[%s3742_s1 + $0x594] ss:$8 sps:$4 sm:$0xff]  }
  0x33   :  { %1686 = vmatpush1.bf16.msra.mxu1 %v2528_v56  ;;  %v2608_v56 = vld [vmem:[%s3742_s1 + $0x1a0] ss:$8 sps:$4 sm:$0xff]  }
  0x34   :  { %1858 = vmatpush1.bf16.msra.mxu0 %v2529_v57  ;;  %1687 = vmatprep.subr.bf16.mxu1 %v2530_v58  ;;  %v2611_v57 = vld [vmem:[%s3742_s1 + $0x5a0] ss:$8 sps:$4 sm:$0xff]   ;;  %v2616_v58 = vld [vmem:[%s3742_s1 + $0x1b4] ss:$8 sps:$4 sm:$0xff]  }
  0x35   :  { %1859 = vmatprep.subr.bf16.mxu0 %v2532_v59  ;;  %v2619_v59 = vld [vmem:[%s3742_s1 + $0x5b4] ss:$8 sps:$4 sm:$0xff]  }
  0x37   :  { %1688 = vmatpush1.bf16.msra.mxu1 %v2534_v60  ;;  %v2614_v60 = vld [vmem:[%s3742_s1 + $0x1b0] ss:$8 sps:$4 sm:$0xff]  }
  0x38   :  { %1860 = vmatpush1.bf16.msra.mxu0 %v2535_v61  ;;  %1689 = vmatprep.subr.bf16.mxu1 %v2536_v62  ;;  %v2617_v61 = vld [vmem:[%s3742_s1 + $0x5b0] ss:$8 sps:$4 sm:$0xff]   ;;  %v2622_v62 = vld [vmem:[%s3742_s1 + $0x1c4] ss:$8 sps:$4 sm:$0xff]  }
  0x39   :  { %1861 = vmatprep.subr.bf16.mxu0 %v2538_v63  ;;  %v2625_v63 = vld [vmem:[%s3742_s1 + $0x5c4] ss:$8 sps:$4 sm:$0xff]  }
  0x3b   :  { %1690 = vmatpush1.bf16.msra.mxu1 %v2540_v0  ;;  %v2620_v0 = vld [vmem:[%s3742_s1 + $0x1c0] ss:$8 sps:$4 sm:$0xff]  }
  0x3c   :  { %1862 = vmatpush1.bf16.msra.mxu0 %v2541_v1  ;;  %1691 = vmatprep.subr.bf16.mxu1 %v2542_v2  ;;  %v2623_v1 = vld [vmem:[%s3742_s1 + $0x5c0] ss:$8 sps:$4 sm:$0xff]   ;;  %v2628_v2 = vld [vmem:[%s3742_s1 + $0x1d4] ss:$8 sps:$4 sm:$0xff]  }
  0x3d   :  { %1863 = vmatprep.subr.bf16.mxu0 %v2544_v3  ;;  %v2631_v3 = vld [vmem:[%s3742_s1 + $0x5d4] ss:$8 sps:$4 sm:$0xff]  }
  0x3f   :  { %1692 = vmatpush1.bf16.msra.mxu1 %v2546_v4  ;;  %v2626_v4 = vld [vmem:[%s3742_s1 + $0x1d0] ss:$8 sps:$4 sm:$0xff]  }
  0x40   :  { %1864 = vmatpush1.bf16.msra.mxu0 %v2547_v5  ;;  %1704 = vmatprep.subr.bf16.mxu1 %v2550_v6  ;;  %v2629_v5 = vld [vmem:[%s3742_s1 + $0x5d0] ss:$8 sps:$4 sm:$0xff]   ;;  %v2634_v6 = vld [vmem:[%s3742_s1 + $0x1e4] ss:$8 sps:$4 sm:$0xff]  }
  0x41   :  { %1876 = vmatprep.subr.bf16.mxu0 %v2553_v7  ;;  %v2637_v7 = vld [vmem:[%s3742_s1 + $0x5e4] ss:$8 sps:$4 sm:$0xff]  }
  0x42   :  { %1694 = vmatmul.mubr.bf16.vlgmr.msra.gmra.mrb[0].mxu1 %v2149_v8  ;;  %v2632_v8 = vld [vmem:[%s3742_s1 + $0x1e0] ss:$8 sps:$4 sm:$0xff]  }
  0x43   :  { %1866 = vmatmul.mubr.bf16.vlgmr.msra.gmra.mrb[0].mxu0 %v2157_v10  ;;  %1705 = vmatpush1.bf16.msra.mxu1 %v2548_v9  ;;  %v2635_v9 = vld [vmem:[%s3742_s1 + $0x5e0] ss:$8 sps:$4 sm:$0xff]   ;;  %v2640_v10 = vld [vmem:[%s3742_s1 + $0x1f4] ss:$8 sps:$4 sm:$0xff]  }
  0x44   :  { %1877 = vmatpush1.bf16.msra.mxu0 %v2551_v11  ;;  %1706 = vmatprep.subr.bf16.mxu1 %v2556_v12  ;;  %v2643_v11 = vld [vmem:[%s3742_s1 + $0x5f4] ss:$8 sps:$4 sm:$0xff]   ;;  %v2638_v12 = vld [vmem:[%s3742_s1 + $0x1f0] ss:$8 sps:$4 sm:$0xff]  }
  0x45   :  { %1878 = vmatprep.subr.bf16.mxu0 %v2559_v13  ;;  %1736 = vmatprep.mubr.bf16.mxu1 %v2152_v40  ;;  %v2641_v13 = vld [vmem:[%s3742_s1 + $0x5f0] ss:$8 sps:$4 sm:$0xff]   ;;  %v2668_v40 = vld [vmem:[%s3742_s1 + $0x240] ss:$8 sps:$4 sm:$0xff]  }
  0x46   :  { %1908 = vmatprep.mubr.bf16.mxu0 %v2160_v43  ;;  %v2679_v43 = vld [vmem:[%s3742_s1 + $0x654] ss:$8 sps:$4 sm:$0xff]  }
  0x47   :  { %1707 = vmatpush1.bf16.msra.mxu1 %v2554_v14  ;;  %v2646_v14 = vld [vmem:[%s3742_s1 + $0x204] ss:$8 sps:$4 sm:$0xff]  }
  0x48   :  { %1879 = vmatpush1.bf16.msra.mxu0 %v2557_v15  ;;  %1708 = vmatprep.subr.bf16.mxu1 %v2562_v16  ;;  %v2649_v15 = vld [vmem:[%s3742_s1 + $0x604] ss:$8 sps:$4 sm:$0xff]   ;;  %v2151_v16 = vcombine.low %v3157_v36, %v3162_v37  ;;  %v2662_v36 = vld [vmem:[%s3742_s1 + $0x230] ss:$8 sps:$4 sm:$0xff]  }
  0x49   :  { %1880 = vmatprep.subr.bf16.mxu0 %v2565_v17  ;;  %v2644_v17 = vld [vmem:[%s3742_s1 + $0x200] ss:$8 sps:$4 sm:$0xff]   ;;  %v2665_v37 = vld [vmem:[%s3742_s1 + $0x630] ss:$8 sps:$4 sm:$0xff]  }
  0x4b   :  { %1709 = vmatpush1.bf16.msra.mxu1 %v2560_v18  ;;  %v2159_v18 = vcombine.low %v3175_v41, %v3180_v42  ;;  %v2671_v41 = vld [vmem:[%s3742_s1 + $0x640] ss:$8 sps:$4 sm:$0xff]   ;;  %v2676_v42 = vld [vmem:[%s3742_s1 + $0x254] ss:$8 sps:$4 sm:$0xff]  }
  0x4c   :  { %1881 = vmatpush1.bf16.msra.mxu0 %v2563_v19  ;;  %1710 = vmatprep.subr.bf16.mxu1 %v2568_v20  ;;  %v2647_v19 = vld [vmem:[%s3742_s1 + $0x600] ss:$8 sps:$4 sm:$0xff]   ;;  %v2652_v20 = vld [vmem:[%s3742_s1 + $0x214] ss:$8 sps:$4 sm:$0xff]  }
  0x4d   :  { %1882 = vmatprep.subr.bf16.mxu0 %v2571_v21  ;;  %v2655_v21 = vld [vmem:[%s3742_s1 + $0x614] ss:$8 sps:$4 sm:$0xff]  }
  0x4f   :  { %1711 = vmatpush1.bf16.msra.mxu1 %v2566_v22  ;;  %v2650_v22 = vld [vmem:[%s3742_s1 + $0x210] ss:$8 sps:$4 sm:$0xff]  }
  0x50   :  { %1883 = vmatpush1.bf16.msra.mxu0 %v2569_v23  ;;  %1712 = vmatprep.subr.bf16.mxu1 %v2574_v24  ;;  %v2653_v23 = vld [vmem:[%s3742_s1 + $0x610] ss:$8 sps:$4 sm:$0xff]  }
  0x51   :  { %1884 = vmatprep.subr.bf16.mxu0 %v2577_v25  ;;  %v3317_v24 = vld [vmem:[%s3743_s0 + $0x10] sm:$0xff] }
  0x52   :  { %v3322_v25 = vld [vmem:[%s3743_s0 + $0x50] sm:$0xff] }
  0x53   :  { %1713 = vmatpush1.bf16.msra.mxu1 %v2572_v26  ;;  %v2658_v26 = vld [vmem:[%s3742_s1 + $0x224] ss:$8 sps:$4 sm:$0xff]  }
  0x54   :  { %1885 = vmatpush1.bf16.msra.mxu0 %v2575_v27  ;;  %1714 = vmatprep.subr.bf16.mxu1 %v2580_v28  ;;  %v2661_v27 = vld [vmem:[%s3742_s1 + $0x624] ss:$8 sps:$4 sm:$0xff]   ;;  %v2154_v28 = vcombine.high %v3317_v24, %v3322_v25 }
  0x55   :  { %1886 = vmatprep.subr.bf16.mxu0 %v2583_v29  ;;  %v3335_v29 = vld [vmem:[%s3743_s0 + $0x30] sm:$0xff] }
  0x57   :  { %1715 = vmatpush1.bf16.msra.mxu1 %v2578_v30  ;;  %v3340_v30 = vld [vmem:[%s3743_s0 + $0x70] sm:$0xff] }
  0x58   :  { %1887 = vmatpush1.bf16.msra.mxu0 %v2581_v31  ;;  %1716 = vmatprep.subr.bf16.mxu1 %v2586_v32  ;;  %v2162_v31 = vcombine.high %v3335_v29, %v3340_v30  ;;  %v2656_v32 = vld [vmem:[%s3742_s1 + $0x220] ss:$8 sps:$4 sm:$0xff]  }
  0x59   :  { %1888 = vmatprep.subr.bf16.mxu0 %v2589_v33  ;;  %v2659_v33 = vld [vmem:[%s3742_s1 + $0x620] ss:$8 sps:$4 sm:$0xff]  }
  0x5b   :  { %1717 = vmatpush1.bf16.msra.mxu1 %v2584_v34  ;;  %v2664_v34 = vld [vmem:[%s3742_s1 + $0x234] ss:$8 sps:$4 sm:$0xff]  }
  0x5c   :  { %1889 = vmatpush1.bf16.msra.mxu0 %v2587_v35  ;;  %1718 = vmatprep.subr.bf16.mxu1 %v2592_v38  ;;  %v2667_v35 = vld [vmem:[%s3742_s1 + $0x634] ss:$8 sps:$4 sm:$0xff]   ;;  %v2670_v38 = vld [vmem:[%s3742_s1 + $0x244] ss:$8 sps:$4 sm:$0xff]  }
  0x5d   :  { %1890 = vmatprep.subr.bf16.mxu0 %v2595_v39  ;;  %v2673_v39 = vld [vmem:[%s3742_s1 + $0x644] ss:$8 sps:$4 sm:$0xff]  }
  0x5f   :  { %1719 = vmatpush1.bf16.msra.mxu1 %v2590_v44  ;;  %v2674_v44 = vld [vmem:[%s3742_s1 + $0x250] ss:$8 sps:$4 sm:$0xff]  }
  0x60   :  { %1891 = vmatpush1.bf16.msra.mxu0 %v2593_v45  ;;  %1720 = vmatprep.subr.bf16.mxu1 %v2598_v46  ;;  %v2677_v45 = vld [vmem:[%s3742_s1 + $0x650] ss:$8 sps:$4 sm:$0xff]   ;;  %v2682_v46 = vld [vmem:[%s3742_s1 + $0x264] ss:$8 sps:$4 sm:$0xff]  }
  0x61   :  { %1892 = vmatprep.subr.bf16.mxu0 %v2601_v47  ;;  %v2685_v47 = vld [vmem:[%s3742_s1 + $0x664] ss:$8 sps:$4 sm:$0xff]  }
  0x63   :  { %1721 = vmatpush1.bf16.msra.mxu1 %v2596_v48  ;;  %v2680_v48 = vld [vmem:[%s3742_s1 + $0x260] ss:$8 sps:$4 sm:$0xff]  }
  0x64   :  { %1893 = vmatpush1.bf16.msra.mxu0 %v2599_v49  ;;  %1722 = vmatprep.subr.bf16.mxu1 %v2604_v50  ;;  %v2683_v49 = vld [vmem:[%s3742_s1 + $0x660] ss:$8 sps:$4 sm:$0xff]   ;;  %v2688_v50 = vld [vmem:[%s3742_s1 + $0x274] ss:$8 sps:$4 sm:$0xff]  }
  0x65   :  { %1894 = vmatprep.subr.bf16.mxu0 %v2607_v51  ;;  %v2691_v51 = vld [vmem:[%s3742_s1 + $0x674] ss:$8 sps:$4 sm:$0xff]  }
  0x67   :  { %1723 = vmatpush1.bf16.msra.mxu1 %v2602_v52  ;;  %v2686_v52 = vld [vmem:[%s3742_s1 + $0x270] ss:$8 sps:$4 sm:$0xff]  }
  0x68   :  { %1895 = vmatpush1.bf16.msra.mxu0 %v2605_v53  ;;  %1724 = vmatprep.subr.bf16.mxu1 %v2610_v54  ;;  %v2689_v53 = vld [vmem:[%s3742_s1 + $0x670] ss:$8 sps:$4 sm:$0xff]   ;;  %v2694_v54 = vld [vmem:[%s3742_s1 + $0x284] ss:$8 sps:$4 sm:$0xff]  }
  0x69   :  { %1896 = vmatprep.subr.bf16.mxu0 %v2613_v55  ;;  %v2697_v55 = vld [vmem:[%s3742_s1 + $0x684] ss:$8 sps:$4 sm:$0xff]  }
  0x6b   :  { %1725 = vmatpush1.bf16.msra.mxu1 %v2608_v56  ;;  %v2692_v56 = vld [vmem:[%s3742_s1 + $0x280] ss:$8 sps:$4 sm:$0xff]  }
  0x6c   :  { %1897 = vmatpush1.bf16.msra.mxu0 %v2611_v57  ;;  %1726 = vmatprep.subr.bf16.mxu1 %v2616_v58  ;;  %v2695_v57 = vld [vmem:[%s3742_s1 + $0x680] ss:$8 sps:$4 sm:$0xff]   ;;  %v2700_v58 = vld [vmem:[%s3742_s1 + $0x294] ss:$8 sps:$4 sm:$0xff]  }
  0x6d   :  { %1898 = vmatprep.subr.bf16.mxu0 %v2619_v59  ;;  %v2703_v59 = vld [vmem:[%s3742_s1 + $0x694] ss:$8 sps:$4 sm:$0xff]  }
  0x6f   :  { %1727 = vmatpush1.bf16.msra.mxu1 %v2614_v60  ;;  %v2698_v60 = vld [vmem:[%s3742_s1 + $0x290] ss:$8 sps:$4 sm:$0xff]  }
  0x70   :  { %1899 = vmatpush1.bf16.msra.mxu0 %v2617_v61  ;;  %1728 = vmatprep.subr.bf16.mxu1 %v2622_v62  ;;  %v2701_v61 = vld [vmem:[%s3742_s1 + $0x690] ss:$8 sps:$4 sm:$0xff]   ;;  %v2706_v62 = vld [vmem:[%s3742_s1 + $0x2a4] ss:$8 sps:$4 sm:$0xff]  }
  0x71   :  { %1900 = vmatprep.subr.bf16.mxu0 %v2625_v63  ;;  %v2709_v63 = vld [vmem:[%s3742_s1 + $0x6a4] ss:$8 sps:$4 sm:$0xff]  }
  0x73   :  { %1729 = vmatpush1.bf16.msra.mxu1 %v2620_v0  ;;  %v2704_v0 = vld [vmem:[%s3742_s1 + $0x2a0] ss:$8 sps:$4 sm:$0xff]  }
  0x74   :  { %1901 = vmatpush1.bf16.msra.mxu0 %v2623_v1  ;;  %1730 = vmatprep.subr.bf16.mxu1 %v2628_v2  ;;  %v2707_v1 = vld [vmem:[%s3742_s1 + $0x6a0] ss:$8 sps:$4 sm:$0xff]   ;;  %v2712_v2 = vld [vmem:[%s3742_s1 + $0x2b4] ss:$8 sps:$4 sm:$0xff]  }
  0x75   :  { %1902 = vmatprep.subr.bf16.mxu0 %v2631_v3  ;;  %v2715_v3 = vld [vmem:[%s3742_s1 + $0x6b4] ss:$8 sps:$4 sm:$0xff]  }
  0x77   :  { %1731 = vmatpush1.bf16.msra.mxu1 %v2626_v4  ;;  %v2710_v4 = vld [vmem:[%s3742_s1 + $0x2b0] ss:$8 sps:$4 sm:$0xff]  }
  0x78   :  { %1903 = vmatpush1.bf16.msra.mxu0 %v2629_v5  ;;  %1732 = vmatprep.subr.bf16.mxu1 %v2634_v6  ;;  %v2713_v5 = vld [vmem:[%s3742_s1 + $0x6b0] ss:$8 sps:$4 sm:$0xff]   ;;  %v2718_v6 = vld [vmem:[%s3742_s1 + $0x2c4] ss:$8 sps:$4 sm:$0xff]  }
  0x79   :  { %1904 = vmatprep.subr.bf16.mxu0 %v2637_v7  ;;  %v2721_v7 = vld [vmem:[%s3742_s1 + $0x6c4] ss:$8 sps:$4 sm:$0xff]  }
  0x7b   :  { %1733 = vmatpush1.bf16.msra.mxu1 %v2632_v8  ;;  %v2716_v8 = vld [vmem:[%s3742_s1 + $0x2c0] ss:$8 sps:$4 sm:$0xff]  }
  0x7c   :  { %1905 = vmatpush1.bf16.msra.mxu0 %v2635_v9  ;;  %1734 = vmatprep.subr.bf16.mxu1 %v2640_v10  ;;  %v2719_v9 = vld [vmem:[%s3742_s1 + $0x6c0] ss:$8 sps:$4 sm:$0xff]   ;;  %v2724_v10 = vld [vmem:[%s3742_s1 + $0x2d4] ss:$8 sps:$4 sm:$0xff]  }
  0x7d   :  { %1906 = vmatprep.subr.bf16.mxu0 %v2643_v11  ;;  %v2727_v11 = vld [vmem:[%s3742_s1 + $0x6d4] ss:$8 sps:$4 sm:$0xff]  }
  0x7f   :  { %1735 = vmatpush1.bf16.msra.mxu1 %v2638_v12  ;;  %v2722_v12 = vld [vmem:[%s3742_s1 + $0x2d0] ss:$8 sps:$4 sm:$0xff]  }
  0x80   :  { %1907 = vmatpush1.bf16.msra.mxu0 %v2641_v13  ;;  %1747 = vmatprep.subr.bf16.mxu1 %v2646_v14  ;;  %v2725_v13 = vld [vmem:[%s3742_s1 + $0x6d0] ss:$8 sps:$4 sm:$0xff]   ;;  %v2730_v14 = vld [vmem:[%s3742_s1 + $0x2e4] ss:$8 sps:$4 sm:$0xff]  }
  0x81   :  { %1919 = vmatprep.subr.bf16.mxu0 %v2649_v15  ;;  %v2733_v15 = vld [vmem:[%s3742_s1 + $0x6e4] ss:$8 sps:$4 sm:$0xff]  }
  0x82   :  { %1737 = vmatmul.mubr.bf16.vlgmr.msra.gmra.mrb[0].mxu1 %v2151_v16  ;;  %v2728_v16 = vld [vmem:[%s3742_s1 + $0x2e0] ss:$8 sps:$4 sm:$0xff]  }
  0x83   :  { %1909 = vmatmul.mubr.bf16.vlgmr.msra.gmra.mrb[0].mxu0 %v2159_v18  ;;  %1748 = vmatpush1.bf16.msra.mxu1 %v2644_v17  ;;  %v2731_v17 = vld [vmem:[%s3742_s1 + $0x6e0] ss:$8 sps:$4 sm:$0xff]   ;;  %v2736_v18 = vld [vmem:[%s3742_s1 + $0x2f4] ss:$8 sps:$4 sm:$0xff]  }
  0x84   :  { %1920 = vmatpush1.bf16.msra.mxu0 %v2647_v19  ;;  %1749 = vmatprep.subr.bf16.mxu1 %v2652_v20  ;;  %v2739_v19 = vld [vmem:[%s3742_s1 + $0x6f4] ss:$8 sps:$4 sm:$0xff]   ;;  %v2734_v20 = vld [vmem:[%s3742_s1 + $0x2f0] ss:$8 sps:$4 sm:$0xff]  }
  0x85   :  { %1921 = vmatprep.subr.bf16.mxu0 %v2655_v21  ;;  %1779 = vmatprep.mubr.bf16.mxu1 %v2154_v28  ;;  %v2737_v21 = vld [vmem:[%s3742_s1 + $0x6f0] ss:$8 sps:$4 sm:$0xff]   ;;  %v2161_v28 = vcombine.low %v3335_v29, %v3340_v30  ;;  %v2748_v29 = vld [vmem:[%s3742_s1 + $0x314] ss:$8 sps:$4 sm:$0xff]  }
  0x86   :  { %1951 = vmatprep.mubr.bf16.mxu0 %v2162_v31  ;;  %v3524_v31 = vld [vmem:[%s3743_s0 + $0x58] sm:$0xff] }
  0x87   :  { %1750 = vmatpush1.bf16.msra.mxu1 %v2650_v22  ;;  %v2742_v22 = vld [vmem:[%s3742_s1 + $0x304] ss:$8 sps:$4 sm:$0xff]   ;;  %v2751_v30 = vld [vmem:[%s3742_s1 + $0x714] ss:$8 sps:$4 sm:$0xff]  }
  0x88   :  { %1922 = vmatpush1.bf16.msra.mxu0 %v2653_v23  ;;  %1751 = vmatprep.subr.bf16.mxu1 %v2658_v26  ;;  %v2745_v23 = vld [vmem:[%s3742_s1 + $0x704] ss:$8 sps:$4 sm:$0xff]   ;;  %v3515_v26 = vld [vmem:[%s3743_s0 + $0x18] sm:$0xff] }
  0x89   :  { %1923 = vmatprep.subr.bf16.mxu0 %v2661_v27  ;;  %v2153_v27 = vcombine.low %v3317_v24, %v3322_v25  ;;  %v2740_v24 = vld [vmem:[%s3742_s1 + $0x300] ss:$8 sps:$4 sm:$0xff]  }
  0x8a   :  { %v2743_v25 = vld [vmem:[%s3742_s1 + $0x700] ss:$8 sps:$4 sm:$0xff]  }
  0x8b   :  { %1752 = vmatpush1.bf16.msra.mxu1 %v2656_v32  ;;  %v3529_v32 = vld [vmem:[%s3743_s0 + $0x38] sm:$0xff] }
  0x8c   :  { %1924 = vmatpush1.bf16.msra.mxu0 %v2659_v33  ;;  %1753 = vmatprep.subr.bf16.mxu1 %v2664_v34  ;;  %v3534_v33 = vld [vmem:[%s3743_s0 + $0x78] sm:$0xff]  ;;  %v2156_v34 = vcombine.high %v3515_v26, %v3524_v31 }
  0x8d   :  { %1925 = vmatprep.subr.bf16.mxu0 %v2667_v35  ;;  %v2164_v35 = vcombine.high %v3529_v32, %v3534_v33 }
  0x8f   :  { %1754 = vmatpush1.bf16.msra.mxu1 %v2662_v36  ;;  %v2746_v36 = vld [vmem:[%s3742_s1 + $0x310] ss:$8 sps:$4 sm:$0xff]  }
  0x90   :  { %1926 = vmatpush1.bf16.msra.mxu0 %v2665_v37  ;;  %1755 = vmatprep.subr.bf16.mxu1 %v2670_v38  ;;  %v2749_v37 = vld [vmem:[%s3742_s1 + $0x710] ss:$8 sps:$4 sm:$0xff]   ;;  %v2754_v38 = vld [vmem:[%s3742_s1 + $0x324] ss:$8 sps:$4 sm:$0xff]  }
  0x91   :  { %1927 = vmatprep.subr.bf16.mxu0 %v2673_v39  ;;  %v2757_v39 = vld [vmem:[%s3742_s1 + $0x724] ss:$8 sps:$4 sm:$0xff]  }
  0x93   :  { %1756 = vmatpush1.bf16.msra.mxu1 %v2668_v40  ;;  %v2752_v40 = vld [vmem:[%s3742_s1 + $0x320] ss:$8 sps:$4 sm:$0xff]  }
  0x94   :  { %1928 = vmatpush1.bf16.msra.mxu0 %v2671_v41  ;;  %1757 = vmatprep.subr.bf16.mxu1 %v2676_v42  ;;  %v2755_v41 = vld [vmem:[%s3742_s1 + $0x720] ss:$8 sps:$4 sm:$0xff]   ;;  %v2760_v42 = vld [vmem:[%s3742_s1 + $0x334] ss:$8 sps:$4 sm:$0xff]  }
  0x95   :  { %1929 = vmatprep.subr.bf16.mxu0 %v2679_v43  ;;  %v2763_v43 = vld [vmem:[%s3742_s1 + $0x734] ss:$8 sps:$4 sm:$0xff]  }
  0x97   :  { %1758 = vmatpush1.bf16.msra.mxu1 %v2674_v44  ;;  %v2758_v44 = vld [vmem:[%s3742_s1 + $0x330] ss:$8 sps:$4 sm:$0xff]  }
  0x98   :  { %1930 = vmatpush1.bf16.msra.mxu0 %v2677_v45  ;;  %1759 = vmatprep.subr.bf16.mxu1 %v2682_v46  ;;  %v2761_v45 = vld [vmem:[%s3742_s1 + $0x730] ss:$8 sps:$4 sm:$0xff]   ;;  %v2766_v46 = vld [vmem:[%s3742_s1 + $0x344] ss:$8 sps:$4 sm:$0xff]  }
  0x99   :  { %1931 = vmatprep.subr.bf16.mxu0 %v2685_v47  ;;  %v2769_v47 = vld [vmem:[%s3742_s1 + $0x744] ss:$8 sps:$4 sm:$0xff]  }
  0x9b   :  { %1760 = vmatpush1.bf16.msra.mxu1 %v2680_v48  ;;  %v2764_v48 = vld [vmem:[%s3742_s1 + $0x340] ss:$8 sps:$4 sm:$0xff]  }
  0x9c   :  { %1932 = vmatpush1.bf16.msra.mxu0 %v2683_v49  ;;  %1761 = vmatprep.subr.bf16.mxu1 %v2688_v50  ;;  %v2767_v49 = vld [vmem:[%s3742_s1 + $0x740] ss:$8 sps:$4 sm:$0xff]   ;;  %v2772_v50 = vld [vmem:[%s3742_s1 + $0x354] ss:$8 sps:$4 sm:$0xff]  }
  0x9d   :  { %1933 = vmatprep.subr.bf16.mxu0 %v2691_v51  ;;  %v2775_v51 = vld [vmem:[%s3742_s1 + $0x754] ss:$8 sps:$4 sm:$0xff]  }
  0x9f   :  { %1762 = vmatpush1.bf16.msra.mxu1 %v2686_v52  ;;  %v2770_v52 = vld [vmem:[%s3742_s1 + $0x350] ss:$8 sps:$4 sm:$0xff]  }
  0xa0   :  { %1934 = vmatpush1.bf16.msra.mxu0 %v2689_v53  ;;  %1763 = vmatprep.subr.bf16.mxu1 %v2694_v54  ;;  %v2773_v53 = vld [vmem:[%s3742_s1 + $0x750] ss:$8 sps:$4 sm:$0xff]   ;;  %v2778_v54 = vld [vmem:[%s3742_s1 + $0x364] ss:$8 sps:$4 sm:$0xff]  }
  0xa1   :  { %1935 = vmatprep.subr.bf16.mxu0 %v2697_v55  ;;  %v2781_v55 = vld [vmem:[%s3742_s1 + $0x764] ss:$8 sps:$4 sm:$0xff]  }
  0xa3   :  { %1764 = vmatpush1.bf16.msra.mxu1 %v2692_v56  ;;  %v2776_v56 = vld [vmem:[%s3742_s1 + $0x360] ss:$8 sps:$4 sm:$0xff]  }
  0xa4   :  { %1936 = vmatpush1.bf16.msra.mxu0 %v2695_v57  ;;  %1765 = vmatprep.subr.bf16.mxu1 %v2700_v58  ;;  %v2779_v57 = vld [vmem:[%s3742_s1 + $0x760] ss:$8 sps:$4 sm:$0xff]   ;;  %v2784_v58 = vld [vmem:[%s3742_s1 + $0x374] ss:$8 sps:$4 sm:$0xff]  }
  0xa5   :  { %1937 = vmatprep.subr.bf16.mxu0 %v2703_v59  ;;  %v2787_v59 = vld [vmem:[%s3742_s1 + $0x774] ss:$8 sps:$4 sm:$0xff]  }
  0xa7   :  { %1766 = vmatpush1.bf16.msra.mxu1 %v2698_v60  ;;  %v2782_v60 = vld [vmem:[%s3742_s1 + $0x370] ss:$8 sps:$4 sm:$0xff]  }
  0xa8   :  { %1938 = vmatpush1.bf16.msra.mxu0 %v2701_v61  ;;  %1767 = vmatprep.subr.bf16.mxu1 %v2706_v62  ;;  %v2785_v61 = vld [vmem:[%s3742_s1 + $0x770] ss:$8 sps:$4 sm:$0xff]   ;;  %v2790_v62 = vld [vmem:[%s3742_s1 + $0x384] ss:$8 sps:$4 sm:$0xff]  }
  0xa9   :  { %1939 = vmatprep.subr.bf16.mxu0 %v2709_v63  ;;  %v2793_v63 = vld [vmem:[%s3742_s1 + $0x784] ss:$8 sps:$4 sm:$0xff]  }
  0xab   :  { %1768 = vmatpush1.bf16.msra.mxu1 %v2704_v0  ;;  %v2788_v0 = vld [vmem:[%s3742_s1 + $0x380] ss:$8 sps:$4 sm:$0xff]  }
  0xac   :  { %1940 = vmatpush1.bf16.msra.mxu0 %v2707_v1  ;;  %1769 = vmatprep.subr.bf16.mxu1 %v2712_v2  ;;  %v2791_v1 = vld [vmem:[%s3742_s1 + $0x780] ss:$8 sps:$4 sm:$0xff]   ;;  %v2796_v2 = vld [vmem:[%s3742_s1 + $0x394] ss:$8 sps:$4 sm:$0xff]  }
  0xad   :  { %1941 = vmatprep.subr.bf16.mxu0 %v2715_v3  ;;  %v2799_v3 = vld [vmem:[%s3742_s1 + $0x794] ss:$8 sps:$4 sm:$0xff]  }
  0xaf   :  { %1770 = vmatpush1.bf16.msra.mxu1 %v2710_v4  ;;  %v2794_v4 = vld [vmem:[%s3742_s1 + $0x390] ss:$8 sps:$4 sm:$0xff]  }
  0xb0   :  { %1942 = vmatpush1.bf16.msra.mxu0 %v2713_v5  ;;  %1771 = vmatprep.subr.bf16.mxu1 %v2718_v6  ;;  %v2797_v5 = vld [vmem:[%s3742_s1 + $0x790] ss:$8 sps:$4 sm:$0xff]   ;;  %v2802_v6 = vld [vmem:[%s3742_s1 + $0x3a4] ss:$8 sps:$4 sm:$0xff]  }
  0xb1   :  { %1943 = vmatprep.subr.bf16.mxu0 %v2721_v7  ;;  %v2805_v7 = vld [vmem:[%s3742_s1 + $0x7a4] ss:$8 sps:$4 sm:$0xff]  }
  0xb3   :  { %1772 = vmatpush1.bf16.msra.mxu1 %v2716_v8  ;;  %v2800_v8 = vld [vmem:[%s3742_s1 + $0x3a0] ss:$8 sps:$4 sm:$0xff]  }
  0xb4   :  { %1944 = vmatpush1.bf16.msra.mxu0 %v2719_v9  ;;  %1773 = vmatprep.subr.bf16.mxu1 %v2724_v10  ;;  %v2803_v9 = vld [vmem:[%s3742_s1 + $0x7a0] ss:$8 sps:$4 sm:$0xff]   ;;  %v2808_v10 = vld [vmem:[%s3742_s1 + $0x3b4] ss:$8 sps:$4 sm:$0xff]  }
  0xb5   :  { %1945 = vmatprep.subr.bf16.mxu0 %v2727_v11  ;;  %v2811_v11 = vld [vmem:[%s3742_s1 + $0x7b4] ss:$8 sps:$4 sm:$0xff]  }
  0xb7   :  { %1774 = vmatpush1.bf16.msra.mxu1 %v2722_v12  ;;  %v2806_v12 = vld [vmem:[%s3742_s1 + $0x3b0] ss:$8 sps:$4 sm:$0xff]  }
  0xb8   :  { %1946 = vmatpush1.bf16.msra.mxu0 %v2725_v13  ;;  %1775 = vmatprep.subr.bf16.mxu1 %v2730_v14  ;;  %v2809_v13 = vld [vmem:[%s3742_s1 + $0x7b0] ss:$8 sps:$4 sm:$0xff]   ;;  %v2814_v14 = vld [vmem:[%s3742_s1 + $0x3c4] ss:$8 sps:$4 sm:$0xff]  }
  0xb9   :  { %1947 = vmatprep.subr.bf16.mxu0 %v2733_v15  ;;  %v2817_v15 = vld [vmem:[%s3742_s1 + $0x7c4] ss:$8 sps:$4 sm:$0xff]  }
  0xbb   :  { %1776 = vmatpush1.bf16.msra.mxu1 %v2728_v16  ;;  %v2812_v16 = vld [vmem:[%s3742_s1 + $0x3c0] ss:$8 sps:$4 sm:$0xff]  }
  0xbc   :  { %1948 = vmatpush1.bf16.msra.mxu0 %v2731_v17  ;;  %1777 = vmatprep.subr.bf16.mxu1 %v2736_v18  ;;  %v2815_v17 = vld [vmem:[%s3742_s1 + $0x7c0] ss:$8 sps:$4 sm:$0xff]   ;;  %v2820_v18 = vld [vmem:[%s3742_s1 + $0x3d4] ss:$8 sps:$4 sm:$0xff]  }
  0xbd   :  { %1949 = vmatprep.subr.bf16.mxu0 %v2739_v19  ;;  %v2823_v19 = vld [vmem:[%s3742_s1 + $0x7d4] ss:$8 sps:$4 sm:$0xff]  }
  0xbf   :  { %1778 = vmatpush1.bf16.msra.mxu1 %v2734_v20  ;;  %v2818_v20 = vld [vmem:[%s3742_s1 + $0x3d0] ss:$8 sps:$4 sm:$0xff]  }
  0xc0   :  { %1950 = vmatpush1.bf16.msra.mxu0 %v2737_v21  ;;  %1790 = vmatprep.subr.bf16.mxu1 %v2742_v22  ;;  %v2821_v21 = vld [vmem:[%s3742_s1 + $0x7d0] ss:$8 sps:$4 sm:$0xff]   ;;  %v2826_v22 = vld [vmem:[%s3742_s1 + $0x3e4] ss:$8 sps:$4 sm:$0xff]  }
  0xc1   :  { %1962 = vmatprep.subr.bf16.mxu0 %v2745_v23  ;;  %v2829_v23 = vld [vmem:[%s3742_s1 + $0x7e4] ss:$8 sps:$4 sm:$0xff]  }
  0xc2   :  { %1780 = vmatmul.mubr.bf16.vlgmr.msra.gmra.mrb[0].mxu1 %v2153_v27  ;;  %v2824_v27 = vld [vmem:[%s3742_s1 + $0x3e0] ss:$8 sps:$4 sm:$0xff]  }
  0xc3   :  { %1952 = vmatmul.mubr.bf16.vlgmr.msra.gmra.mrb[0].mxu0 %v2161_v28  ;;  %1791 = vmatpush1.bf16.msra.mxu1 %v2740_v24  ;;  %v2827_v28 = vld [vmem:[%s3742_s1 + $0x7e0] ss:$8 sps:$4 sm:$0xff]   ;;  %v2832_v24 = vld [vmem:[%s3742_s1 + $0x3f4] ss:$8 sps:$4 sm:$0xff]  }
  0xc4   :  { %1963 = vmatpush1.bf16.msra.mxu0 %v2743_v25  ;;  %1792 = vmatprep.subr.bf16.mxu1 %v2748_v29  ;;  %v2835_v25 = vld [vmem:[%s3742_s1 + $0x7f4] ss:$8 sps:$4 sm:$0xff]   ;;  %v2830_v29 = vld [vmem:[%s3742_s1 + $0x3f0] ss:$8 sps:$4 sm:$0xff]  }
  0xc5   :  { %1964 = vmatprep.subr.bf16.mxu0 %v2751_v30  ;;  %1822 = vmatprep.mubr.bf16.mxu1 %v2156_v34  ;;  %v2833_v30 = vld [vmem:[%s3742_s1 + $0x7f0] ss:$8 sps:$4 sm:$0xff]   ;;  %v2155_v34 = vcombine.low %v3515_v26, %v3524_v31 }
  0xc6   :  { %1994 = vmatprep.mubr.bf16.mxu0 %v2164_v35  ;;  %v2163_v35 = vcombine.low %v3529_v32, %v3534_v33 }
  0xc7   :  { %1793 = vmatpush1.bf16.msra.mxu1 %v2746_v36  ;;  %v2840_v36 = vmov 0.0|0.0  }
  0xc8   :  { %1965 = vmatpush1.bf16.msra.mxu0 %v2749_v37  ;;  %1794 = vmatprep.subr.bf16.mxu1 %v2754_v38  ;;  %2144 = vst [vmem:[%s3744_s4 + $0x8] sm:$0xff] %v2840_v36 }
  0xc9   :  { %1966 = vmatprep.subr.bf16.mxu0 %v2757_v39 }
  0xcb   :  { %1795 = vmatpush1.bf16.msra.mxu1 %v2752_v40 }
  0xcc   :  { %1967 = vmatpush1.bf16.msra.mxu0 %v2755_v41  ;;  %1796 = vmatprep.subr.bf16.mxu1 %v2760_v42 }
  0xcd   :  { %1968 = vmatprep.subr.bf16.mxu0 %v2763_v43 }
  0xcf   :  { %1797 = vmatpush1.bf16.msra.mxu1 %v2758_v44 }
  0xd0   :  { %1969 = vmatpush1.bf16.msra.mxu0 %v2761_v45  ;;  %1798 = vmatprep.subr.bf16.mxu1 %v2766_v46 }
  0xd1   :  { %1970 = vmatprep.subr.bf16.mxu0 %v2769_v47 }
  0xd3   :  { %1799 = vmatpush1.bf16.msra.mxu1 %v2764_v48 }
  0xd4   :  { %1971 = vmatpush1.bf16.msra.mxu0 %v2767_v49  ;;  %1800 = vmatprep.subr.bf16.mxu1 %v2772_v50 }
  0xd5   :  { %1972 = vmatprep.subr.bf16.mxu0 %v2775_v51 }
  0xd7   :  { %1801 = vmatpush1.bf16.msra.mxu1 %v2770_v52 }
  0xd8   :  { %1973 = vmatpush1.bf16.msra.mxu0 %v2773_v53  ;;  %1802 = vmatprep.subr.bf16.mxu1 %v2778_v54 }
  0xd9   :  { %1974 = vmatprep.subr.bf16.mxu0 %v2781_v55 }
  0xdb   :  { %1803 = vmatpush1.bf16.msra.mxu1 %v2776_v56 }
  0xdc   :  { %1975 = vmatpush1.bf16.msra.mxu0 %v2779_v57  ;;  %1804 = vmatprep.subr.bf16.mxu1 %v2784_v58 }
  0xdd   :  { %1976 = vmatprep.subr.bf16.mxu0 %v2787_v59 }
  0xdf   :  { %1805 = vmatpush1.bf16.msra.mxu1 %v2782_v60 }
  0xe0   :  { %1977 = vmatpush1.bf16.msra.mxu0 %v2785_v61  ;;  %1806 = vmatprep.subr.bf16.mxu1 %v2790_v62 }
  0xe1   :  { %1978 = vmatprep.subr.bf16.mxu0 %v2793_v63 }
  0xe3   :  { %1807 = vmatpush1.bf16.msra.mxu1 %v2788_v0 }
  0xe4   :  { %1979 = vmatpush1.bf16.msra.mxu0 %v2791_v1  ;;  %1808 = vmatprep.subr.bf16.mxu1 %v2796_v2 }
  0xe5   :  { %1980 = vmatprep.subr.bf16.mxu0 %v2799_v3 }
  0xe7   :  { %1809 = vmatpush1.bf16.msra.mxu1 %v2794_v4 }
  0xe8   :  { %1981 = vmatpush1.bf16.msra.mxu0 %v2797_v5  ;;  %1810 = vmatprep.subr.bf16.mxu1 %v2802_v6 }
  0xe9   :  { %1982 = vmatprep.subr.bf16.mxu0 %v2805_v7 }
  0xeb   :  { %1811 = vmatpush1.bf16.msra.mxu1 %v2800_v8  ;;  %v2084_v8 = vlaneseq }
  0xec   :  { %1983 = vmatpush1.bf16.msra.mxu0 %v2803_v9  ;;  %1812 = vmatprep.subr.bf16.mxu1 %v2808_v10 }
  0xed   :  { %1984 = vmatprep.subr.bf16.mxu0 %v2811_v11 }
  0xef   :  { %1813 = vmatpush1.bf16.msra.mxu1 %v2806_v12 }
  0xf0   :  { %1985 = vmatpush1.bf16.msra.mxu0 %v2809_v13  ;;  %1814 = vmatprep.subr.bf16.mxu1 %v2814_v14  ;;  %v2085_v13 = vshrl.u32 %v2084_v8, 7 }
  0xf1   :  { %1986 = vmatprep.subr.bf16.mxu0 %v2817_v15 }
  0xf2   :  { %v2086_v15 = vsub.s32 0, %v2085_v13 }
  0xf3   :  { %1815 = vmatpush1.bf16.msra.mxu1 %v2812_v16  ;;  %v2020_v16 = vld [vmem:[%s3745_s2] sm:$0x3] }
  0xf4   :  { %1987 = vmatpush1.bf16.msra.mxu0 %v2815_v17  ;;  %1816 = vmatprep.subr.bf16.mxu1 %v2820_v18  ;;  %v2090_v17 = vsub.s32 1, %v2085_v13  ;;  %v2087_v18 = vrot.slane %v2020_v16, %v2086_v15 }
  0xf5   :  { %1988 = vmatprep.subr.bf16.mxu0 %v2823_v19 }
  0xf6   :  { %v2091_v19 = vrot.slane %v2020_v16, %v2090_v17 }
  0xf7   :  { %1817 = vmatpush1.bf16.msra.mxu1 %v2818_v20 }
  0xf8   :  { %1989 = vmatpush1.bf16.msra.mxu0 %v2821_v21  ;;  %1818 = vmatprep.subr.bf16.mxu1 %v2826_v22  ;;  %v2021_v21 = vld [vmem:[%s3746_s3] sm:$0x3] }
  0xf9   :  { %1990 = vmatprep.subr.bf16.mxu0 %v2829_v23 }
  0xfb   :  { %1819 = vmatpush1.bf16.msra.mxu1 %v2824_v27 }
  0xfc   :  { %1991 = vmatpush1.bf16.msra.mxu0 %v2827_v28  ;;  %1820 = vmatprep.subr.bf16.mxu1 %v2832_v24  ;;  %v2112_v24 = vrot.slane %v2021_v21, %v2086_v15 }
  0xfd   :  { %1992 = vmatprep.subr.bf16.mxu0 %v2835_v25 }
  0xff   :  { %1821 = vmatpush1.bf16.msra.mxu1 %v2830_v29  ;;  %v2116_v29 = vrot.slane %v2021_v21, %v2090_v17 }
 0x100   :  { %1993 = vmatpush1.bf16.msra.mxu0 %v2833_v30 }
 0x102   :  { %1823 = vmatmul.mubr.bf16.vlgmr.msra.gmra.mrb[0].mxu1 %v2155_v34 }
 0x103   :  { %1995 = vmatmul.mubr.bf16.vlgmr.msra.gmra.mrb[0].mxu0 %v2163_v35 }
 0x1d5   :  { %v1824_v37 = vpop.f32.mrb[0].mxu1 }
 0x1d6   :  { %v1996_v38 = vpop.f32.mrb[0].mxu0  ;;  %v1826_v40 = vpop.f32.mrb[1].mxu1 }
 0x1d7   :  { %v2425_v39 = vadd.f32 %v1996_v38, %v1824_v37  ;;  %v1998_v41 = vpop.f32.mrb[1].mxu0  ;;  %v1828_v43 = vpop.f32.mrb[2].mxu1 }
 0x1d8   :  { %v2426_v42 = vadd.f32 %v1998_v41, %v1826_v40  ;;  %v2000_v26 = vpop.f32.mrb[2].mxu0  ;;  %v1830_v44 = vpop.f32.mrb[3].mxu1 }
 0x1d9   :  { %v2036_v31 = vrot.slane %v2425_v39, 4  ;;  %v2002_v32 = vpop.f32.mrb[3].mxu0 }
 0x1da   :  { %v2043_v33 = vrot.slane %v2426_v42, 4 }
 0x1db   :  { %v2037_v45 = vadd.f32 %v2425_v39, %v2036_v31 }
 0x1dc   :  { %v2044_v46 = vadd.f32 %v2426_v42, %v2043_v33 }
 0x1dd   :  { %v2038_v47 = vrot.slane %v2037_v45, 2 }
 0x1de   :  { %v2045_v48 = vrot.slane %v2044_v46, 2 }
 0x1df   :  { %v2039_v49 = vadd.f32 %v2038_v47, %v2037_v45 }
 0x1e0   :  { %v2046_v50 = vadd.f32 %v2045_v48, %v2044_v46 }
 0x1e1   :  { %v2040_v51 = vrot.slane %v2039_v49, 1 }
 0x1e2   :  { %v2047_v52 = vrot.slane %v2046_v50, 1 }
 0x1e3   :  { %v2041_v53 = vadd.f32 %v2040_v51, %v2039_v49 }
 0x1e4   :  { %v2048_v54 = vadd.f32 %v2047_v52, %v2046_v50 }
 0x1e5   :  { %v2049_v55 = vmul.f32 0.125, %v2041_v53 }
 0x1e6   :  { %v2050_v56 = vmul.f32 0.125, %v2048_v54 }
 0x1e7   :  { %v2051_v57 = vsub.f32 %v2425_v39, %v2049_v55 }
 0x1e8   :  { %v2052_v58 = vsub.f32 %v2426_v42, %v2050_v56 }
 0x1e9   :  { %v2059_v59 = vmul.f32 %v2051_v57, %v2051_v57 }
 0x1ea   :  { %v2060_v60 = vmul.f32 %v2052_v58, %v2052_v58 }
 0x1eb   :  { %v2064_v61 = vrot.slane %v2059_v59, 4 }
 0x1ec   :  { %v2071_v62 = vrot.slane %v2060_v60, 4 }
 0x1ed   :  { %v2065_v63 = vadd.f32 %v2064_v61, %v2059_v59 }
 0x1ee   :  { %v2072_v0 = vadd.f32 %v2071_v62, %v2060_v60 }
 0x1ef   :  { %v2066_v1 = vrot.slane %v2065_v63, 2 }
 0x1f0   :  { %v2073_v2 = vrot.slane %v2072_v0, 2 }
 0x1f1   :  { %v2067_v3 = vadd.f32 %v2066_v1, %v2065_v63 }
 0x1f2   :  { %v2074_v4 = vadd.f32 %v2073_v2, %v2072_v0 }
 0x1f3   :  { %v2068_v5 = vrot.slane %v2067_v3, 1 }
 0x1f4   :  { %v2075_v6 = vrot.slane %v2074_v4, 1 }
 0x1f5   :  { %v2069_v7 = vadd.f32 %v2068_v5, %v2067_v3 }
 0x1f6   :  { %v2076_v9 = vadd.f32 %v2075_v6, %v2074_v4 }
 0x1f7   :  { %v2077_v10 = vmul.f32 0.125, %v2069_v7 }
 0x1f8   :  { %v2078_v11 = vmul.f32 0.125, %v2076_v9 }
 0x1f9   :  { %v2079_v12 = vadd.f32 1e-05, %v2077_v10 }
 0x1fa   :  { %v2080_v14 = vadd.f32 1e-05, %v2078_v11 }
 0x1fb   :  { %2836 = vrsqrt.f32 %v2079_v12 }
 0x1fc   :  { %2838 = vrsqrt.f32 %v2080_v14 }
 0x205   :  { %v2837_v20 = vpop.eup %2836 }
 0x206   :  { %v2839_v22 = vpop.eup %2838  ;;  %v2094_v23 = vmul.f32 %v2837_v20, %v2087_v18 }
 0x207   :  { %v2095_v27 = vmul.f32 %v2839_v22, %v2091_v19 }
 0x208   :  { %v2099_v28 = vrot.slane %v2094_v23, %v2086_v15 }
 0x209   :  { %v2103_v25 = vrot.slane %v2095_v27, %v2086_v15 }
 0x20a   :  { %v2104_v30 = vmul.f32 %v2099_v28, %v2051_v57 }
 0x20b   :  { %v2105_v34 = vmul.f32 %v2103_v25, %v2052_v58 }
 0x20c   :  { %v2119_v35 = vadd.f32 %v2112_v24, %v2104_v30 }
 0x20d   :  { %v2120_v36 = vadd.f32 %v2116_v29, %v2105_v34 }
 0x20e   :  { %v2123_v37 = vmax.f32 %v2119_v35, 0.0 }
 0x20f   :  { %v2124_v38 = vmax.f32 %v2120_v36, 0.0 }
 0x211   :  { %v2423_v39 = vpack.c.bf16 %v2124_v38, %v2123_v37 }
 0x213   :  { %2143 = vst [vmem:[%s3744_s4] sm:$0xff] %v2423_v39 }

// kernel: _lambda_.7
= control target key start
LH: loop header
LB: loop body
LE: loop exit
PB: predicated region body
PF: predicated region fallthrough
CT: control target
= control target key end

     0   :  { %vm13727_vm1 = vmmov 1   ;;  %s18090_s1 = inlined_call_operand.vmem [shape: bf16[4096,512], index: 1, kind: input, shape index: {}]   ;;  %s18091_s0 = inlined_call_operand.vmem [shape: bf16[16,4096], index: 0, kind: input, shape index: {}]   ;;  %s18092_s4 = inlined_call_operand.vmem [shape: bf16[512,512], index: 4, kind: input, shape index: {}]   ;;  %s18093_s7 = inlined_call_operand.vmem [shape: bf16[512,512], index: 7, kind: input, shape index: {}]   ;;  %s18094_s2 = inlined_call_operand.vmem [shape: f32[1,512], index: 2, kind: input, shape index: {}]   ;;  %s18095_s3 = inlined_call_operand.vmem [shape: f32[1,512], index: 3, kind: input, shape index: {}, may-alias: {3,6,9}]   ;;  %s18096_s5 = inlined_call_operand.vmem [shape: f32[1,512], index: 5, kind: input, shape index: {}]   ;;  %s18097_s6 = inlined_call_operand.vmem [shape: f32[1,512], index: 6, kind: input, shape index: {}, may-alias: {3,6,9}]   ;;  %s18098_s10 = inlined_call_operand.vmem [shape: bf16[16,512], index: 10, kind: output, shape index: {}]   ;;  %s18099_s8 = inlined_call_operand.vmem [shape: f32[1,512], index: 8, kind: input, shape index: {}]   ;;  %s18100_s9 = inlined_call_operand.vmem [shape: f32[1,512], index: 9, kind: input, shape index: {}, may-alias: {3,6,9}]  }
   0x1   :  { %v11783_v0 = vld [vmem:[%s18090_s1 + $0x4] ss:$16 sps:$4 sm:$0xff]   ;;  %v11785_v1 = vld [vmem:[%s18090_s1 + $0xc] ss:$16 sps:$4 sm:$0xff]   ;;  %v11787_v2 = vld [vmem:[%s18090_s1] ss:$16 sps:$4 sm:$0xff]  }
   0x2   :  { %6371 = vmatprep.subr.bf16.mxu0 %v11783_v0  ;;  %v11788_v3 = vld [vmem:[%s18090_s1 + $0x8] ss:$16 sps:$4 sm:$0xff]   ;;  %7059 = vmatprep.subr.bf16.mxu1 %v11785_v1  ;;  %v11789_v4 = vld [vmem:[%s18090_s1 + $0x24] ss:$16 sps:$4 sm:$0xff]   ;;  %v11791_v5 = vld [vmem:[%s18090_s1 + $0x2c] ss:$16 sps:$4 sm:$0xff]  }
   0x3   :  { %6372 = vmatpush1.bf16.msra.mxu0 %v11787_v2  ;;  %7060 = vmatpush1.bf16.msra.mxu1 %v11788_v3  ;;  %v11793_v6 = vld [vmem:[%s18090_s1 + $0x20] ss:$16 sps:$4 sm:$0xff]   ;;  %v11794_v7 = vld [vmem:[%s18090_s1 + $0x28] ss:$16 sps:$4 sm:$0xff]   ;;  %v11795_v8 = vld [vmem:[%s18090_s1 + $0x44] ss:$16 sps:$4 sm:$0xff]  }
   0x4   :  { %6373 = vmatprep.subr.bf16.mxu0 %v11789_v4  ;;  %7061 = vmatprep.subr.bf16.mxu1 %v11791_v5  ;;  %v11797_v9 = vld [vmem:[%s18090_s1 + $0x4c] ss:$16 sps:$4 sm:$0xff]   ;;  %v11799_v10 = vld [vmem:[%s18090_s1 + $0x40] ss:$16 sps:$4 sm:$0xff]   ;;  %v11800_v11 = vld [vmem:[%s18090_s1 + $0x48] ss:$16 sps:$4 sm:$0xff]  }
   0x5   :  { %v11801_v12 = vld [vmem:[%s18090_s1 + $0x64] ss:$16 sps:$4 sm:$0xff]   ;;  %v11803_v13 = vld [vmem:[%s18090_s1 + $0x6c] ss:$16 sps:$4 sm:$0xff]   ;;  %v11805_v14 = vld [vmem:[%s18090_s1 + $0x60] ss:$16 sps:$4 sm:$0xff]  }
   0x6   :  { %v11806_v15 = vld [vmem:[%s18090_s1 + $0x68] ss:$16 sps:$4 sm:$0xff]   ;;  %v11807_v16 = vld [vmem:[%s18090_s1 + $0x84] ss:$16 sps:$4 sm:$0xff]   ;;  %v11809_v17 = vld [vmem:[%s18090_s1 + $0x8c] ss:$16 sps:$4 sm:$0xff]  }
   0x7   :  { %6374 = vmatpush1.bf16.msra.mxu0 %v11793_v6  ;;  %7062 = vmatpush1.bf16.msra.mxu1 %v11794_v7  ;;  %v11811_v18 = vld [vmem:[%s18090_s1 + $0x80] ss:$16 sps:$4 sm:$0xff]   ;;  %v11812_v19 = vld [vmem:[%s18090_s1 + $0x88] ss:$16 sps:$4 sm:$0xff]   ;;  %v11813_v20 = vld [vmem:[%s18090_s1 + $0xa4] ss:$16 sps:$4 sm:$0xff]  }
   0x8   :  { %6375 = vmatprep.subr.bf16.mxu0 %v11795_v8  ;;  %7063 = vmatprep.subr.bf16.mxu1 %v11797_v9  ;;  %v11815_v21 = vld [vmem:[%s18090_s1 + $0xac] ss:$16 sps:$4 sm:$0xff]   ;;  %v11817_v22 = vld [vmem:[%s18090_s1 + $0xa0] ss:$16 sps:$4 sm:$0xff]   ;;  %v11818_v23 = vld [vmem:[%s18090_s1 + $0xa8] ss:$16 sps:$4 sm:$0xff]  }
   0x9   :  { %v11819_v24 = vld [vmem:[%s18090_s1 + $0xc4] ss:$16 sps:$4 sm:$0xff]   ;;  %v11821_v25 = vld [vmem:[%s18090_s1 + $0xcc] ss:$16 sps:$4 sm:$0xff]   ;;  %v11823_v26 = vld [vmem:[%s18090_s1 + $0xc0] ss:$16 sps:$4 sm:$0xff]  }
   0xa   :  { %v11824_v27 = vld [vmem:[%s18090_s1 + $0xc8] ss:$16 sps:$4 sm:$0xff]   ;;  %v11825_v28 = vld [vmem:[%s18090_s1 + $0xe4] ss:$16 sps:$4 sm:$0xff]   ;;  %v11827_v29 = vld [vmem:[%s18090_s1 + $0xec] ss:$16 sps:$4 sm:$0xff]  }
   0xb   :  { %6376 = vmatpush1.bf16.msra.mxu0 %v11799_v10  ;;  %7064 = vmatpush1.bf16.msra.mxu1 %v11800_v11  ;;  %v11829_v30 = vld [vmem:[%s18090_s1 + $0xe0] ss:$16 sps:$4 sm:$0xff]   ;;  %v11830_v31 = vld [vmem:[%s18090_s1 + $0xe8] ss:$16 sps:$4 sm:$0xff]   ;;  %v11831_v32 = vld [vmem:[%s18090_s1 + $0x104] ss:$16 sps:$4 sm:$0xff]  }
   0xc   :  { %6377 = vmatprep.subr.bf16.mxu0 %v11801_v12  ;;  %7065 = vmatprep.subr.bf16.mxu1 %v11803_v13  ;;  %v11833_v33 = vld [vmem:[%s18090_s1 + $0x10c] ss:$16 sps:$4 sm:$0xff]   ;;  %v11835_v34 = vld [vmem:[%s18090_s1 + $0x100] ss:$16 sps:$4 sm:$0xff]   ;;  %v11836_v35 = vld [vmem:[%s18090_s1 + $0x108] ss:$16 sps:$4 sm:$0xff]  }
   0xd   :  { %v11837_v36 = vld [vmem:[%s18090_s1 + $0x124] ss:$16 sps:$4 sm:$0xff]   ;;  %v11839_v37 = vld [vmem:[%s18090_s1 + $0x12c] ss:$16 sps:$4 sm:$0xff]   ;;  %v11841_v38 = vld [vmem:[%s18090_s1 + $0x120] ss:$16 sps:$4 sm:$0xff]  }
   0xe   :  { %v11842_v39 = vld [vmem:[%s18090_s1 + $0x128] ss:$16 sps:$4 sm:$0xff]   ;;  %v11843_v40 = vld [vmem:[%s18090_s1 + $0x144] ss:$16 sps:$4 sm:$0xff]   ;;  %v11845_v41 = vld [vmem:[%s18090_s1 + $0x14c] ss:$16 sps:$4 sm:$0xff]  }
   0xf   :  { %6378 = vmatpush1.bf16.msra.mxu0 %v11805_v14  ;;  %7066 = vmatpush1.bf16.msra.mxu1 %v11806_v15  ;;  %v11847_v42 = vld [vmem:[%s18090_s1 + $0x140] ss:$16 sps:$4 sm:$0xff]   ;;  %v11848_v43 = vld [vmem:[%s18090_s1 + $0x148] ss:$16 sps:$4 sm:$0xff]   ;;  %v11849_v44 = vld [vmem:[%s18090_s1 + $0x164] ss:$16 sps:$4 sm:$0xff]  }
  0x10   :  { %6379 = vmatprep.subr.bf16.mxu0 %v11807_v16  ;;  %7067 = vmatprep.subr.bf16.mxu1 %v11809_v17  ;;  %v11851_v45 = vld [vmem:[%s18090_s1 + $0x16c] ss:$16 sps:$4 sm:$0xff]   ;;  %v35_v46 = vld [vmem:[%s18091_s0] sm:$0xff]  ;;  %v11854_v49 = vld [vmem:[%s18090_s1 + $0x168] ss:$16 sps:$4 sm:$0xff]  }
  0x11   :  { %v51_v47 = vld [vmem:[%s18091_s0 + $0x80] sm:$0xff]  ;;  %v11857_v52 = vld [vmem:[%s18090_s1 + $0x18c] ss:$16 sps:$4 sm:$0xff]   ;;  %v11860_v54 = vld [vmem:[%s18090_s1 + $0x188] ss:$16 sps:$4 sm:$0xff]  }
  0x12   :  { %v11853_v48 = vld [vmem:[%s18090_s1 + $0x160] ss:$16 sps:$4 sm:$0xff]   ;;  %v10277_v50 = vcombine.high %v35_v46, %v51_v47  ;;  %v11855_v51 = vld [vmem:[%s18090_s1 + $0x184] ss:$16 sps:$4 sm:$0xff]   ;;  %v11863_v56 = vld [vmem:[%s18090_s1 + $0x1ac] ss:$16 sps:$4 sm:$0xff]   ;;  %v10276_v5 = vcombine.low %v35_v46, %v51_v47 }
  0x13   :  { %6380 = vmatpush1.bf16.msra.mxu0 %v11811_v18  ;;  %7068 = vmatpush1.bf16.msra.mxu1 %v11812_v19  ;;  %v11859_v53 = vld [vmem:[%s18090_s1 + $0x180] ss:$16 sps:$4 sm:$0xff]   ;;  %v11861_v55 = vld [vmem:[%s18090_s1 + $0x1a4] ss:$16 sps:$4 sm:$0xff]   ;;  %v11866_v58 = vld [vmem:[%s18090_s1 + $0x1a8] ss:$16 sps:$4 sm:$0xff]  }
  0x14   :  { %6381 = vmatprep.subr.bf16.mxu0 %v11813_v20  ;;  %7069 = vmatprep.subr.bf16.mxu1 %v11815_v21  ;;  %v11865_v57 = vld [vmem:[%s18090_s1 + $0x1a0] ss:$16 sps:$4 sm:$0xff]   ;;  %v11867_v59 = vld [vmem:[%s18090_s1 + $0x1c4] ss:$16 sps:$4 sm:$0xff]   ;;  %v11869_v60 = vld [vmem:[%s18090_s1 + $0x1cc] ss:$16 sps:$4 sm:$0xff]  }
  0x15   :  { %6403 = vmatprep.mubr.bf16.mxu0 %v10277_v50  ;;  %7091 = vmatprep.mubr.bf16.mxu1 %v10277_v50  ;;  %v11871_v61 = vld [vmem:[%s18090_s1 + $0x1c0] ss:$16 sps:$4 sm:$0xff]   ;;  %v11872_v62 = vld [vmem:[%s18090_s1 + $0x1c8] ss:$16 sps:$4 sm:$0xff]   ;;  %v11873_v63 = vld [vmem:[%s18090_s1 + $0x1e4] ss:$16 sps:$4 sm:$0xff]  }
  0x16   :  { %v11875_v0 = vld [vmem:[%s18090_s1 + $0x1ec] ss:$16 sps:$4 sm:$0xff]   ;;  %v11877_v1 = vld [vmem:[%s18090_s1 + $0x1e0] ss:$16 sps:$4 sm:$0xff]   ;;  %v11878_v2 = vld [vmem:[%s18090_s1 + $0x1e8] ss:$16 sps:$4 sm:$0xff]  }
  0x17   :  { %6382 = vmatpush1.bf16.msra.mxu0 %v11817_v22  ;;  %7070 = vmatpush1.bf16.msra.mxu1 %v11818_v23  ;;  %v11881_v3 = vld [vmem:[%s18090_s1 + $0x204] ss:$16 sps:$4 sm:$0xff]   ;;  %v11884_v4 = vld [vmem:[%s18090_s1 + $0x20c] ss:$16 sps:$4 sm:$0xff]   ;;  %v11879_v6 = vld [vmem:[%s18090_s1 + $0x200] ss:$16 sps:$4 sm:$0xff]  }
  0x18   :  { %6383 = vmatprep.subr.bf16.mxu0 %v11819_v24  ;;  %7071 = vmatprep.subr.bf16.mxu1 %v11821_v25  ;;  %v11882_v7 = vld [vmem:[%s18090_s1 + $0x208] ss:$16 sps:$4 sm:$0xff]   ;;  %v11887_v8 = vld [vmem:[%s18090_s1 + $0x224] ss:$16 sps:$4 sm:$0xff]   ;;  %v11890_v9 = vld [vmem:[%s18090_s1 + $0x22c] ss:$16 sps:$4 sm:$0xff]  }
  0x19   :  { %v11885_v10 = vld [vmem:[%s18090_s1 + $0x220] ss:$16 sps:$4 sm:$0xff]   ;;  %v11888_v11 = vld [vmem:[%s18090_s1 + $0x228] ss:$16 sps:$4 sm:$0xff]   ;;  %v11893_v12 = vld [vmem:[%s18090_s1 + $0x244] ss:$16 sps:$4 sm:$0xff]  }
  0x1a   :  { %v11896_v13 = vld [vmem:[%s18090_s1 + $0x24c] ss:$16 sps:$4 sm:$0xff]   ;;  %v11891_v14 = vld [vmem:[%s18090_s1 + $0x240] ss:$16 sps:$4 sm:$0xff]   ;;  %v11894_v15 = vld [vmem:[%s18090_s1 + $0x248] ss:$16 sps:$4 sm:$0xff]  }
  0x1b   :  { %6384 = vmatpush1.bf16.msra.mxu0 %v11823_v26  ;;  %7072 = vmatpush1.bf16.msra.mxu1 %v11824_v27  ;;  %v11899_v16 = vld [vmem:[%s18090_s1 + $0x264] ss:$16 sps:$4 sm:$0xff]   ;;  %v11902_v17 = vld [vmem:[%s18090_s1 + $0x26c] ss:$16 sps:$4 sm:$0xff]   ;;  %v11897_v18 = vld [vmem:[%s18090_s1 + $0x260] ss:$16 sps:$4 sm:$0xff]  }
  0x1c   :  { %6385 = vmatprep.subr.bf16.mxu0 %v11825_v28  ;;  %7073 = vmatprep.subr.bf16.mxu1 %v11827_v29  ;;  %v11900_v19 = vld [vmem:[%s18090_s1 + $0x268] ss:$16 sps:$4 sm:$0xff]   ;;  %v11905_v20 = vld [vmem:[%s18090_s1 + $0x284] ss:$16 sps:$4 sm:$0xff]   ;;  %v11908_v21 = vld [vmem:[%s18090_s1 + $0x28c] ss:$16 sps:$4 sm:$0xff]  }
  0x1d   :  { %v11903_v22 = vld [vmem:[%s18090_s1 + $0x280] ss:$16 sps:$4 sm:$0xff]   ;;  %v11906_v23 = vld [vmem:[%s18090_s1 + $0x288] ss:$16 sps:$4 sm:$0xff]   ;;  %v11911_v24 = vld [vmem:[%s18090_s1 + $0x2a4] ss:$16 sps:$4 sm:$0xff]  }
  0x1e   :  { %v11914_v25 = vld [vmem:[%s18090_s1 + $0x2ac] ss:$16 sps:$4 sm:$0xff]   ;;  %v11909_v26 = vld [vmem:[%s18090_s1 + $0x2a0] ss:$16 sps:$4 sm:$0xff]   ;;  %v11912_v27 = vld [vmem:[%s18090_s1 + $0x2a8] ss:$16 sps:$4 sm:$0xff]  }
  0x1f   :  { %6386 = vmatpush1.bf16.msra.mxu0 %v11829_v30  ;;  %7074 = vmatpush1.bf16.msra.mxu1 %v11830_v31  ;;  %v11917_v28 = vld [vmem:[%s18090_s1 + $0x2c4] ss:$16 sps:$4 sm:$0xff]   ;;  %v11920_v29 = vld [vmem:[%s18090_s1 + $0x2cc] ss:$16 sps:$4 sm:$0xff]   ;;  %v11936_v46 = vld [vmem:[%s18090_s1 + $0x328] ss:$16 sps:$4 sm:$0xff]  }
  0x20   :  { %6387 = vmatprep.subr.bf16.mxu0 %v11831_v32  ;;  %7075 = vmatprep.subr.bf16.mxu1 %v11833_v33  ;;  %v14064_v30 = vld [vmem:[%s18091_s0 + $0x8] sm:$0xff]  ;;  %v11915_v32 = vld [vmem:[%s18090_s1 + $0x2c0] ss:$16 sps:$4 sm:$0xff]   ;;  %v11941_v47 = vld [vmem:[%s18090_s1 + $0x344] ss:$16 sps:$4 sm:$0xff]  }
  0x21   :  { %v14069_v31 = vld [vmem:[%s18091_s0 + $0x88] sm:$0xff] }
  0x22   :  { %v11918_v33 = vld [vmem:[%s18090_s1 + $0x2c8] ss:$16 sps:$4 sm:$0xff]  }
  0x23   :  { %6388 = vmatpush1.bf16.msra.mxu0 %v11835_v34  ;;  %7076 = vmatpush1.bf16.msra.mxu1 %v11836_v35  ;;  %v10279_v34 = vcombine.high %v14064_v30, %v14069_v31  ;;  %v11923_v35 = vld [vmem:[%s18090_s1 + $0x2e4] ss:$16 sps:$4 sm:$0xff]   ;;  %v11942_v50 = vld [vmem:[%s18090_s1 + $0x348] ss:$16 sps:$4 sm:$0xff]  }
  0x24   :  { %6389 = vmatprep.subr.bf16.mxu0 %v11837_v36  ;;  %7077 = vmatprep.subr.bf16.mxu1 %v11839_v37  ;;  %v11926_v36 = vld [vmem:[%s18090_s1 + $0x2ec] ss:$16 sps:$4 sm:$0xff]   ;;  %v11921_v37 = vld [vmem:[%s18090_s1 + $0x2e0] ss:$16 sps:$4 sm:$0xff]  }
  0x27   :  { %6390 = vmatpush1.bf16.msra.mxu0 %v11841_v38  ;;  %7078 = vmatpush1.bf16.msra.mxu1 %v11842_v39  ;;  %v11924_v38 = vld [vmem:[%s18090_s1 + $0x2e8] ss:$16 sps:$4 sm:$0xff]   ;;  %v11929_v39 = vld [vmem:[%s18090_s1 + $0x304] ss:$16 sps:$4 sm:$0xff]  }
  0x28   :  { %6391 = vmatprep.subr.bf16.mxu0 %v11843_v40  ;;  %7079 = vmatprep.subr.bf16.mxu1 %v11845_v41  ;;  %v11932_v40 = vld [vmem:[%s18090_s1 + $0x30c] ss:$16 sps:$4 sm:$0xff]   ;;  %v11927_v41 = vld [vmem:[%s18090_s1 + $0x300] ss:$16 sps:$4 sm:$0xff]  }
  0x2b   :  { %6392 = vmatpush1.bf16.msra.mxu0 %v11847_v42  ;;  %7080 = vmatpush1.bf16.msra.mxu1 %v11848_v43  ;;  %v11930_v42 = vld [vmem:[%s18090_s1 + $0x308] ss:$16 sps:$4 sm:$0xff]   ;;  %v11935_v43 = vld [vmem:[%s18090_s1 + $0x324] ss:$16 sps:$4 sm:$0xff]  }
  0x2c   :  { %6393 = vmatprep.subr.bf16.mxu0 %v11849_v44  ;;  %7081 = vmatprep.subr.bf16.mxu1 %v11851_v45  ;;  %v11938_v44 = vld [vmem:[%s18090_s1 + $0x32c] ss:$16 sps:$4 sm:$0xff]   ;;  %v11933_v45 = vld [vmem:[%s18090_s1 + $0x320] ss:$16 sps:$4 sm:$0xff]  }
  0x2f   :  { %6394 = vmatpush1.bf16.msra.mxu0 %v11853_v48  ;;  %7082 = vmatpush1.bf16.msra.mxu1 %v11854_v49  ;;  %v11944_v48 = vld [vmem:[%s18090_s1 + $0x34c] ss:$16 sps:$4 sm:$0xff]   ;;  %v11939_v49 = vld [vmem:[%s18090_s1 + $0x340] ss:$16 sps:$4 sm:$0xff]  }
  0x30   :  { %6395 = vmatprep.subr.bf16.mxu0 %v11855_v51  ;;  %7083 = vmatprep.subr.bf16.mxu1 %v11857_v52  ;;  %v11947_v51 = vld [vmem:[%s18090_s1 + $0x364] ss:$16 sps:$4 sm:$0xff]   ;;  %v11950_v52 = vld [vmem:[%s18090_s1 + $0x36c] ss:$16 sps:$4 sm:$0xff]  }
  0x33   :  { %6396 = vmatpush1.bf16.msra.mxu0 %v11859_v53  ;;  %7084 = vmatpush1.bf16.msra.mxu1 %v11860_v54  ;;  %v11945_v53 = vld [vmem:[%s18090_s1 + $0x360] ss:$16 sps:$4 sm:$0xff]   ;;  %v11948_v54 = vld [vmem:[%s18090_s1 + $0x368] ss:$16 sps:$4 sm:$0xff]  }
  0x34   :  { %6397 = vmatprep.subr.bf16.mxu0 %v11861_v55  ;;  %7085 = vmatprep.subr.bf16.mxu1 %v11863_v56  ;;  %v11953_v55 = vld [vmem:[%s18090_s1 + $0x384] ss:$16 sps:$4 sm:$0xff]   ;;  %v11956_v56 = vld [vmem:[%s18090_s1 + $0x38c] ss:$16 sps:$4 sm:$0xff]  }
  0x37   :  { %6398 = vmatpush1.bf16.msra.mxu0 %v11865_v57  ;;  %7086 = vmatpush1.bf16.msra.mxu1 %v11866_v58  ;;  %v11951_v57 = vld [vmem:[%s18090_s1 + $0x380] ss:$16 sps:$4 sm:$0xff]   ;;  %v11954_v58 = vld [vmem:[%s18090_s1 + $0x388] ss:$16 sps:$4 sm:$0xff]  }
  0x38   :  { %6399 = vmatprep.subr.bf16.mxu0 %v11867_v59  ;;  %7087 = vmatprep.subr.bf16.mxu1 %v11869_v60  ;;  %v11959_v59 = vld [vmem:[%s18090_s1 + $0x3a4] ss:$16 sps:$4 sm:$0xff]   ;;  %v11962_v60 = vld [vmem:[%s18090_s1 + $0x3ac] ss:$16 sps:$4 sm:$0xff]  }
  0x3b   :  { %6400 = vmatpush1.bf16.msra.mxu0 %v11871_v61  ;;  %7088 = vmatpush1.bf16.msra.mxu1 %v11872_v62  ;;  %v11957_v61 = vld [vmem:[%s18090_s1 + $0x3a0] ss:$16 sps:$4 sm:$0xff]   ;;  %v11960_v62 = vld [vmem:[%s18090_s1 + $0x3a8] ss:$16 sps:$4 sm:$0xff]  }
  0x3c   :  { %6401 = vmatprep.subr.bf16.mxu0 %v11873_v63  ;;  %7089 = vmatprep.subr.bf16.mxu1 %v11875_v0  ;;  %v11965_v63 = vld [vmem:[%s18090_s1 + $0x3c4] ss:$16 sps:$4 sm:$0xff]   ;;  %v11968_v0 = vld [vmem:[%s18090_s1 + $0x3cc] ss:$16 sps:$4 sm:$0xff]  }
  0x3f   :  { %6402 = vmatpush1.bf16.msra.mxu0 %v11877_v1  ;;  %7090 = vmatpush1.bf16.msra.mxu1 %v11878_v2  ;;  %v11963_v1 = vld [vmem:[%s18090_s1 + $0x3c0] ss:$16 sps:$4 sm:$0xff]   ;;  %v11966_v2 = vld [vmem:[%s18090_s1 + $0x3c8] ss:$16 sps:$4 sm:$0xff]  }
  0x40   :  { %6414 = vmatprep.subr.bf16.mxu0 %v11881_v3  ;;  %7102 = vmatprep.subr.bf16.mxu1 %v11884_v4  ;;  %v11971_v3 = vld [vmem:[%s18090_s1 + $0x3e4] ss:$16 sps:$4 sm:$0xff]   ;;  %v11974_v4 = vld [vmem:[%s18090_s1 + $0x3ec] ss:$16 sps:$4 sm:$0xff]  }
  0x42   :  { %6404 = vmatmul.mubr.bf16.vlgmr.msra.gmra.mrb[0].mxu0 %v10276_v5  ;;  %7092 = vmatmul.mubr.bf16.vlgmr.msra.gmra.mrb[0].mxu1 %v10276_v5  ;;  %v11969_v5 = vld [vmem:[%s18090_s1 + $0x3e0] ss:$16 sps:$4 sm:$0xff]  }
  0x43   :  { %6415 = vmatpush1.bf16.msra.mxu0 %v11879_v6  ;;  %7103 = vmatpush1.bf16.msra.mxu1 %v11882_v7  ;;  %v11972_v6 = vld [vmem:[%s18090_s1 + $0x3e8] ss:$16 sps:$4 sm:$0xff]   ;;  %v11977_v7 = vld [vmem:[%s18090_s1 + $0x404] ss:$16 sps:$4 sm:$0xff]  }
  0x44   :  { %6416 = vmatprep.subr.bf16.mxu0 %v11887_v8  ;;  %7104 = vmatprep.subr.bf16.mxu1 %v11890_v9  ;;  %v11980_v8 = vld [vmem:[%s18090_s1 + $0x40c] ss:$16 sps:$4 sm:$0xff]   ;;  %v10278_v9 = vcombine.low %v14064_v30, %v14069_v31  ;;  %v12002_v30 = vld [vmem:[%s18090_s1 + $0x488] ss:$16 sps:$4 sm:$0xff]   ;;  %v12007_v31 = vld [vmem:[%s18090_s1 + $0x4a4] ss:$16 sps:$4 sm:$0xff]  }
  0x45   :  { %6446 = vmatprep.mubr.bf16.mxu0 %v10279_v34  ;;  %7134 = vmatprep.mubr.bf16.mxu1 %v10279_v34  ;;  %v12008_v34 = vld [vmem:[%s18090_s1 + $0x4a8] ss:$16 sps:$4 sm:$0xff]  }
  0x47   :  { %6417 = vmatpush1.bf16.msra.mxu0 %v11885_v10  ;;  %7105 = vmatpush1.bf16.msra.mxu1 %v11888_v11  ;;  %v11975_v10 = vld [vmem:[%s18090_s1 + $0x400] ss:$16 sps:$4 sm:$0xff]   ;;  %v11978_v11 = vld [vmem:[%s18090_s1 + $0x408] ss:$16 sps:$4 sm:$0xff]  }
  0x48   :  { %6418 = vmatprep.subr.bf16.mxu0 %v11893_v12  ;;  %7106 = vmatprep.subr.bf16.mxu1 %v11896_v13  ;;  %v11983_v12 = vld [vmem:[%s18090_s1 + $0x424] ss:$16 sps:$4 sm:$0xff]   ;;  %v11986_v13 = vld [vmem:[%s18090_s1 + $0x42c] ss:$16 sps:$4 sm:$0xff]  }
  0x4b   :  { %6419 = vmatpush1.bf16.msra.mxu0 %v11891_v14  ;;  %7107 = vmatpush1.bf16.msra.mxu1 %v11894_v15  ;;  %v14210_v14 = vld [vmem:[%s18091_s0 + $0x10] sm:$0xff] }
  0x4c   :  { %6420 = vmatprep.subr.bf16.mxu0 %v11899_v16  ;;  %7108 = vmatprep.subr.bf16.mxu1 %v11902_v17  ;;  %v14215_v15 = vld [vmem:[%s18091_s0 + $0x90] sm:$0xff] }
  0x4d   :  { %v10281_v16 = vcombine.high %v14210_v14, %v14215_v15  ;;  %v11981_v17 = vld [vmem:[%s18090_s1 + $0x420] ss:$16 sps:$4 sm:$0xff]  }
  0x4f   :  { %6421 = vmatpush1.bf16.msra.mxu0 %v11897_v18  ;;  %7109 = vmatpush1.bf16.msra.mxu1 %v11900_v19  ;;  %v11984_v18 = vld [vmem:[%s18090_s1 + $0x428] ss:$16 sps:$4 sm:$0xff]   ;;  %v11989_v19 = vld [vmem:[%s18090_s1 + $0x444] ss:$16 sps:$4 sm:$0xff]  }
  0x50   :  { %6422 = vmatprep.subr.bf16.mxu0 %v11905_v20  ;;  %7110 = vmatprep.subr.bf16.mxu1 %v11908_v21  ;;  %v11992_v20 = vld [vmem:[%s18090_s1 + $0x44c] ss:$16 sps:$4 sm:$0xff]   ;;  %v11987_v21 = vld [vmem:[%s18090_s1 + $0x440] ss:$16 sps:$4 sm:$0xff]  }
  0x53   :  { %6423 = vmatpush1.bf16.msra.mxu0 %v11903_v22  ;;  %7111 = vmatpush1.bf16.msra.mxu1 %v11906_v23  ;;  %v11990_v22 = vld [vmem:[%s18090_s1 + $0x448] ss:$16 sps:$4 sm:$0xff]   ;;  %v11995_v23 = vld [vmem:[%s18090_s1 + $0x464] ss:$16 sps:$4 sm:$0xff]  }
  0x54   :  { %6424 = vmatprep.subr.bf16.mxu0 %v11911_v24  ;;  %7112 = vmatprep.subr.bf16.mxu1 %v11914_v25  ;;  %v11998_v24 = vld [vmem:[%s18090_s1 + $0x46c] ss:$16 sps:$4 sm:$0xff]   ;;  %v11993_v25 = vld [vmem:[%s18090_s1 + $0x460] ss:$16 sps:$4 sm:$0xff]  }
  0x57   :  { %6425 = vmatpush1.bf16.msra.mxu0 %v11909_v26  ;;  %7113 = vmatpush1.bf16.msra.mxu1 %v11912_v27  ;;  %v11996_v26 = vld [vmem:[%s18090_s1 + $0x468] ss:$16 sps:$4 sm:$0xff]   ;;  %v12001_v27 = vld [vmem:[%s18090_s1 + $0x484] ss:$16 sps:$4 sm:$0xff]  }
  0x58   :  { %6426 = vmatprep.subr.bf16.mxu0 %v11917_v28  ;;  %7114 = vmatprep.subr.bf16.mxu1 %v11920_v29  ;;  %v12004_v28 = vld [vmem:[%s18090_s1 + $0x48c] ss:$16 sps:$4 sm:$0xff]   ;;  %v11999_v29 = vld [vmem:[%s18090_s1 + $0x480] ss:$16 sps:$4 sm:$0xff]  }
  0x5b   :  { %6427 = vmatpush1.bf16.msra.mxu0 %v11915_v32  ;;  %7115 = vmatpush1.bf16.msra.mxu1 %v11918_v33  ;;  %v12010_v32 = vld [vmem:[%s18090_s1 + $0x4ac] ss:$16 sps:$4 sm:$0xff]   ;;  %v12005_v33 = vld [vmem:[%s18090_s1 + $0x4a0] ss:$16 sps:$4 sm:$0xff]  }
  0x5c   :  { %6428 = vmatprep.subr.bf16.mxu0 %v11923_v35  ;;  %7116 = vmatprep.subr.bf16.mxu1 %v11926_v36  ;;  %v12013_v35 = vld [vmem:[%s18090_s1 + $0x4c4] ss:$16 sps:$4 sm:$0xff]   ;;  %v12016_v36 = vld [vmem:[%s18090_s1 + $0x4cc] ss:$16 sps:$4 sm:$0xff]  }
  0x5f   :  { %6429 = vmatpush1.bf16.msra.mxu0 %v11921_v37  ;;  %7117 = vmatpush1.bf16.msra.mxu1 %v11924_v38  ;;  %v12011_v37 = vld [vmem:[%s18090_s1 + $0x4c0] ss:$16 sps:$4 sm:$0xff]   ;;  %v12014_v38 = vld [vmem:[%s18090_s1 + $0x4c8] ss:$16 sps:$4 sm:$0xff]  }
  0x60   :  { %6430 = vmatprep.subr.bf16.mxu0 %v11929_v39  ;;  %7118 = vmatprep.subr.bf16.mxu1 %v11932_v40  ;;  %v12019_v39 = vld [vmem:[%s18090_s1 + $0x4e4] ss:$16 sps:$4 sm:$0xff]   ;;  %v12022_v40 = vld [vmem:[%s18090_s1 + $0x4ec] ss:$16 sps:$4 sm:$0xff]  }
  0x63   :  { %6431 = vmatpush1.bf16.msra.mxu0 %v11927_v41  ;;  %7119 = vmatpush1.bf16.msra.mxu1 %v11930_v42  ;;  %v12017_v41 = vld [vmem:[%s18090_s1 + $0x4e0] ss:$16 sps:$4 sm:$0xff]   ;;  %v12020_v42 = vld [vmem:[%s18090_s1 + $0x4e8] ss:$16 sps:$4 sm:$0xff]  }
  0x64   :  { %6432 = vmatprep.subr.bf16.mxu0 %v11935_v43  ;;  %7120 = vmatprep.subr.bf16.mxu1 %v11938_v44  ;;  %v12025_v43 = vld [vmem:[%s18090_s1 + $0x504] ss:$16 sps:$4 sm:$0xff]   ;;  %v12028_v44 = vld [vmem:[%s18090_s1 + $0x50c] ss:$16 sps:$4 sm:$0xff]  }
  0x67   :  { %6433 = vmatpush1.bf16.msra.mxu0 %v11933_v45  ;;  %7121 = vmatpush1.bf16.msra.mxu1 %v11936_v46  ;;  %v12023_v45 = vld [vmem:[%s18090_s1 + $0x500] ss:$16 sps:$4 sm:$0xff]   ;;  %v12026_v46 = vld [vmem:[%s18090_s1 + $0x508] ss:$16 sps:$4 sm:$0xff]  }
  0x68   :  { %6434 = vmatprep.subr.bf16.mxu0 %v11941_v47  ;;  %7122 = vmatprep.subr.bf16.mxu1 %v11944_v48  ;;  %v12031_v47 = vld [vmem:[%s18090_s1 + $0x524] ss:$16 sps:$4 sm:$0xff]   ;;  %v12034_v48 = vld [vmem:[%s18090_s1 + $0x52c] ss:$16 sps:$4 sm:$0xff]  }
  0x6b   :  { %6435 = vmatpush1.bf16.msra.mxu0 %v11939_v49  ;;  %7123 = vmatpush1.bf16.msra.mxu1 %v11942_v50  ;;  %v12029_v49 = vld [vmem:[%s18090_s1 + $0x520] ss:$16 sps:$4 sm:$0xff]   ;;  %v12032_v50 = vld [vmem:[%s18090_s1 + $0x528] ss:$16 sps:$4 sm:$0xff]  }
  0x6c   :  { %6436 = vmatprep.subr.bf16.mxu0 %v11947_v51  ;;  %7124 = vmatprep.subr.bf16.mxu1 %v11950_v52  ;;  %v12037_v51 = vld [vmem:[%s18090_s1 + $0x544] ss:$16 sps:$4 sm:$0xff]   ;;  %v12040_v52 = vld [vmem:[%s18090_s1 + $0x54c] ss:$16 sps:$4 sm:$0xff]  }
  0x6f   :  { %6437 = vmatpush1.bf16.msra.mxu0 %v11945_v53  ;;  %7125 = vmatpush1.bf16.msra.mxu1 %v11948_v54  ;;  %v12035_v53 = vld [vmem:[%s18090_s1 + $0x540] ss:$16 sps:$4 sm:$0xff]   ;;  %v12038_v54 = vld [vmem:[%s18090_s1 + $0x548] ss:$16 sps:$4 sm:$0xff]  }
  0x70   :  { %6438 = vmatprep.subr.bf16.mxu0 %v11953_v55  ;;  %7126 = vmatprep.subr.bf16.mxu1 %v11956_v56  ;;  %v12043_v55 = vld [vmem:[%s18090_s1 + $0x564] ss:$16 sps:$4 sm:$0xff]   ;;  %v12046_v56 = vld [vmem:[%s18090_s1 + $0x56c] ss:$16 sps:$4 sm:$0xff]  }
  0x73   :  { %6439 = vmatpush1.bf16.msra.mxu0 %v11951_v57  ;;  %7127 = vmatpush1.bf16.msra.mxu1 %v11954_v58  ;;  %v12041_v57 = vld [vmem:[%s18090_s1 + $0x560] ss:$16 sps:$4 sm:$0xff]   ;;  %v12044_v58 = vld [vmem:[%s18090_s1 + $0x568] ss:$16 sps:$4 sm:$0xff]  }
  0x74   :  { %6440 = vmatprep.subr.bf16.mxu0 %v11959_v59  ;;  %7128 = vmatprep.subr.bf16.mxu1 %v11962_v60  ;;  %v12049_v59 = vld [vmem:[%s18090_s1 + $0x584] ss:$16 sps:$4 sm:$0xff]   ;;  %v12052_v60 = vld [vmem:[%s18090_s1 + $0x58c] ss:$16 sps:$4 sm:$0xff]  }
  0x77   :  { %6441 = vmatpush1.bf16.msra.mxu0 %v11957_v61  ;;  %7129 = vmatpush1.bf16.msra.mxu1 %v11960_v62  ;;  %v12047_v61 = vld [vmem:[%s18090_s1 + $0x580] ss:$16 sps:$4 sm:$0xff]   ;;  %v12050_v62 = vld [vmem:[%s18090_s1 + $0x588] ss:$16 sps:$4 sm:$0xff]  }
  0x78   :  { %6442 = vmatprep.subr.bf16.mxu0 %v11965_v63  ;;  %7130 = vmatprep.subr.bf16.mxu1 %v11968_v0  ;;  %v12055_v63 = vld [vmem:[%s18090_s1 + $0x5a4] ss:$16 sps:$4 sm:$0xff]   ;;  %v12058_v0 = vld [vmem:[%s18090_s1 + $0x5ac] ss:$16 sps:$4 sm:$0xff]  }
  0x7b   :  { %6443 = vmatpush1.bf16.msra.mxu0 %v11963_v1  ;;  %7131 = vmatpush1.bf16.msra.mxu1 %v11966_v2  ;;  %v12053_v1 = vld [vmem:[%s18090_s1 + $0x5a0] ss:$16 sps:$4 sm:$0xff]   ;;  %v12056_v2 = vld [vmem:[%s18090_s1 + $0x5a8] ss:$16 sps:$4 sm:$0xff]  }
  0x7c   :  { %6444 = vmatprep.subr.bf16.mxu0 %v11971_v3  ;;  %7132 = vmatprep.subr.bf16.mxu1 %v11974_v4  ;;  %v12061_v3 = vld [vmem:[%s18090_s1 + $0x5c4] ss:$16 sps:$4 sm:$0xff]   ;;  %v12064_v4 = vld [vmem:[%s18090_s1 + $0x5cc] ss:$16 sps:$4 sm:$0xff]  }
  0x7f   :  { %6445 = vmatpush1.bf16.msra.mxu0 %v11969_v5  ;;  %7133 = vmatpush1.bf16.msra.mxu1 %v11972_v6  ;;  %v12059_v5 = vld [vmem:[%s18090_s1 + $0x5c0] ss:$16 sps:$4 sm:$0xff]   ;;  %v12062_v6 = vld [vmem:[%s18090_s1 + $0x5c8] ss:$16 sps:$4 sm:$0xff]  }
  0x80   :  { %6457 = vmatprep.subr.bf16.mxu0 %v11977_v7  ;;  %7145 = vmatprep.subr.bf16.mxu1 %v11980_v8  ;;  %v12067_v7 = vld [vmem:[%s18090_s1 + $0x5e4] ss:$16 sps:$4 sm:$0xff]   ;;  %v12070_v8 = vld [vmem:[%s18090_s1 + $0x5ec] ss:$16 sps:$4 sm:$0xff]  }
  0x82   :  { %6447 = vmatmul.mubr.bf16.vlgmr.msra.gmra.mrb[0].mxu0 %v10278_v9  ;;  %7135 = vmatmul.mubr.bf16.vlgmr.msra.gmra.mrb[0].mxu1 %v10278_v9  ;;  %v12065_v9 = vld [vmem:[%s18090_s1 + $0x5e0] ss:$16 sps:$4 sm:$0xff]  }
  0x83   :  { %6458 = vmatpush1.bf16.msra.mxu0 %v11975_v10  ;;  %7146 = vmatpush1.bf16.msra.mxu1 %v11978_v11  ;;  %v12068_v10 = vld [vmem:[%s18090_s1 + $0x5e8] ss:$16 sps:$4 sm:$0xff]   ;;  %v12073_v11 = vld [vmem:[%s18090_s1 + $0x604] ss:$16 sps:$4 sm:$0xff]  }
  0x84   :  { %6459 = vmatprep.subr.bf16.mxu0 %v11983_v12  ;;  %7147 = vmatprep.subr.bf16.mxu1 %v11986_v13  ;;  %v12076_v12 = vld [vmem:[%s18090_s1 + $0x60c] ss:$16 sps:$4 sm:$0xff]   ;;  %v12071_v13 = vld [vmem:[%s18090_s1 + $0x600] ss:$16 sps:$4 sm:$0xff]  }
  0x85   :  { %6489 = vmatprep.mubr.bf16.mxu0 %v10281_v16  ;;  %7177 = vmatprep.mubr.bf16.mxu1 %v10281_v16  ;;  %v12074_v16 = vld [vmem:[%s18090_s1 + $0x608] ss:$16 sps:$4 sm:$0xff]  }
  0x87   :  { %6460 = vmatpush1.bf16.msra.mxu0 %v11981_v17  ;;  %7148 = vmatpush1.bf16.msra.mxu1 %v11984_v18  ;;  %v10280_v17 = vcombine.low %v14210_v14, %v14215_v15  ;;  %v14410_v18 = vld [vmem:[%s18091_s0 + $0x18] sm:$0xff] }
  0x88   :  { %6461 = vmatprep.subr.bf16.mxu0 %v11989_v19  ;;  %7149 = vmatprep.subr.bf16.mxu1 %v11992_v20  ;;  %v14415_v19 = vld [vmem:[%s18091_s0 + $0x98] sm:$0xff]  ;;  %v12079_v20 = vld [vmem:[%s18090_s1 + $0x624] ss:$16 sps:$4 sm:$0xff]  }
  0x89   :  { %v12082_v14 = vld [vmem:[%s18090_s1 + $0x62c] ss:$16 sps:$4 sm:$0xff]   ;;  %v10283_v15 = vcombine.high %v14410_v18, %v14415_v19 }
  0x8b   :  { %6462 = vmatpush1.bf16.msra.mxu0 %v11987_v21  ;;  %7150 = vmatpush1.bf16.msra.mxu1 %v11990_v22  ;;  %v12077_v21 = vld [vmem:[%s18090_s1 + $0x620] ss:$16 sps:$4 sm:$0xff]   ;;  %v12080_v22 = vld [vmem:[%s18090_s1 + $0x628] ss:$16 sps:$4 sm:$0xff]  }
  0x8c   :  { %6463 = vmatprep.subr.bf16.mxu0 %v11995_v23  ;;  %7151 = vmatprep.subr.bf16.mxu1 %v11998_v24  ;;  %v12085_v23 = vld [vmem:[%s18090_s1 + $0x644] ss:$16 sps:$4 sm:$0xff]   ;;  %v12088_v24 = vld [vmem:[%s18090_s1 + $0x64c] ss:$16 sps:$4 sm:$0xff]  }
  0x8f   :  { %6464 = vmatpush1.bf16.msra.mxu0 %v11993_v25  ;;  %7152 = vmatpush1.bf16.msra.mxu1 %v11996_v26  ;;  %v12083_v25 = vld [vmem:[%s18090_s1 + $0x640] ss:$16 sps:$4 sm:$0xff]   ;;  %v12086_v26 = vld [vmem:[%s18090_s1 + $0x648] ss:$16 sps:$4 sm:$0xff]  }
  0x90   :  { %6465 = vmatprep.subr.bf16.mxu0 %v12001_v27  ;;  %7153 = vmatprep.subr.bf16.mxu1 %v12004_v28  ;;  %v12091_v27 = vld [vmem:[%s18090_s1 + $0x664] ss:$16 sps:$4 sm:$0xff]   ;;  %v12094_v28 = vld [vmem:[%s18090_s1 + $0x66c] ss:$16 sps:$4 sm:$0xff]  }
  0x93   :  { %6466 = vmatpush1.bf16.msra.mxu0 %v11999_v29  ;;  %7154 = vmatpush1.bf16.msra.mxu1 %v12002_v30  ;;  %v12089_v29 = vld [vmem:[%s18090_s1 + $0x660] ss:$16 sps:$4 sm:$0xff]   ;;  %v12092_v30 = vld [vmem:[%s18090_s1 + $0x668] ss:$16 sps:$4 sm:$0xff]  }
  0x94   :  { %6467 = vmatprep.subr.bf16.mxu0 %v12007_v31  ;;  %7155 = vmatprep.subr.bf16.mxu1 %v12010_v32  ;;  %v12097_v31 = vld [vmem:[%s18090_s1 + $0x684] ss:$16 sps:$4 sm:$0xff]   ;;  %v12100_v32 = vld [vmem:[%s18090_s1 + $0x68c] ss:$16 sps:$4 sm:$0xff]  }
  0x97   :  { %6468 = vmatpush1.bf16.msra.mxu0 %v12005_v33  ;;  %7156 = vmatpush1.bf16.msra.mxu1 %v12008_v34  ;;  %v12095_v33 = vld [vmem:[%s18090_s1 + $0x680] ss:$16 sps:$4 sm:$0xff]   ;;  %v12098_v34 = vld [vmem:[%s18090_s1 + $0x688] ss:$16 sps:$4 sm:$0xff]  }
  0x98   :  { %6469 = vmatprep.subr.bf16.mxu0 %v12013_v35  ;;  %7157 = vmatprep.subr.bf16.mxu1 %v12016_v36  ;;  %v12103_v35 = vld [vmem:[%s18090_s1 + $0x6a4] ss:$16 sps:$4 sm:$0xff]   ;;  %v12106_v36 = vld [vmem:[%s18090_s1 + $0x6ac] ss:$16 sps:$4 sm:$0xff]  }
  0x9b   :  { %6470 = vmatpush1.bf16.msra.mxu0 %v12011_v37  ;;  %7158 = vmatpush1.bf16.msra.mxu1 %v12014_v38  ;;  %v12101_v37 = vld [vmem:[%s18090_s1 + $0x6a0] ss:$16 sps:$4 sm:$0xff]   ;;  %v12104_v38 = vld [vmem:[%s18090_s1 + $0x6a8] ss:$16 sps:$4 sm:$0xff]  }
  0x9c   :  { %6471 = vmatprep.subr.bf16.mxu0 %v12019_v39  ;;  %7159 = vmatprep.subr.bf16.mxu1 %v12022_v40  ;;  %v12109_v39 = vld [vmem:[%s18090_s1 + $0x6c4] ss:$16 sps:$4 sm:$0xff]   ;;  %v12112_v40 = vld [vmem:[%s18090_s1 + $0x6cc] ss:$16 sps:$4 sm:$0xff]  }
  0x9f   :  { %6472 = vmatpush1.bf16.msra.mxu0 %v12017_v41  ;;  %7160 = vmatpush1.bf16.msra.mxu1 %v12020_v42  ;;  %v12107_v41 = vld [vmem:[%s18090_s1 + $0x6c0] ss:$16 sps:$4 sm:$0xff]   ;;  %v12110_v42 = vld [vmem:[%s18090_s1 + $0x6c8] ss:$16 sps:$4 sm:$0xff]  }
  0xa0   :  { %6473 = vmatprep.subr.bf16.mxu0 %v12025_v43  ;;  %7161 = vmatprep.subr.bf16.mxu1 %v12028_v44  ;;  %v12115_v43 = vld [vmem:[%s18090_s1 + $0x6e4] ss:$16 sps:$4 sm:$0xff]   ;;  %v12118_v44 = vld [vmem:[%s18090_s1 + $0x6ec] ss:$16 sps:$4 sm:$0xff]  }
  0xa3   :  { %6474 = vmatpush1.bf16.msra.mxu0 %v12023_v45  ;;  %7162 = vmatpush1.bf16.msra.mxu1 %v12026_v46  ;;  %v12113_v45 = vld [vmem:[%s18090_s1 + $0x6e0] ss:$16 sps:$4 sm:$0xff]   ;;  %v12116_v46 = vld [vmem:[%s18090_s1 + $0x6e8] ss:$16 sps:$4 sm:$0xff]  }
  0xa4   :  { %6475 = vmatprep.subr.bf16.mxu0 %v12031_v47  ;;  %7163 = vmatprep.subr.bf16.mxu1 %v12034_v48  ;;  %v12121_v47 = vld [vmem:[%s18090_s1 + $0x704] ss:$16 sps:$4 sm:$0xff]   ;;  %v12124_v48 = vld [vmem:[%s18090_s1 + $0x70c] ss:$16 sps:$4 sm:$0xff]  }
  0xa7   :  { %6476 = vmatpush1.bf16.msra.mxu0 %v12029_v49  ;;  %7164 = vmatpush1.bf16.msra.mxu1 %v12032_v50  ;;  %v12119_v49 = vld [vmem:[%s18090_s1 + $0x700] ss:$16 sps:$4 sm:$0xff]   ;;  %v12122_v50 = vld [vmem:[%s18090_s1 + $0x708] ss:$16 sps:$4 sm:$0xff]  }
  0xa8   :  { %6477 = vmatprep.subr.bf16.mxu0 %v12037_v51  ;;  %7165 = vmatprep.subr.bf16.mxu1 %v12040_v52  ;;  %v12127_v51 = vld [vmem:[%s18090_s1 + $0x724] ss:$16 sps:$4 sm:$0xff]   ;;  %v12130_v52 = vld [vmem:[%s18090_s1 + $0x72c] ss:$16 sps:$4 sm:$0xff]  }
  0xab   :  { %6478 = vmatpush1.bf16.msra.mxu0 %v12035_v53  ;;  %7166 = vmatpush1.bf16.msra.mxu1 %v12038_v54  ;;  %v12125_v53 = vld [vmem:[%s18090_s1 + $0x720] ss:$16 sps:$4 sm:$0xff]   ;;  %v12128_v54 = vld [vmem:[%s18090_s1 + $0x728] ss:$16 sps:$4 sm:$0xff]  }
  0xac   :  { %6479 = vmatprep.subr.bf16.mxu0 %v12043_v55  ;;  %7167 = vmatprep.subr.bf16.mxu1 %v12046_v56  ;;  %v12133_v55 = vld [vmem:[%s18090_s1 + $0x744] ss:$16 sps:$4 sm:$0xff]   ;;  %v12136_v56 = vld [vmem:[%s18090_s1 + $0x74c] ss:$16 sps:$4 sm:$0xff]  }
  0xaf   :  { %6480 = vmatpush1.bf16.msra.mxu0 %v12041_v57  ;;  %7168 = vmatpush1.bf16.msra.mxu1 %v12044_v58  ;;  %v12131_v57 = vld [vmem:[%s18090_s1 + $0x740] ss:$16 sps:$4 sm:$0xff]   ;;  %v12134_v58 = vld [vmem:[%s18090_s1 + $0x748] ss:$16 sps:$4 sm:$0xff]  }
  0xb0   :  { %6481 = vmatprep.subr.bf16.mxu0 %v12049_v59  ;;  %7169 = vmatprep.subr.bf16.mxu1 %v12052_v60  ;;  %v12139_v59 = vld [vmem:[%s18090_s1 + $0x764] ss:$16 sps:$4 sm:$0xff]   ;;  %v12142_v60 = vld [vmem:[%s18090_s1 + $0x76c] ss:$16 sps:$4 sm:$0xff]  }
  0xb3   :  { %6482 = vmatpush1.bf16.msra.mxu0 %v12047_v61  ;;  %7170 = vmatpush1.bf16.msra.mxu1 %v12050_v62  ;;  %v12137_v61 = vld [vmem:[%s18090_s1 + $0x760] ss:$16 sps:$4 sm:$0xff]   ;;  %v12140_v62 = vld [vmem:[%s18090_s1 + $0x768] ss:$16 sps:$4 sm:$0xff]  }
  0xb4   :  { %6483 = vmatprep.subr.bf16.mxu0 %v12055_v63  ;;  %7171 = vmatprep.subr.bf16.mxu1 %v12058_v0  ;;  %v12145_v63 = vld [vmem:[%s18090_s1 + $0x784] ss:$16 sps:$4 sm:$0xff]   ;;  %v12148_v0 = vld [vmem:[%s18090_s1 + $0x78c] ss:$16 sps:$4 sm:$0xff]  }
  0xb7   :  { %6484 = vmatpush1.bf16.msra.mxu0 %v12053_v1  ;;  %7172 = vmatpush1.bf16.msra.mxu1 %v12056_v2  ;;  %v12143_v1 = vld [vmem:[%s18090_s1 + $0x780] ss:$16 sps:$4 sm:$0xff]   ;;  %v12146_v2 = vld [vmem:[%s18090_s1 + $0x788] ss:$16 sps:$4 sm:$0xff]  }
  0xb8   :  { %6485 = vmatprep.subr.bf16.mxu0 %v12061_v3  ;;  %7173 = vmatprep.subr.bf16.mxu1 %v12064_v4  ;;  %v12151_v3 = vld [vmem:[%s18090_s1 + $0x7a4] ss:$16 sps:$4 sm:$0xff]   ;;  %v12154_v4 = vld [vmem:[%s18090_s1 + $0x7ac] ss:$16 sps:$4 sm:$0xff]  }
  0xbb   :  { %6486 = vmatpush1.bf16.msra.mxu0 %v12059_v5  ;;  %7174 = vmatpush1.bf16.msra.mxu1 %v12062_v6  ;;  %v12149_v5 = vld [vmem:[%s18090_s1 + $0x7a0] ss:$16 sps:$4 sm:$0xff]   ;;  %v12152_v6 = vld [vmem:[%s18090_s1 + $0x7a8] ss:$16 sps:$4 sm:$0xff]  }
  0xbc   :  { %6487 = vmatprep.subr.bf16.mxu0 %v12067_v7  ;;  %7175 = vmatprep.subr.bf16.mxu1 %v12070_v8  ;;  %v12157_v7 = vld [vmem:[%s18090_s1 + $0x7c4] ss:$16 sps:$4 sm:$0xff]   ;;  %v12160_v8 = vld [vmem:[%s18090_s1 + $0x7cc] ss:$16 sps:$4 sm:$0xff]  }
  0xbf   :  { %6488 = vmatpush1.bf16.msra.mxu0 %v12065_v9  ;;  %7176 = vmatpush1.bf16.msra.mxu1 %v12068_v10  ;;  %v12155_v9 = vld [vmem:[%s18090_s1 + $0x7c0] ss:$16 sps:$4 sm:$0xff]   ;;  %v12158_v10 = vld [vmem:[%s18090_s1 + $0x7c8] ss:$16 sps:$4 sm:$0xff]  }
  0xc0   :  { %6500 = vmatprep.subr.bf16.mxu0 %v12073_v11  ;;  %7188 = vmatprep.subr.bf16.mxu1 %v12076_v12  ;;  %v12163_v11 = vld [vmem:[%s18090_s1 + $0x7e4] ss:$16 sps:$4 sm:$0xff]   ;;  %v12166_v12 = vld [vmem:[%s18090_s1 + $0x7ec] ss:$16 sps:$4 sm:$0xff]  }
  0xc2   :  { %6490 = vmatmul.mubr.bf16.vlgmr.msra.gmra.mrb[0].mxu0 %v10280_v17  ;;  %7178 = vmatmul.mubr.bf16.vlgmr.msra.gmra.mrb[0].mxu1 %v10280_v17  ;;  %v12169_v17 = vld [vmem:[%s18090_s1 + $0x804] ss:$16 sps:$4 sm:$0xff]  }
  0xc3   :  { %6501 = vmatpush1.bf16.msra.mxu0 %v12071_v13  ;;  %7189 = vmatpush1.bf16.msra.mxu1 %v12074_v16  ;;  %v12161_v13 = vld [vmem:[%s18090_s1 + $0x7e0] ss:$16 sps:$4 sm:$0xff]   ;;  %v12164_v16 = vld [vmem:[%s18090_s1 + $0x7e8] ss:$16 sps:$4 sm:$0xff]  }
  0xc4   :  { %6502 = vmatprep.subr.bf16.mxu0 %v12079_v20  ;;  %7190 = vmatprep.subr.bf16.mxu1 %v12082_v14  ;;  %v12172_v20 = vld [vmem:[%s18090_s1 + $0x80c] ss:$16 sps:$4 sm:$0xff]   ;;  %v14608_v14 = vld [vmem:[%s18091_s0 + $0x20] sm:$0xff] }
  0xc5   :  { %6532 = vmatprep.mubr.bf16.mxu0 %v10283_v15  ;;  %7220 = vmatprep.mubr.bf16.mxu1 %v10283_v15  ;;  %v10282_v15 = vcombine.low %v14410_v18, %v14415_v19  ;;  %v12175_v18 = vld [vmem:[%s18090_s1 + $0x824] ss:$16 sps:$4 sm:$0xff]   ;;  %v12178_v19 = vld [vmem:[%s18090_s1 + $0x82c] ss:$16 sps:$4 sm:$0xff]  }
  0xc7   :  { %6503 = vmatpush1.bf16.msra.mxu0 %v12077_v21  ;;  %7191 = vmatpush1.bf16.msra.mxu1 %v12080_v22  ;;  %v14615_v21 = vld [vmem:[%s18091_s0 + $0xa0] sm:$0xff] }
  0xc8   :  { %6504 = vmatprep.subr.bf16.mxu0 %v12085_v23  ;;  %7192 = vmatprep.subr.bf16.mxu1 %v12088_v24  ;;  %v12167_v22 = vld [vmem:[%s18090_s1 + $0x800] ss:$16 sps:$4 sm:$0xff]   ;;  %v12170_v23 = vld [vmem:[%s18090_s1 + $0x808] ss:$16 sps:$4 sm:$0xff]   ;;  %v10285_v24 = vcombine.high %v14608_v14, %v14615_v21 }
  0xcb   :  { %6505 = vmatpush1.bf16.msra.mxu0 %v12083_v25  ;;  %7193 = vmatpush1.bf16.msra.mxu1 %v12086_v26  ;;  %v12173_v25 = vld [vmem:[%s18090_s1 + $0x820] ss:$16 sps:$4 sm:$0xff]   ;;  %v12176_v26 = vld [vmem:[%s18090_s1 + $0x828] ss:$16 sps:$4 sm:$0xff]  }
  0xcc   :  { %6506 = vmatprep.subr.bf16.mxu0 %v12091_v27  ;;  %7194 = vmatprep.subr.bf16.mxu1 %v12094_v28  ;;  %v12181_v27 = vld [vmem:[%s18090_s1 + $0x844] ss:$16 sps:$4 sm:$0xff]   ;;  %v12184_v28 = vld [vmem:[%s18090_s1 + $0x84c] ss:$16 sps:$4 sm:$0xff]  }
  0xcf   :  { %6507 = vmatpush1.bf16.msra.mxu0 %v12089_v29  ;;  %7195 = vmatpush1.bf16.msra.mxu1 %v12092_v30  ;;  %v12179_v29 = vld [vmem:[%s18090_s1 + $0x840] ss:$16 sps:$4 sm:$0xff]   ;;  %v12182_v30 = vld [vmem:[%s18090_s1 + $0x848] ss:$16 sps:$4 sm:$0xff]  }
  0xd0   :  { %6508 = vmatprep.subr.bf16.mxu0 %v12097_v31  ;;  %7196 = vmatprep.subr.bf16.mxu1 %v12100_v32  ;;  %v12187_v31 = vld [vmem:[%s18090_s1 + $0x864] ss:$16 sps:$4 sm:$0xff]   ;;  %v12190_v32 = vld [vmem:[%s18090_s1 + $0x86c] ss:$16 sps:$4 sm:$0xff]  }
  0xd3   :  { %6509 = vmatpush1.bf16.msra.mxu0 %v12095_v33  ;;  %7197 = vmatpush1.bf16.msra.mxu1 %v12098_v34  ;;  %v12185_v33 = vld [vmem:[%s18090_s1 + $0x860] ss:$16 sps:$4 sm:$0xff]   ;;  %v12188_v34 = vld [vmem:[%s18090_s1 + $0x868] ss:$16 sps:$4 sm:$0xff]  }
  0xd4   :  { %6510 = vmatprep.subr.bf16.mxu0 %v12103_v35  ;;  %7198 = vmatprep.subr.bf16.mxu1 %v12106_v36  ;;  %v12193_v35 = vld [vmem:[%s18090_s1 + $0x884] ss:$16 sps:$4 sm:$0xff]   ;;  %v12196_v36 = vld [vmem:[%s18090_s1 + $0x88c] ss:$16 sps:$4 sm:$0xff]  }
  0xd7   :  { %6511 = vmatpush1.bf16.msra.mxu0 %v12101_v37  ;;  %7199 = vmatpush1.bf16.msra.mxu1 %v12104_v38  ;;  %v12191_v37 = vld [vmem:[%s18090_s1 + $0x880] ss:$16 sps:$4 sm:$0xff]   ;;  %v12194_v38 = vld [vmem:[%s18090_s1 + $0x888] ss:$16 sps:$4 sm:$0xff]  }
  0xd8   :  { %6512 = vmatprep.subr.bf16.mxu0 %v12109_v39  ;;  %7200 = vmatprep.subr.bf16.mxu1 %v12112_v40  ;;  %v12199_v39 = vld [vmem:[%s18090_s1 + $0x8a4] ss:$16 sps:$4 sm:$0xff]   ;;  %v12202_v40 = vld [vmem:[%s18090_s1 + $0x8ac] ss:$16 sps:$4 sm:$0xff]  }
  0xdb   :  { %6513 = vmatpush1.bf16.msra.mxu0 %v12107_v41  ;;  %7201 = vmatpush1.bf16.msra.mxu1 %v12110_v42  ;;  %v12197_v41 = vld [vmem:[%s18090_s1 + $0x8a0] ss:$16 sps:$4 sm:$0xff]   ;;  %v12200_v42 = vld [vmem:[%s18090_s1 + $0x8a8] ss:$16 sps:$4 sm:$0xff]  }
  0xdc   :  { %6514 = vmatprep.subr.bf16.mxu0 %v12115_v43  ;;  %7202 = vmatprep.subr.bf16.mxu1 %v12118_v44  ;;  %v12205_v43 = vld [vmem:[%s18090_s1 + $0x8c4] ss:$16 sps:$4 sm:$0xff]   ;;  %v12208_v44 = vld [vmem:[%s18090_s1 + $0x8cc] ss:$16 sps:$4 sm:$0xff]  }
  0xdf   :  { %6515 = vmatpush1.bf16.msra.mxu0 %v12113_v45  ;;  %7203 = vmatpush1.bf16.msra.mxu1 %v12116_v46  ;;  %v12203_v45 = vld [vmem:[%s18090_s1 + $0x8c0] ss:$16 sps:$4 sm:$0xff]   ;;  %v12206_v46 = vld [vmem:[%s18090_s1 + $0x8c8] ss:$16 sps:$4 sm:$0xff]  }
  0xe0   :  { %6516 = vmatprep.subr.bf16.mxu0 %v12121_v47  ;;  %7204 = vmatprep.subr.bf16.mxu1 %v12124_v48  ;;  %v12211_v47 = vld [vmem:[%s18090_s1 + $0x8e4] ss:$16 sps:$4 sm:$0xff]   ;;  %v12214_v48 = vld [vmem:[%s18090_s1 + $0x8ec] ss:$16 sps:$4 sm:$0xff]  }
  0xe3   :  { %6517 = vmatpush1.bf16.msra.mxu0 %v12119_v49  ;;  %7205 = vmatpush1.bf16.msra.mxu1 %v12122_v50  ;;  %v12209_v49 = vld [vmem:[%s18090_s1 + $0x8e0] ss:$16 sps:$4 sm:$0xff]   ;;  %v12212_v50 = vld [vmem:[%s18090_s1 + $0x8e8] ss:$16 sps:$4 sm:$0xff]  }
  0xe4   :  { %6518 = vmatprep.subr.bf16.mxu0 %v12127_v51  ;;  %7206 = vmatprep.subr.bf16.mxu1 %v12130_v52  ;;  %v12217_v51 = vld [vmem:[%s18090_s1 + $0x904] ss:$16 sps:$4 sm:$0xff]   ;;  %v12220_v52 = vld [vmem:[%s18090_s1 + $0x90c] ss:$16 sps:$4 sm:$0xff]  }
  0xe7   :  { %6519 = vmatpush1.bf16.msra.mxu0 %v12125_v53  ;;  %7207 = vmatpush1.bf16.msra.mxu1 %v12128_v54  ;;  %v12215_v53 = vld [vmem:[%s18090_s1 + $0x900] ss:$16 sps:$4 sm:$0xff]   ;;  %v12218_v54 = vld [vmem:[%s18090_s1 + $0x908] ss:$16 sps:$4 sm:$0xff]  }
  0xe8   :  { %6520 = vmatprep.subr.bf16.mxu0 %v12133_v55  ;;  %7208 = vmatprep.subr.bf16.mxu1 %v12136_v56  ;;  %v12223_v55 = vld [vmem:[%s18090_s1 + $0x924] ss:$16 sps:$4 sm:$0xff]   ;;  %v12226_v56 = vld [vmem:[%s18090_s1 + $0x92c] ss:$16 sps:$4 sm:$0xff]  }
  0xeb   :  { %6521 = vmatpush1.bf16.msra.mxu0 %v12131_v57  ;;  %7209 = vmatpush1.bf16.msra.mxu1 %v12134_v58  ;;  %v12221_v57 = vld [vmem:[%s18090_s1 + $0x920] ss:$16 sps:$4 sm:$0xff]   ;;  %v12224_v58 = vld [vmem:[%s18090_s1 + $0x928] ss:$16 sps:$4 sm:$0xff]  }
  0xec   :  { %6522 = vmatprep.subr.bf16.mxu0 %v12139_v59  ;;  %7210 = vmatprep.subr.bf16.mxu1 %v12142_v60  ;;  %v12229_v59 = vld [vmem:[%s18090_s1 + $0x944] ss:$16 sps:$4 sm:$0xff]   ;;  %v12232_v60 = vld [vmem:[%s18090_s1 + $0x94c] ss:$16 sps:$4 sm:$0xff]  }
  0xef   :  { %6523 = vmatpush1.bf16.msra.mxu0 %v12137_v61  ;;  %7211 = vmatpush1.bf16.msra.mxu1 %v12140_v62  ;;  %v12227_v61 = vld [vmem:[%s18090_s1 + $0x940] ss:$16 sps:$4 sm:$0xff]   ;;  %v12230_v62 = vld [vmem:[%s18090_s1 + $0x948] ss:$16 sps:$4 sm:$0xff]  }
  0xf0   :  { %6524 = vmatprep.subr.bf16.mxu0 %v12145_v63  ;;  %7212 = vmatprep.subr.bf16.mxu1 %v12148_v0  ;;  %v12235_v63 = vld [vmem:[%s18090_s1 + $0x964] ss:$16 sps:$4 sm:$0xff]   ;;  %v12238_v0 = vld [vmem:[%s18090_s1 + $0x96c] ss:$16 sps:$4 sm:$0xff]  }
  0xf3   :  { %6525 = vmatpush1.bf16.msra.mxu0 %v12143_v1  ;;  %7213 = vmatpush1.bf16.msra.mxu1 %v12146_v2  ;;  %v12233_v1 = vld [vmem:[%s18090_s1 + $0x960] ss:$16 sps:$4 sm:$0xff]   ;;  %v12236_v2 = vld [vmem:[%s18090_s1 + $0x968] ss:$16 sps:$4 sm:$0xff]  }
  0xf4   :  { %6526 = vmatprep.subr.bf16.mxu0 %v12151_v3  ;;  %7214 = vmatprep.subr.bf16.mxu1 %v12154_v4  ;;  %v12241_v3 = vld [vmem:[%s18090_s1 + $0x984] ss:$16 sps:$4 sm:$0xff]   ;;  %v12244_v4 = vld [vmem:[%s18090_s1 + $0x98c] ss:$16 sps:$4 sm:$0xff]  }
  0xf7   :  { %6527 = vmatpush1.bf16.msra.mxu0 %v12149_v5  ;;  %7215 = vmatpush1.bf16.msra.mxu1 %v12152_v6  ;;  %v12239_v5 = vld [vmem:[%s18090_s1 + $0x980] ss:$16 sps:$4 sm:$0xff]   ;;  %v12242_v6 = vld [vmem:[%s18090_s1 + $0x988] ss:$16 sps:$4 sm:$0xff]  }
  0xf8   :  { %6528 = vmatprep.subr.bf16.mxu0 %v12157_v7  ;;  %7216 = vmatprep.subr.bf16.mxu1 %v12160_v8  ;;  %v12247_v7 = vld [vmem:[%s18090_s1 + $0x9a4] ss:$16 sps:$4 sm:$0xff]   ;;  %v12250_v8 = vld [vmem:[%s18090_s1 + $0x9ac] ss:$16 sps:$4 sm:$0xff]  }
  0xfb   :  { %6529 = vmatpush1.bf16.msra.mxu0 %v12155_v9  ;;  %7217 = vmatpush1.bf16.msra.mxu1 %v12158_v10  ;;  %v12245_v9 = vld [vmem:[%s18090_s1 + $0x9a0] ss:$16 sps:$4 sm:$0xff]   ;;  %v12248_v10 = vld [vmem:[%s18090_s1 + $0x9a8] ss:$16 sps:$4 sm:$0xff]  }
  0xfc   :  { %6530 = vmatprep.subr.bf16.mxu0 %v12163_v11  ;;  %7218 = vmatprep.subr.bf16.mxu1 %v12166_v12  ;;  %v12253_v11 = vld [vmem:[%s18090_s1 + $0x9c4] ss:$16 sps:$4 sm:$0xff]   ;;  %v12256_v12 = vld [vmem:[%s18090_s1 + $0x9cc] ss:$16 sps:$4 sm:$0xff]  }
  0xff   :  { %6531 = vmatpush1.bf16.msra.mxu0 %v12161_v13  ;;  %7219 = vmatpush1.bf16.msra.mxu1 %v12164_v16  ;;  %v12251_v13 = vld [vmem:[%s18090_s1 + $0x9c0] ss:$16 sps:$4 sm:$0xff]   ;;  %v12254_v16 = vld [vmem:[%s18090_s1 + $0x9c8] ss:$16 sps:$4 sm:$0xff]  }
 0x100   :  { %6543 = vmatprep.subr.bf16.mxu0 %v12169_v17  ;;  %7231 = vmatprep.subr.bf16.mxu1 %v12172_v20  ;;  %v12259_v17 = vld [vmem:[%s18090_s1 + $0x9e4] ss:$16 sps:$4 sm:$0xff]   ;;  %v12262_v20 = vld [vmem:[%s18090_s1 + $0x9ec] ss:$16 sps:$4 sm:$0xff]  }
 0x102   :  { %6533 = vmatmul.mubr.bf16.vlgmr.msra.gmra.mrb[0].mxu0 %v10282_v15  ;;  %7221 = vmatmul.mubr.bf16.vlgmr.msra.gmra.mrb[0].mxu1 %v10282_v15  ;;  %v12257_v15 = vld [vmem:[%s18090_s1 + $0x9e0] ss:$16 sps:$4 sm:$0xff]  }
 0x103   :  { %6544 = vmatpush1.bf16.msra.mxu0 %v12167_v22  ;;  %7232 = vmatpush1.bf16.msra.mxu1 %v12170_v23  ;;  %v12260_v22 = vld [vmem:[%s18090_s1 + $0x9e8] ss:$16 sps:$4 sm:$0xff]   ;;  %v12265_v23 = vld [vmem:[%s18090_s1 + $0xa04] ss:$16 sps:$4 sm:$0xff]  }
 0x104   :  { %6545 = vmatprep.subr.bf16.mxu0 %v12175_v18  ;;  %7233 = vmatprep.subr.bf16.mxu1 %v12178_v19  ;;  %v12268_v18 = vld [vmem:[%s18090_s1 + $0xa0c] ss:$16 sps:$4 sm:$0xff]  }
 0x105   :  { %6575 = vmatprep.mubr.bf16.mxu0 %v10285_v24  ;;  %7263 = vmatprep.mubr.bf16.mxu1 %v10285_v24  ;;  %v14814_v19 = vld [vmem:[%s18091_s0 + $0x28] sm:$0xff] }
 0x106   :  { %v14819_v24 = vld [vmem:[%s18091_s0 + $0xa8] sm:$0xff] }
 0x107   :  { %6546 = vmatpush1.bf16.msra.mxu0 %v12173_v25  ;;  %7234 = vmatpush1.bf16.msra.mxu1 %v12176_v26  ;;  %v10284_v25 = vcombine.low %v14608_v14, %v14615_v21  ;;  %v12263_v26 = vld [vmem:[%s18090_s1 + $0xa00] ss:$16 sps:$4 sm:$0xff]   ;;  %v12274_v14 = vld [vmem:[%s18090_s1 + $0xa2c] ss:$16 sps:$4 sm:$0xff]   ;;  %v10287_v21 = vcombine.high %v14814_v19, %v14819_v24 }
 0x108   :  { %6547 = vmatprep.subr.bf16.mxu0 %v12181_v27  ;;  %7235 = vmatprep.subr.bf16.mxu1 %v12184_v28  ;;  %v12266_v27 = vld [vmem:[%s18090_s1 + $0xa08] ss:$16 sps:$4 sm:$0xff]   ;;  %v12271_v28 = vld [vmem:[%s18090_s1 + $0xa24] ss:$16 sps:$4 sm:$0xff]  }
 0x10b   :  { %6548 = vmatpush1.bf16.msra.mxu0 %v12179_v29  ;;  %7236 = vmatpush1.bf16.msra.mxu1 %v12182_v30  ;;  %v12269_v29 = vld [vmem:[%s18090_s1 + $0xa20] ss:$16 sps:$4 sm:$0xff]   ;;  %v12272_v30 = vld [vmem:[%s18090_s1 + $0xa28] ss:$16 sps:$4 sm:$0xff]  }
 0x10c   :  { %6549 = vmatprep.subr.bf16.mxu0 %v12187_v31  ;;  %7237 = vmatprep.subr.bf16.mxu1 %v12190_v32  ;;  %v12277_v31 = vld [vmem:[%s18090_s1 + $0xa44] ss:$16 sps:$4 sm:$0xff]   ;;  %v12280_v32 = vld [vmem:[%s18090_s1 + $0xa4c] ss:$16 sps:$4 sm:$0xff]  }
 0x10f   :  { %6550 = vmatpush1.bf16.msra.mxu0 %v12185_v33  ;;  %7238 = vmatpush1.bf16.msra.mxu1 %v12188_v34  ;;  %v12275_v33 = vld [vmem:[%s18090_s1 + $0xa40] ss:$16 sps:$4 sm:$0xff]   ;;  %v12278_v34 = vld [vmem:[%s18090_s1 + $0xa48] ss:$16 sps:$4 sm:$0xff]  }
 0x110   :  { %6551 = vmatprep.subr.bf16.mxu0 %v12193_v35  ;;  %7239 = vmatprep.subr.bf16.mxu1 %v12196_v36  ;;  %v12283_v35 = vld [vmem:[%s18090_s1 + $0xa64] ss:$16 sps:$4 sm:$0xff]   ;;  %v12286_v36 = vld [vmem:[%s18090_s1 + $0xa6c] ss:$16 sps:$4 sm:$0xff]  }
 0x113   :  { %6552 = vmatpush1.bf16.msra.mxu0 %v12191_v37  ;;  %7240 = vmatpush1.bf16.msra.mxu1 %v12194_v38  ;;  %v12281_v37 = vld [vmem:[%s18090_s1 + $0xa60] ss:$16 sps:$4 sm:$0xff]   ;;  %v12284_v38 = vld [vmem:[%s18090_s1 + $0xa68] ss:$16 sps:$4 sm:$0xff]  }
 0x114   :  { %6553 = vmatprep.subr.bf16.mxu0 %v12199_v39  ;;  %7241 = vmatprep.subr.bf16.mxu1 %v12202_v40  ;;  %v12289_v39 = vld [vmem:[%s18090_s1 + $0xa84] ss:$16 sps:$4 sm:$0xff]   ;;  %v12292_v40 = vld [vmem:[%s18090_s1 + $0xa8c] ss:$16 sps:$4 sm:$0xff]  }
 0x117   :  { %6554 = vmatpush1.bf16.msra.mxu0 %v12197_v41  ;;  %7242 = vmatpush1.bf16.msra.mxu1 %v12200_v42  ;;  %v12287_v41 = vld [vmem:[%s18090_s1 + $0xa80] ss:$16 sps:$4 sm:$0xff]   ;;  %v12290_v42 = vld [vmem:[%s18090_s1 + $0xa88] ss:$16 sps:$4 sm:$0xff]  }
 0x118   :  { %6555 = vmatprep.subr.bf16.mxu0 %v12205_v43  ;;  %7243 = vmatprep.subr.bf16.mxu1 %v12208_v44  ;;  %v12295_v43 = vld [vmem:[%s18090_s1 + $0xaa4] ss:$16 sps:$4 sm:$0xff]   ;;  %v12298_v44 = vld [vmem:[%s18090_s1 + $0xaac] ss:$16 sps:$4 sm:$0xff]  }
 0x11b   :  { %6556 = vmatpush1.bf16.msra.mxu0 %v12203_v45  ;;  %7244 = vmatpush1.bf16.msra.mxu1 %v12206_v46  ;;  %v12293_v45 = vld [vmem:[%s18090_s1 + $0xaa0] ss:$16 sps:$4 sm:$0xff]   ;;  %v12296_v46 = vld [vmem:[%s18090_s1 + $0xaa8] ss:$16 sps:$4 sm:$0xff]  }
 0x11c   :  { %6557 = vmatprep.subr.bf16.mxu0 %v12211_v47  ;;  %7245 = vmatprep.subr.bf16.mxu1 %v12214_v48  ;;  %v12301_v47 = vld [vmem:[%s18090_s1 + $0xac4] ss:$16 sps:$4 sm:$0xff]   ;;  %v12304_v48 = vld [vmem:[%s18090_s1 + $0xacc] ss:$16 sps:$4 sm:$0xff]  }
 0x11f   :  { %6558 = vmatpush1.bf16.msra.mxu0 %v12209_v49  ;;  %7246 = vmatpush1.bf16.msra.mxu1 %v12212_v50  ;;  %v12299_v49 = vld [vmem:[%s18090_s1 + $0xac0] ss:$16 sps:$4 sm:$0xff]   ;;  %v12302_v50 = vld [vmem:[%s18090_s1 + $0xac8] ss:$16 sps:$4 sm:$0xff]  }
 0x120   :  { %6559 = vmatprep.subr.bf16.mxu0 %v12217_v51  ;;  %7247 = vmatprep.subr.bf16.mxu1 %v12220_v52  ;;  %v12307_v51 = vld [vmem:[%s18090_s1 + $0xae4] ss:$16 sps:$4 sm:$0xff]   ;;  %v12310_v52 = vld [vmem:[%s18090_s1 + $0xaec] ss:$16 sps:$4 sm:$0xff]  }
 0x123   :  { %6560 = vmatpush1.bf16.msra.mxu0 %v12215_v53  ;;  %7248 = vmatpush1.bf16.msra.mxu1 %v12218_v54  ;;  %v12305_v53 = vld [vmem:[%s18090_s1 + $0xae0] ss:$16 sps:$4 sm:$0xff]   ;;  %v12308_v54 = vld [vmem:[%s18090_s1 + $0xae8] ss:$16 sps:$4 sm:$0xff]  }
 0x124   :  { %6561 = vmatprep.subr.bf16.mxu0 %v12223_v55  ;;  %7249 = vmatprep.subr.bf16.mxu1 %v12226_v56  ;;  %v12313_v55 = vld [vmem:[%s18090_s1 + $0xb04] ss:$16 sps:$4 sm:$0xff]   ;;  %v12316_v56 = vld [vmem:[%s18090_s1 + $0xb0c] ss:$16 sps:$4 sm:$0xff]  }
 0x127   :  { %6562 = vmatpush1.bf16.msra.mxu0 %v12221_v57  ;;  %7250 = vmatpush1.bf16.msra.mxu1 %v12224_v58  ;;  %v12311_v57 = vld [vmem:[%s18090_s1 + $0xb00] ss:$16 sps:$4 sm:$0xff]   ;;  %v12314_v58 = vld [vmem:[%s18090_s1 + $0xb08] ss:$16 sps:$4 sm:$0xff]  }
 0x128   :  { %6563 = vmatprep.subr.bf16.mxu0 %v12229_v59  ;;  %7251 = vmatprep.subr.bf16.mxu1 %v12232_v60  ;;  %v12319_v59 = vld [vmem:[%s18090_s1 + $0xb24] ss:$16 sps:$4 sm:$0xff]   ;;  %v12322_v60 = vld [vmem:[%s18090_s1 + $0xb2c] ss:$16 sps:$4 sm:$0xff]  }
 0x12b   :  { %6564 = vmatpush1.bf16.msra.mxu0 %v12227_v61  ;;  %7252 = vmatpush1.bf16.msra.mxu1 %v12230_v62  ;;  %v12317_v61 = vld [vmem:[%s18090_s1 + $0xb20] ss:$16 sps:$4 sm:$0xff]   ;;  %v12320_v62 = vld [vmem:[%s18090_s1 + $0xb28] ss:$16 sps:$4 sm:$0xff]  }
 0x12c   :  { %6565 = vmatprep.subr.bf16.mxu0 %v12235_v63  ;;  %7253 = vmatprep.subr.bf16.mxu1 %v12238_v0  ;;  %v12325_v63 = vld [vmem:[%s18090_s1 + $0xb44] ss:$16 sps:$4 sm:$0xff]   ;;  %v12328_v0 = vld [vmem:[%s18090_s1 + $0xb4c] ss:$16 sps:$4 sm:$0xff]  }
 0x12f   :  { %6566 = vmatpush1.bf16.msra.mxu0 %v12233_v1  ;;  %7254 = vmatpush1.bf16.msra.mxu1 %v12236_v2  ;;  %v12323_v1 = vld [vmem:[%s18090_s1 + $0xb40] ss:$16 sps:$4 sm:$0xff]   ;;  %v12326_v2 = vld [vmem:[%s18090_s1 + $0xb48] ss:$16 sps:$4 sm:$0xff]  }
 0x130   :  { %6567 = vmatprep.subr.bf16.mxu0 %v12241_v3  ;;  %7255 = vmatprep.subr.bf16.mxu1 %v12244_v4  ;;  %v12331_v3 = vld [vmem:[%s18090_s1 + $0xb64] ss:$16 sps:$4 sm:$0xff]   ;;  %v12334_v4 = vld [vmem:[%s18090_s1 + $0xb6c] ss:$16 sps:$4 sm:$0xff]  }
 0x133   :  { %6568 = vmatpush1.bf16.msra.mxu0 %v12239_v5  ;;  %7256 = vmatpush1.bf16.msra.mxu1 %v12242_v6  ;;  %v12329_v5 = vld [vmem:[%s18090_s1 + $0xb60] ss:$16 sps:$4 sm:$0xff]   ;;  %v12332_v6 = vld [vmem:[%s18090_s1 + $0xb68] ss:$16 sps:$4 sm:$0xff]  }
 0x134   :  { %6569 = vmatprep.subr.bf16.mxu0 %v12247_v7  ;;  %7257 = vmatprep.subr.bf16.mxu1 %v12250_v8  ;;  %v12337_v7 = vld [vmem:[%s18090_s1 + $0xb84] ss:$16 sps:$4 sm:$0xff]   ;;  %v12340_v8 = vld [vmem:[%s18090_s1 + $0xb8c] ss:$16 sps:$4 sm:$0xff]  }
 0x137   :  { %6570 = vmatpush1.bf16.msra.mxu0 %v12245_v9  ;;  %7258 = vmatpush1.bf16.msra.mxu1 %v12248_v10  ;;  %v12335_v9 = vld [vmem:[%s18090_s1 + $0xb80] ss:$16 sps:$4 sm:$0xff]   ;;  %v12338_v10 = vld [vmem:[%s18090_s1 + $0xb88] ss:$16 sps:$4 sm:$0xff]  }
 0x138   :  { %6571 = vmatprep.subr.bf16.mxu0 %v12253_v11  ;;  %7259 = vmatprep.subr.bf16.mxu1 %v12256_v12  ;;  %v12343_v11 = vld [vmem:[%s18090_s1 + $0xba4] ss:$16 sps:$4 sm:$0xff]   ;;  %v12346_v12 = vld [vmem:[%s18090_s1 + $0xbac] ss:$16 sps:$4 sm:$0xff]  }
 0x13b   :  { %6572 = vmatpush1.bf16.msra.mxu0 %v12251_v13  ;;  %7260 = vmatpush1.bf16.msra.mxu1 %v12254_v16  ;;  %v12341_v13 = vld [vmem:[%s18090_s1 + $0xba0] ss:$16 sps:$4 sm:$0xff]   ;;  %v12344_v16 = vld [vmem:[%s18090_s1 + $0xba8] ss:$16 sps:$4 sm:$0xff]  }
 0x13c   :  { %6573 = vmatprep.subr.bf16.mxu0 %v12259_v17  ;;  %7261 = vmatprep.subr.bf16.mxu1 %v12262_v20  ;;  %v12349_v17 = vld [vmem:[%s18090_s1 + $0xbc4] ss:$16 sps:$4 sm:$0xff]   ;;  %v12352_v20 = vld [vmem:[%s18090_s1 + $0xbcc] ss:$16 sps:$4 sm:$0xff]  }
 0x13f   :  { %6574 = vmatpush1.bf16.msra.mxu0 %v12257_v15  ;;  %7262 = vmatpush1.bf16.msra.mxu1 %v12260_v22  ;;  %v12347_v15 = vld [vmem:[%s18090_s1 + $0xbc0] ss:$16 sps:$4 sm:$0xff]   ;;  %v12350_v22 = vld [vmem:[%s18090_s1 + $0xbc8] ss:$16 sps:$4 sm:$0xff]  }
 0x140   :  { %6586 = vmatprep.subr.bf16.mxu0 %v12265_v23  ;;  %7274 = vmatprep.subr.bf16.mxu1 %v12268_v18  ;;  %v12355_v23 = vld [vmem:[%s18090_s1 + $0xbe4] ss:$16 sps:$4 sm:$0xff]   ;;  %v12358_v18 = vld [vmem:[%s18090_s1 + $0xbec] ss:$16 sps:$4 sm:$0xff]  }
 0x142   :  { %6576 = vmatmul.mubr.bf16.vlgmr.msra.gmra.mrb[0].mxu0 %v10284_v25  ;;  %7264 = vmatmul.mubr.bf16.vlgmr.msra.gmra.mrb[0].mxu1 %v10284_v25  ;;  %v12353_v25 = vld [vmem:[%s18090_s1 + $0xbe0] ss:$16 sps:$4 sm:$0xff]  }
 0x143   :  { %6587 = vmatpush1.bf16.msra.mxu0 %v12263_v26  ;;  %7275 = vmatpush1.bf16.msra.mxu1 %v12266_v27  ;;  %v12356_v26 = vld [vmem:[%s18090_s1 + $0xbe8] ss:$16 sps:$4 sm:$0xff]   ;;  %v12361_v27 = vld [vmem:[%s18090_s1 + $0xc04] ss:$16 sps:$4 sm:$0xff]  }
 0x144   :  { %6588 = vmatprep.subr.bf16.mxu0 %v12271_v28  ;;  %7276 = vmatprep.subr.bf16.mxu1 %v12274_v14  ;;  %v12364_v28 = vld [vmem:[%s18090_s1 + $0xc0c] ss:$16 sps:$4 sm:$0xff]   ;;  %v15020_v14 = vld [vmem:[%s18091_s0 + $0x30] sm:$0xff] }
 0x145   :  { %6618 = vmatprep.mubr.bf16.mxu0 %v10287_v21  ;;  %7306 = vmatprep.mubr.bf16.mxu1 %v10287_v21  ;;  %v15025_v21 = vld [vmem:[%s18091_s0 + $0xb0] sm:$0xff] }
 0x147   :  { %6589 = vmatpush1.bf16.msra.mxu0 %v12269_v29  ;;  %7277 = vmatpush1.bf16.msra.mxu1 %v12272_v30  ;;  %v10286_v29 = vcombine.low %v14814_v19, %v14819_v24  ;;  %v12359_v30 = vld [vmem:[%s18090_s1 + $0xc00] ss:$16 sps:$4 sm:$0xff]   ;;  %v12370_v19 = vld [vmem:[%s18090_s1 + $0xc2c] ss:$16 sps:$4 sm:$0xff]   ;;  %v10289_v24 = vcombine.high %v15020_v14, %v15025_v21 }
 0x148   :  { %6590 = vmatprep.subr.bf16.mxu0 %v12277_v31  ;;  %7278 = vmatprep.subr.bf16.mxu1 %v12280_v32  ;;  %v12362_v31 = vld [vmem:[%s18090_s1 + $0xc08] ss:$16 sps:$4 sm:$0xff]   ;;  %v12367_v32 = vld [vmem:[%s18090_s1 + $0xc24] ss:$16 sps:$4 sm:$0xff]  }
 0x14b   :  { %6591 = vmatpush1.bf16.msra.mxu0 %v12275_v33  ;;  %7279 = vmatpush1.bf16.msra.mxu1 %v12278_v34  ;;  %v12365_v33 = vld [vmem:[%s18090_s1 + $0xc20] ss:$16 sps:$4 sm:$0xff]   ;;  %v12368_v34 = vld [vmem:[%s18090_s1 + $0xc28] ss:$16 sps:$4 sm:$0xff]  }
 0x14c   :  { %6592 = vmatprep.subr.bf16.mxu0 %v12283_v35  ;;  %7280 = vmatprep.subr.bf16.mxu1 %v12286_v36  ;;  %v12373_v35 = vld [vmem:[%s18090_s1 + $0xc44] ss:$16 sps:$4 sm:$0xff]   ;;  %v12376_v36 = vld [vmem:[%s18090_s1 + $0xc4c] ss:$16 sps:$4 sm:$0xff]  }
 0x14f   :  { %6593 = vmatpush1.bf16.msra.mxu0 %v12281_v37  ;;  %7281 = vmatpush1.bf16.msra.mxu1 %v12284_v38  ;;  %v12371_v37 = vld [vmem:[%s18090_s1 + $0xc40] ss:$16 sps:$4 sm:$0xff]   ;;  %v12374_v38 = vld [vmem:[%s18090_s1 + $0xc48] ss:$16 sps:$4 sm:$0xff]  }
 0x150   :  { %6594 = vmatprep.subr.bf16.mxu0 %v12289_v39  ;;  %7282 = vmatprep.subr.bf16.mxu1 %v12292_v40  ;;  %v12379_v39 = vld [vmem:[%s18090_s1 + $0xc64] ss:$16 sps:$4 sm:$0xff]   ;;  %v12382_v40 = vld [vmem:[%s18090_s1 + $0xc6c] ss:$16 sps:$4 sm:$0xff]  }
 0x153   :  { %6595 = vmatpush1.bf16.msra.mxu0 %v12287_v41  ;;  %7283 = vmatpush1.bf16.msra.mxu1 %v12290_v42  ;;  %v12377_v41 = vld [vmem:[%s18090_s1 + $0xc60] ss:$16 sps:$4 sm:$0xff]   ;;  %v12380_v42 = vld [vmem:[%s18090_s1 + $0xc68] ss:$16 sps:$4 sm:$0xff]  }
 0x154   :  { %6596 = vmatprep.subr.bf16.mxu0 %v12295_v43  ;;  %7284 = vmatprep.subr.bf16.mxu1 %v12298_v44  ;;  %v12385_v43 = vld [vmem:[%s18090_s1 + $0xc84] ss:$16 sps:$4 sm:$0xff]   ;;  %v12388_v44 = vld [vmem:[%s18090_s1 + $0xc8c] ss:$16 sps:$4 sm:$0xff]  }
 0x157   :  { %6597 = vmatpush1.bf16.msra.mxu0 %v12293_v45  ;;  %7285 = vmatpush1.bf16.msra.mxu1 %v12296_v46  ;;  %v12383_v45 = vld [vmem:[%s18090_s1 + $0xc80] ss:$16 sps:$4 sm:$0xff]   ;;  %v12386_v46 = vld [vmem:[%s18090_s1 + $0xc88] ss:$16 sps:$4 sm:$0xff]  }
 0x158   :  { %6598 = vmatprep.subr.bf16.mxu0 %v12301_v47  ;;  %7286 = vmatprep.subr.bf16.mxu1 %v12304_v48  ;;  %v12391_v47 = vld [vmem:[%s18090_s1 + $0xca4] ss:$16 sps:$4 sm:$0xff]   ;;  %v12394_v48 = vld [vmem:[%s18090_s1 + $0xcac] ss:$16 sps:$4 sm:$0xff]  }
 0x15b   :  { %6599 = vmatpush1.bf16.msra.mxu0 %v12299_v49  ;;  %7287 = vmatpush1.bf16.msra.mxu1 %v12302_v50  ;;  %v12389_v49 = vld [vmem:[%s18090_s1 + $0xca0] ss:$16 sps:$4 sm:$0xff]   ;;  %v12392_v50 = vld [vmem:[%s18090_s1 + $0xca8] ss:$16 sps:$4 sm:$0xff]  }
 0x15c   :  { %6600 = vmatprep.subr.bf16.mxu0 %v12307_v51  ;;  %7288 = vmatprep.subr.bf16.mxu1 %v12310_v52  ;;  %v12397_v51 = vld [vmem:[%s18090_s1 + $0xcc4] ss:$16 sps:$4 sm:$0xff]   ;;  %v12400_v52 = vld [vmem:[%s18090_s1 + $0xccc] ss:$16 sps:$4 sm:$0xff]  }
 0x15f   :  { %6601 = vmatpush1.bf16.msra.mxu0 %v12305_v53  ;;  %7289 = vmatpush1.bf16.msra.mxu1 %v12308_v54  ;;  %v12395_v53 = vld [vmem:[%s18090_s1 + $0xcc0] ss:$16 sps:$4 sm:$0xff]   ;;  %v12398_v54 = vld [vmem:[%s18090_s1 + $0xcc8] ss:$16 sps:$4 sm:$0xff]  }
 0x160   :  { %6602 = vmatprep.subr.bf16.mxu0 %v12313_v55  ;;  %7290 = vmatprep.subr.bf16.mxu1 %v12316_v56  ;;  %v12403_v55 = vld [vmem:[%s18090_s1 + $0xce4] ss:$16 sps:$4 sm:$0xff]   ;;  %v12406_v56 = vld [vmem:[%s18090_s1 + $0xcec] ss:$16 sps:$4 sm:$0xff]  }
 0x163   :  { %6603 = vmatpush1.bf16.msra.mxu0 %v12311_v57  ;;  %7291 = vmatpush1.bf16.msra.mxu1 %v12314_v58  ;;  %v12401_v57 = vld [vmem:[%s18090_s1 + $0xce0] ss:$16 sps:$4 sm:$0xff]   ;;  %v12404_v58 = vld [vmem:[%s18090_s1 + $0xce8] ss:$16 sps:$4 sm:$0xff]  }
 0x164   :  { %6604 = vmatprep.subr.bf16.mxu0 %v12319_v59  ;;  %7292 = vmatprep.subr.bf16.mxu1 %v12322_v60  ;;  %v12409_v59 = vld [vmem:[%s18090_s1 + $0xd04] ss:$16 sps:$4 sm:$0xff]   ;;  %v12412_v60 = vld [vmem:[%s18090_s1 + $0xd0c] ss:$16 sps:$4 sm:$0xff]  }
 0x167   :  { %6605 = vmatpush1.bf16.msra.mxu0 %v12317_v61  ;;  %7293 = vmatpush1.bf16.msra.mxu1 %v12320_v62  ;;  %v12407_v61 = vld [vmem:[%s18090_s1 + $0xd00] ss:$16 sps:$4 sm:$0xff]   ;;  %v12410_v62 = vld [vmem:[%s18090_s1 + $0xd08] ss:$16 sps:$4 sm:$0xff]  }
 0x168   :  { %6606 = vmatprep.subr.bf16.mxu0 %v12325_v63  ;;  %7294 = vmatprep.subr.bf16.mxu1 %v12328_v0  ;;  %v12415_v63 = vld [vmem:[%s18090_s1 + $0xd24] ss:$16 sps:$4 sm:$0xff]   ;;  %v12418_v0 = vld [vmem:[%s18090_s1 + $0xd2c] ss:$16 sps:$4 sm:$0xff]  }
 0x16b   :  { %6607 = vmatpush1.bf16.msra.mxu0 %v12323_v1  ;;  %7295 = vmatpush1.bf16.msra.mxu1 %v12326_v2  ;;  %v12413_v1 = vld [vmem:[%s18090_s1 + $0xd20] ss:$16 sps:$4 sm:$0xff]   ;;  %v12416_v2 = vld [vmem:[%s18090_s1 + $0xd28] ss:$16 sps:$4 sm:$0xff]  }
 0x16c   :  { %6608 = vmatprep.subr.bf16.mxu0 %v12331_v3  ;;  %7296 = vmatprep.subr.bf16.mxu1 %v12334_v4  ;;  %v12421_v3 = vld [vmem:[%s18090_s1 + $0xd44] ss:$16 sps:$4 sm:$0xff]   ;;  %v12424_v4 = vld [vmem:[%s18090_s1 + $0xd4c] ss:$16 sps:$4 sm:$0xff]  }
 0x16f   :  { %6609 = vmatpush1.bf16.msra.mxu0 %v12329_v5  ;;  %7297 = vmatpush1.bf16.msra.mxu1 %v12332_v6  ;;  %v12419_v5 = vld [vmem:[%s18090_s1 + $0xd40] ss:$16 sps:$4 sm:$0xff]   ;;  %v12422_v6 = vld [vmem:[%s18090_s1 + $0xd48] ss:$16 sps:$4 sm:$0xff]  }
 0x170   :  { %6610 = vmatprep.subr.bf16.mxu0 %v12337_v7  ;;  %7298 = vmatprep.subr.bf16.mxu1 %v12340_v8  ;;  %v12427_v7 = vld [vmem:[%s18090_s1 + $0xd64] ss:$16 sps:$4 sm:$0xff]   ;;  %v12430_v8 = vld [vmem:[%s18090_s1 + $0xd6c] ss:$16 sps:$4 sm:$0xff]  }
 0x173   :  { %6611 = vmatpush1.bf16.msra.mxu0 %v12335_v9  ;;  %7299 = vmatpush1.bf16.msra.mxu1 %v12338_v10  ;;  %v12425_v9 = vld [vmem:[%s18090_s1 + $0xd60] ss:$16 sps:$4 sm:$0xff]   ;;  %v12428_v10 = vld [vmem:[%s18090_s1 + $0xd68] ss:$16 sps:$4 sm:$0xff]  }
 0x174   :  { %6612 = vmatprep.subr.bf16.mxu0 %v12343_v11  ;;  %7300 = vmatprep.subr.bf16.mxu1 %v12346_v12  ;;  %v12433_v11 = vld [vmem:[%s18090_s1 + $0xd84] ss:$16 sps:$4 sm:$0xff]   ;;  %v12436_v12 = vld [vmem:[%s18090_s1 + $0xd8c] ss:$16 sps:$4 sm:$0xff]  }
 0x177   :  { %6613 = vmatpush1.bf16.msra.mxu0 %v12341_v13  ;;  %7301 = vmatpush1.bf16.msra.mxu1 %v12344_v16  ;;  %v12431_v13 = vld [vmem:[%s18090_s1 + $0xd80] ss:$16 sps:$4 sm:$0xff]   ;;  %v12434_v16 = vld [vmem:[%s18090_s1 + $0xd88] ss:$16 sps:$4 sm:$0xff]  }
 0x178   :  { %6614 = vmatprep.subr.bf16.mxu0 %v12349_v17  ;;  %7302 = vmatprep.subr.bf16.mxu1 %v12352_v20  ;;  %v12439_v17 = vld [vmem:[%s18090_s1 + $0xda4] ss:$16 sps:$4 sm:$0xff]   ;;  %v12442_v20 = vld [vmem:[%s18090_s1 + $0xdac] ss:$16 sps:$4 sm:$0xff]  }
 0x17b   :  { %6615 = vmatpush1.bf16.msra.mxu0 %v12347_v15  ;;  %7303 = vmatpush1.bf16.msra.mxu1 %v12350_v22  ;;  %v12437_v15 = vld [vmem:[%s18090_s1 + $0xda0] ss:$16 sps:$4 sm:$0xff]   ;;  %v12440_v22 = vld [vmem:[%s18090_s1 + $0xda8] ss:$16 sps:$4 sm:$0xff]  }
 0x17c   :  { %6616 = vmatprep.subr.bf16.mxu0 %v12355_v23  ;;  %7304 = vmatprep.subr.bf16.mxu1 %v12358_v18  ;;  %v12445_v23 = vld [vmem:[%s18090_s1 + $0xdc4] ss:$16 sps:$4 sm:$0xff]   ;;  %v12448_v18 = vld [vmem:[%s18090_s1 + $0xdcc] ss:$16 sps:$4 sm:$0xff]  }
 0x17f   :  { %6617 = vmatpush1.bf16.msra.mxu0 %v12353_v25  ;;  %7305 = vmatpush1.bf16.msra.mxu1 %v12356_v26  ;;  %v12443_v25 = vld [vmem:[%s18090_s1 + $0xdc0] ss:$16 sps:$4 sm:$0xff]   ;;  %v12446_v26 = vld [vmem:[%s18090_s1 + $0xdc8] ss:$16 sps:$4 sm:$0xff]  }
 0x180   :  { %6629 = vmatprep.subr.bf16.mxu0 %v12361_v27  ;;  %7317 = vmatprep.subr.bf16.mxu1 %v12364_v28  ;;  %v12451_v27 = vld [vmem:[%s18090_s1 + $0xde4] ss:$16 sps:$4 sm:$0xff]   ;;  %v12454_v28 = vld [vmem:[%s18090_s1 + $0xdec] ss:$16 sps:$4 sm:$0xff]  }
 0x182   :  { %6619 = vmatmul.mubr.bf16.vlgmr.msra.gmra.mrb[0].mxu0 %v10286_v29  ;;  %7307 = vmatmul.mubr.bf16.vlgmr.msra.gmra.mrb[0].mxu1 %v10286_v29  ;;  %v12449_v29 = vld [vmem:[%s18090_s1 + $0xde0] ss:$16 sps:$4 sm:$0xff]  }
 0x183   :  { %6630 = vmatpush1.bf16.msra.mxu0 %v12359_v30  ;;  %7318 = vmatpush1.bf16.msra.mxu1 %v12362_v31  ;;  %v12452_v30 = vld [vmem:[%s18090_s1 + $0xde8] ss:$16 sps:$4 sm:$0xff]   ;;  %v12457_v31 = vld [vmem:[%s18090_s1 + $0xe04] ss:$16 sps:$4 sm:$0xff]  }
 0x184   :  { %6631 = vmatprep.subr.bf16.mxu0 %v12367_v32  ;;  %7319 = vmatprep.subr.bf16.mxu1 %v12370_v19  ;;  %v12460_v32 = vld [vmem:[%s18090_s1 + $0xe0c] ss:$16 sps:$4 sm:$0xff]  }
 0x185   :  { %6661 = vmatprep.mubr.bf16.mxu0 %v10289_v24  ;;  %7349 = vmatprep.mubr.bf16.mxu1 %v10289_v24  ;;  %v15226_v19 = vld [vmem:[%s18091_s0 + $0x38] sm:$0xff] }
 0x186   :  { %v15231_v24 = vld [vmem:[%s18091_s0 + $0xb8] sm:$0xff] }
 0x187   :  { %6632 = vmatpush1.bf16.msra.mxu0 %v12365_v33  ;;  %7320 = vmatpush1.bf16.msra.mxu1 %v12368_v34  ;;  %v10288_v33 = vcombine.low %v15020_v14, %v15025_v21  ;;  %v12455_v34 = vld [vmem:[%s18090_s1 + $0xe00] ss:$16 sps:$4 sm:$0xff]   ;;  %v12466_v14 = vld [vmem:[%s18090_s1 + $0xe2c] ss:$16 sps:$4 sm:$0xff]   ;;  %v10291_v21 = vcombine.high %v15226_v19, %v15231_v24 }
 0x188   :  { %6633 = vmatprep.subr.bf16.mxu0 %v12373_v35  ;;  %7321 = vmatprep.subr.bf16.mxu1 %v12376_v36  ;;  %v12458_v35 = vld [vmem:[%s18090_s1 + $0xe08] ss:$16 sps:$4 sm:$0xff]   ;;  %v12463_v36 = vld [vmem:[%s18090_s1 + $0xe24] ss:$16 sps:$4 sm:$0xff]  }
 0x18b   :  { %6634 = vmatpush1.bf16.msra.mxu0 %v12371_v37  ;;  %7322 = vmatpush1.bf16.msra.mxu1 %v12374_v38  ;;  %v12461_v37 = vld [vmem:[%s18090_s1 + $0xe20] ss:$16 sps:$4 sm:$0xff]   ;;  %v12464_v38 = vld [vmem:[%s18090_s1 + $0xe28] ss:$16 sps:$4 sm:$0xff]  }
 0x18c   :  { %6635 = vmatprep.subr.bf16.mxu0 %v12379_v39  ;;  %7323 = vmatprep.subr.bf16.mxu1 %v12382_v40  ;;  %v12469_v39 = vld [vmem:[%s18090_s1 + $0xe44] ss:$16 sps:$4 sm:$0xff]   ;;  %v12472_v40 = vld [vmem:[%s18090_s1 + $0xe4c] ss:$16 sps:$4 sm:$0xff]  }
 0x18f   :  { %6636 = vmatpush1.bf16.msra.mxu0 %v12377_v41  ;;  %7324 = vmatpush1.bf16.msra.mxu1 %v12380_v42  ;;  %v12467_v41 = vld [vmem:[%s18090_s1 + $0xe40] ss:$16 sps:$4 sm:$0xff]   ;;  %v12470_v42 = vld [vmem:[%s18090_s1 + $0xe48] ss:$16 sps:$4 sm:$0xff]  }
 0x190   :  { %6637 = vmatprep.subr.bf16.mxu0 %v12385_v43  ;;  %7325 = vmatprep.subr.bf16.mxu1 %v12388_v44  ;;  %v12475_v43 = vld [vmem:[%s18090_s1 + $0xe64] ss:$16 sps:$4 sm:$0xff]   ;;  %v12478_v44 = vld [vmem:[%s18090_s1 + $0xe6c] ss:$16 sps:$4 sm:$0xff]  }
 0x193   :  { %6638 = vmatpush1.bf16.msra.mxu0 %v12383_v45  ;;  %7326 = vmatpush1.bf16.msra.mxu1 %v12386_v46  ;;  %v12473_v45 = vld [vmem:[%s18090_s1 + $0xe60] ss:$16 sps:$4 sm:$0xff]   ;;  %v12476_v46 = vld [vmem:[%s18090_s1 + $0xe68] ss:$16 sps:$4 sm:$0xff]  }
 0x194   :  { %6639 = vmatprep.subr.bf16.mxu0 %v12391_v47  ;;  %7327 = vmatprep.subr.bf16.mxu1 %v12394_v48  ;;  %v12481_v47 = vld [vmem:[%s18090_s1 + $0xe84] ss:$16 sps:$4 sm:$0xff]   ;;  %v12484_v48 = vld [vmem:[%s18090_s1 + $0xe8c] ss:$16 sps:$4 sm:$0xff]  }
 0x197   :  { %6640 = vmatpush1.bf16.msra.mxu0 %v12389_v49  ;;  %7328 = vmatpush1.bf16.msra.mxu1 %v12392_v50  ;;  %v12479_v49 = vld [vmem:[%s18090_s1 + $0xe80] ss:$16 sps:$4 sm:$0xff]   ;;  %v12482_v50 = vld [vmem:[%s18090_s1 + $0xe88] ss:$16 sps:$4 sm:$0xff]  }
 0x198   :  { %6641 = vmatprep.subr.bf16.mxu0 %v12397_v51  ;;  %7329 = vmatprep.subr.bf16.mxu1 %v12400_v52  ;;  %v12487_v51 = vld [vmem:[%s18090_s1 + $0xea4] ss:$16 sps:$4 sm:$0xff]   ;;  %v12490_v52 = vld [vmem:[%s18090_s1 + $0xeac] ss:$16 sps:$4 sm:$0xff]  }
 0x19b   :  { %6642 = vmatpush1.bf16.msra.mxu0 %v12395_v53  ;;  %7330 = vmatpush1.bf16.msra.mxu1 %v12398_v54  ;;  %v12485_v53 = vld [vmem:[%s18090_s1 + $0xea0] ss:$16 sps:$4 sm:$0xff]   ;;  %v12488_v54 = vld [vmem:[%s18090_s1 + $0xea8] ss:$16 sps:$4 sm:$0xff]  }
 0x19c   :  { %6643 = vmatprep.subr.bf16.mxu0 %v12403_v55  ;;  %7331 = vmatprep.subr.bf16.mxu1 %v12406_v56  ;;  %v12493_v55 = vld [vmem:[%s18090_s1 + $0xec4] ss:$16 sps:$4 sm:$0xff]   ;;  %v12496_v56 = vld [vmem:[%s18090_s1 + $0xecc] ss:$16 sps:$4 sm:$0xff]  }
 0x19f   :  { %6644 = vmatpush1.bf16.msra.mxu0 %v12401_v57  ;;  %7332 = vmatpush1.bf16.msra.mxu1 %v12404_v58  ;;  %v12491_v57 = vld [vmem:[%s18090_s1 + $0xec0] ss:$16 sps:$4 sm:$0xff]   ;;  %v12494_v58 = vld [vmem:[%s18090_s1 + $0xec8] ss:$16 sps:$4 sm:$0xff]  }
 0x1a0   :  { %6645 = vmatprep.subr.bf16.mxu0 %v12409_v59  ;;  %7333 = vmatprep.subr.bf16.mxu1 %v12412_v60  ;;  %v12499_v59 = vld [vmem:[%s18090_s1 + $0xee4] ss:$16 sps:$4 sm:$0xff]   ;;  %v12502_v60 = vld [vmem:[%s18090_s1 + $0xeec] ss:$16 sps:$4 sm:$0xff]  }
 0x1a3   :  { %6646 = vmatpush1.bf16.msra.mxu0 %v12407_v61  ;;  %7334 = vmatpush1.bf16.msra.mxu1 %v12410_v62  ;;  %v12497_v61 = vld [vmem:[%s18090_s1 + $0xee0] ss:$16 sps:$4 sm:$0xff]   ;;  %v12500_v62 = vld [vmem:[%s18090_s1 + $0xee8] ss:$16 sps:$4 sm:$0xff]  }
 0x1a4   :  { %6647 = vmatprep.subr.bf16.mxu0 %v12415_v63  ;;  %7335 = vmatprep.subr.bf16.mxu1 %v12418_v0  ;;  %v12505_v63 = vld [vmem:[%s18090_s1 + $0xf04] ss:$16 sps:$4 sm:$0xff]   ;;  %v12508_v0 = vld [vmem:[%s18090_s1 + $0xf0c] ss:$16 sps:$4 sm:$0xff]  }
 0x1a7   :  { %6648 = vmatpush1.bf16.msra.mxu0 %v12413_v1  ;;  %7336 = vmatpush1.bf16.msra.mxu1 %v12416_v2  ;;  %v12503_v1 = vld [vmem:[%s18090_s1 + $0xf00] ss:$16 sps:$4 sm:$0xff]   ;;  %v12506_v2 = vld [vmem:[%s18090_s1 + $0xf08] ss:$16 sps:$4 sm:$0xff]  }
 0x1a8   :  { %6649 = vmatprep.subr.bf16.mxu0 %v12421_v3  ;;  %7337 = vmatprep.subr.bf16.mxu1 %v12424_v4  ;;  %v12511_v3 = vld [vmem:[%s18090_s1 + $0xf24] ss:$16 sps:$4 sm:$0xff]   ;;  %v12514_v4 = vld [vmem:[%s18090_s1 + $0xf2c] ss:$16 sps:$4 sm:$0xff]  }
 0x1ab   :  { %6650 = vmatpush1.bf16.msra.mxu0 %v12419_v5  ;;  %7338 = vmatpush1.bf16.msra.mxu1 %v12422_v6  ;;  %v12509_v5 = vld [vmem:[%s18090_s1 + $0xf20] ss:$16 sps:$4 sm:$0xff]   ;;  %v12512_v6 = vld [vmem:[%s18090_s1 + $0xf28] ss:$16 sps:$4 sm:$0xff]  }
 0x1ac   :  { %6651 = vmatprep.subr.bf16.mxu0 %v12427_v7  ;;  %7339 = vmatprep.subr.bf16.mxu1 %v12430_v8  ;;  %v12517_v7 = vld [vmem:[%s18090_s1 + $0xf44] ss:$16 sps:$4 sm:$0xff]   ;;  %v12520_v8 = vld [vmem:[%s18090_s1 + $0xf4c] ss:$16 sps:$4 sm:$0xff]  }
 0x1af   :  { %6652 = vmatpush1.bf16.msra.mxu0 %v12425_v9  ;;  %7340 = vmatpush1.bf16.msra.mxu1 %v12428_v10  ;;  %v12515_v9 = vld [vmem:[%s18090_s1 + $0xf40] ss:$16 sps:$4 sm:$0xff]   ;;  %v12518_v10 = vld [vmem:[%s18090_s1 + $0xf48] ss:$16 sps:$4 sm:$0xff]  }
 0x1b0   :  { %6653 = vmatprep.subr.bf16.mxu0 %v12433_v11  ;;  %7341 = vmatprep.subr.bf16.mxu1 %v12436_v12  ;;  %v12523_v11 = vld [vmem:[%s18090_s1 + $0xf64] ss:$16 sps:$4 sm:$0xff]   ;;  %v12526_v12 = vld [vmem:[%s18090_s1 + $0xf6c] ss:$16 sps:$4 sm:$0xff]  }
 0x1b3   :  { %6654 = vmatpush1.bf16.msra.mxu0 %v12431_v13  ;;  %7342 = vmatpush1.bf16.msra.mxu1 %v12434_v16  ;;  %v12521_v13 = vld [vmem:[%s18090_s1 + $0xf60] ss:$16 sps:$4 sm:$0xff]   ;;  %v12524_v16 = vld [vmem:[%s18090_s1 + $0xf68] ss:$16 sps:$4 sm:$0xff]  }
 0x1b4   :  { %6655 = vmatprep.subr.bf16.mxu0 %v12439_v17  ;;  %7343 = vmatprep.subr.bf16.mxu1 %v12442_v20  ;;  %v12529_v17 = vld [vmem:[%s18090_s1 + $0xf84] ss:$16 sps:$4 sm:$0xff]   ;;  %v12532_v20 = vld [vmem:[%s18090_s1 + $0xf8c] ss:$16 sps:$4 sm:$0xff]  }
 0x1b7   :  { %6656 = vmatpush1.bf16.msra.mxu0 %v12437_v15  ;;  %7344 = vmatpush1.bf16.msra.mxu1 %v12440_v22  ;;  %v12527_v15 = vld [vmem:[%s18090_s1 + $0xf80] ss:$16 sps:$4 sm:$0xff]   ;;  %v12530_v22 = vld [vmem:[%s18090_s1 + $0xf88] ss:$16 sps:$4 sm:$0xff]  }
 0x1b8   :  { %6657 = vmatprep.subr.bf16.mxu0 %v12445_v23  ;;  %7345 = vmatprep.subr.bf16.mxu1 %v12448_v18  ;;  %v12535_v23 = vld [vmem:[%s18090_s1 + $0xfa4] ss:$16 sps:$4 sm:$0xff]   ;;  %v12538_v18 = vld [vmem:[%s18090_s1 + $0xfac] ss:$16 sps:$4 sm:$0xff]  }
 0x1bb   :  { %6658 = vmatpush1.bf16.msra.mxu0 %v12443_v25  ;;  %7346 = vmatpush1.bf16.msra.mxu1 %v12446_v26  ;;  %v12533_v25 = vld [vmem:[%s18090_s1 + $0xfa0] ss:$16 sps:$4 sm:$0xff]   ;;  %v12536_v26 = vld [vmem:[%s18090_s1 + $0xfa8] ss:$16 sps:$4 sm:$0xff]  }
 0x1bc   :  { %6659 = vmatprep.subr.bf16.mxu0 %v12451_v27  ;;  %7347 = vmatprep.subr.bf16.mxu1 %v12454_v28  ;;  %v12541_v27 = vld [vmem:[%s18090_s1 + $0xfc4] ss:$16 sps:$4 sm:$0xff]   ;;  %v12544_v28 = vld [vmem:[%s18090_s1 + $0xfcc] ss:$16 sps:$4 sm:$0xff]  }
 0x1bf   :  { %6660 = vmatpush1.bf16.msra.mxu0 %v12449_v29  ;;  %7348 = vmatpush1.bf16.msra.mxu1 %v12452_v30  ;;  %v12539_v29 = vld [vmem:[%s18090_s1 + $0xfc0] ss:$16 sps:$4 sm:$0xff]   ;;  %v12542_v30 = vld [vmem:[%s18090_s1 + $0xfc8] ss:$16 sps:$4 sm:$0xff]  }
 0x1c0   :  { %6672 = vmatprep.subr.bf16.mxu0 %v12457_v31  ;;  %7360 = vmatprep.subr.bf16.mxu1 %v12460_v32  ;;  %v12547_v31 = vld [vmem:[%s18090_s1 + $0xfe4] ss:$16 sps:$4 sm:$0xff]   ;;  %v12550_v32 = vld [vmem:[%s18090_s1 + $0xfec] ss:$16 sps:$4 sm:$0xff]  }
 0x1c2   :  { %6662 = vmatmul.mubr.bf16.vlgmr.msra.gmra.mrb[0].mxu0 %v10288_v33  ;;  %7350 = vmatmul.mubr.bf16.vlgmr.msra.gmra.mrb[0].mxu1 %v10288_v33  ;;  %v12545_v33 = vld [vmem:[%s18090_s1 + $0xfe0] ss:$16 sps:$4 sm:$0xff]  }
 0x1c3   :  { %6673 = vmatpush1.bf16.msra.mxu0 %v12455_v34  ;;  %7361 = vmatpush1.bf16.msra.mxu1 %v12458_v35  ;;  %v12548_v34 = vld [vmem:[%s18090_s1 + $0xfe8] ss:$16 sps:$4 sm:$0xff]   ;;  %v12553_v35 = vld [vmem:[%s18090_s1 + $0x1004] ss:$16 sps:$4 sm:$0xff]  }
 0x1c4   :  { %6674 = vmatprep.subr.bf16.mxu0 %v12463_v36  ;;  %7362 = vmatprep.subr.bf16.mxu1 %v12466_v14  ;;  %v12556_v36 = vld [vmem:[%s18090_s1 + $0x100c] ss:$16 sps:$4 sm:$0xff]   ;;  %v15432_v14 = vld [vmem:[%s18091_s0 + $0x40] sm:$0xff] }
 0x1c5   :  { %6704 = vmatprep.mubr.bf16.mxu0 %v10291_v21  ;;  %7392 = vmatprep.mubr.bf16.mxu1 %v10291_v21  ;;  %v15437_v21 = vld [vmem:[%s18091_s0 + $0xc0] sm:$0xff] }
 0x1c7   :  { %6675 = vmatpush1.bf16.msra.mxu0 %v12461_v37  ;;  %7363 = vmatpush1.bf16.msra.mxu1 %v12464_v38  ;;  %v10290_v37 = vcombine.low %v15226_v19, %v15231_v24  ;;  %v12551_v38 = vld [vmem:[%s18090_s1 + $0x1000] ss:$16 sps:$4 sm:$0xff]   ;;  %v12562_v19 = vld [vmem:[%s18090_s1 + $0x102c] ss:$16 sps:$4 sm:$0xff]   ;;  %v10293_v24 = vcombine.high %v15432_v14, %v15437_v21 }
 0x1c8   :  { %6676 = vmatprep.subr.bf16.mxu0 %v12469_v39  ;;  %7364 = vmatprep.subr.bf16.mxu1 %v12472_v40  ;;  %v12554_v39 = vld [vmem:[%s18090_s1 + $0x1008] ss:$16 sps:$4 sm:$0xff]   ;;  %v12559_v40 = vld [vmem:[%s18090_s1 + $0x1024] ss:$16 sps:$4 sm:$0xff]  }
 0x1cb   :  { %6677 = vmatpush1.bf16.msra.mxu0 %v12467_v41  ;;  %7365 = vmatpush1.bf16.msra.mxu1 %v12470_v42  ;;  %v12557_v41 = vld [vmem:[%s18090_s1 + $0x1020] ss:$16 sps:$4 sm:$0xff]   ;;  %v12560_v42 = vld [vmem:[%s18090_s1 + $0x1028] ss:$16 sps:$4 sm:$0xff]  }
 0x1cc   :  { %6678 = vmatprep.subr.bf16.mxu0 %v12475_v43  ;;  %7366 = vmatprep.subr.bf16.mxu1 %v12478_v44  ;;  %v12565_v43 = vld [vmem:[%s18090_s1 + $0x1044] ss:$16 sps:$4 sm:$0xff]   ;;  %v12568_v44 = vld [vmem:[%s18090_s1 + $0x104c] ss:$16 sps:$4 sm:$0xff]  }
 0x1cf   :  { %6679 = vmatpush1.bf16.msra.mxu0 %v12473_v45  ;;  %7367 = vmatpush1.bf16.msra.mxu1 %v12476_v46  ;;  %v12563_v45 = vld [vmem:[%s18090_s1 + $0x1040] ss:$16 sps:$4 sm:$0xff]   ;;  %v12566_v46 = vld [vmem:[%s18090_s1 + $0x1048] ss:$16 sps:$4 sm:$0xff]  }
 0x1d0   :  { %6680 = vmatprep.subr.bf16.mxu0 %v12481_v47  ;;  %7368 = vmatprep.subr.bf16.mxu1 %v12484_v48  ;;  %v12571_v47 = vld [vmem:[%s18090_s1 + $0x1064] ss:$16 sps:$4 sm:$0xff]   ;;  %v12574_v48 = vld [vmem:[%s18090_s1 + $0x106c] ss:$16 sps:$4 sm:$0xff]  }
 0x1d3   :  { %6681 = vmatpush1.bf16.msra.mxu0 %v12479_v49  ;;  %7369 = vmatpush1.bf16.msra.mxu1 %v12482_v50  ;;  %v12569_v49 = vld [vmem:[%s18090_s1 + $0x1060] ss:$16 sps:$4 sm:$0xff]   ;;  %v12572_v50 = vld [vmem:[%s18090_s1 + $0x1068] ss:$16 sps:$4 sm:$0xff]  }
 0x1d4   :  { %6682 = vmatprep.subr.bf16.mxu0 %v12487_v51  ;;  %7370 = vmatprep.subr.bf16.mxu1 %v12490_v52  ;;  %v12577_v51 = vld [vmem:[%s18090_s1 + $0x1084] ss:$16 sps:$4 sm:$0xff]   ;;  %v12580_v52 = vld [vmem:[%s18090_s1 + $0x108c] ss:$16 sps:$4 sm:$0xff]  }
 0x1d7   :  { %6683 = vmatpush1.bf16.msra.mxu0 %v12485_v53  ;;  %7371 = vmatpush1.bf16.msra.mxu1 %v12488_v54  ;;  %v12575_v53 = vld [vmem:[%s18090_s1 + $0x1080] ss:$16 sps:$4 sm:$0xff]   ;;  %v12578_v54 = vld [vmem:[%s18090_s1 + $0x1088] ss:$16 sps:$4 sm:$0xff]  }
 0x1d8   :  { %6684 = vmatprep.subr.bf16.mxu0 %v12493_v55  ;;  %7372 = vmatprep.subr.bf16.mxu1 %v12496_v56  ;;  %v12583_v55 = vld [vmem:[%s18090_s1 + $0x10a4] ss:$16 sps:$4 sm:$0xff]   ;;  %v12586_v56 = vld [vmem:[%s18090_s1 + $0x10ac] ss:$16 sps:$4 sm:$0xff]  }
 0x1db   :  { %6685 = vmatpush1.bf16.msra.mxu0 %v12491_v57  ;;  %7373 = vmatpush1.bf16.msra.mxu1 %v12494_v58  ;;  %v12581_v57 = vld [vmem:[%s18090_s1 + $0x10a0] ss:$16 sps:$4 sm:$0xff]   ;;  %v12584_v58 = vld [vmem:[%s18090_s1 + $0x10a8] ss:$16 sps:$4 sm:$0xff]  }
 0x1dc   :  { %6686 = vmatprep.subr.bf16.mxu0 %v12499_v59  ;;  %7374 = vmatprep.subr.bf16.mxu1 %v12502_v60  ;;  %v12589_v59 = vld [vmem:[%s18090_s1 + $0x10c4] ss:$16 sps:$4 sm:$0xff]   ;;  %v12592_v60 = vld [vmem:[%s18090_s1 + $0x10cc] ss:$16 sps:$4 sm:$0xff]  }
 0x1df   :  { %6687 = vmatpush1.bf16.msra.mxu0 %v12497_v61  ;;  %7375 = vmatpush1.bf16.msra.mxu1 %v12500_v62  ;;  %v12587_v61 = vld [vmem:[%s18090_s1 + $0x10c0] ss:$16 sps:$4 sm:$0xff]   ;;  %v12590_v62 = vld [vmem:[%s18090_s1 + $0x10c8] ss:$16 sps:$4 sm:$0xff]  }
 0x1e0   :  { %6688 = vmatprep.subr.bf16.mxu0 %v12505_v63  ;;  %7376 = vmatprep.subr.bf16.mxu1 %v12508_v0  ;;  %v12595_v63 = vld [vmem:[%s18090_s1 + $0x10e4] ss:$16 sps:$4 sm:$0xff]   ;;  %v12598_v0 = vld [vmem:[%s18090_s1 + $0x10ec] ss:$16 sps:$4 sm:$0xff]  }
 0x1e3   :  { %6689 = vmatpush1.bf16.msra.mxu0 %v12503_v1  ;;  %7377 = vmatpush1.bf16.msra.mxu1 %v12506_v2  ;;  %v12593_v1 = vld [vmem:[%s18090_s1 + $0x10e0] ss:$16 sps:$4 sm:$0xff]   ;;  %v12596_v2 = vld [vmem:[%s18090_s1 + $0x10e8] ss:$16 sps:$4 sm:$0xff]  }
 0x1e4   :  { %6690 = vmatprep.subr.bf16.mxu0 %v12511_v3  ;;  %7378 = vmatprep.subr.bf16.mxu1 %v12514_v4  ;;  %v12601_v3 = vld [vmem:[%s18090_s1 + $0x1104] ss:$16 sps:$4 sm:$0xff]   ;;  %v12604_v4 = vld [vmem:[%s18090_s1 + $0x110c] ss:$16 sps:$4 sm:$0xff]  }
 0x1e7   :  { %6691 = vmatpush1.bf16.msra.mxu0 %v12509_v5  ;;  %7379 = vmatpush1.bf16.msra.mxu1 %v12512_v6  ;;  %v12599_v5 = vld [vmem:[%s18090_s1 + $0x1100] ss:$16 sps:$4 sm:$0xff]   ;;  %v12602_v6 = vld [vmem:[%s18090_s1 + $0x1108] ss:$16 sps:$4 sm:$0xff]  }
 0x1e8   :  { %6692 = vmatprep.subr.bf16.mxu0 %v12517_v7  ;;  %7380 = vmatprep.subr.bf16.mxu1 %v12520_v8  ;;  %v12607_v7 = vld [vmem:[%s18090_s1 + $0x1124] ss:$16 sps:$4 sm:$0xff]   ;;  %v12610_v8 = vld [vmem:[%s18090_s1 + $0x112c] ss:$16 sps:$4 sm:$0xff]  }
 0x1eb   :  { %6693 = vmatpush1.bf16.msra.mxu0 %v12515_v9  ;;  %7381 = vmatpush1.bf16.msra.mxu1 %v12518_v10  ;;  %v12605_v9 = vld [vmem:[%s18090_s1 + $0x1120] ss:$16 sps:$4 sm:$0xff]   ;;  %v12608_v10 = vld [vmem:[%s18090_s1 + $0x1128] ss:$16 sps:$4 sm:$0xff]  }
 0x1ec   :  { %6694 = vmatprep.subr.bf16.mxu0 %v12523_v11  ;;  %7382 = vmatprep.subr.bf16.mxu1 %v12526_v12  ;;  %v12613_v11 = vld [vmem:[%s18090_s1 + $0x1144] ss:$16 sps:$4 sm:$0xff]   ;;  %v12616_v12 = vld [vmem:[%s18090_s1 + $0x114c] ss:$16 sps:$4 sm:$0xff]  }
 0x1ef   :  { %6695 = vmatpush1.bf16.msra.mxu0 %v12521_v13  ;;  %7383 = vmatpush1.bf16.msra.mxu1 %v12524_v16  ;;  %v12611_v13 = vld [vmem:[%s18090_s1 + $0x1140] ss:$16 sps:$4 sm:$0xff]   ;;  %v12614_v16 = vld [vmem:[%s18090_s1 + $0x1148] ss:$16 sps:$4 sm:$0xff]  }
 0x1f0   :  { %6696 = vmatprep.subr.bf16.mxu0 %v12529_v17  ;;  %7384 = vmatprep.subr.bf16.mxu1 %v12532_v20  ;;  %v12619_v17 = vld [vmem:[%s18090_s1 + $0x1164] ss:$16 sps:$4 sm:$0xff]   ;;  %v12622_v20 = vld [vmem:[%s18090_s1 + $0x116c] ss:$16 sps:$4 sm:$0xff]  }
 0x1f3   :  { %6697 = vmatpush1.bf16.msra.mxu0 %v12527_v15  ;;  %7385 = vmatpush1.bf16.msra.mxu1 %v12530_v22  ;;  %v12617_v15 = vld [vmem:[%s18090_s1 + $0x1160] ss:$16 sps:$4 sm:$0xff]   ;;  %v12620_v22 = vld [vmem:[%s18090_s1 + $0x1168] ss:$16 sps:$4 sm:$0xff]  }
 0x1f4   :  { %6698 = vmatprep.subr.bf16.mxu0 %v12535_v23  ;;  %7386 = vmatprep.subr.bf16.mxu1 %v12538_v18  ;;  %v12625_v23 = vld [vmem:[%s18090_s1 + $0x1184] ss:$16 sps:$4 sm:$0xff]   ;;  %v12628_v18 = vld [vmem:[%s18090_s1 + $0x118c] ss:$16 sps:$4 sm:$0xff]  }
 0x1f7   :  { %6699 = vmatpush1.bf16.msra.mxu0 %v12533_v25  ;;  %7387 = vmatpush1.bf16.msra.mxu1 %v12536_v26  ;;  %v12623_v25 = vld [vmem:[%s18090_s1 + $0x1180] ss:$16 sps:$4 sm:$0xff]   ;;  %v12626_v26 = vld [vmem:[%s18090_s1 + $0x1188] ss:$16 sps:$4 sm:$0xff]  }
 0x1f8   :  { %6700 = vmatprep.subr.bf16.mxu0 %v12541_v27  ;;  %7388 = vmatprep.subr.bf16.mxu1 %v12544_v28  ;;  %v12631_v27 = vld [vmem:[%s18090_s1 + $0x11a4] ss:$16 sps:$4 sm:$0xff]   ;;  %v12634_v28 = vld [vmem:[%s18090_s1 + $0x11ac] ss:$16 sps:$4 sm:$0xff]  }
 0x1fb   :  { %6701 = vmatpush1.bf16.msra.mxu0 %v12539_v29  ;;  %7389 = vmatpush1.bf16.msra.mxu1 %v12542_v30  ;;  %v12629_v29 = vld [vmem:[%s18090_s1 + $0x11a0] ss:$16 sps:$4 sm:$0xff]   ;;  %v12632_v30 = vld [vmem:[%s18090_s1 + $0x11a8] ss:$16 sps:$4 sm:$0xff]  }
 0x1fc   :  { %6702 = vmatprep.subr.bf16.mxu0 %v12547_v31  ;;  %7390 = vmatprep.subr.bf16.mxu1 %v12550_v32  ;;  %v12637_v31 = vld [vmem:[%s18090_s1 + $0x11c4] ss:$16 sps:$4 sm:$0xff]   ;;  %v12640_v32 = vld [vmem:[%s18090_s1 + $0x11cc] ss:$16 sps:$4 sm:$0xff]  }
 0x1ff   :  { %6703 = vmatpush1.bf16.msra.mxu0 %v12545_v33  ;;  %7391 = vmatpush1.bf16.msra.mxu1 %v12548_v34  ;;  %v12635_v33 = vld [vmem:[%s18090_s1 + $0x11c0] ss:$16 sps:$4 sm:$0xff]   ;;  %v12638_v34 = vld [vmem:[%s18090_s1 + $0x11c8] ss:$16 sps:$4 sm:$0xff]  }
 0x200   :  { %6715 = vmatprep.subr.bf16.mxu0 %v12553_v35  ;;  %7403 = vmatprep.subr.bf16.mxu1 %v12556_v36  ;;  %v12643_v35 = vld [vmem:[%s18090_s1 + $0x11e4] ss:$16 sps:$4 sm:$0xff]   ;;  %v12646_v36 = vld [vmem:[%s18090_s1 + $0x11ec] ss:$16 sps:$4 sm:$0xff]  }
 0x202   :  { %6705 = vmatmul.mubr.bf16.vlgmr.msra.gmra.mrb[0].mxu0 %v10290_v37  ;;  %7393 = vmatmul.mubr.bf16.vlgmr.msra.gmra.mrb[0].mxu1 %v10290_v37  ;;  %v12641_v37 = vld [vmem:[%s18090_s1 + $0x11e0] ss:$16 sps:$4 sm:$0xff]  }
 0x203   :  { %6716 = vmatpush1.bf16.msra.mxu0 %v12551_v38  ;;  %7404 = vmatpush1.bf16.msra.mxu1 %v12554_v39  ;;  %v12644_v38 = vld [vmem:[%s18090_s1 + $0x11e8] ss:$16 sps:$4 sm:$0xff]   ;;  %v12649_v39 = vld [vmem:[%s18090_s1 + $0x1204] ss:$16 sps:$4 sm:$0xff]  }
 0x204   :  { %6717 = vmatprep.subr.bf16.mxu0 %v12559_v40  ;;  %7405 = vmatprep.subr.bf16.mxu1 %v12562_v19  ;;  %v12652_v40 = vld [vmem:[%s18090_s1 + $0x120c] ss:$16 sps:$4 sm:$0xff]  }
 0x205   :  { %6747 = vmatprep.mubr.bf16.mxu0 %v10293_v24  ;;  %7435 = vmatprep.mubr.bf16.mxu1 %v10293_v24  ;;  %v15638_v19 = vld [vmem:[%s18091_s0 + $0x48] sm:$0xff] }
 0x206   :  { %v15643_v24 = vld [vmem:[%s18091_s0 + $0xc8] sm:$0xff] }
 0x207   :  { %6718 = vmatpush1.bf16.msra.mxu0 %v12557_v41  ;;  %7406 = vmatpush1.bf16.msra.mxu1 %v12560_v42  ;;  %v10292_v41 = vcombine.low %v15432_v14, %v15437_v21  ;;  %v12647_v42 = vld [vmem:[%s18090_s1 + $0x1200] ss:$16 sps:$4 sm:$0xff]   ;;  %v12658_v14 = vld [vmem:[%s18090_s1 + $0x122c] ss:$16 sps:$4 sm:$0xff]   ;;  %v10295_v21 = vcombine.high %v15638_v19, %v15643_v24 }
 0x208   :  { %6719 = vmatprep.subr.bf16.mxu0 %v12565_v43  ;;  %7407 = vmatprep.subr.bf16.mxu1 %v12568_v44  ;;  %v12650_v43 = vld [vmem:[%s18090_s1 + $0x1208] ss:$16 sps:$4 sm:$0xff]   ;;  %v12655_v44 = vld [vmem:[%s18090_s1 + $0x1224] ss:$16 sps:$4 sm:$0xff]  }
 0x20b   :  { %6720 = vmatpush1.bf16.msra.mxu0 %v12563_v45  ;;  %7408 = vmatpush1.bf16.msra.mxu1 %v12566_v46  ;;  %v12653_v45 = vld [vmem:[%s18090_s1 + $0x1220] ss:$16 sps:$4 sm:$0xff]   ;;  %v12656_v46 = vld [vmem:[%s18090_s1 + $0x1228] ss:$16 sps:$4 sm:$0xff]  }
 0x20c   :  { %6721 = vmatprep.subr.bf16.mxu0 %v12571_v47  ;;  %7409 = vmatprep.subr.bf16.mxu1 %v12574_v48  ;;  %v12661_v47 = vld [vmem:[%s18090_s1 + $0x1244] ss:$16 sps:$4 sm:$0xff]   ;;  %v12664_v48 = vld [vmem:[%s18090_s1 + $0x124c] ss:$16 sps:$4 sm:$0xff]  }
 0x20f   :  { %6722 = vmatpush1.bf16.msra.mxu0 %v12569_v49  ;;  %7410 = vmatpush1.bf16.msra.mxu1 %v12572_v50  ;;  %v12659_v49 = vld [vmem:[%s18090_s1 + $0x1240] ss:$16 sps:$4 sm:$0xff]   ;;  %v12662_v50 = vld [vmem:[%s18090_s1 + $0x1248] ss:$16 sps:$4 sm:$0xff]  }
 0x210   :  { %6723 = vmatprep.subr.bf16.mxu0 %v12577_v51  ;;  %7411 = vmatprep.subr.bf16.mxu1 %v12580_v52  ;;  %v12667_v51 = vld [vmem:[%s18090_s1 + $0x1264] ss:$16 sps:$4 sm:$0xff]   ;;  %v12670_v52 = vld [vmem:[%s18090_s1 + $0x126c] ss:$16 sps:$4 sm:$0xff]  }
 0x213   :  { %6724 = vmatpush1.bf16.msra.mxu0 %v12575_v53  ;;  %7412 = vmatpush1.bf16.msra.mxu1 %v12578_v54  ;;  %v12665_v53 = vld [vmem:[%s18090_s1 + $0x1260] ss:$16 sps:$4 sm:$0xff]   ;;  %v12668_v54 = vld [vmem:[%s18090_s1 + $0x1268] ss:$16 sps:$4 sm:$0xff]  }
 0x214   :  { %6725 = vmatprep.subr.bf16.mxu0 %v12583_v55  ;;  %7413 = vmatprep.subr.bf16.mxu1 %v12586_v56  ;;  %v12673_v55 = vld [vmem:[%s18090_s1 + $0x1284] ss:$16 sps:$4 sm:$0xff]   ;;  %v12676_v56 = vld [vmem:[%s18090_s1 + $0x128c] ss:$16 sps:$4 sm:$0xff]  }
 0x217   :  { %6726 = vmatpush1.bf16.msra.mxu0 %v12581_v57  ;;  %7414 = vmatpush1.bf16.msra.mxu1 %v12584_v58  ;;  %v12671_v57 = vld [vmem:[%s18090_s1 + $0x1280] ss:$16 sps:$4 sm:$0xff]   ;;  %v12674_v58 = vld [vmem:[%s18090_s1 + $0x1288] ss:$16 sps:$4 sm:$0xff]  }
 0x218   :  { %6727 = vmatprep.subr.bf16.mxu0 %v12589_v59  ;;  %7415 = vmatprep.subr.bf16.mxu1 %v12592_v60  ;;  %v12679_v59 = vld [vmem:[%s18090_s1 + $0x12a4] ss:$16 sps:$4 sm:$0xff]   ;;  %v12682_v60 = vld [vmem:[%s18090_s1 + $0x12ac] ss:$16 sps:$4 sm:$0xff]  }
 0x21b   :  { %6728 = vmatpush1.bf16.msra.mxu0 %v12587_v61  ;;  %7416 = vmatpush1.bf16.msra.mxu1 %v12590_v62  ;;  %v12677_v61 = vld [vmem:[%s18090_s1 + $0x12a0] ss:$16 sps:$4 sm:$0xff]   ;;  %v12680_v62 = vld [vmem:[%s18090_s1 + $0x12a8] ss:$16 sps:$4 sm:$0xff]  }
 0x21c   :  { %6729 = vmatprep.subr.bf16.mxu0 %v12595_v63  ;;  %7417 = vmatprep.subr.bf16.mxu1 %v12598_v0  ;;  %v12685_v63 = vld [vmem:[%s18090_s1 + $0x12c4] ss:$16 sps:$4 sm:$0xff]   ;;  %v12688_v0 = vld [vmem:[%s18090_s1 + $0x12cc] ss:$16 sps:$4 sm:$0xff]  }
 0x21f   :  { %6730 = vmatpush1.bf16.msra.mxu0 %v12593_v1  ;;  %7418 = vmatpush1.bf16.msra.mxu1 %v12596_v2  ;;  %v12683_v1 = vld [vmem:[%s18090_s1 + $0x12c0] ss:$16 sps:$4 sm:$0xff]   ;;  %v12686_v2 = vld [vmem:[%s18090_s1 + $0x12c8] ss:$16 sps:$4 sm:$0xff]  }
 0x220   :  { %6731 = vmatprep.subr.bf16.mxu0 %v12601_v3  ;;  %7419 = vmatprep.subr.bf16.mxu1 %v12604_v4  ;;  %v12691_v3 = vld [vmem:[%s18090_s1 + $0x12e4] ss:$16 sps:$4 sm:$0xff]   ;;  %v12694_v4 = vld [vmem:[%s18090_s1 + $0x12ec] ss:$16 sps:$4 sm:$0xff]  }
 0x223   :  { %6732 = vmatpush1.bf16.msra.mxu0 %v12599_v5  ;;  %7420 = vmatpush1.bf16.msra.mxu1 %v12602_v6  ;;  %v12689_v5 = vld [vmem:[%s18090_s1 + $0x12e0] ss:$16 sps:$4 sm:$0xff]   ;;  %v12692_v6 = vld [vmem:[%s18090_s1 + $0x12e8] ss:$16 sps:$4 sm:$0xff]  }
 0x224   :  { %6733 = vmatprep.subr.bf16.mxu0 %v12607_v7  ;;  %7421 = vmatprep.subr.bf16.mxu1 %v12610_v8  ;;  %v12697_v7 = vld [vmem:[%s18090_s1 + $0x1304] ss:$16 sps:$4 sm:$0xff]   ;;  %v12700_v8 = vld [vmem:[%s18090_s1 + $0x130c] ss:$16 sps:$4 sm:$0xff]  }
 0x227   :  { %6734 = vmatpush1.bf16.msra.mxu0 %v12605_v9  ;;  %7422 = vmatpush1.bf16.msra.mxu1 %v12608_v10  ;;  %v12695_v9 = vld [vmem:[%s18090_s1 + $0x1300] ss:$16 sps:$4 sm:$0xff]   ;;  %v12698_v10 = vld [vmem:[%s18090_s1 + $0x1308] ss:$16 sps:$4 sm:$0xff]  }
 0x228   :  { %6735 = vmatprep.subr.bf16.mxu0 %v12613_v11  ;;  %7423 = vmatprep.subr.bf16.mxu1 %v12616_v12  ;;  %v12703_v11 = vld [vmem:[%s18090_s1 + $0x1324] ss:$16 sps:$4 sm:$0xff]   ;;  %v12706_v12 = vld [vmem:[%s18090_s1 + $0x132c] ss:$16 sps:$4 sm:$0xff]  }
 0x22b   :  { %6736 = vmatpush1.bf16.msra.mxu0 %v12611_v13  ;;  %7424 = vmatpush1.bf16.msra.mxu1 %v12614_v16  ;;  %v12701_v13 = vld [vmem:[%s18090_s1 + $0x1320] ss:$16 sps:$4 sm:$0xff]   ;;  %v12704_v16 = vld [vmem:[%s18090_s1 + $0x1328] ss:$16 sps:$4 sm:$0xff]  }
 0x22c   :  { %6737 = vmatprep.subr.bf16.mxu0 %v12619_v17  ;;  %7425 = vmatprep.subr.bf16.mxu1 %v12622_v20  ;;  %v12709_v17 = vld [vmem:[%s18090_s1 + $0x1344] ss:$16 sps:$4 sm:$0xff]   ;;  %v12712_v20 = vld [vmem:[%s18090_s1 + $0x134c] ss:$16 sps:$4 sm:$0xff]  }
 0x22f   :  { %6738 = vmatpush1.bf16.msra.mxu0 %v12617_v15  ;;  %7426 = vmatpush1.bf16.msra.mxu1 %v12620_v22  ;;  %v12707_v15 = vld [vmem:[%s18090_s1 + $0x1340] ss:$16 sps:$4 sm:$0xff]   ;;  %v12710_v22 = vld [vmem:[%s18090_s1 + $0x1348] ss:$16 sps:$4 sm:$0xff]  }
 0x230   :  { %6739 = vmatprep.subr.bf16.mxu0 %v12625_v23  ;;  %7427 = vmatprep.subr.bf16.mxu1 %v12628_v18  ;;  %v12715_v23 = vld [vmem:[%s18090_s1 + $0x1364] ss:$16 sps:$4 sm:$0xff]   ;;  %v12718_v18 = vld [vmem:[%s18090_s1 + $0x136c] ss:$16 sps:$4 sm:$0xff]  }
 0x233   :  { %6740 = vmatpush1.bf16.msra.mxu0 %v12623_v25  ;;  %7428 = vmatpush1.bf16.msra.mxu1 %v12626_v26  ;;  %v12713_v25 = vld [vmem:[%s18090_s1 + $0x1360] ss:$16 sps:$4 sm:$0xff]   ;;  %v12716_v26 = vld [vmem:[%s18090_s1 + $0x1368] ss:$16 sps:$4 sm:$0xff]  }
 0x234   :  { %6741 = vmatprep.subr.bf16.mxu0 %v12631_v27  ;;  %7429 = vmatprep.subr.bf16.mxu1 %v12634_v28  ;;  %v12721_v27 = vld [vmem:[%s18090_s1 + $0x1384] ss:$16 sps:$4 sm:$0xff]   ;;  %v12724_v28 = vld [vmem:[%s18090_s1 + $0x138c] ss:$16 sps:$4 sm:$0xff]  }
 0x237   :  { %6742 = vmatpush1.bf16.msra.mxu0 %v12629_v29  ;;  %7430 = vmatpush1.bf16.msra.mxu1 %v12632_v30  ;;  %v12719_v29 = vld [vmem:[%s18090_s1 + $0x1380] ss:$16 sps:$4 sm:$0xff]   ;;  %v12722_v30 = vld [vmem:[%s18090_s1 + $0x1388] ss:$16 sps:$4 sm:$0xff]  }
 0x238   :  { %6743 = vmatprep.subr.bf16.mxu0 %v12637_v31  ;;  %7431 = vmatprep.subr.bf16.mxu1 %v12640_v32  ;;  %v12727_v31 = vld [vmem:[%s18090_s1 + $0x13a4] ss:$16 sps:$4 sm:$0xff]   ;;  %v12730_v32 = vld [vmem:[%s18090_s1 + $0x13ac] ss:$16 sps:$4 sm:$0xff]  }
 0x23b   :  { %6744 = vmatpush1.bf16.msra.mxu0 %v12635_v33  ;;  %7432 = vmatpush1.bf16.msra.mxu1 %v12638_v34  ;;  %v12725_v33 = vld [vmem:[%s18090_s1 + $0x13a0] ss:$16 sps:$4 sm:$0xff]   ;;  %v12728_v34 = vld [vmem:[%s18090_s1 + $0x13a8] ss:$16 sps:$4 sm:$0xff]  }
 0x23c   :  { %6745 = vmatprep.subr.bf16.mxu0 %v12643_v35  ;;  %7433 = vmatprep.subr.bf16.mxu1 %v12646_v36  ;;  %v12733_v35 = vld [vmem:[%s18090_s1 + $0x13c4] ss:$16 sps:$4 sm:$0xff]   ;;  %v12736_v36 = vld [vmem:[%s18090_s1 + $0x13cc] ss:$16 sps:$4 sm:$0xff]  }
 0x23f   :  { %6746 = vmatpush1.bf16.msra.mxu0 %v12641_v37  ;;  %7434 = vmatpush1.bf16.msra.mxu1 %v12644_v38  ;;  %v12731_v37 = vld [vmem:[%s18090_s1 + $0x13c0] ss:$16 sps:$4 sm:$0xff]   ;;  %v12734_v38 = vld [vmem:[%s18090_s1 + $0x13c8] ss:$16 sps:$4 sm:$0xff]  }
 0x240   :  { %6758 = vmatprep.subr.bf16.mxu0 %v12649_v39  ;;  %7446 = vmatprep.subr.bf16.mxu1 %v12652_v40  ;;  %v12739_v39 = vld [vmem:[%s18090_s1 + $0x13e4] ss:$16 sps:$4 sm:$0xff]   ;;  %v12742_v40 = vld [vmem:[%s18090_s1 + $0x13ec] ss:$16 sps:$4 sm:$0xff]  }
 0x242   :  { %6748 = vmatmul.mubr.bf16.vlgmr.msra.gmra.mrb[0].mxu0 %v10292_v41  ;;  %7436 = vmatmul.mubr.bf16.vlgmr.msra.gmra.mrb[0].mxu1 %v10292_v41  ;;  %v12737_v41 = vld [vmem:[%s18090_s1 + $0x13e0] ss:$16 sps:$4 sm:$0xff]  }
 0x243   :  { %6759 = vmatpush1.bf16.msra.mxu0 %v12647_v42  ;;  %7447 = vmatpush1.bf16.msra.mxu1 %v12650_v43  ;;  %v12740_v42 = vld [vmem:[%s18090_s1 + $0x13e8] ss:$16 sps:$4 sm:$0xff]   ;;  %v12745_v43 = vld [vmem:[%s18090_s1 + $0x1404] ss:$16 sps:$4 sm:$0xff]  }
 0x244   :  { %6760 = vmatprep.subr.bf16.mxu0 %v12655_v44  ;;  %7448 = vmatprep.subr.bf16.mxu1 %v12658_v14  ;;  %v12748_v44 = vld [vmem:[%s18090_s1 + $0x140c] ss:$16 sps:$4 sm:$0xff]   ;;  %v10294_v14 = vcombine.low %v15638_v19, %v15643_v24  ;;  %v12746_v19 = vld [vmem:[%s18090_s1 + $0x1408] ss:$16 sps:$4 sm:$0xff]   ;;  %v12751_v24 = vld [vmem:[%s18090_s1 + $0x1424] ss:$16 sps:$4 sm:$0xff]  }
 0x245   :  { %6790 = vmatprep.mubr.bf16.mxu0 %v10295_v21  ;;  %7478 = vmatprep.mubr.bf16.mxu1 %v10295_v21  ;;  %v15846_v21 = vld [vmem:[%s18091_s0 + $0x50] sm:$0xff] }
 0x247   :  { %6761 = vmatpush1.bf16.msra.mxu0 %v12653_v45  ;;  %7449 = vmatpush1.bf16.msra.mxu1 %v12656_v46  ;;  %v15851_v45 = vld [vmem:[%s18091_s0 + $0xd0] sm:$0xff] }
 0x248   :  { %6762 = vmatprep.subr.bf16.mxu0 %v12661_v47  ;;  %7450 = vmatprep.subr.bf16.mxu1 %v12664_v48  ;;  %v12743_v46 = vld [vmem:[%s18090_s1 + $0x1400] ss:$16 sps:$4 sm:$0xff]   ;;  %v12754_v47 = vld [vmem:[%s18090_s1 + $0x142c] ss:$16 sps:$4 sm:$0xff]   ;;  %v10297_v48 = vcombine.high %v15846_v21, %v15851_v45 }
 0x24b   :  { %6763 = vmatpush1.bf16.msra.mxu0 %v12659_v49  ;;  %7451 = vmatpush1.bf16.msra.mxu1 %v12662_v50  ;;  %v12749_v49 = vld [vmem:[%s18090_s1 + $0x1420] ss:$16 sps:$4 sm:$0xff]   ;;  %v12752_v50 = vld [vmem:[%s18090_s1 + $0x1428] ss:$16 sps:$4 sm:$0xff]  }
 0x24c   :  { %6764 = vmatprep.subr.bf16.mxu0 %v12667_v51  ;;  %7452 = vmatprep.subr.bf16.mxu1 %v12670_v52  ;;  %v12757_v51 = vld [vmem:[%s18090_s1 + $0x1444] ss:$16 sps:$4 sm:$0xff]   ;;  %v12760_v52 = vld [vmem:[%s18090_s1 + $0x144c] ss:$16 sps:$4 sm:$0xff]  }
 0x24f   :  { %6765 = vmatpush1.bf16.msra.mxu0 %v12665_v53  ;;  %7453 = vmatpush1.bf16.msra.mxu1 %v12668_v54  ;;  %v12755_v53 = vld [vmem:[%s18090_s1 + $0x1440] ss:$16 sps:$4 sm:$0xff]   ;;  %v12758_v54 = vld [vmem:[%s18090_s1 + $0x1448] ss:$16 sps:$4 sm:$0xff]  }
 0x250   :  { %6766 = vmatprep.subr.bf16.mxu0 %v12673_v55  ;;  %7454 = vmatprep.subr.bf16.mxu1 %v12676_v56  ;;  %v12763_v55 = vld [vmem:[%s18090_s1 + $0x1464] ss:$16 sps:$4 sm:$0xff]   ;;  %v12766_v56 = vld [vmem:[%s18090_s1 + $0x146c] ss:$16 sps:$4 sm:$0xff]  }
 0x253   :  { %6767 = vmatpush1.bf16.msra.mxu0 %v12671_v57  ;;  %7455 = vmatpush1.bf16.msra.mxu1 %v12674_v58  ;;  %v12761_v57 = vld [vmem:[%s18090_s1 + $0x1460] ss:$16 sps:$4 sm:$0xff]   ;;  %v12764_v58 = vld [vmem:[%s18090_s1 + $0x1468] ss:$16 sps:$4 sm:$0xff]  }
 0x254   :  { %6768 = vmatprep.subr.bf16.mxu0 %v12679_v59  ;;  %7456 = vmatprep.subr.bf16.mxu1 %v12682_v60  ;;  %v12769_v59 = vld [vmem:[%s18090_s1 + $0x1484] ss:$16 sps:$4 sm:$0xff]   ;;  %v12772_v60 = vld [vmem:[%s18090_s1 + $0x148c] ss:$16 sps:$4 sm:$0xff]  }
 0x257   :  { %6769 = vmatpush1.bf16.msra.mxu0 %v12677_v61  ;;  %7457 = vmatpush1.bf16.msra.mxu1 %v12680_v62  ;;  %v12767_v61 = vld [vmem:[%s18090_s1 + $0x1480] ss:$16 sps:$4 sm:$0xff]   ;;  %v12770_v62 = vld [vmem:[%s18090_s1 + $0x1488] ss:$16 sps:$4 sm:$0xff]  }
 0x258   :  { %6770 = vmatprep.subr.bf16.mxu0 %v12685_v63  ;;  %7458 = vmatprep.subr.bf16.mxu1 %v12688_v0  ;;  %v12775_v63 = vld [vmem:[%s18090_s1 + $0x14a4] ss:$16 sps:$4 sm:$0xff]   ;;  %v12778_v0 = vld [vmem:[%s18090_s1 + $0x14ac] ss:$16 sps:$4 sm:$0xff]  }
 0x25b   :  { %6771 = vmatpush1.bf16.msra.mxu0 %v12683_v1  ;;  %7459 = vmatpush1.bf16.msra.mxu1 %v12686_v2  ;;  %v12773_v1 = vld [vmem:[%s18090_s1 + $0x14a0] ss:$16 sps:$4 sm:$0xff]   ;;  %v12776_v2 = vld [vmem:[%s18090_s1 + $0x14a8] ss:$16 sps:$4 sm:$0xff]  }
 0x25c   :  { %6772 = vmatprep.subr.bf16.mxu0 %v12691_v3  ;;  %7460 = vmatprep.subr.bf16.mxu1 %v12694_v4  ;;  %v12781_v3 = vld [vmem:[%s18090_s1 + $0x14c4] ss:$16 sps:$4 sm:$0xff]   ;;  %v12784_v4 = vld [vmem:[%s18090_s1 + $0x14cc] ss:$16 sps:$4 sm:$0xff]  }
 0x25f   :  { %6773 = vmatpush1.bf16.msra.mxu0 %v12689_v5  ;;  %7461 = vmatpush1.bf16.msra.mxu1 %v12692_v6  ;;  %v12779_v5 = vld [vmem:[%s18090_s1 + $0x14c0] ss:$16 sps:$4 sm:$0xff]   ;;  %v12782_v6 = vld [vmem:[%s18090_s1 + $0x14c8] ss:$16 sps:$4 sm:$0xff]  }
 0x260   :  { %6774 = vmatprep.subr.bf16.mxu0 %v12697_v7  ;;  %7462 = vmatprep.subr.bf16.mxu1 %v12700_v8  ;;  %v12787_v7 = vld [vmem:[%s18090_s1 + $0x14e4] ss:$16 sps:$4 sm:$0xff]   ;;  %v12790_v8 = vld [vmem:[%s18090_s1 + $0x14ec] ss:$16 sps:$4 sm:$0xff]  }
 0x263   :  { %6775 = vmatpush1.bf16.msra.mxu0 %v12695_v9  ;;  %7463 = vmatpush1.bf16.msra.mxu1 %v12698_v10  ;;  %v12785_v9 = vld [vmem:[%s18090_s1 + $0x14e0] ss:$16 sps:$4 sm:$0xff]   ;;  %v12788_v10 = vld [vmem:[%s18090_s1 + $0x14e8] ss:$16 sps:$4 sm:$0xff]  }
 0x264   :  { %6776 = vmatprep.subr.bf16.mxu0 %v12703_v11  ;;  %7464 = vmatprep.subr.bf16.mxu1 %v12706_v12  ;;  %v12793_v11 = vld [vmem:[%s18090_s1 + $0x1504] ss:$16 sps:$4 sm:$0xff]   ;;  %v12796_v12 = vld [vmem:[%s18090_s1 + $0x150c] ss:$16 sps:$4 sm:$0xff]  }
 0x267   :  { %6777 = vmatpush1.bf16.msra.mxu0 %v12701_v13  ;;  %7465 = vmatpush1.bf16.msra.mxu1 %v12704_v16  ;;  %v12791_v13 = vld [vmem:[%s18090_s1 + $0x1500] ss:$16 sps:$4 sm:$0xff]   ;;  %v12794_v16 = vld [vmem:[%s18090_s1 + $0x1508] ss:$16 sps:$4 sm:$0xff]  }
 0x268   :  { %6778 = vmatprep.subr.bf16.mxu0 %v12709_v17  ;;  %7466 = vmatprep.subr.bf16.mxu1 %v12712_v20  ;;  %v12799_v17 = vld [vmem:[%s18090_s1 + $0x1524] ss:$16 sps:$4 sm:$0xff]   ;;  %v12802_v20 = vld [vmem:[%s18090_s1 + $0x152c] ss:$16 sps:$4 sm:$0xff]  }
 0x26b   :  { %6779 = vmatpush1.bf16.msra.mxu0 %v12707_v15  ;;  %7467 = vmatpush1.bf16.msra.mxu1 %v12710_v22  ;;  %v12797_v15 = vld [vmem:[%s18090_s1 + $0x1520] ss:$16 sps:$4 sm:$0xff]   ;;  %v12800_v22 = vld [vmem:[%s18090_s1 + $0x1528] ss:$16 sps:$4 sm:$0xff]  }
 0x26c   :  { %6780 = vmatprep.subr.bf16.mxu0 %v12715_v23  ;;  %7468 = vmatprep.subr.bf16.mxu1 %v12718_v18  ;;  %v12805_v23 = vld [vmem:[%s18090_s1 + $0x1544] ss:$16 sps:$4 sm:$0xff]   ;;  %v12808_v18 = vld [vmem:[%s18090_s1 + $0x154c] ss:$16 sps:$4 sm:$0xff]  }
 0x26f   :  { %6781 = vmatpush1.bf16.msra.mxu0 %v12713_v25  ;;  %7469 = vmatpush1.bf16.msra.mxu1 %v12716_v26  ;;  %v12803_v25 = vld [vmem:[%s18090_s1 + $0x1540] ss:$16 sps:$4 sm:$0xff]   ;;  %v12806_v26 = vld [vmem:[%s18090_s1 + $0x1548] ss:$16 sps:$4 sm:$0xff]  }
 0x270   :  { %6782 = vmatprep.subr.bf16.mxu0 %v12721_v27  ;;  %7470 = vmatprep.subr.bf16.mxu1 %v12724_v28  ;;  %v12811_v27 = vld [vmem:[%s18090_s1 + $0x1564] ss:$16 sps:$4 sm:$0xff]   ;;  %v12814_v28 = vld [vmem:[%s18090_s1 + $0x156c] ss:$16 sps:$4 sm:$0xff]  }
 0x273   :  { %6783 = vmatpush1.bf16.msra.mxu0 %v12719_v29  ;;  %7471 = vmatpush1.bf16.msra.mxu1 %v12722_v30  ;;  %v12809_v29 = vld [vmem:[%s18090_s1 + $0x1560] ss:$16 sps:$4 sm:$0xff]   ;;  %v12812_v30 = vld [vmem:[%s18090_s1 + $0x1568] ss:$16 sps:$4 sm:$0xff]  }
 0x274   :  { %6784 = vmatprep.subr.bf16.mxu0 %v12727_v31  ;;  %7472 = vmatprep.subr.bf16.mxu1 %v12730_v32  ;;  %v12817_v31 = vld [vmem:[%s18090_s1 + $0x1584] ss:$16 sps:$4 sm:$0xff]   ;;  %v12820_v32 = vld [vmem:[%s18090_s1 + $0x158c] ss:$16 sps:$4 sm:$0xff]  }
 0x277   :  { %6785 = vmatpush1.bf16.msra.mxu0 %v12725_v33  ;;  %7473 = vmatpush1.bf16.msra.mxu1 %v12728_v34  ;;  %v12815_v33 = vld [vmem:[%s18090_s1 + $0x1580] ss:$16 sps:$4 sm:$0xff]   ;;  %v12818_v34 = vld [vmem:[%s18090_s1 + $0x1588] ss:$16 sps:$4 sm:$0xff]  }
 0x278   :  { %6786 = vmatprep.subr.bf16.mxu0 %v12733_v35  ;;  %7474 = vmatprep.subr.bf16.mxu1 %v12736_v36  ;;  %v12823_v35 = vld [vmem:[%s18090_s1 + $0x15a4] ss:$16 sps:$4 sm:$0xff]   ;;  %v12826_v36 = vld [vmem:[%s18090_s1 + $0x15ac] ss:$16 sps:$4 sm:$0xff]  }
 0x27b   :  { %6787 = vmatpush1.bf16.msra.mxu0 %v12731_v37  ;;  %7475 = vmatpush1.bf16.msra.mxu1 %v12734_v38  ;;  %v12821_v37 = vld [vmem:[%s18090_s1 + $0x15a0] ss:$16 sps:$4 sm:$0xff]   ;;  %v12824_v38 = vld [vmem:[%s18090_s1 + $0x15a8] ss:$16 sps:$4 sm:$0xff]  }
 0x27c   :  { %6788 = vmatprep.subr.bf16.mxu0 %v12739_v39  ;;  %7476 = vmatprep.subr.bf16.mxu1 %v12742_v40  ;;  %v12829_v39 = vld [vmem:[%s18090_s1 + $0x15c4] ss:$16 sps:$4 sm:$0xff]   ;;  %v12832_v40 = vld [vmem:[%s18090_s1 + $0x15cc] ss:$16 sps:$4 sm:$0xff]  }
 0x27f   :  { %6789 = vmatpush1.bf16.msra.mxu0 %v12737_v41  ;;  %7477 = vmatpush1.bf16.msra.mxu1 %v12740_v42  ;;  %v12827_v41 = vld [vmem:[%s18090_s1 + $0x15c0] ss:$16 sps:$4 sm:$0xff]   ;;  %v12830_v42 = vld [vmem:[%s18090_s1 + $0x15c8] ss:$16 sps:$4 sm:$0xff]  }
 0x280   :  { %6801 = vmatprep.subr.bf16.mxu0 %v12745_v43  ;;  %7489 = vmatprep.subr.bf16.mxu1 %v12748_v44  ;;  %v12835_v43 = vld [vmem:[%s18090_s1 + $0x15e4] ss:$16 sps:$4 sm:$0xff]   ;;  %v12838_v44 = vld [vmem:[%s18090_s1 + $0x15ec] ss:$16 sps:$4 sm:$0xff]  }
 0x282   :  { %6791 = vmatmul.mubr.bf16.vlgmr.msra.gmra.mrb[0].mxu0 %v10294_v14  ;;  %7479 = vmatmul.mubr.bf16.vlgmr.msra.gmra.mrb[0].mxu1 %v10294_v14  ;;  %v12833_v14 = vld [vmem:[%s18090_s1 + $0x15e0] ss:$16 sps:$4 sm:$0xff]  }
 0x283   :  { %6802 = vmatpush1.bf16.msra.mxu0 %v12743_v46  ;;  %7490 = vmatpush1.bf16.msra.mxu1 %v12746_v19  ;;  %v12836_v46 = vld [vmem:[%s18090_s1 + $0x15e8] ss:$16 sps:$4 sm:$0xff]   ;;  %v12841_v19 = vld [vmem:[%s18090_s1 + $0x1604] ss:$16 sps:$4 sm:$0xff]  }
 0x284   :  { %6803 = vmatprep.subr.bf16.mxu0 %v12751_v24  ;;  %7491 = vmatprep.subr.bf16.mxu1 %v12754_v47  ;;  %v12844_v24 = vld [vmem:[%s18090_s1 + $0x160c] ss:$16 sps:$4 sm:$0xff]   ;;  %v10296_v47 = vcombine.low %v15846_v21, %v15851_v45  ;;  %v12842_v21 = vld [vmem:[%s18090_s1 + $0x1608] ss:$16 sps:$4 sm:$0xff]   ;;  %v12847_v45 = vld [vmem:[%s18090_s1 + $0x1624] ss:$16 sps:$4 sm:$0xff]  }
 0x285   :  { %6833 = vmatprep.mubr.bf16.mxu0 %v10297_v48  ;;  %7521 = vmatprep.mubr.bf16.mxu1 %v10297_v48  ;;  %v16052_v48 = vld [vmem:[%s18091_s0 + $0x58] sm:$0xff] }
 0x287   :  { %6804 = vmatpush1.bf16.msra.mxu0 %v12749_v49  ;;  %7492 = vmatpush1.bf16.msra.mxu1 %v12752_v50  ;;  %v16057_v49 = vld [vmem:[%s18091_s0 + $0xd8] sm:$0xff]  ;;  %v12839_v50 = vld [vmem:[%s18090_s1 + $0x1600] ss:$16 sps:$4 sm:$0xff]  }
 0x288   :  { %6805 = vmatprep.subr.bf16.mxu0 %v12757_v51  ;;  %7493 = vmatprep.subr.bf16.mxu1 %v12760_v52  ;;  %v12850_v51 = vld [vmem:[%s18090_s1 + $0x162c] ss:$16 sps:$4 sm:$0xff]   ;;  %v10299_v52 = vcombine.high %v16052_v48, %v16057_v49 }
 0x28b   :  { %6806 = vmatpush1.bf16.msra.mxu0 %v12755_v53  ;;  %7494 = vmatpush1.bf16.msra.mxu1 %v12758_v54  ;;  %v12845_v53 = vld [vmem:[%s18090_s1 + $0x1620] ss:$16 sps:$4 sm:$0xff]   ;;  %v12848_v54 = vld [vmem:[%s18090_s1 + $0x1628] ss:$16 sps:$4 sm:$0xff]  }
 0x28c   :  { %6807 = vmatprep.subr.bf16.mxu0 %v12763_v55  ;;  %7495 = vmatprep.subr.bf16.mxu1 %v12766_v56  ;;  %v12853_v55 = vld [vmem:[%s18090_s1 + $0x1644] ss:$16 sps:$4 sm:$0xff]   ;;  %v12856_v56 = vld [vmem:[%s18090_s1 + $0x164c] ss:$16 sps:$4 sm:$0xff]  }
 0x28f   :  { %6808 = vmatpush1.bf16.msra.mxu0 %v12761_v57  ;;  %7496 = vmatpush1.bf16.msra.mxu1 %v12764_v58  ;;  %v12851_v57 = vld [vmem:[%s18090_s1 + $0x1640] ss:$16 sps:$4 sm:$0xff]   ;;  %v12854_v58 = vld [vmem:[%s18090_s1 + $0x1648] ss:$16 sps:$4 sm:$0xff]  }
 0x290   :  { %6809 = vmatprep.subr.bf16.mxu0 %v12769_v59  ;;  %7497 = vmatprep.subr.bf16.mxu1 %v12772_v60  ;;  %v12859_v59 = vld [vmem:[%s18090_s1 + $0x1664] ss:$16 sps:$4 sm:$0xff]   ;;  %v12862_v60 = vld [vmem:[%s18090_s1 + $0x166c] ss:$16 sps:$4 sm:$0xff]  }
 0x293   :  { %6810 = vmatpush1.bf16.msra.mxu0 %v12767_v61  ;;  %7498 = vmatpush1.bf16.msra.mxu1 %v12770_v62  ;;  %v12857_v61 = vld [vmem:[%s18090_s1 + $0x1660] ss:$16 sps:$4 sm:$0xff]   ;;  %v12860_v62 = vld [vmem:[%s18090_s1 + $0x1668] ss:$16 sps:$4 sm:$0xff]  }
 0x294   :  { %6811 = vmatprep.subr.bf16.mxu0 %v12775_v63  ;;  %7499 = vmatprep.subr.bf16.mxu1 %v12778_v0  ;;  %v12865_v63 = vld [vmem:[%s18090_s1 + $0x1684] ss:$16 sps:$4 sm:$0xff]   ;;  %v12868_v0 = vld [vmem:[%s18090_s1 + $0x168c] ss:$16 sps:$4 sm:$0xff]  }
 0x297   :  { %6812 = vmatpush1.bf16.msra.mxu0 %v12773_v1  ;;  %7500 = vmatpush1.bf16.msra.mxu1 %v12776_v2  ;;  %v12863_v1 = vld [vmem:[%s18090_s1 + $0x1680] ss:$16 sps:$4 sm:$0xff]   ;;  %v12866_v2 = vld [vmem:[%s18090_s1 + $0x1688] ss:$16 sps:$4 sm:$0xff]  }
 0x298   :  { %6813 = vmatprep.subr.bf16.mxu0 %v12781_v3  ;;  %7501 = vmatprep.subr.bf16.mxu1 %v12784_v4  ;;  %v12871_v3 = vld [vmem:[%s18090_s1 + $0x16a4] ss:$16 sps:$4 sm:$0xff]   ;;  %v12874_v4 = vld [vmem:[%s18090_s1 + $0x16ac] ss:$16 sps:$4 sm:$0xff]  }
 0x29b   :  { %6814 = vmatpush1.bf16.msra.mxu0 %v12779_v5  ;;  %7502 = vmatpush1.bf16.msra.mxu1 %v12782_v6  ;;  %v12869_v5 = vld [vmem:[%s18090_s1 + $0x16a0] ss:$16 sps:$4 sm:$0xff]   ;;  %v12872_v6 = vld [vmem:[%s18090_s1 + $0x16a8] ss:$16 sps:$4 sm:$0xff]  }
 0x29c   :  { %6815 = vmatprep.subr.bf16.mxu0 %v12787_v7  ;;  %7503 = vmatprep.subr.bf16.mxu1 %v12790_v8  ;;  %v12877_v7 = vld [vmem:[%s18090_s1 + $0x16c4] ss:$16 sps:$4 sm:$0xff]   ;;  %v12880_v8 = vld [vmem:[%s18090_s1 + $0x16cc] ss:$16 sps:$4 sm:$0xff]  }
 0x29f   :  { %6816 = vmatpush1.bf16.msra.mxu0 %v12785_v9  ;;  %7504 = vmatpush1.bf16.msra.mxu1 %v12788_v10  ;;  %v12875_v9 = vld [vmem:[%s18090_s1 + $0x16c0] ss:$16 sps:$4 sm:$0xff]   ;;  %v12878_v10 = vld [vmem:[%s18090_s1 + $0x16c8] ss:$16 sps:$4 sm:$0xff]  }
 0x2a0   :  { %6817 = vmatprep.subr.bf16.mxu0 %v12793_v11  ;;  %7505 = vmatprep.subr.bf16.mxu1 %v12796_v12  ;;  %v12883_v11 = vld [vmem:[%s18090_s1 + $0x16e4] ss:$16 sps:$4 sm:$0xff]   ;;  %v12886_v12 = vld [vmem:[%s18090_s1 + $0x16ec] ss:$16 sps:$4 sm:$0xff]  }
 0x2a3   :  { %6818 = vmatpush1.bf16.msra.mxu0 %v12791_v13  ;;  %7506 = vmatpush1.bf16.msra.mxu1 %v12794_v16  ;;  %v12881_v13 = vld [vmem:[%s18090_s1 + $0x16e0] ss:$16 sps:$4 sm:$0xff]   ;;  %v12884_v16 = vld [vmem:[%s18090_s1 + $0x16e8] ss:$16 sps:$4 sm:$0xff]  }
 0x2a4   :  { %6819 = vmatprep.subr.bf16.mxu0 %v12799_v17  ;;  %7507 = vmatprep.subr.bf16.mxu1 %v12802_v20  ;;  %v12889_v17 = vld [vmem:[%s18090_s1 + $0x1704] ss:$16 sps:$4 sm:$0xff]   ;;  %v12892_v20 = vld [vmem:[%s18090_s1 + $0x170c] ss:$16 sps:$4 sm:$0xff]  }
 0x2a7   :  { %6820 = vmatpush1.bf16.msra.mxu0 %v12797_v15  ;;  %7508 = vmatpush1.bf16.msra.mxu1 %v12800_v22  ;;  %v12887_v15 = vld [vmem:[%s18090_s1 + $0x1700] ss:$16 sps:$4 sm:$0xff]   ;;  %v12890_v22 = vld [vmem:[%s18090_s1 + $0x1708] ss:$16 sps:$4 sm:$0xff]  }
 0x2a8   :  { %6821 = vmatprep.subr.bf16.mxu0 %v12805_v23  ;;  %7509 = vmatprep.subr.bf16.mxu1 %v12808_v18  ;;  %v12895_v23 = vld [vmem:[%s18090_s1 + $0x1724] ss:$16 sps:$4 sm:$0xff]   ;;  %v12898_v18 = vld [vmem:[%s18090_s1 + $0x172c] ss:$16 sps:$4 sm:$0xff]  }
 0x2ab   :  { %6822 = vmatpush1.bf16.msra.mxu0 %v12803_v25  ;;  %7510 = vmatpush1.bf16.msra.mxu1 %v12806_v26  ;;  %v12893_v25 = vld [vmem:[%s18090_s1 + $0x1720] ss:$16 sps:$4 sm:$0xff]   ;;  %v12896_v26 = vld [vmem:[%s18090_s1 + $0x1728] ss:$16 sps:$4 sm:$0xff]  }
 0x2ac   :  { %6823 = vmatprep.subr.bf16.mxu0 %v12811_v27  ;;  %7511 = vmatprep.subr.bf16.mxu1 %v12814_v28  ;;  %v12901_v27 = vld [vmem:[%s18090_s1 + $0x1744] ss:$16 sps:$4 sm:$0xff]   ;;  %v12904_v28 = vld [vmem:[%s18090_s1 + $0x174c] ss:$16 sps:$4 sm:$0xff]  }
 0x2af   :  { %6824 = vmatpush1.bf16.msra.mxu0 %v12809_v29  ;;  %7512 = vmatpush1.bf16.msra.mxu1 %v12812_v30  ;;  %v12899_v29 = vld [vmem:[%s18090_s1 + $0x1740] ss:$16 sps:$4 sm:$0xff]   ;;  %v12902_v30 = vld [vmem:[%s18090_s1 + $0x1748] ss:$16 sps:$4 sm:$0xff]  }
 0x2b0   :  { %6825 = vmatprep.subr.bf16.mxu0 %v12817_v31  ;;  %7513 = vmatprep.subr.bf16.mxu1 %v12820_v32  ;;  %v12907_v31 = vld [vmem:[%s18090_s1 + $0x1764] ss:$16 sps:$4 sm:$0xff]   ;;  %v12910_v32 = vld [vmem:[%s18090_s1 + $0x176c] ss:$16 sps:$4 sm:$0xff]  }
 0x2b3   :  { %6826 = vmatpush1.bf16.msra.mxu0 %v12815_v33  ;;  %7514 = vmatpush1.bf16.msra.mxu1 %v12818_v34  ;;  %v12905_v33 = vld [vmem:[%s18090_s1 + $0x1760] ss:$16 sps:$4 sm:$0xff]   ;;  %v12908_v34 = vld [vmem:[%s18090_s1 + $0x1768] ss:$16 sps:$4 sm:$0xff]  }
 0x2b4   :  { %6827 = vmatprep.subr.bf16.mxu0 %v12823_v35  ;;  %7515 = vmatprep.subr.bf16.mxu1 %v12826_v36  ;;  %v12913_v35 = vld [vmem:[%s18090_s1 + $0x1784] ss:$16 sps:$4 sm:$0xff]   ;;  %v12916_v36 = vld [vmem:[%s18090_s1 + $0x178c] ss:$16 sps:$4 sm:$0xff]  }
 0x2b7   :  { %6828 = vmatpush1.bf16.msra.mxu0 %v12821_v37  ;;  %7516 = vmatpush1.bf16.msra.mxu1 %v12824_v38  ;;  %v12911_v37 = vld [vmem:[%s18090_s1 + $0x1780] ss:$16 sps:$4 sm:$0xff]   ;;  %v12914_v38 = vld [vmem:[%s18090_s1 + $0x1788] ss:$16 sps:$4 sm:$0xff]  }
 0x2b8   :  { %6829 = vmatprep.subr.bf16.mxu0 %v12829_v39  ;;  %7517 = vmatprep.subr.bf16.mxu1 %v12832_v40  ;;  %v12919_v39 = vld [vmem:[%s18090_s1 + $0x17a4] ss:$16 sps:$4 sm:$0xff]   ;;  %v12922_v40 = vld [vmem:[%s18090_s1 + $0x17ac] ss:$16 sps:$4 sm:$0xff]  }
 0x2bb   :  { %6830 = vmatpush1.bf16.msra.mxu0 %v12827_v41  ;;  %7518 = vmatpush1.bf16.msra.mxu1 %v12830_v42  ;;  %v12917_v41 = vld [vmem:[%s18090_s1 + $0x17a0] ss:$16 sps:$4 sm:$0xff]   ;;  %v12920_v42 = vld [vmem:[%s18090_s1 + $0x17a8] ss:$16 sps:$4 sm:$0xff]  }
 0x2bc   :  { %6831 = vmatprep.subr.bf16.mxu0 %v12835_v43  ;;  %7519 = vmatprep.subr.bf16.mxu1 %v12838_v44  ;;  %v12925_v43 = vld [vmem:[%s18090_s1 + $0x17c4] ss:$16 sps:$4 sm:$0xff]   ;;  %v12928_v44 = vld [vmem:[%s18090_s1 + $0x17cc] ss:$16 sps:$4 sm:$0xff]  }
 0x2bf   :  { %6832 = vmatpush1.bf16.msra.mxu0 %v12833_v14  ;;  %7520 = vmatpush1.bf16.msra.mxu1 %v12836_v46  ;;  %v12923_v14 = vld [vmem:[%s18090_s1 + $0x17c0] ss:$16 sps:$4 sm:$0xff]   ;;  %v12926_v46 = vld [vmem:[%s18090_s1 + $0x17c8] ss:$16 sps:$4 sm:$0xff]  }
 0x2c0   :  { %6844 = vmatprep.subr.bf16.mxu0 %v12841_v19  ;;  %7532 = vmatprep.subr.bf16.mxu1 %v12844_v24  ;;  %v12931_v19 = vld [vmem:[%s18090_s1 + $0x17e4] ss:$16 sps:$4 sm:$0xff]   ;;  %v12934_v24 = vld [vmem:[%s18090_s1 + $0x17ec] ss:$16 sps:$4 sm:$0xff]  }
 0x2c2   :  { %6834 = vmatmul.mubr.bf16.vlgmr.msra.gmra.mrb[0].mxu0 %v10296_v47  ;;  %7522 = vmatmul.mubr.bf16.vlgmr.msra.gmra.mrb[0].mxu1 %v10296_v47  ;;  %v12929_v47 = vld [vmem:[%s18090_s1 + $0x17e0] ss:$16 sps:$4 sm:$0xff]  }
 0x2c3   :  { %6845 = vmatpush1.bf16.msra.mxu0 %v12839_v50  ;;  %7533 = vmatpush1.bf16.msra.mxu1 %v12842_v21  ;;  %v12932_v50 = vld [vmem:[%s18090_s1 + $0x17e8] ss:$16 sps:$4 sm:$0xff]   ;;  %v12937_v21 = vld [vmem:[%s18090_s1 + $0x1804] ss:$16 sps:$4 sm:$0xff]  }
 0x2c4   :  { %6846 = vmatprep.subr.bf16.mxu0 %v12847_v45  ;;  %7534 = vmatprep.subr.bf16.mxu1 %v12850_v51  ;;  %v12940_v45 = vld [vmem:[%s18090_s1 + $0x180c] ss:$16 sps:$4 sm:$0xff]   ;;  %v10298_v51 = vcombine.low %v16052_v48, %v16057_v49  ;;  %v12938_v48 = vld [vmem:[%s18090_s1 + $0x1808] ss:$16 sps:$4 sm:$0xff]   ;;  %v12943_v49 = vld [vmem:[%s18090_s1 + $0x1824] ss:$16 sps:$4 sm:$0xff]  }
 0x2c5   :  { %6876 = vmatprep.mubr.bf16.mxu0 %v10299_v52  ;;  %7564 = vmatprep.mubr.bf16.mxu1 %v10299_v52  ;;  %v16258_v52 = vld [vmem:[%s18091_s0 + $0x60] sm:$0xff] }
 0x2c7   :  { %6847 = vmatpush1.bf16.msra.mxu0 %v12845_v53  ;;  %7535 = vmatpush1.bf16.msra.mxu1 %v12848_v54  ;;  %v16263_v53 = vld [vmem:[%s18091_s0 + $0xe0] sm:$0xff] }
 0x2c8   :  { %6848 = vmatprep.subr.bf16.mxu0 %v12853_v55  ;;  %7536 = vmatprep.subr.bf16.mxu1 %v12856_v56  ;;  %v12935_v54 = vld [vmem:[%s18090_s1 + $0x1800] ss:$16 sps:$4 sm:$0xff]   ;;  %v12946_v55 = vld [vmem:[%s18090_s1 + $0x182c] ss:$16 sps:$4 sm:$0xff]   ;;  %v10301_v56 = vcombine.high %v16258_v52, %v16263_v53 }
 0x2cb   :  { %6849 = vmatpush1.bf16.msra.mxu0 %v12851_v57  ;;  %7537 = vmatpush1.bf16.msra.mxu1 %v12854_v58  ;;  %v12941_v57 = vld [vmem:[%s18090_s1 + $0x1820] ss:$16 sps:$4 sm:$0xff]   ;;  %v12944_v58 = vld [vmem:[%s18090_s1 + $0x1828] ss:$16 sps:$4 sm:$0xff]  }
 0x2cc   :  { %6850 = vmatprep.subr.bf16.mxu0 %v12859_v59  ;;  %7538 = vmatprep.subr.bf16.mxu1 %v12862_v60  ;;  %v12949_v59 = vld [vmem:[%s18090_s1 + $0x1844] ss:$16 sps:$4 sm:$0xff]   ;;  %v12952_v60 = vld [vmem:[%s18090_s1 + $0x184c] ss:$16 sps:$4 sm:$0xff]  }
 0x2cf   :  { %6851 = vmatpush1.bf16.msra.mxu0 %v12857_v61  ;;  %7539 = vmatpush1.bf16.msra.mxu1 %v12860_v62  ;;  %v12947_v61 = vld [vmem:[%s18090_s1 + $0x1840] ss:$16 sps:$4 sm:$0xff]   ;;  %v12950_v62 = vld [vmem:[%s18090_s1 + $0x1848] ss:$16 sps:$4 sm:$0xff]  }
 0x2d0   :  { %6852 = vmatprep.subr.bf16.mxu0 %v12865_v63  ;;  %7540 = vmatprep.subr.bf16.mxu1 %v12868_v0  ;;  %v12955_v63 = vld [vmem:[%s18090_s1 + $0x1864] ss:$16 sps:$4 sm:$0xff]   ;;  %v12958_v0 = vld [vmem:[%s18090_s1 + $0x186c] ss:$16 sps:$4 sm:$0xff]  }
 0x2d3   :  { %6853 = vmatpush1.bf16.msra.mxu0 %v12863_v1  ;;  %7541 = vmatpush1.bf16.msra.mxu1 %v12866_v2  ;;  %v12953_v1 = vld [vmem:[%s18090_s1 + $0x1860] ss:$16 sps:$4 sm:$0xff]   ;;  %v12956_v2 = vld [vmem:[%s18090_s1 + $0x1868] ss:$16 sps:$4 sm:$0xff]  }
 0x2d4   :  { %6854 = vmatprep.subr.bf16.mxu0 %v12871_v3  ;;  %7542 = vmatprep.subr.bf16.mxu1 %v12874_v4  ;;  %v12961_v3 = vld [vmem:[%s18090_s1 + $0x1884] ss:$16 sps:$4 sm:$0xff]   ;;  %v12964_v4 = vld [vmem:[%s18090_s1 + $0x188c] ss:$16 sps:$4 sm:$0xff]  }
 0x2d7   :  { %6855 = vmatpush1.bf16.msra.mxu0 %v12869_v5  ;;  %7543 = vmatpush1.bf16.msra.mxu1 %v12872_v6  ;;  %v12959_v5 = vld [vmem:[%s18090_s1 + $0x1880] ss:$16 sps:$4 sm:$0xff]   ;;  %v12962_v6 = vld [vmem:[%s18090_s1 + $0x1888] ss:$16 sps:$4 sm:$0xff]  }
 0x2d8   :  { %6856 = vmatprep.subr.bf16.mxu0 %v12877_v7  ;;  %7544 = vmatprep.subr.bf16.mxu1 %v12880_v8  ;;  %v12967_v7 = vld [vmem:[%s18090_s1 + $0x18a4] ss:$16 sps:$4 sm:$0xff]   ;;  %v12970_v8 = vld [vmem:[%s18090_s1 + $0x18ac] ss:$16 sps:$4 sm:$0xff]  }
 0x2db   :  { %6857 = vmatpush1.bf16.msra.mxu0 %v12875_v9  ;;  %7545 = vmatpush1.bf16.msra.mxu1 %v12878_v10  ;;  %v12965_v9 = vld [vmem:[%s18090_s1 + $0x18a0] ss:$16 sps:$4 sm:$0xff]   ;;  %v12968_v10 = vld [vmem:[%s18090_s1 + $0x18a8] ss:$16 sps:$4 sm:$0xff]  }
 0x2dc   :  { %6858 = vmatprep.subr.bf16.mxu0 %v12883_v11  ;;  %7546 = vmatprep.subr.bf16.mxu1 %v12886_v12  ;;  %v12973_v11 = vld [vmem:[%s18090_s1 + $0x18c4] ss:$16 sps:$4 sm:$0xff]   ;;  %v12976_v12 = vld [vmem:[%s18090_s1 + $0x18cc] ss:$16 sps:$4 sm:$0xff]  }
 0x2df   :  { %6859 = vmatpush1.bf16.msra.mxu0 %v12881_v13  ;;  %7547 = vmatpush1.bf16.msra.mxu1 %v12884_v16  ;;  %v12971_v13 = vld [vmem:[%s18090_s1 + $0x18c0] ss:$16 sps:$4 sm:$0xff]   ;;  %v12974_v16 = vld [vmem:[%s18090_s1 + $0x18c8] ss:$16 sps:$4 sm:$0xff]  }
 0x2e0   :  { %6860 = vmatprep.subr.bf16.mxu0 %v12889_v17  ;;  %7548 = vmatprep.subr.bf16.mxu1 %v12892_v20  ;;  %v12979_v17 = vld [vmem:[%s18090_s1 + $0x18e4] ss:$16 sps:$4 sm:$0xff]   ;;  %v12982_v20 = vld [vmem:[%s18090_s1 + $0x18ec] ss:$16 sps:$4 sm:$0xff]  }
 0x2e3   :  { %6861 = vmatpush1.bf16.msra.mxu0 %v12887_v15  ;;  %7549 = vmatpush1.bf16.msra.mxu1 %v12890_v22  ;;  %v12977_v15 = vld [vmem:[%s18090_s1 + $0x18e0] ss:$16 sps:$4 sm:$0xff]   ;;  %v12980_v22 = vld [vmem:[%s18090_s1 + $0x18e8] ss:$16 sps:$4 sm:$0xff]  }
 0x2e4   :  { %6862 = vmatprep.subr.bf16.mxu0 %v12895_v23  ;;  %7550 = vmatprep.subr.bf16.mxu1 %v12898_v18  ;;  %v12985_v23 = vld [vmem:[%s18090_s1 + $0x1904] ss:$16 sps:$4 sm:$0xff]   ;;  %v12988_v18 = vld [vmem:[%s18090_s1 + $0x190c] ss:$16 sps:$4 sm:$0xff]  }
 0x2e7   :  { %6863 = vmatpush1.bf16.msra.mxu0 %v12893_v25  ;;  %7551 = vmatpush1.bf16.msra.mxu1 %v12896_v26  ;;  %v12983_v25 = vld [vmem:[%s18090_s1 + $0x1900] ss:$16 sps:$4 sm:$0xff]   ;;  %v12986_v26 = vld [vmem:[%s18090_s1 + $0x1908] ss:$16 sps:$4 sm:$0xff]  }
 0x2e8   :  { %6864 = vmatprep.subr.bf16.mxu0 %v12901_v27  ;;  %7552 = vmatprep.subr.bf16.mxu1 %v12904_v28  ;;  %v12991_v27 = vld [vmem:[%s18090_s1 + $0x1924] ss:$16 sps:$4 sm:$0xff]   ;;  %v12994_v28 = vld [vmem:[%s18090_s1 + $0x192c] ss:$16 sps:$4 sm:$0xff]  }
 0x2eb   :  { %6865 = vmatpush1.bf16.msra.mxu0 %v12899_v29  ;;  %7553 = vmatpush1.bf16.msra.mxu1 %v12902_v30  ;;  %v12989_v29 = vld [vmem:[%s18090_s1 + $0x1920] ss:$16 sps:$4 sm:$0xff]   ;;  %v12992_v30 = vld [vmem:[%s18090_s1 + $0x1928] ss:$16 sps:$4 sm:$0xff]  }
 0x2ec   :  { %6866 = vmatprep.subr.bf16.mxu0 %v12907_v31  ;;  %7554 = vmatprep.subr.bf16.mxu1 %v12910_v32  ;;  %v12997_v31 = vld [vmem:[%s18090_s1 + $0x1944] ss:$16 sps:$4 sm:$0xff]   ;;  %v13000_v32 = vld [vmem:[%s18090_s1 + $0x194c] ss:$16 sps:$4 sm:$0xff]  }
 0x2ef   :  { %6867 = vmatpush1.bf16.msra.mxu0 %v12905_v33  ;;  %7555 = vmatpush1.bf16.msra.mxu1 %v12908_v34  ;;  %v12995_v33 = vld [vmem:[%s18090_s1 + $0x1940] ss:$16 sps:$4 sm:$0xff]   ;;  %v12998_v34 = vld [vmem:[%s18090_s1 + $0x1948] ss:$16 sps:$4 sm:$0xff]  }
 0x2f0   :  { %6868 = vmatprep.subr.bf16.mxu0 %v12913_v35  ;;  %7556 = vmatprep.subr.bf16.mxu1 %v12916_v36  ;;  %v13003_v35 = vld [vmem:[%s18090_s1 + $0x1964] ss:$16 sps:$4 sm:$0xff]   ;;  %v13006_v36 = vld [vmem:[%s18090_s1 + $0x196c] ss:$16 sps:$4 sm:$0xff]  }
 0x2f3   :  { %6869 = vmatpush1.bf16.msra.mxu0 %v12911_v37  ;;  %7557 = vmatpush1.bf16.msra.mxu1 %v12914_v38  ;;  %v13001_v37 = vld [vmem:[%s18090_s1 + $0x1960] ss:$16 sps:$4 sm:$0xff]   ;;  %v13004_v38 = vld [vmem:[%s18090_s1 + $0x1968] ss:$16 sps:$4 sm:$0xff]  }
 0x2f4   :  { %6870 = vmatprep.subr.bf16.mxu0 %v12919_v39  ;;  %7558 = vmatprep.subr.bf16.mxu1 %v12922_v40  ;;  %v13009_v39 = vld [vmem:[%s18090_s1 + $0x1984] ss:$16 sps:$4 sm:$0xff]   ;;  %v13012_v40 = vld [vmem:[%s18090_s1 + $0x198c] ss:$16 sps:$4 sm:$0xff]  }
 0x2f7   :  { %6871 = vmatpush1.bf16.msra.mxu0 %v12917_v41  ;;  %7559 = vmatpush1.bf16.msra.mxu1 %v12920_v42  ;;  %v13007_v41 = vld [vmem:[%s18090_s1 + $0x1980] ss:$16 sps:$4 sm:$0xff]   ;;  %v13010_v42 = vld [vmem:[%s18090_s1 + $0x1988] ss:$16 sps:$4 sm:$0xff]  }
 0x2f8   :  { %6872 = vmatprep.subr.bf16.mxu0 %v12925_v43  ;;  %7560 = vmatprep.subr.bf16.mxu1 %v12928_v44  ;;  %v13015_v43 = vld [vmem:[%s18090_s1 + $0x19a4] ss:$16 sps:$4 sm:$0xff]   ;;  %v13018_v44 = vld [vmem:[%s18090_s1 + $0x19ac] ss:$16 sps:$4 sm:$0xff]  }
 0x2fb   :  { %6873 = vmatpush1.bf16.msra.mxu0 %v12923_v14  ;;  %7561 = vmatpush1.bf16.msra.mxu1 %v12926_v46  ;;  %v13013_v14 = vld [vmem:[%s18090_s1 + $0x19a0] ss:$16 sps:$4 sm:$0xff]   ;;  %v13016_v46 = vld [vmem:[%s18090_s1 + $0x19a8] ss:$16 sps:$4 sm:$0xff]  }
 0x2fc   :  { %6874 = vmatprep.subr.bf16.mxu0 %v12931_v19  ;;  %7562 = vmatprep.subr.bf16.mxu1 %v12934_v24  ;;  %v13021_v19 = vld [vmem:[%s18090_s1 + $0x19c4] ss:$16 sps:$4 sm:$0xff]   ;;  %v13024_v24 = vld [vmem:[%s18090_s1 + $0x19cc] ss:$16 sps:$4 sm:$0xff]  }
 0x2ff   :  { %6875 = vmatpush1.bf16.msra.mxu0 %v12929_v47  ;;  %7563 = vmatpush1.bf16.msra.mxu1 %v12932_v50  ;;  %v13019_v47 = vld [vmem:[%s18090_s1 + $0x19c0] ss:$16 sps:$4 sm:$0xff]   ;;  %v13022_v50 = vld [vmem:[%s18090_s1 + $0x19c8] ss:$16 sps:$4 sm:$0xff]  }
 0x300   :  { %6887 = vmatprep.subr.bf16.mxu0 %v12937_v21  ;;  %7575 = vmatprep.subr.bf16.mxu1 %v12940_v45  ;;  %v13027_v21 = vld [vmem:[%s18090_s1 + $0x19e4] ss:$16 sps:$4 sm:$0xff]   ;;  %v13030_v45 = vld [vmem:[%s18090_s1 + $0x19ec] ss:$16 sps:$4 sm:$0xff]  }
 0x302   :  { %6877 = vmatmul.mubr.bf16.vlgmr.msra.gmra.mrb[0].mxu0 %v10298_v51  ;;  %7565 = vmatmul.mubr.bf16.vlgmr.msra.gmra.mrb[0].mxu1 %v10298_v51  ;;  %v13025_v51 = vld [vmem:[%s18090_s1 + $0x19e0] ss:$16 sps:$4 sm:$0xff]  }
 0x303   :  { %6888 = vmatpush1.bf16.msra.mxu0 %v12935_v54  ;;  %7576 = vmatpush1.bf16.msra.mxu1 %v12938_v48  ;;  %v13028_v54 = vld [vmem:[%s18090_s1 + $0x19e8] ss:$16 sps:$4 sm:$0xff]   ;;  %v13033_v48 = vld [vmem:[%s18090_s1 + $0x1a04] ss:$16 sps:$4 sm:$0xff]  }
 0x304   :  { %6889 = vmatprep.subr.bf16.mxu0 %v12943_v49  ;;  %7577 = vmatprep.subr.bf16.mxu1 %v12946_v55  ;;  %v13036_v49 = vld [vmem:[%s18090_s1 + $0x1a0c] ss:$16 sps:$4 sm:$0xff]   ;;  %v10300_v55 = vcombine.low %v16258_v52, %v16263_v53  ;;  %v13034_v52 = vld [vmem:[%s18090_s1 + $0x1a08] ss:$16 sps:$4 sm:$0xff]   ;;  %v13039_v53 = vld [vmem:[%s18090_s1 + $0x1a24] ss:$16 sps:$4 sm:$0xff]  }
 0x305   :  { %6919 = vmatprep.mubr.bf16.mxu0 %v10301_v56  ;;  %7607 = vmatprep.mubr.bf16.mxu1 %v10301_v56  ;;  %v16464_v56 = vld [vmem:[%s18091_s0 + $0x68] sm:$0xff] }
 0x307   :  { %6890 = vmatpush1.bf16.msra.mxu0 %v12941_v57  ;;  %7578 = vmatpush1.bf16.msra.mxu1 %v12944_v58  ;;  %v16469_v57 = vld [vmem:[%s18091_s0 + $0xe8] sm:$0xff]  ;;  %v13031_v58 = vld [vmem:[%s18090_s1 + $0x1a00] ss:$16 sps:$4 sm:$0xff]  }
 0x308   :  { %6891 = vmatprep.subr.bf16.mxu0 %v12949_v59  ;;  %7579 = vmatprep.subr.bf16.mxu1 %v12952_v60  ;;  %v13042_v59 = vld [vmem:[%s18090_s1 + $0x1a2c] ss:$16 sps:$4 sm:$0xff]   ;;  %v10303_v60 = vcombine.high %v16464_v56, %v16469_v57 }
 0x30b   :  { %6892 = vmatpush1.bf16.msra.mxu0 %v12947_v61  ;;  %7580 = vmatpush1.bf16.msra.mxu1 %v12950_v62  ;;  %v13037_v61 = vld [vmem:[%s18090_s1 + $0x1a20] ss:$16 sps:$4 sm:$0xff]   ;;  %v13040_v62 = vld [vmem:[%s18090_s1 + $0x1a28] ss:$16 sps:$4 sm:$0xff]  }
 0x30c   :  { %6893 = vmatprep.subr.bf16.mxu0 %v12955_v63  ;;  %7581 = vmatprep.subr.bf16.mxu1 %v12958_v0  ;;  %v13045_v63 = vld [vmem:[%s18090_s1 + $0x1a44] ss:$16 sps:$4 sm:$0xff]   ;;  %v13048_v0 = vld [vmem:[%s18090_s1 + $0x1a4c] ss:$16 sps:$4 sm:$0xff]  }
 0x30f   :  { %6894 = vmatpush1.bf16.msra.mxu0 %v12953_v1  ;;  %7582 = vmatpush1.bf16.msra.mxu1 %v12956_v2  ;;  %v13043_v1 = vld [vmem:[%s18090_s1 + $0x1a40] ss:$16 sps:$4 sm:$0xff]   ;;  %v13046_v2 = vld [vmem:[%s18090_s1 + $0x1a48] ss:$16 sps:$4 sm:$0xff]  }
 0x310   :  { %6895 = vmatprep.subr.bf16.mxu0 %v12961_v3  ;;  %7583 = vmatprep.subr.bf16.mxu1 %v12964_v4  ;;  %v13051_v3 = vld [vmem:[%s18090_s1 + $0x1a64] ss:$16 sps:$4 sm:$0xff]   ;;  %v13054_v4 = vld [vmem:[%s18090_s1 + $0x1a6c] ss:$16 sps:$4 sm:$0xff]  }
 0x313   :  { %6896 = vmatpush1.bf16.msra.mxu0 %v12959_v5  ;;  %7584 = vmatpush1.bf16.msra.mxu1 %v12962_v6  ;;  %v13049_v5 = vld [vmem:[%s18090_s1 + $0x1a60] ss:$16 sps:$4 sm:$0xff]   ;;  %v13052_v6 = vld [vmem:[%s18090_s1 + $0x1a68] ss:$16 sps:$4 sm:$0xff]  }
 0x314   :  { %6897 = vmatprep.subr.bf16.mxu0 %v12967_v7  ;;  %7585 = vmatprep.subr.bf16.mxu1 %v12970_v8  ;;  %v13057_v7 = vld [vmem:[%s18090_s1 + $0x1a84] ss:$16 sps:$4 sm:$0xff]   ;;  %v13060_v8 = vld [vmem:[%s18090_s1 + $0x1a8c] ss:$16 sps:$4 sm:$0xff]  }
 0x317   :  { %6898 = vmatpush1.bf16.msra.mxu0 %v12965_v9  ;;  %7586 = vmatpush1.bf16.msra.mxu1 %v12968_v10  ;;  %v13055_v9 = vld [vmem:[%s18090_s1 + $0x1a80] ss:$16 sps:$4 sm:$0xff]   ;;  %v13058_v10 = vld [vmem:[%s18090_s1 + $0x1a88] ss:$16 sps:$4 sm:$0xff]  }
 0x318   :  { %6899 = vmatprep.subr.bf16.mxu0 %v12973_v11  ;;  %7587 = vmatprep.subr.bf16.mxu1 %v12976_v12  ;;  %v13063_v11 = vld [vmem:[%s18090_s1 + $0x1aa4] ss:$16 sps:$4 sm:$0xff]   ;;  %v13066_v12 = vld [vmem:[%s18090_s1 + $0x1aac] ss:$16 sps:$4 sm:$0xff]  }
 0x31b   :  { %6900 = vmatpush1.bf16.msra.mxu0 %v12971_v13  ;;  %7588 = vmatpush1.bf16.msra.mxu1 %v12974_v16  ;;  %v13061_v13 = vld [vmem:[%s18090_s1 + $0x1aa0] ss:$16 sps:$4 sm:$0xff]   ;;  %v13064_v16 = vld [vmem:[%s18090_s1 + $0x1aa8] ss:$16 sps:$4 sm:$0xff]  }
 0x31c   :  { %6901 = vmatprep.subr.bf16.mxu0 %v12979_v17  ;;  %7589 = vmatprep.subr.bf16.mxu1 %v12982_v20  ;;  %v13069_v17 = vld [vmem:[%s18090_s1 + $0x1ac4] ss:$16 sps:$4 sm:$0xff]   ;;  %v13072_v20 = vld [vmem:[%s18090_s1 + $0x1acc] ss:$16 sps:$4 sm:$0xff]  }
 0x31f   :  { %6902 = vmatpush1.bf16.msra.mxu0 %v12977_v15  ;;  %7590 = vmatpush1.bf16.msra.mxu1 %v12980_v22  ;;  %v13067_v15 = vld [vmem:[%s18090_s1 + $0x1ac0] ss:$16 sps:$4 sm:$0xff]   ;;  %v13070_v22 = vld [vmem:[%s18090_s1 + $0x1ac8] ss:$16 sps:$4 sm:$0xff]  }
 0x320   :  { %6903 = vmatprep.subr.bf16.mxu0 %v12985_v23  ;;  %7591 = vmatprep.subr.bf16.mxu1 %v12988_v18  ;;  %v13075_v23 = vld [vmem:[%s18090_s1 + $0x1ae4] ss:$16 sps:$4 sm:$0xff]   ;;  %v13078_v18 = vld [vmem:[%s18090_s1 + $0x1aec] ss:$16 sps:$4 sm:$0xff]  }
 0x323   :  { %6904 = vmatpush1.bf16.msra.mxu0 %v12983_v25  ;;  %7592 = vmatpush1.bf16.msra.mxu1 %v12986_v26  ;;  %v13073_v25 = vld [vmem:[%s18090_s1 + $0x1ae0] ss:$16 sps:$4 sm:$0xff]   ;;  %v13076_v26 = vld [vmem:[%s18090_s1 + $0x1ae8] ss:$16 sps:$4 sm:$0xff]  }
 0x324   :  { %6905 = vmatprep.subr.bf16.mxu0 %v12991_v27  ;;  %7593 = vmatprep.subr.bf16.mxu1 %v12994_v28  ;;  %v13081_v27 = vld [vmem:[%s18090_s1 + $0x1b04] ss:$16 sps:$4 sm:$0xff]   ;;  %v13084_v28 = vld [vmem:[%s18090_s1 + $0x1b0c] ss:$16 sps:$4 sm:$0xff]  }
 0x327   :  { %6906 = vmatpush1.bf16.msra.mxu0 %v12989_v29  ;;  %7594 = vmatpush1.bf16.msra.mxu1 %v12992_v30  ;;  %v13079_v29 = vld [vmem:[%s18090_s1 + $0x1b00] ss:$16 sps:$4 sm:$0xff]   ;;  %v13082_v30 = vld [vmem:[%s18090_s1 + $0x1b08] ss:$16 sps:$4 sm:$0xff]  }
 0x328   :  { %6907 = vmatprep.subr.bf16.mxu0 %v12997_v31  ;;  %7595 = vmatprep.subr.bf16.mxu1 %v13000_v32  ;;  %v13087_v31 = vld [vmem:[%s18090_s1 + $0x1b24] ss:$16 sps:$4 sm:$0xff]   ;;  %v13090_v32 = vld [vmem:[%s18090_s1 + $0x1b2c] ss:$16 sps:$4 sm:$0xff]  }
 0x32b   :  { %6908 = vmatpush1.bf16.msra.mxu0 %v12995_v33  ;;  %7596 = vmatpush1.bf16.msra.mxu1 %v12998_v34  ;;  %v13085_v33 = vld [vmem:[%s18090_s1 + $0x1b20] ss:$16 sps:$4 sm:$0xff]   ;;  %v13088_v34 = vld [vmem:[%s18090_s1 + $0x1b28] ss:$16 sps:$4 sm:$0xff]  }
 0x32c   :  { %6909 = vmatprep.subr.bf16.mxu0 %v13003_v35  ;;  %7597 = vmatprep.subr.bf16.mxu1 %v13006_v36  ;;  %v13093_v35 = vld [vmem:[%s18090_s1 + $0x1b44] ss:$16 sps:$4 sm:$0xff]   ;;  %v13096_v36 = vld [vmem:[%s18090_s1 + $0x1b4c] ss:$16 sps:$4 sm:$0xff]  }
 0x32f   :  { %6910 = vmatpush1.bf16.msra.mxu0 %v13001_v37  ;;  %7598 = vmatpush1.bf16.msra.mxu1 %v13004_v38  ;;  %v13091_v37 = vld [vmem:[%s18090_s1 + $0x1b40] ss:$16 sps:$4 sm:$0xff]   ;;  %v13094_v38 = vld [vmem:[%s18090_s1 + $0x1b48] ss:$16 sps:$4 sm:$0xff]  }
 0x330   :  { %6911 = vmatprep.subr.bf16.mxu0 %v13009_v39  ;;  %7599 = vmatprep.subr.bf16.mxu1 %v13012_v40  ;;  %v13099_v39 = vld [vmem:[%s18090_s1 + $0x1b64] ss:$16 sps:$4 sm:$0xff]   ;;  %v13102_v40 = vld [vmem:[%s18090_s1 + $0x1b6c] ss:$16 sps:$4 sm:$0xff]  }
 0x333   :  { %6912 = vmatpush1.bf16.msra.mxu0 %v13007_v41  ;;  %7600 = vmatpush1.bf16.msra.mxu1 %v13010_v42  ;;  %v13097_v41 = vld [vmem:[%s18090_s1 + $0x1b60] ss:$16 sps:$4 sm:$0xff]   ;;  %v13100_v42 = vld [vmem:[%s18090_s1 + $0x1b68] ss:$16 sps:$4 sm:$0xff]  }
 0x334   :  { %6913 = vmatprep.subr.bf16.mxu0 %v13015_v43  ;;  %7601 = vmatprep.subr.bf16.mxu1 %v13018_v44  ;;  %v13105_v43 = vld [vmem:[%s18090_s1 + $0x1b84] ss:$16 sps:$4 sm:$0xff]   ;;  %v13108_v44 = vld [vmem:[%s18090_s1 + $0x1b8c] ss:$16 sps:$4 sm:$0xff]  }
 0x337   :  { %6914 = vmatpush1.bf16.msra.mxu0 %v13013_v14  ;;  %7602 = vmatpush1.bf16.msra.mxu1 %v13016_v46  ;;  %v13103_v14 = vld [vmem:[%s18090_s1 + $0x1b80] ss:$16 sps:$4 sm:$0xff]   ;;  %v13106_v46 = vld [vmem:[%s18090_s1 + $0x1b88] ss:$16 sps:$4 sm:$0xff]  }
 0x338   :  { %6915 = vmatprep.subr.bf16.mxu0 %v13021_v19  ;;  %7603 = vmatprep.subr.bf16.mxu1 %v13024_v24  ;;  %v13111_v19 = vld [vmem:[%s18090_s1 + $0x1ba4] ss:$16 sps:$4 sm:$0xff]   ;;  %v13114_v24 = vld [vmem:[%s18090_s1 + $0x1bac] ss:$16 sps:$4 sm:$0xff]  }
 0x33b   :  { %6916 = vmatpush1.bf16.msra.mxu0 %v13019_v47  ;;  %7604 = vmatpush1.bf16.msra.mxu1 %v13022_v50  ;;  %v13109_v47 = vld [vmem:[%s18090_s1 + $0x1ba0] ss:$16 sps:$4 sm:$0xff]   ;;  %v13112_v50 = vld [vmem:[%s18090_s1 + $0x1ba8] ss:$16 sps:$4 sm:$0xff]  }
 0x33c   :  { %6917 = vmatprep.subr.bf16.mxu0 %v13027_v21  ;;  %7605 = vmatprep.subr.bf16.mxu1 %v13030_v45  ;;  %v13117_v21 = vld [vmem:[%s18090_s1 + $0x1bc4] ss:$16 sps:$4 sm:$0xff]   ;;  %v13120_v45 = vld [vmem:[%s18090_s1 + $0x1bcc] ss:$16 sps:$4 sm:$0xff]  }
 0x33f   :  { %6918 = vmatpush1.bf16.msra.mxu0 %v13025_v51  ;;  %7606 = vmatpush1.bf16.msra.mxu1 %v13028_v54  ;;  %v13115_v51 = vld [vmem:[%s18090_s1 + $0x1bc0] ss:$16 sps:$4 sm:$0xff]   ;;  %v13118_v54 = vld [vmem:[%s18090_s1 + $0x1bc8] ss:$16 sps:$4 sm:$0xff]  }
 0x340   :  { %6930 = vmatprep.subr.bf16.mxu0 %v13033_v48  ;;  %7618 = vmatprep.subr.bf16.mxu1 %v13036_v49  ;;  %v13123_v48 = vld [vmem:[%s18090_s1 + $0x1be4] ss:$16 sps:$4 sm:$0xff]   ;;  %v13126_v49 = vld [vmem:[%s18090_s1 + $0x1bec] ss:$16 sps:$4 sm:$0xff]  }
 0x342   :  { %6920 = vmatmul.mubr.bf16.vlgmr.msra.gmra.mrb[0].mxu0 %v10300_v55  ;;  %7608 = vmatmul.mubr.bf16.vlgmr.msra.gmra.mrb[0].mxu1 %v10300_v55  ;;  %v13121_v55 = vld [vmem:[%s18090_s1 + $0x1be0] ss:$16 sps:$4 sm:$0xff]  }
 0x343   :  { %6931 = vmatpush1.bf16.msra.mxu0 %v13031_v58  ;;  %7619 = vmatpush1.bf16.msra.mxu1 %v13034_v52  ;;  %v13124_v58 = vld [vmem:[%s18090_s1 + $0x1be8] ss:$16 sps:$4 sm:$0xff]   ;;  %v13129_v52 = vld [vmem:[%s18090_s1 + $0x1c04] ss:$16 sps:$4 sm:$0xff]  }
 0x344   :  { %6932 = vmatprep.subr.bf16.mxu0 %v13039_v53  ;;  %7620 = vmatprep.subr.bf16.mxu1 %v13042_v59  ;;  %v13132_v53 = vld [vmem:[%s18090_s1 + $0x1c0c] ss:$16 sps:$4 sm:$0xff]   ;;  %v10302_v59 = vcombine.low %v16464_v56, %v16469_v57  ;;  %v13130_v56 = vld [vmem:[%s18090_s1 + $0x1c08] ss:$16 sps:$4 sm:$0xff]   ;;  %v13135_v57 = vld [vmem:[%s18090_s1 + $0x1c24] ss:$16 sps:$4 sm:$0xff]  }
 0x345   :  { %6962 = vmatprep.mubr.bf16.mxu0 %v10303_v60  ;;  %7650 = vmatprep.mubr.bf16.mxu1 %v10303_v60  ;;  %v16670_v60 = vld [vmem:[%s18091_s0 + $0x70] sm:$0xff] }
 0x347   :  { %6933 = vmatpush1.bf16.msra.mxu0 %v13037_v61  ;;  %7621 = vmatpush1.bf16.msra.mxu1 %v13040_v62  ;;  %v16675_v61 = vld [vmem:[%s18091_s0 + $0xf0] sm:$0xff] }
 0x348   :  { %6934 = vmatprep.subr.bf16.mxu0 %v13045_v63  ;;  %7622 = vmatprep.subr.bf16.mxu1 %v13048_v0  ;;  %v13127_v62 = vld [vmem:[%s18090_s1 + $0x1c00] ss:$16 sps:$4 sm:$0xff]   ;;  %v13138_v63 = vld [vmem:[%s18090_s1 + $0x1c2c] ss:$16 sps:$4 sm:$0xff]   ;;  %v10305_v0 = vcombine.high %v16670_v60, %v16675_v61 }
 0x34b   :  { %6935 = vmatpush1.bf16.msra.mxu0 %v13043_v1  ;;  %7623 = vmatpush1.bf16.msra.mxu1 %v13046_v2  ;;  %v13133_v1 = vld [vmem:[%s18090_s1 + $0x1c20] ss:$16 sps:$4 sm:$0xff]   ;;  %v13136_v2 = vld [vmem:[%s18090_s1 + $0x1c28] ss:$16 sps:$4 sm:$0xff]  }
 0x34c   :  { %6936 = vmatprep.subr.bf16.mxu0 %v13051_v3  ;;  %7624 = vmatprep.subr.bf16.mxu1 %v13054_v4  ;;  %v13141_v3 = vld [vmem:[%s18090_s1 + $0x1c44] ss:$16 sps:$4 sm:$0xff]   ;;  %v13144_v4 = vld [vmem:[%s18090_s1 + $0x1c4c] ss:$16 sps:$4 sm:$0xff]  }
 0x34f   :  { %6937 = vmatpush1.bf16.msra.mxu0 %v13049_v5  ;;  %7625 = vmatpush1.bf16.msra.mxu1 %v13052_v6  ;;  %v13139_v5 = vld [vmem:[%s18090_s1 + $0x1c40] ss:$16 sps:$4 sm:$0xff]   ;;  %v13142_v6 = vld [vmem:[%s18090_s1 + $0x1c48] ss:$16 sps:$4 sm:$0xff]  }
 0x350   :  { %6938 = vmatprep.subr.bf16.mxu0 %v13057_v7  ;;  %7626 = vmatprep.subr.bf16.mxu1 %v13060_v8  ;;  %v13147_v7 = vld [vmem:[%s18090_s1 + $0x1c64] ss:$16 sps:$4 sm:$0xff]   ;;  %v13150_v8 = vld [vmem:[%s18090_s1 + $0x1c6c] ss:$16 sps:$4 sm:$0xff]  }
 0x353   :  { %6939 = vmatpush1.bf16.msra.mxu0 %v13055_v9  ;;  %7627 = vmatpush1.bf16.msra.mxu1 %v13058_v10  ;;  %v13145_v9 = vld [vmem:[%s18090_s1 + $0x1c60] ss:$16 sps:$4 sm:$0xff]   ;;  %v13148_v10 = vld [vmem:[%s18090_s1 + $0x1c68] ss:$16 sps:$4 sm:$0xff]  }
 0x354   :  { %6940 = vmatprep.subr.bf16.mxu0 %v13063_v11  ;;  %7628 = vmatprep.subr.bf16.mxu1 %v13066_v12  ;;  %v13153_v11 = vld [vmem:[%s18090_s1 + $0x1c84] ss:$16 sps:$4 sm:$0xff]   ;;  %v13156_v12 = vld [vmem:[%s18090_s1 + $0x1c8c] ss:$16 sps:$4 sm:$0xff]  }
 0x357   :  { %6941 = vmatpush1.bf16.msra.mxu0 %v13061_v13  ;;  %7629 = vmatpush1.bf16.msra.mxu1 %v13064_v16  ;;  %v13151_v13 = vld [vmem:[%s18090_s1 + $0x1c80] ss:$16 sps:$4 sm:$0xff]   ;;  %v13154_v16 = vld [vmem:[%s18090_s1 + $0x1c88] ss:$16 sps:$4 sm:$0xff]  }
 0x358   :  { %6942 = vmatprep.subr.bf16.mxu0 %v13069_v17  ;;  %7630 = vmatprep.subr.bf16.mxu1 %v13072_v20  ;;  %v13159_v17 = vld [vmem:[%s18090_s1 + $0x1ca4] ss:$16 sps:$4 sm:$0xff]   ;;  %v13162_v20 = vld [vmem:[%s18090_s1 + $0x1cac] ss:$16 sps:$4 sm:$0xff]  }
 0x35b   :  { %6943 = vmatpush1.bf16.msra.mxu0 %v13067_v15  ;;  %7631 = vmatpush1.bf16.msra.mxu1 %v13070_v22  ;;  %v13157_v15 = vld [vmem:[%s18090_s1 + $0x1ca0] ss:$16 sps:$4 sm:$0xff]   ;;  %v13160_v22 = vld [vmem:[%s18090_s1 + $0x1ca8] ss:$16 sps:$4 sm:$0xff]  }
 0x35c   :  { %6944 = vmatprep.subr.bf16.mxu0 %v13075_v23  ;;  %7632 = vmatprep.subr.bf16.mxu1 %v13078_v18  ;;  %v13165_v23 = vld [vmem:[%s18090_s1 + $0x1cc4] ss:$16 sps:$4 sm:$0xff]   ;;  %v13168_v18 = vld [vmem:[%s18090_s1 + $0x1ccc] ss:$16 sps:$4 sm:$0xff]  }
 0x35f   :  { %6945 = vmatpush1.bf16.msra.mxu0 %v13073_v25  ;;  %7633 = vmatpush1.bf16.msra.mxu1 %v13076_v26  ;;  %v13163_v25 = vld [vmem:[%s18090_s1 + $0x1cc0] ss:$16 sps:$4 sm:$0xff]   ;;  %v13166_v26 = vld [vmem:[%s18090_s1 + $0x1cc8] ss:$16 sps:$4 sm:$0xff]  }
 0x360   :  { %6946 = vmatprep.subr.bf16.mxu0 %v13081_v27  ;;  %7634 = vmatprep.subr.bf16.mxu1 %v13084_v28  ;;  %v13171_v27 = vld [vmem:[%s18090_s1 + $0x1ce4] ss:$16 sps:$4 sm:$0xff]   ;;  %v13174_v28 = vld [vmem:[%s18090_s1 + $0x1cec] ss:$16 sps:$4 sm:$0xff]  }
 0x363   :  { %6947 = vmatpush1.bf16.msra.mxu0 %v13079_v29  ;;  %7635 = vmatpush1.bf16.msra.mxu1 %v13082_v30  ;;  %v13169_v29 = vld [vmem:[%s18090_s1 + $0x1ce0] ss:$16 sps:$4 sm:$0xff]   ;;  %v13172_v30 = vld [vmem:[%s18090_s1 + $0x1ce8] ss:$16 sps:$4 sm:$0xff]  }
 0x364   :  { %6948 = vmatprep.subr.bf16.mxu0 %v13087_v31  ;;  %7636 = vmatprep.subr.bf16.mxu1 %v13090_v32  ;;  %v13177_v31 = vld [vmem:[%s18090_s1 + $0x1d04] ss:$16 sps:$4 sm:$0xff]   ;;  %v13180_v32 = vld [vmem:[%s18090_s1 + $0x1d0c] ss:$16 sps:$4 sm:$0xff]  }
 0x367   :  { %6949 = vmatpush1.bf16.msra.mxu0 %v13085_v33  ;;  %7637 = vmatpush1.bf16.msra.mxu1 %v13088_v34  ;;  %v13175_v33 = vld [vmem:[%s18090_s1 + $0x1d00] ss:$16 sps:$4 sm:$0xff]   ;;  %v13178_v34 = vld [vmem:[%s18090_s1 + $0x1d08] ss:$16 sps:$4 sm:$0xff]  }
 0x368   :  { %6950 = vmatprep.subr.bf16.mxu0 %v13093_v35  ;;  %7638 = vmatprep.subr.bf16.mxu1 %v13096_v36  ;;  %v13183_v35 = vld [vmem:[%s18090_s1 + $0x1d24] ss:$16 sps:$4 sm:$0xff]   ;;  %v13186_v36 = vld [vmem:[%s18090_s1 + $0x1d2c] ss:$16 sps:$4 sm:$0xff]  }
 0x36b   :  { %6951 = vmatpush1.bf16.msra.mxu0 %v13091_v37  ;;  %7639 = vmatpush1.bf16.msra.mxu1 %v13094_v38  ;;  %v13181_v37 = vld [vmem:[%s18090_s1 + $0x1d20] ss:$16 sps:$4 sm:$0xff]   ;;  %v13184_v38 = vld [vmem:[%s18090_s1 + $0x1d28] ss:$16 sps:$4 sm:$0xff]  }
 0x36c   :  { %6952 = vmatprep.subr.bf16.mxu0 %v13099_v39  ;;  %7640 = vmatprep.subr.bf16.mxu1 %v13102_v40  ;;  %v13189_v39 = vld [vmem:[%s18090_s1 + $0x1d44] ss:$16 sps:$4 sm:$0xff]   ;;  %v13192_v40 = vld [vmem:[%s18090_s1 + $0x1d4c] ss:$16 sps:$4 sm:$0xff]  }
 0x36f   :  { %6953 = vmatpush1.bf16.msra.mxu0 %v13097_v41  ;;  %7641 = vmatpush1.bf16.msra.mxu1 %v13100_v42  ;;  %v13187_v41 = vld [vmem:[%s18090_s1 + $0x1d40] ss:$16 sps:$4 sm:$0xff]   ;;  %v13190_v42 = vld [vmem:[%s18090_s1 + $0x1d48] ss:$16 sps:$4 sm:$0xff]  }
 0x370   :  { %6954 = vmatprep.subr.bf16.mxu0 %v13105_v43  ;;  %7642 = vmatprep.subr.bf16.mxu1 %v13108_v44  ;;  %v13195_v43 = vld [vmem:[%s18090_s1 + $0x1d64] ss:$16 sps:$4 sm:$0xff]   ;;  %v13198_v44 = vld [vmem:[%s18090_s1 + $0x1d6c] ss:$16 sps:$4 sm:$0xff]  }
 0x373   :  { %6955 = vmatpush1.bf16.msra.mxu0 %v13103_v14  ;;  %7643 = vmatpush1.bf16.msra.mxu1 %v13106_v46  ;;  %v13193_v14 = vld [vmem:[%s18090_s1 + $0x1d60] ss:$16 sps:$4 sm:$0xff]   ;;  %v13196_v46 = vld [vmem:[%s18090_s1 + $0x1d68] ss:$16 sps:$4 sm:$0xff]  }
 0x374   :  { %6956 = vmatprep.subr.bf16.mxu0 %v13111_v19  ;;  %7644 = vmatprep.subr.bf16.mxu1 %v13114_v24  ;;  %v13201_v19 = vld [vmem:[%s18090_s1 + $0x1d84] ss:$16 sps:$4 sm:$0xff]   ;;  %v13204_v24 = vld [vmem:[%s18090_s1 + $0x1d8c] ss:$16 sps:$4 sm:$0xff]  }
 0x377   :  { %6957 = vmatpush1.bf16.msra.mxu0 %v13109_v47  ;;  %7645 = vmatpush1.bf16.msra.mxu1 %v13112_v50  ;;  %v13199_v47 = vld [vmem:[%s18090_s1 + $0x1d80] ss:$16 sps:$4 sm:$0xff]   ;;  %v13202_v50 = vld [vmem:[%s18090_s1 + $0x1d88] ss:$16 sps:$4 sm:$0xff]  }
 0x378   :  { %6958 = vmatprep.subr.bf16.mxu0 %v13117_v21  ;;  %7646 = vmatprep.subr.bf16.mxu1 %v13120_v45  ;;  %v13207_v21 = vld [vmem:[%s18090_s1 + $0x1da4] ss:$16 sps:$4 sm:$0xff]   ;;  %v13210_v45 = vld [vmem:[%s18090_s1 + $0x1dac] ss:$16 sps:$4 sm:$0xff]  }
 0x37b   :  { %6959 = vmatpush1.bf16.msra.mxu0 %v13115_v51  ;;  %7647 = vmatpush1.bf16.msra.mxu1 %v13118_v54  ;;  %v13205_v51 = vld [vmem:[%s18090_s1 + $0x1da0] ss:$16 sps:$4 sm:$0xff]   ;;  %v13208_v54 = vld [vmem:[%s18090_s1 + $0x1da8] ss:$16 sps:$4 sm:$0xff]  }
 0x37c   :  { %6960 = vmatprep.subr.bf16.mxu0 %v13123_v48  ;;  %7648 = vmatprep.subr.bf16.mxu1 %v13126_v49  ;;  %v13213_v48 = vld [vmem:[%s18090_s1 + $0x1dc4] ss:$16 sps:$4 sm:$0xff]   ;;  %v13216_v49 = vld [vmem:[%s18090_s1 + $0x1dcc] ss:$16 sps:$4 sm:$0xff]  }
 0x37f   :  { %6961 = vmatpush1.bf16.msra.mxu0 %v13121_v55  ;;  %7649 = vmatpush1.bf16.msra.mxu1 %v13124_v58  ;;  %v13211_v55 = vld [vmem:[%s18090_s1 + $0x1dc0] ss:$16 sps:$4 sm:$0xff]   ;;  %v13214_v58 = vld [vmem:[%s18090_s1 + $0x1dc8] ss:$16 sps:$4 sm:$0xff]  }
 0x380   :  { %6973 = vmatprep.subr.bf16.mxu0 %v13129_v52  ;;  %7661 = vmatprep.subr.bf16.mxu1 %v13132_v53  ;;  %v13219_v52 = vld [vmem:[%s18090_s1 + $0x1de4] ss:$16 sps:$4 sm:$0xff]   ;;  %v13222_v53 = vld [vmem:[%s18090_s1 + $0x1dec] ss:$16 sps:$4 sm:$0xff]  }
 0x382   :  { %6963 = vmatmul.mubr.bf16.vlgmr.msra.gmra.mrb[0].mxu0 %v10302_v59  ;;  %7651 = vmatmul.mubr.bf16.vlgmr.msra.gmra.mrb[0].mxu1 %v10302_v59  ;;  %v13217_v59 = vld [vmem:[%s18090_s1 + $0x1de0] ss:$16 sps:$4 sm:$0xff]  }
 0x383   :  { %6974 = vmatpush1.bf16.msra.mxu0 %v13127_v62  ;;  %7662 = vmatpush1.bf16.msra.mxu1 %v13130_v56  ;;  %v13220_v62 = vld [vmem:[%s18090_s1 + $0x1de8] ss:$16 sps:$4 sm:$0xff]   ;;  %v13225_v56 = vld [vmem:[%s18090_s1 + $0x1e04] ss:$16 sps:$4 sm:$0xff]  }
 0x384   :  { %6975 = vmatprep.subr.bf16.mxu0 %v13135_v57  ;;  %7663 = vmatprep.subr.bf16.mxu1 %v13138_v63  ;;  %v13228_v57 = vld [vmem:[%s18090_s1 + $0x1e0c] ss:$16 sps:$4 sm:$0xff]   ;;  %v10304_v63 = vcombine.low %v16670_v60, %v16675_v61  ;;  %v13226_v60 = vld [vmem:[%s18090_s1 + $0x1e08] ss:$16 sps:$4 sm:$0xff]   ;;  %v13231_v61 = vld [vmem:[%s18090_s1 + $0x1e24] ss:$16 sps:$4 sm:$0xff]  }
 0x385   :  { %7005 = vmatprep.mubr.bf16.mxu0 %v10305_v0  ;;  %7693 = vmatprep.mubr.bf16.mxu1 %v10305_v0  ;;  %v16876_v0 = vld [vmem:[%s18091_s0 + $0x78] sm:$0xff] }
 0x387   :  { %6976 = vmatpush1.bf16.msra.mxu0 %v13133_v1  ;;  %7664 = vmatpush1.bf16.msra.mxu1 %v13136_v2  ;;  %v16881_v1 = vld [vmem:[%s18091_s0 + $0xf8] sm:$0xff]  ;;  %v13223_v2 = vld [vmem:[%s18090_s1 + $0x1e00] ss:$16 sps:$4 sm:$0xff]  }
 0x388   :  { %6977 = vmatprep.subr.bf16.mxu0 %v13141_v3  ;;  %7665 = vmatprep.subr.bf16.mxu1 %v13144_v4  ;;  %v13234_v3 = vld [vmem:[%s18090_s1 + $0x1e2c] ss:$16 sps:$4 sm:$0xff]   ;;  %v10307_v4 = vcombine.high %v16876_v0, %v16881_v1 }
 0x38b   :  { %6978 = vmatpush1.bf16.msra.mxu0 %v13139_v5  ;;  %7666 = vmatpush1.bf16.msra.mxu1 %v13142_v6  ;;  %v13229_v5 = vld [vmem:[%s18090_s1 + $0x1e20] ss:$16 sps:$4 sm:$0xff]   ;;  %v13232_v6 = vld [vmem:[%s18090_s1 + $0x1e28] ss:$16 sps:$4 sm:$0xff]  }
 0x38c   :  { %6979 = vmatprep.subr.bf16.mxu0 %v13147_v7  ;;  %7667 = vmatprep.subr.bf16.mxu1 %v13150_v8  ;;  %v13237_v7 = vld [vmem:[%s18090_s1 + $0x1e44] ss:$16 sps:$4 sm:$0xff]   ;;  %v13240_v8 = vld [vmem:[%s18090_s1 + $0x1e4c] ss:$16 sps:$4 sm:$0xff]  }
 0x38f   :  { %6980 = vmatpush1.bf16.msra.mxu0 %v13145_v9  ;;  %7668 = vmatpush1.bf16.msra.mxu1 %v13148_v10  ;;  %v13235_v9 = vld [vmem:[%s18090_s1 + $0x1e40] ss:$16 sps:$4 sm:$0xff]   ;;  %v13238_v10 = vld [vmem:[%s18090_s1 + $0x1e48] ss:$16 sps:$4 sm:$0xff]  }
 0x390   :  { %6981 = vmatprep.subr.bf16.mxu0 %v13153_v11  ;;  %7669 = vmatprep.subr.bf16.mxu1 %v13156_v12  ;;  %v13243_v11 = vld [vmem:[%s18090_s1 + $0x1e64] ss:$16 sps:$4 sm:$0xff]   ;;  %v13246_v12 = vld [vmem:[%s18090_s1 + $0x1e6c] ss:$16 sps:$4 sm:$0xff]  }
 0x393   :  { %6982 = vmatpush1.bf16.msra.mxu0 %v13151_v13  ;;  %7670 = vmatpush1.bf16.msra.mxu1 %v13154_v16  ;;  %v13241_v13 = vld [vmem:[%s18090_s1 + $0x1e60] ss:$16 sps:$4 sm:$0xff]   ;;  %v13244_v16 = vld [vmem:[%s18090_s1 + $0x1e68] ss:$16 sps:$4 sm:$0xff]  }
 0x394   :  { %6983 = vmatprep.subr.bf16.mxu0 %v13159_v17  ;;  %7671 = vmatprep.subr.bf16.mxu1 %v13162_v20  ;;  %v13249_v17 = vld [vmem:[%s18090_s1 + $0x1e84] ss:$16 sps:$4 sm:$0xff]   ;;  %v13252_v20 = vld [vmem:[%s18090_s1 + $0x1e8c] ss:$16 sps:$4 sm:$0xff]  }
 0x397   :  { %6984 = vmatpush1.bf16.msra.mxu0 %v13157_v15  ;;  %7672 = vmatpush1.bf16.msra.mxu1 %v13160_v22  ;;  %v13247_v15 = vld [vmem:[%s18090_s1 + $0x1e80] ss:$16 sps:$4 sm:$0xff]   ;;  %v13250_v22 = vld [vmem:[%s18090_s1 + $0x1e88] ss:$16 sps:$4 sm:$0xff]  }
 0x398   :  { %6985 = vmatprep.subr.bf16.mxu0 %v13165_v23  ;;  %7673 = vmatprep.subr.bf16.mxu1 %v13168_v18  ;;  %v13255_v23 = vld [vmem:[%s18090_s1 + $0x1ea4] ss:$16 sps:$4 sm:$0xff]   ;;  %v13258_v18 = vld [vmem:[%s18090_s1 + $0x1eac] ss:$16 sps:$4 sm:$0xff]  }
 0x39b   :  { %6986 = vmatpush1.bf16.msra.mxu0 %v13163_v25  ;;  %7674 = vmatpush1.bf16.msra.mxu1 %v13166_v26  ;;  %v13253_v25 = vld [vmem:[%s18090_s1 + $0x1ea0] ss:$16 sps:$4 sm:$0xff]   ;;  %v13256_v26 = vld [vmem:[%s18090_s1 + $0x1ea8] ss:$16 sps:$4 sm:$0xff]  }
 0x39c   :  { %6987 = vmatprep.subr.bf16.mxu0 %v13171_v27  ;;  %7675 = vmatprep.subr.bf16.mxu1 %v13174_v28  ;;  %v13261_v27 = vld [vmem:[%s18090_s1 + $0x1ec4] ss:$16 sps:$4 sm:$0xff]   ;;  %v13264_v28 = vld [vmem:[%s18090_s1 + $0x1ecc] ss:$16 sps:$4 sm:$0xff]  }
 0x39f   :  { %6988 = vmatpush1.bf16.msra.mxu0 %v13169_v29  ;;  %7676 = vmatpush1.bf16.msra.mxu1 %v13172_v30  ;;  %v13259_v29 = vld [vmem:[%s18090_s1 + $0x1ec0] ss:$16 sps:$4 sm:$0xff]   ;;  %v13262_v30 = vld [vmem:[%s18090_s1 + $0x1ec8] ss:$16 sps:$4 sm:$0xff]  }
 0x3a0   :  { %6989 = vmatprep.subr.bf16.mxu0 %v13177_v31  ;;  %7677 = vmatprep.subr.bf16.mxu1 %v13180_v32  ;;  %v13267_v31 = vld [vmem:[%s18090_s1 + $0x1ee4] ss:$16 sps:$4 sm:$0xff]   ;;  %v13270_v32 = vld [vmem:[%s18090_s1 + $0x1eec] ss:$16 sps:$4 sm:$0xff]  }
 0x3a3   :  { %6990 = vmatpush1.bf16.msra.mxu0 %v13175_v33  ;;  %7678 = vmatpush1.bf16.msra.mxu1 %v13178_v34  ;;  %v13265_v33 = vld [vmem:[%s18090_s1 + $0x1ee0] ss:$16 sps:$4 sm:$0xff]   ;;  %v13268_v34 = vld [vmem:[%s18090_s1 + $0x1ee8] ss:$16 sps:$4 sm:$0xff]  }
 0x3a4   :  { %6991 = vmatprep.subr.bf16.mxu0 %v13183_v35  ;;  %7679 = vmatprep.subr.bf16.mxu1 %v13186_v36  ;;  %v13273_v35 = vld [vmem:[%s18090_s1 + $0x1f04] ss:$16 sps:$4 sm:$0xff]   ;;  %v13276_v36 = vld [vmem:[%s18090_s1 + $0x1f0c] ss:$16 sps:$4 sm:$0xff]  }
 0x3a7   :  { %6992 = vmatpush1.bf16.msra.mxu0 %v13181_v37  ;;  %7680 = vmatpush1.bf16.msra.mxu1 %v13184_v38  ;;  %v13271_v37 = vld [vmem:[%s18090_s1 + $0x1f00] ss:$16 sps:$4 sm:$0xff]   ;;  %v13274_v38 = vld [vmem:[%s18090_s1 + $0x1f08] ss:$16 sps:$4 sm:$0xff]  }
 0x3a8   :  { %6993 = vmatprep.subr.bf16.mxu0 %v13189_v39  ;;  %7681 = vmatprep.subr.bf16.mxu1 %v13192_v40  ;;  %v13279_v39 = vld [vmem:[%s18090_s1 + $0x1f24] ss:$16 sps:$4 sm:$0xff]   ;;  %v13282_v40 = vld [vmem:[%s18090_s1 + $0x1f2c] ss:$16 sps:$4 sm:$0xff]  }
 0x3ab   :  { %6994 = vmatpush1.bf16.msra.mxu0 %v13187_v41  ;;  %7682 = vmatpush1.bf16.msra.mxu1 %v13190_v42  ;;  %v13277_v41 = vld [vmem:[%s18090_s1 + $0x1f20] ss:$16 sps:$4 sm:$0xff]   ;;  %v13280_v42 = vld [vmem:[%s18090_s1 + $0x1f28] ss:$16 sps:$4 sm:$0xff]  }
 0x3ac   :  { %6995 = vmatprep.subr.bf16.mxu0 %v13195_v43  ;;  %7683 = vmatprep.subr.bf16.mxu1 %v13198_v44  ;;  %v13285_v43 = vld [vmem:[%s18090_s1 + $0x1f44] ss:$16 sps:$4 sm:$0xff]   ;;  %v13288_v44 = vld [vmem:[%s18090_s1 + $0x1f4c] ss:$16 sps:$4 sm:$0xff]  }
 0x3af   :  { %6996 = vmatpush1.bf16.msra.mxu0 %v13193_v14  ;;  %7684 = vmatpush1.bf16.msra.mxu1 %v13196_v46  ;;  %v13283_v14 = vld [vmem:[%s18090_s1 + $0x1f40] ss:$16 sps:$4 sm:$0xff]   ;;  %v13286_v46 = vld [vmem:[%s18090_s1 + $0x1f48] ss:$16 sps:$4 sm:$0xff]  }
 0x3b0   :  { %6997 = vmatprep.subr.bf16.mxu0 %v13201_v19  ;;  %7685 = vmatprep.subr.bf16.mxu1 %v13204_v24  ;;  %v13291_v19 = vld [vmem:[%s18090_s1 + $0x1f64] ss:$16 sps:$4 sm:$0xff]   ;;  %v13294_v24 = vld [vmem:[%s18090_s1 + $0x1f6c] ss:$16 sps:$4 sm:$0xff]  }
 0x3b3   :  { %6998 = vmatpush1.bf16.msra.mxu0 %v13199_v47  ;;  %7686 = vmatpush1.bf16.msra.mxu1 %v13202_v50  ;;  %v13289_v47 = vld [vmem:[%s18090_s1 + $0x1f60] ss:$16 sps:$4 sm:$0xff]   ;;  %v13292_v50 = vld [vmem:[%s18090_s1 + $0x1f68] ss:$16 sps:$4 sm:$0xff]  }
 0x3b4   :  { %6999 = vmatprep.subr.bf16.mxu0 %v13207_v21  ;;  %7687 = vmatprep.subr.bf16.mxu1 %v13210_v45  ;;  %v13297_v21 = vld [vmem:[%s18090_s1 + $0x1f84] ss:$16 sps:$4 sm:$0xff]   ;;  %v13300_v45 = vld [vmem:[%s18090_s1 + $0x1f8c] ss:$16 sps:$4 sm:$0xff]  }
 0x3b7   :  { %7000 = vmatpush1.bf16.msra.mxu0 %v13205_v51  ;;  %7688 = vmatpush1.bf16.msra.mxu1 %v13208_v54  ;;  %v13295_v51 = vld [vmem:[%s18090_s1 + $0x1f80] ss:$16 sps:$4 sm:$0xff]   ;;  %v13298_v54 = vld [vmem:[%s18090_s1 + $0x1f88] ss:$16 sps:$4 sm:$0xff]  }
 0x3b8   :  { %7001 = vmatprep.subr.bf16.mxu0 %v13213_v48  ;;  %7689 = vmatprep.subr.bf16.mxu1 %v13216_v49  ;;  %v13303_v48 = vld [vmem:[%s18090_s1 + $0x1fa4] ss:$16 sps:$4 sm:$0xff]   ;;  %v13306_v49 = vld [vmem:[%s18090_s1 + $0x1fac] ss:$16 sps:$4 sm:$0xff]  }
 0x3bb   :  { %7002 = vmatpush1.bf16.msra.mxu0 %v13211_v55  ;;  %7690 = vmatpush1.bf16.msra.mxu1 %v13214_v58  ;;  %v13301_v55 = vld [vmem:[%s18090_s1 + $0x1fa0] ss:$16 sps:$4 sm:$0xff]   ;;  %v13304_v58 = vld [vmem:[%s18090_s1 + $0x1fa8] ss:$16 sps:$4 sm:$0xff]  }
 0x3bc   :  { %7003 = vmatprep.subr.bf16.mxu0 %v13219_v52  ;;  %7691 = vmatprep.subr.bf16.mxu1 %v13222_v53  ;;  %v13309_v52 = vld [vmem:[%s18090_s1 + $0x1fc4] ss:$16 sps:$4 sm:$0xff]   ;;  %v13312_v53 = vld [vmem:[%s18090_s1 + $0x1fcc] ss:$16 sps:$4 sm:$0xff]  }
 0x3bf   :  { %7004 = vmatpush1.bf16.msra.mxu0 %v13217_v59  ;;  %7692 = vmatpush1.bf16.msra.mxu1 %v13220_v62  ;;  %v13307_v59 = vld [vmem:[%s18090_s1 + $0x1fc0] ss:$16 sps:$4 sm:$0xff]   ;;  %v13310_v62 = vld [vmem:[%s18090_s1 + $0x1fc8] ss:$16 sps:$4 sm:$0xff]  }
 0x3c0   :  { %7016 = vmatprep.subr.bf16.mxu0 %v13225_v56  ;;  %7704 = vmatprep.subr.bf16.mxu1 %v13228_v57  ;;  %v13315_v56 = vld [vmem:[%s18090_s1 + $0x1fe4] ss:$16 sps:$4 sm:$0xff]   ;;  %v13318_v57 = vld [vmem:[%s18090_s1 + $0x1fec] ss:$16 sps:$4 sm:$0xff]  }
 0x3c2   :  { %7006 = vmatmul.mubr.bf16.vlgmr.msra.gmra.mrb[0].mxu0 %v10304_v63  ;;  %7694 = vmatmul.mubr.bf16.vlgmr.msra.gmra.mrb[0].mxu1 %v10304_v63  ;;  %v13313_v63 = vld [vmem:[%s18090_s1 + $0x1fe0] ss:$16 sps:$4 sm:$0xff]  }
 0x3c3   :  { %7017 = vmatpush1.bf16.msra.mxu0 %v13223_v2  ;;  %7705 = vmatpush1.bf16.msra.mxu1 %v13226_v60  ;;  %v13316_v2 = vld [vmem:[%s18090_s1 + $0x1fe8] ss:$16 sps:$4 sm:$0xff]   ;;  %v13321_v60 = vld [vmem:[%s18092_s4 + $0x4] ss:$16 sps:$4 sm:$0xff]  }
 0x3c4   :  { %7018 = vmatprep.subr.bf16.mxu0 %v13231_v61  ;;  %7706 = vmatprep.subr.bf16.mxu1 %v13234_v3  ;;  %v13324_v61 = vld [vmem:[%s18092_s4 + $0xc] ss:$16 sps:$4 sm:$0xff]   ;;  %v10306_v3 = vcombine.low %v16876_v0, %v16881_v1  ;;  %v13327_v0 = vld [vmem:[%s18092_s4 + $0x24] ss:$16 sps:$4 sm:$0xff]  }
 0x3c5   :  { %7048 = vmatprep.mubr.bf16.mxu0 %v10307_v4  ;;  %7736 = vmatprep.mubr.bf16.mxu1 %v10307_v4  ;;  %v13319_v4 = vld [vmem:[%s18092_s4] ss:$16 sps:$4 sm:$0xff]   ;;  %v13330_v1 = vld [vmem:[%s18092_s4 + $0x2c] ss:$16 sps:$4 sm:$0xff]  }
 0x3c7   :  { %7019 = vmatpush1.bf16.msra.mxu0 %v13229_v5  ;;  %7707 = vmatpush1.bf16.msra.mxu1 %v13232_v6  ;;  %v13322_v5 = vld [vmem:[%s18092_s4 + $0x8] ss:$16 sps:$4 sm:$0xff]   ;;  %v13325_v6 = vld [vmem:[%s18092_s4 + $0x20] ss:$16 sps:$4 sm:$0xff]  }
 0x3c8   :  { %7020 = vmatprep.subr.bf16.mxu0 %v13237_v7  ;;  %7708 = vmatprep.subr.bf16.mxu1 %v13240_v8  ;;  %v13328_v7 = vld [vmem:[%s18092_s4 + $0x28] ss:$16 sps:$4 sm:$0xff]   ;;  %v13333_v8 = vld [vmem:[%s18092_s4 + $0x44] ss:$16 sps:$4 sm:$0xff]  }
 0x3cb   :  { %7021 = vmatpush1.bf16.msra.mxu0 %v13235_v9  ;;  %7709 = vmatpush1.bf16.msra.mxu1 %v13238_v10  ;;  %v13336_v9 = vld [vmem:[%s18092_s4 + $0x4c] ss:$16 sps:$4 sm:$0xff]   ;;  %v13331_v10 = vld [vmem:[%s18092_s4 + $0x40] ss:$16 sps:$4 sm:$0xff]  }
 0x3cc   :  { %7022 = vmatprep.subr.bf16.mxu0 %v13243_v11  ;;  %7710 = vmatprep.subr.bf16.mxu1 %v13246_v12  ;;  %v13334_v11 = vld [vmem:[%s18092_s4 + $0x48] ss:$16 sps:$4 sm:$0xff]   ;;  %v13339_v12 = vld [vmem:[%s18092_s4 + $0x64] ss:$16 sps:$4 sm:$0xff]  }
 0x3cf   :  { %7023 = vmatpush1.bf16.msra.mxu0 %v13241_v13  ;;  %7711 = vmatpush1.bf16.msra.mxu1 %v13244_v16  ;;  %v13342_v13 = vld [vmem:[%s18092_s4 + $0x6c] ss:$16 sps:$4 sm:$0xff]   ;;  %v13337_v16 = vld [vmem:[%s18092_s4 + $0x60] ss:$16 sps:$4 sm:$0xff]  }
 0x3d0   :  { %7024 = vmatprep.subr.bf16.mxu0 %v13249_v17  ;;  %7712 = vmatprep.subr.bf16.mxu1 %v13252_v20  ;;  %v13340_v17 = vld [vmem:[%s18092_s4 + $0x68] ss:$16 sps:$4 sm:$0xff]   ;;  %v13345_v20 = vld [vmem:[%s18092_s4 + $0x84] ss:$16 sps:$4 sm:$0xff]  }
 0x3d3   :  { %7025 = vmatpush1.bf16.msra.mxu0 %v13247_v15  ;;  %7713 = vmatpush1.bf16.msra.mxu1 %v13250_v22  ;;  %v13348_v15 = vld [vmem:[%s18092_s4 + $0x8c] ss:$16 sps:$4 sm:$0xff]   ;;  %v13343_v22 = vld [vmem:[%s18092_s4 + $0x80] ss:$16 sps:$4 sm:$0xff]  }
 0x3d4   :  { %7026 = vmatprep.subr.bf16.mxu0 %v13255_v23  ;;  %7714 = vmatprep.subr.bf16.mxu1 %v13258_v18  ;;  %v13346_v23 = vld [vmem:[%s18092_s4 + $0x88] ss:$16 sps:$4 sm:$0xff]   ;;  %v13351_v18 = vld [vmem:[%s18092_s4 + $0xa4] ss:$16 sps:$4 sm:$0xff]  }
 0x3d7   :  { %7027 = vmatpush1.bf16.msra.mxu0 %v13253_v25  ;;  %7715 = vmatpush1.bf16.msra.mxu1 %v13256_v26  ;;  %v13354_v25 = vld [vmem:[%s18092_s4 + $0xac] ss:$16 sps:$4 sm:$0xff]   ;;  %v13349_v26 = vld [vmem:[%s18092_s4 + $0xa0] ss:$16 sps:$4 sm:$0xff]  }
 0x3d8   :  { %7028 = vmatprep.subr.bf16.mxu0 %v13261_v27  ;;  %7716 = vmatprep.subr.bf16.mxu1 %v13264_v28  ;;  %v13352_v27 = vld [vmem:[%s18092_s4 + $0xa8] ss:$16 sps:$4 sm:$0xff]   ;;  %v13357_v28 = vld [vmem:[%s18092_s4 + $0xc4] ss:$16 sps:$4 sm:$0xff]  }
 0x3db   :  { %7029 = vmatpush1.bf16.msra.mxu0 %v13259_v29  ;;  %7717 = vmatpush1.bf16.msra.mxu1 %v13262_v30  ;;  %v13360_v29 = vld [vmem:[%s18092_s4 + $0xcc] ss:$16 sps:$4 sm:$0xff]   ;;  %v13355_v30 = vld [vmem:[%s18092_s4 + $0xc0] ss:$16 sps:$4 sm:$0xff]  }
 0x3dc   :  { %7030 = vmatprep.subr.bf16.mxu0 %v13267_v31  ;;  %7718 = vmatprep.subr.bf16.mxu1 %v13270_v32  ;;  %v13358_v31 = vld [vmem:[%s18092_s4 + $0xc8] ss:$16 sps:$4 sm:$0xff]   ;;  %v13363_v32 = vld [vmem:[%s18092_s4 + $0xe4] ss:$16 sps:$4 sm:$0xff]  }
 0x3df   :  { %7031 = vmatpush1.bf16.msra.mxu0 %v13265_v33  ;;  %7719 = vmatpush1.bf16.msra.mxu1 %v13268_v34  ;;  %v13366_v33 = vld [vmem:[%s18092_s4 + $0xec] ss:$16 sps:$4 sm:$0xff]   ;;  %v13361_v34 = vld [vmem:[%s18092_s4 + $0xe0] ss:$16 sps:$4 sm:$0xff]  }
 0x3e0   :  { %7032 = vmatprep.subr.bf16.mxu0 %v13273_v35  ;;  %7720 = vmatprep.subr.bf16.mxu1 %v13276_v36  ;;  %v13364_v35 = vld [vmem:[%s18092_s4 + $0xe8] ss:$16 sps:$4 sm:$0xff]   ;;  %v13369_v36 = vld [vmem:[%s18092_s4 + $0x104] ss:$16 sps:$4 sm:$0xff]  }
 0x3e3   :  { %7033 = vmatpush1.bf16.msra.mxu0 %v13271_v37  ;;  %7721 = vmatpush1.bf16.msra.mxu1 %v13274_v38  ;;  %v13372_v37 = vld [vmem:[%s18092_s4 + $0x10c] ss:$16 sps:$4 sm:$0xff]   ;;  %v13367_v38 = vld [vmem:[%s18092_s4 + $0x100] ss:$16 sps:$4 sm:$0xff]  }
 0x3e4   :  { %7034 = vmatprep.subr.bf16.mxu0 %v13279_v39  ;;  %7722 = vmatprep.subr.bf16.mxu1 %v13282_v40  ;;  %v13370_v39 = vld [vmem:[%s18092_s4 + $0x108] ss:$16 sps:$4 sm:$0xff]   ;;  %v13375_v40 = vld [vmem:[%s18092_s4 + $0x124] ss:$16 sps:$4 sm:$0xff]  }
 0x3e7   :  { %7035 = vmatpush1.bf16.msra.mxu0 %v13277_v41  ;;  %7723 = vmatpush1.bf16.msra.mxu1 %v13280_v42  ;;  %v13378_v41 = vld [vmem:[%s18092_s4 + $0x12c] ss:$16 sps:$4 sm:$0xff]   ;;  %v13373_v42 = vld [vmem:[%s18092_s4 + $0x120] ss:$16 sps:$4 sm:$0xff]  }
 0x3e8   :  { %7036 = vmatprep.subr.bf16.mxu0 %v13285_v43  ;;  %7724 = vmatprep.subr.bf16.mxu1 %v13288_v44  ;;  %v13376_v43 = vld [vmem:[%s18092_s4 + $0x128] ss:$16 sps:$4 sm:$0xff]   ;;  %v13381_v44 = vld [vmem:[%s18092_s4 + $0x144] ss:$16 sps:$4 sm:$0xff]  }
 0x3eb   :  { %7037 = vmatpush1.bf16.msra.mxu0 %v13283_v14  ;;  %7725 = vmatpush1.bf16.msra.mxu1 %v13286_v46  ;;  %v13384_v14 = vld [vmem:[%s18092_s4 + $0x14c] ss:$16 sps:$4 sm:$0xff]   ;;  %v13379_v46 = vld [vmem:[%s18092_s4 + $0x140] ss:$16 sps:$4 sm:$0xff]  }
 0x3ec   :  { %7038 = vmatprep.subr.bf16.mxu0 %v13291_v19  ;;  %7726 = vmatprep.subr.bf16.mxu1 %v13294_v24  ;;  %v13382_v19 = vld [vmem:[%s18092_s4 + $0x148] ss:$16 sps:$4 sm:$0xff]   ;;  %v13387_v24 = vld [vmem:[%s18092_s4 + $0x164] ss:$16 sps:$4 sm:$0xff]  }
 0x3ef   :  { %7039 = vmatpush1.bf16.msra.mxu0 %v13289_v47  ;;  %7727 = vmatpush1.bf16.msra.mxu1 %v13292_v50  ;;  %v13390_v47 = vld [vmem:[%s18092_s4 + $0x16c] ss:$16 sps:$4 sm:$0xff]   ;;  %v13385_v50 = vld [vmem:[%s18092_s4 + $0x160] ss:$16 sps:$4 sm:$0xff]  }
 0x3f0   :  { %7040 = vmatprep.subr.bf16.mxu0 %v13297_v21  ;;  %7728 = vmatprep.subr.bf16.mxu1 %v13300_v45  ;;  %v13388_v21 = vld [vmem:[%s18092_s4 + $0x168] ss:$16 sps:$4 sm:$0xff]   ;;  %v13393_v45 = vld [vmem:[%s18092_s4 + $0x184] ss:$16 sps:$4 sm:$0xff]  }
 0x3f3   :  { %7041 = vmatpush1.bf16.msra.mxu0 %v13295_v51  ;;  %7729 = vmatpush1.bf16.msra.mxu1 %v13298_v54  ;;  %v13396_v51 = vld [vmem:[%s18092_s4 + $0x18c] ss:$16 sps:$4 sm:$0xff]   ;;  %v13391_v54 = vld [vmem:[%s18092_s4 + $0x180] ss:$16 sps:$4 sm:$0xff]  }
 0x3f4   :  { %7042 = vmatprep.subr.bf16.mxu0 %v13303_v48  ;;  %7730 = vmatprep.subr.bf16.mxu1 %v13306_v49  ;;  %v13394_v48 = vld [vmem:[%s18092_s4 + $0x188] ss:$16 sps:$4 sm:$0xff]   ;;  %v13399_v49 = vld [vmem:[%s18092_s4 + $0x1a4] ss:$16 sps:$4 sm:$0xff]  }
 0x3f7   :  { %7043 = vmatpush1.bf16.msra.mxu0 %v13301_v55  ;;  %7731 = vmatpush1.bf16.msra.mxu1 %v13304_v58  ;;  %v13402_v55 = vld [vmem:[%s18092_s4 + $0x1ac] ss:$16 sps:$4 sm:$0xff]   ;;  %v13397_v58 = vld [vmem:[%s18092_s4 + $0x1a0] ss:$16 sps:$4 sm:$0xff]  }
 0x3f8   :  { %7044 = vmatprep.subr.bf16.mxu0 %v13309_v52  ;;  %7732 = vmatprep.subr.bf16.mxu1 %v13312_v53  ;;  %v13400_v52 = vld [vmem:[%s18092_s4 + $0x1a8] ss:$16 sps:$4 sm:$0xff]   ;;  %v13405_v53 = vld [vmem:[%s18092_s4 + $0x1c4] ss:$16 sps:$4 sm:$0xff]  }
 0x3fb   :  { %7045 = vmatpush1.bf16.msra.mxu0 %v13307_v59  ;;  %7733 = vmatpush1.bf16.msra.mxu1 %v13310_v62  ;;  %v13408_v59 = vld [vmem:[%s18092_s4 + $0x1cc] ss:$16 sps:$4 sm:$0xff]   ;;  %v13403_v62 = vld [vmem:[%s18092_s4 + $0x1c0] ss:$16 sps:$4 sm:$0xff]  }
 0x3fc   :  { %7046 = vmatprep.subr.bf16.mxu0 %v13315_v56  ;;  %7734 = vmatprep.subr.bf16.mxu1 %v13318_v57  ;;  %v13406_v56 = vld [vmem:[%s18092_s4 + $0x1c8] ss:$16 sps:$4 sm:$0xff]   ;;  %v13411_v57 = vld [vmem:[%s18092_s4 + $0x1e4] ss:$16 sps:$4 sm:$0xff]  }
 0x3ff   :  { %7047 = vmatpush1.bf16.msra.mxu0 %v13313_v63  ;;  %7735 = vmatpush1.bf16.msra.mxu1 %v13316_v2  ;;  %v13414_v63 = vld [vmem:[%s18092_s4 + $0x1ec] ss:$16 sps:$4 sm:$0xff]   ;;  %v13409_v2 = vld [vmem:[%s18092_s4 + $0x1e0] ss:$16 sps:$4 sm:$0xff]  }
 0x400   :  { %8728 = vmatprep.subr.bf16.mxu0 %v13321_v60  ;;  %8814 = vmatprep.subr.bf16.mxu1 %v13324_v61  ;;  %v13412_v60 = vld [vmem:[%s18092_s4 + $0x1e8] ss:$16 sps:$4 sm:$0xff]   ;;  %v13417_v61 = vld [vmem:[%s18092_s4 + $0x204] ss:$16 sps:$4 sm:$0xff]  }
 0x402   :  { %7049 = vmatmul.mubr.bf16.vlgmr.msra.gmra.mrb[0].mxu0 %v10306_v3  ;;  %7737 = vmatmul.mubr.bf16.vlgmr.msra.gmra.mrb[0].mxu1 %v10306_v3  ;;  %v13420_v3 = vld [vmem:[%s18092_s4 + $0x20c] ss:$16 sps:$4 sm:$0xff]  }
 0x403   :  { %8729 = vmatpush1.bf16.msra.mxu0 %v13319_v4  ;;  %8815 = vmatpush1.bf16.msra.mxu1 %v13322_v5  ;;  %v7749_v4 = vlaneseq }
 0x404   :  { %8730 = vmatprep.subr.bf16.mxu0 %v13327_v0  ;;  %8816 = vmatprep.subr.bf16.mxu1 %v13330_v1 }
 0x405   :  { %v17271_v5 = vshrl.u32 %v7749_v4, 7 }
 0x407   :  { %8731 = vmatpush1.bf16.msra.mxu0 %v13325_v6  ;;  %8817 = vmatpush1.bf16.msra.mxu1 %v13328_v7  ;;  %vm7752_vm0 = vcmp.lt.s32.totalorder %v17271_v5, 2 }
 0x408   :  { %8732 = vmatprep.subr.bf16.mxu0 %v13333_v8  ;;  %8818 = vmatprep.subr.bf16.mxu1 %v13336_v9  ;;  %vm17344_vm2 = vmpackc.low %vm13727_vm1, %vm7752_vm0 }
 0x40b   :  { %8733 = vmatpush1.bf16.msra.mxu0 %v13331_v10  ;;  %8819 = vmatpush1.bf16.msra.mxu1 %v13334_v11 }
 0x40c   :  { %8734 = vmatprep.subr.bf16.mxu0 %v13339_v12  ;;  %8820 = vmatprep.subr.bf16.mxu1 %v13342_v13 }
 0x40f   :  { %8735 = vmatpush1.bf16.msra.mxu0 %v13337_v16  ;;  %8821 = vmatpush1.bf16.msra.mxu1 %v13340_v17 }
 0x410   :  { %8736 = vmatprep.subr.bf16.mxu0 %v13345_v20  ;;  %8822 = vmatprep.subr.bf16.mxu1 %v13348_v15 }
 0x413   :  { %8737 = vmatpush1.bf16.msra.mxu0 %v13343_v22  ;;  %8823 = vmatpush1.bf16.msra.mxu1 %v13346_v23 }
 0x414   :  { %8738 = vmatprep.subr.bf16.mxu0 %v13351_v18  ;;  %8824 = vmatprep.subr.bf16.mxu1 %v13354_v25 }
 0x417   :  { %8739 = vmatpush1.bf16.msra.mxu0 %v13349_v26  ;;  %8825 = vmatpush1.bf16.msra.mxu1 %v13352_v27 }
 0x418   :  { %8740 = vmatprep.subr.bf16.mxu0 %v13357_v28  ;;  %8826 = vmatprep.subr.bf16.mxu1 %v13360_v29 }
 0x41b   :  { %8741 = vmatpush1.bf16.msra.mxu0 %v13355_v30  ;;  %8827 = vmatpush1.bf16.msra.mxu1 %v13358_v31 }
 0x41c   :  { %8742 = vmatprep.subr.bf16.mxu0 %v13363_v32  ;;  %8828 = vmatprep.subr.bf16.mxu1 %v13366_v33 }
 0x41f   :  { %8743 = vmatpush1.bf16.msra.mxu0 %v13361_v34  ;;  %8829 = vmatpush1.bf16.msra.mxu1 %v13364_v35 }
 0x420   :  { %8744 = vmatprep.subr.bf16.mxu0 %v13369_v36  ;;  %8830 = vmatprep.subr.bf16.mxu1 %v13372_v37 }
 0x423   :  { %8745 = vmatpush1.bf16.msra.mxu0 %v13367_v38  ;;  %8831 = vmatpush1.bf16.msra.mxu1 %v13370_v39 }
 0x424   :  { %8746 = vmatprep.subr.bf16.mxu0 %v13375_v40  ;;  %8832 = vmatprep.subr.bf16.mxu1 %v13378_v41 }
 0x427   :  { %8747 = vmatpush1.bf16.msra.mxu0 %v13373_v42  ;;  %8833 = vmatpush1.bf16.msra.mxu1 %v13376_v43 }
 0x428   :  { %8748 = vmatprep.subr.bf16.mxu0 %v13381_v44  ;;  %8834 = vmatprep.subr.bf16.mxu1 %v13384_v14 }
 0x42b   :  { %8749 = vmatpush1.bf16.msra.mxu0 %v13379_v46  ;;  %8835 = vmatpush1.bf16.msra.mxu1 %v13382_v19 }
 0x42c   :  { %8750 = vmatprep.subr.bf16.mxu0 %v13387_v24  ;;  %8836 = vmatprep.subr.bf16.mxu1 %v13390_v47 }
 0x42f   :  { %8751 = vmatpush1.bf16.msra.mxu0 %v13385_v50  ;;  %8837 = vmatpush1.bf16.msra.mxu1 %v13388_v21 }
 0x430   :  { %8752 = vmatprep.subr.bf16.mxu0 %v13393_v45  ;;  %8838 = vmatprep.subr.bf16.mxu1 %v13396_v51 }
 0x433   :  { %8753 = vmatpush1.bf16.msra.mxu0 %v13391_v54  ;;  %8839 = vmatpush1.bf16.msra.mxu1 %v13394_v48 }
 0x434   :  { %8754 = vmatprep.subr.bf16.mxu0 %v13399_v49  ;;  %8840 = vmatprep.subr.bf16.mxu1 %v13402_v55 }
 0x437   :  { %8755 = vmatpush1.bf16.msra.mxu0 %v13397_v58  ;;  %8841 = vmatpush1.bf16.msra.mxu1 %v13400_v52 }
 0x438   :  { %8756 = vmatprep.subr.bf16.mxu0 %v13405_v53  ;;  %8842 = vmatprep.subr.bf16.mxu1 %v13408_v59 }
 0x43b   :  { %8757 = vmatpush1.bf16.msra.mxu0 %v13403_v62  ;;  %8843 = vmatpush1.bf16.msra.mxu1 %v13406_v56 }
 0x43c   :  { %8758 = vmatprep.subr.bf16.mxu0 %v13411_v57  ;;  %8844 = vmatprep.subr.bf16.mxu1 %v13414_v63 }
 0x43f   :  { %8759 = vmatpush1.bf16.msra.mxu0 %v13409_v2  ;;  %8845 = vmatpush1.bf16.msra.mxu1 %v13412_v60 }
 0x440   :  { %8771 = vmatprep.subr.bf16.mxu0 %v13417_v61  ;;  %8857 = vmatprep.subr.bf16.mxu1 %v13420_v3 }
 0x4d5   :  { %v7050_v0 = vpop.f32.mrb[0].mxu0  ;;  %v7738_v1 = vpop.f32.mrb[0].mxu1 }
 0x4d6   :  { %v7758_v6 = vsel %vm7752_vm0, %v7050_v0, 0.0  ;;  %v7760_v7 = vsel %vm7752_vm0, %v7738_v1, 0.0  ;;  %v7052_v8 = vpop.f32.mrb[1].mxu0  ;;  %v7740_v9 = vpop.f32.mrb[1].mxu1 }
 0x4d7   :  { %v7767_v10 = vrot.slane %v7758_v6, 4  ;;  %v7781_v11 = vrot.slane %v7760_v7, 4  ;;  %v7759_v12 = vsel %vm7752_vm0, %v7052_v8, 0.0  ;;  %v7761_v13 = vsel %vm7752_vm0, %v7740_v9, 0.0  ;;  %v7054_v16 = vpop.f32.mrb[2].mxu0  ;;  %v7742_v17 = vpop.f32.mrb[2].mxu1 }
 0x4d8   :  { %v7774_v20 = vrot.slane %v7759_v12, 4  ;;  %v7788_v15 = vrot.slane %v7761_v13, 4  ;;  %v7056_v22 = vpop.f32.mrb[3].mxu0  ;;  %v7744_v23 = vpop.f32.mrb[3].mxu1 }
 0x4d9   :  { %v7768_v18 = vadd.f32 %v7767_v10, %v7758_v6  ;;  %v7782_v25 = vadd.f32 %v7781_v11, %v7760_v7 }
 0x4da   :  { %v7775_v26 = vadd.f32 %v7774_v20, %v7759_v12  ;;  %v7789_v27 = vadd.f32 %v7788_v15, %v7761_v13 }
 0x4db   :  { %v7769_v28 = vrot.slane %v7768_v18, 2  ;;  %v7783_v29 = vrot.slane %v7782_v25, 2 }
 0x4dc   :  { %v7776_v30 = vrot.slane %v7775_v26, 2  ;;  %v7790_v31 = vrot.slane %v7789_v27, 2 }
 0x4dd   :  { %v7770_v32 = vadd.f32 %v7769_v28, %v7768_v18  ;;  %v7784_v33 = vadd.f32 %v7783_v29, %v7782_v25  ;;  %v7747_v29 = vld [vmem:[%s18094_s2] sm:$0xf] }
 0x4de   :  { %v7777_v34 = vadd.f32 %v7776_v30, %v7775_v26  ;;  %v7791_v35 = vadd.f32 %v7790_v31, %v7789_v27  ;;  %v17310_v30 = vsub.s32 0, %v17271_v5  ;;  %v17313_v31 = vsub.s32 2, %v17271_v5 }
 0x4df   :  { %v7771_v36 = vrot.slane %v7770_v32, 1  ;;  %v7785_v37 = vrot.slane %v7784_v33, 1 }
 0x4e0   :  { %v7778_v38 = vrot.slane %v7777_v34, 1  ;;  %v7792_v39 = vrot.slane %v7791_v35, 1 }
 0x4e1   :  { %v7772_v40 = vadd.f32 %v7771_v36, %v7770_v32  ;;  %v7786_v41 = vadd.f32 %v7785_v37, %v7784_v33  ;;  %v17316_v32 = vsub.s32 1, %v17271_v5  ;;  %v17319_v33 = vsub.s32 3, %v17271_v5 }
 0x4e2   :  { %v7779_v42 = vadd.f32 %v7778_v38, %v7777_v34  ;;  %v7793_v43 = vadd.f32 %v7792_v39, %v7791_v35  ;;  %v7866_v34 = vrot.slane %v7747_v29, %v17310_v30  ;;  %v7874_v35 = vrot.slane %v7747_v29, %v17313_v31  ;;  %v7748_v38 = vld [vmem:[%s18095_s3] sm:$0xf] }
 0x4e3   :  { %v7794_v44 = vmul.f32 0.5, %v7772_v40  ;;  %v7796_v14 = vmul.f32 0.5, %v7786_v41  ;;  %v7870_v36 = vrot.slane %v7747_v29, %v17316_v32  ;;  %v7878_v39 = vrot.slane %v7747_v29, %v17319_v33  ;;  %v13448_v29 = vld [vmem:[%s18092_s4 + $0x2a8] ss:$16 sps:$4 sm:$0xff]  }
 0x4e4   :  { %v7795_v46 = vmul.f32 0.5, %v7779_v42  ;;  %v7797_v19 = vmul.f32 0.5, %v7793_v43 }
 0x4e5   :  { %v7798_v24 = vsub.f32 %v7050_v0, %v7794_v44  ;;  %v7800_v47 = vsub.f32 %v7738_v1, %v7796_v14 }
 0x4e6   :  { %v7799_v50 = vsub.f32 %v7052_v8, %v7795_v46  ;;  %v7801_v21 = vsub.f32 %v7740_v9, %v7797_v19  ;;  %v7915_v46 = vrot.slane %v7748_v38, %v17310_v30 }
 0x4e7   :  { %v17284_v45 = vsel %vm7752_vm0, %v7798_v24, 0.0  ;;  %v17288_v51 = vsel %vm7752_vm0, %v7800_v47, 0.0  ;;  %v7923_v47 = vrot.slane %v7748_v38, %v17313_v31 }
 0x4e8   :  { %v7814_v54 = vmul.f32 %v17284_v45, %v17284_v45  ;;  %v7816_v48 = vmul.f32 %v17288_v51, %v17288_v51  ;;  %v17296_v49 = vsel %vm7752_vm0, %v7799_v50, 0.0  ;;  %v17300_v55 = vsel %vm7752_vm0, %v7801_v21, 0.0 }
 0x4e9   :  { %v7815_v58 = vmul.f32 %v17296_v49, %v17296_v49  ;;  %v7817_v52 = vmul.f32 %v17300_v55, %v17300_v55 }
 0x4ea   :  { %v7823_v53 = vrot.slane %v7814_v54, 4  ;;  %v7837_v59 = vrot.slane %v7816_v48, 4 }
 0x4eb   :  { %v7830_v62 = vrot.slane %v7815_v58, 4  ;;  %v7844_v56 = vrot.slane %v7817_v52, 4 }
 0x4ec   :  { %v7824_v57 = vadd.f32 %v7823_v53, %v7814_v54  ;;  %v7838_v63 = vadd.f32 %v7837_v59, %v7816_v48  ;;  %v7919_v48 = vrot.slane %v7748_v38, %v17316_v32  ;;  %v7927_v53 = vrot.slane %v7748_v38, %v17319_v33  ;;  %v13459_v38 = vld [vmem:[%s18092_s4 + $0x2e4] ss:$16 sps:$4 sm:$0xff]  }
 0x4ed   :  { %v7831_v2 = vadd.f32 %v7830_v62, %v7815_v58  ;;  %v7845_v60 = vadd.f32 %v7844_v56, %v7817_v52 }
 0x4ee   :  { %v7825_v61 = vrot.slane %v7824_v57, 2  ;;  %v7839_v3 = vrot.slane %v7838_v63, 2 }
 0x4ef   :  { %v7832_v4 = vrot.slane %v7831_v2, 2  ;;  %v7846_v0 = vrot.slane %v7845_v60, 2 }
 0x4f0   :  { %v7826_v1 = vadd.f32 %v7825_v61, %v7824_v57  ;;  %v7840_v6 = vadd.f32 %v7839_v3, %v7838_v63  ;;  %v13728_v3 = vmov 0.0  }
 0x4f1   :  { %v7833_v7 = vadd.f32 %v7832_v4, %v7831_v2  ;;  %v7847_v8 = vadd.f32 %v7846_v0, %v7845_v60 }
 0x4f2   :  { %v7827_v9 = vrot.slane %v7826_v1, 1  ;;  %v7841_v10 = vrot.slane %v7840_v6, 1 }
 0x4f3   :  { %v7834_v11 = vrot.slane %v7833_v7, 1  ;;  %v7848_v12 = vrot.slane %v7847_v8, 1 }
 0x4f4   :  { %v7828_v13 = vadd.f32 %v7827_v9, %v7826_v1  ;;  %v7842_v16 = vadd.f32 %v7841_v10, %v7840_v6  ;;  %v13423_v1 = vld [vmem:[%s18092_s4 + $0x224] ss:$16 sps:$4 sm:$0xff]   ;;  %v13426_v6 = vld [vmem:[%s18092_s4 + $0x22c] ss:$16 sps:$4 sm:$0xff]   ;;  %v13424_v9 = vld [vmem:[%s18092_s4 + $0x228] ss:$16 sps:$4 sm:$0xff]  }
 0x4f5   :  { %v7835_v17 = vadd.f32 %v7834_v11, %v7833_v7  ;;  %v7849_v20 = vadd.f32 %v7848_v12, %v7847_v8  ;;  %v13421_v8 = vld [vmem:[%s18092_s4 + $0x220] ss:$16 sps:$4 sm:$0xff]   ;;  %v13429_v10 = vld [vmem:[%s18092_s4 + $0x244] ss:$16 sps:$4 sm:$0xff]   ;;  %v13432_v11 = vld [vmem:[%s18092_s4 + $0x24c] ss:$16 sps:$4 sm:$0xff]  }
 0x4f6   :  { %v7850_v15 = vmul.f32 0.5, %v7828_v13  ;;  %v7852_v22 = vmul.f32 0.5, %v7842_v16  ;;  %v13427_v12 = vld [vmem:[%s18092_s4 + $0x240] ss:$16 sps:$4 sm:$0xff]   ;;  %v13430_v13 = vld [vmem:[%s18092_s4 + $0x248] ss:$16 sps:$4 sm:$0xff]  }
 0x4f7   :  { %v7851_v23 = vmul.f32 0.5, %v7835_v17  ;;  %v7853_v18 = vmul.f32 0.5, %v7849_v20  ;;  %v13435_v16 = vld [vmem:[%s18092_s4 + $0x264] ss:$16 sps:$4 sm:$0xff]   ;;  %v13438_v17 = vld [vmem:[%s18092_s4 + $0x26c] ss:$16 sps:$4 sm:$0xff]  }
 0x4f8   :  { %v7854_v25 = vadd.f32 1e-05, %v7850_v15  ;;  %v7856_v26 = vadd.f32 1e-05, %v7852_v22  ;;  %v13433_v20 = vld [vmem:[%s18092_s4 + $0x260] ss:$16 sps:$4 sm:$0xff]  }
 0x4f9   :  { %v7855_v27 = vadd.f32 1e-05, %v7851_v23  ;;  %v7857_v28 = vadd.f32 1e-05, %v7853_v18  ;;  %v13436_v15 = vld [vmem:[%s18092_s4 + $0x268] ss:$16 sps:$4 sm:$0xff]  }
 0x4fa   :  { %13703 = vrsqrt.f32 %v7854_v25  ;;  %v13441_v22 = vld [vmem:[%s18092_s4 + $0x284] ss:$16 sps:$4 sm:$0xff]   ;;  %v13444_v23 = vld [vmem:[%s18092_s4 + $0x28c] ss:$16 sps:$4 sm:$0xff]   ;;  %v13439_v18 = vld [vmem:[%s18092_s4 + $0x280] ss:$16 sps:$4 sm:$0xff]  }
 0x4fb   :  { %13705 = vrsqrt.f32 %v7856_v26  ;;  %v13442_v25 = vld [vmem:[%s18092_s4 + $0x288] ss:$16 sps:$4 sm:$0xff]   ;;  %v13447_v26 = vld [vmem:[%s18092_s4 + $0x2a4] ss:$16 sps:$4 sm:$0xff]  }
 0x4fc   :  { %13707 = vrsqrt.f32 %v7855_v27  ;;  %v13450_v27 = vld [vmem:[%s18092_s4 + $0x2ac] ss:$16 sps:$4 sm:$0xff]  }
 0x4fd   :  { %13709 = vrsqrt.f32 %v7857_v28  ;;  %v13445_v28 = vld [vmem:[%s18092_s4 + $0x2a0] ss:$16 sps:$4 sm:$0xff]  }
 0x504   :  { %v13704_v37 = vpop.eup %13703 }
 0x505   :  { %v13706_v40 = vpop.eup %13705  ;;  %v7883_v41 = vmul.f32 %v13704_v37, %v7866_v34  ;;  %v13453_v34 = vld [vmem:[%s18092_s4 + $0x2c4] ss:$16 sps:$4 sm:$0xff]   ;;  %v13454_v37 = vld [vmem:[%s18092_s4 + $0x2c8] ss:$16 sps:$4 sm:$0xff]  }
 0x506   :  { %v13708_v42 = vpop.eup %13707  ;;  %v7885_v43 = vmul.f32 %v13706_v40, %v7874_v35  ;;  %v13456_v35 = vld [vmem:[%s18092_s4 + $0x2cc] ss:$16 sps:$4 sm:$0xff]   ;;  %v13457_v40 = vld [vmem:[%s18092_s4 + $0x2e0] ss:$16 sps:$4 sm:$0xff]  }
 0x507   :  { %v13710_v44 = vpop.eup %13709  ;;  %v7890_v14 = vrot.slane %v7883_v41, %v17310_v30  ;;  %v7884_v19 = vmul.f32 %v13708_v42, %v7870_v36  ;;  %v13451_v36 = vld [vmem:[%s18092_s4 + $0x2c0] ss:$16 sps:$4 sm:$0xff]   ;;  %v13460_v41 = vld [vmem:[%s18092_s4 + $0x2e8] ss:$16 sps:$4 sm:$0xff]   ;;  %v13465_v42 = vld [vmem:[%s18092_s4 + $0x304] ss:$16 sps:$4 sm:$0xff]  }
 0x508   :  { %v7898_v24 = vrot.slane %v7885_v43, %v17310_v30  ;;  %v7886_v50 = vmul.f32 %v13710_v44, %v7878_v39  ;;  %v13462_v39 = vld [vmem:[%s18092_s4 + $0x2ec] ss:$16 sps:$4 sm:$0xff]   ;;  %v13463_v44 = vld [vmem:[%s18092_s4 + $0x300] ss:$16 sps:$4 sm:$0xff]  }
 0x509   :  { %v7903_v21 = vmul.f32 %v7890_v14, %v17284_v45  ;;  %v7894_v54 = vrot.slane %v7884_v19, %v17310_v30  ;;  %v13468_v43 = vld [vmem:[%s18092_s4 + $0x30c] ss:$16 sps:$4 sm:$0xff]   ;;  %v13466_v14 = vld [vmem:[%s18092_s4 + $0x308] ss:$16 sps:$4 sm:$0xff]  }
 0x50a   :  { %v7905_v58 = vmul.f32 %v7898_v24, %v17288_v51  ;;  %v7902_v52 = vrot.slane %v7886_v50, %v17310_v30  ;;  %v13474_v19 = vld [vmem:[%s18092_s4 + $0x32c] ss:$16 sps:$4 sm:$0xff]   ;;  %v13469_v24 = vld [vmem:[%s18092_s4 + $0x320] ss:$16 sps:$4 sm:$0xff]   ;;  %v13477_v50 = vld [vmem:[%s18092_s4 + $0x344] ss:$16 sps:$4 sm:$0xff]  }
 0x50b   :  { %v7932_v59 = vadd.f32 %v7915_v46, %v7903_v21  ;;  %v7904_v62 = vmul.f32 %v7894_v54, %v17296_v49  ;;  %v13415_v49 = vld [vmem:[%s18092_s4 + $0x200] ss:$16 sps:$4 sm:$0xff]   ;;  %v13471_v46 = vld [vmem:[%s18092_s4 + $0x324] ss:$16 sps:$4 sm:$0xff]   ;;  %v13480_v21 = vld [vmem:[%s18092_s4 + $0x34c] ss:$16 sps:$4 sm:$0xff]  }
 0x50c   :  { %v17339_v56 = vadd.f32 %v7923_v47, %v7905_v58  ;;  %v7906_v57 = vmul.f32 %v7902_v52, %v17300_v55  ;;  %v13418_v55 = vld [vmem:[%s18092_s4 + $0x208] ss:$16 sps:$4 sm:$0xff]   ;;  %v13475_v54 = vld [vmem:[%s18092_s4 + $0x340] ss:$16 sps:$4 sm:$0xff]   ;;  %v13483_v58 = vld [vmem:[%s18092_s4 + $0x364] ss:$16 sps:$4 sm:$0xff]  }
 0x50d   :  { %v7933_v63 = vadd.f32 %v7919_v48, %v7904_v62  ;;  %v7940_v2 = vmax.f32 %v7932_v59, 0.0  ;;  %v13472_v47 = vld [vmem:[%s18092_s4 + $0x328] ss:$16 sps:$4 sm:$0xff]   ;;  %v13486_v52 = vld [vmem:[%s18092_s4 + $0x36c] ss:$16 sps:$4 sm:$0xff]  }
 0x50e   :  { %v7935_v45 = vadd.f32 %v7927_v53, %v7906_v57  ;;  %v13478_v48 = vld [vmem:[%s18092_s4 + $0x348] ss:$16 sps:$4 sm:$0xff]   ;;  %v13481_v53 = vld [vmem:[%s18092_s4 + $0x360] ss:$16 sps:$4 sm:$0xff]   ;;  %v13489_v62 = vld [vmem:[%s18092_s4 + $0x384] ss:$16 sps:$4 sm:$0xff]  }
 0x50f   :  { %v7941_v60 = vmax.f32 %v7933_v63, 0.0  ;;  %v11464_v0 = vpack.c.bf16 %v13728_v3, %v7940_v2  ;;  %v13484_v59 = vld [vmem:[%s18092_s4 + $0x368] ss:$16 sps:$4 sm:$0xff]   ;;  %v13492_v57 = vld [vmem:[%s18092_s4 + $0x38c] ss:$16 sps:$4 sm:$0xff]  }
 0x510   :  { %v7943_v61 = vmax.f32 %v7935_v45, 0.0  ;;  %v13487_v63 = vld [vmem:[%s18092_s4 + $0x380] ss:$16 sps:$4 sm:$0xff]   ;;  %v13490_v2 = vld [vmem:[%s18092_s4 + $0x388] ss:$16 sps:$4 sm:$0xff]  }
 0x511   :  { %v11461_v4 = vpack.c.bf16 %v13728_v3, %v7941_v60  ;;  %v13495_v45 = vld [vmem:[%s18092_s4 + $0x3a4] ss:$16 sps:$4 sm:$0xff]   ;;  %v13498_v60 = vld [vmem:[%s18092_s4 + $0x3ac] ss:$16 sps:$4 sm:$0xff]  }
 0x512   :  { %v11467_v7 = vpack.c.bf16 %v13728_v3, %v7943_v61  ;;  %v13493_v61 = vld [vmem:[%s18092_s4 + $0x3a0] ss:$16 sps:$4 sm:$0xff]  }
 0x513   :  { %11462 = vmatprep.mubr.msk.bf16.mxu0 %vm17344_vm2, %v11461_v4  ;;  %11474 = vmatprep.mubr.msk.bf16.mxu1 %vm17344_vm2, %v11461_v4  ;;  %v13496_v4 = vld [vmem:[%s18092_s4 + $0x3a8] ss:$16 sps:$4 sm:$0xff]  }
 0x514   :  { %11465 = vmatmul.mubr.msk.bf16.vlgmr.msra.gmra.mrb[4].mxu0 %vm17344_vm2, %v11464_v0  ;;  %11477 = vmatmul.mubr.msk.bf16.vlgmr.msra.gmra.mrb[4].mxu1 %vm17344_vm2, %v11464_v0  ;;  %v13499_v0 = vld [vmem:[%s18092_s4 + $0x3c0] ss:$16 sps:$4 sm:$0xff]  }
 0x515   :  { %8772 = vmatpush1.bf16.msra.mxu0 %v13415_v49  ;;  %8858 = vmatpush1.bf16.msra.mxu1 %v13418_v55  ;;  %v13501_v49 = vld [vmem:[%s18092_s4 + $0x3c4] ss:$16 sps:$4 sm:$0xff]   ;;  %v13504_v55 = vld [vmem:[%s18092_s4 + $0x3cc] ss:$16 sps:$4 sm:$0xff]  }
 0x516   :  { %11468 = vmatprep.mubr.msk.bf16.mxu0 %vm17344_vm2, %v11467_v7  ;;  %11480 = vmatprep.mubr.msk.bf16.mxu1 %vm17344_vm2, %v11467_v7  ;;  %v13510_v7 = vld [vmem:[%s18092_s4 + $0x3ec] ss:$16 sps:$4 sm:$0xff]  }
 0x517   :  { %8773 = vmatprep.subr.bf16.mxu0 %v13423_v1  ;;  %8859 = vmatprep.subr.bf16.mxu1 %v13426_v6  ;;  %v13502_v1 = vld [vmem:[%s18092_s4 + $0x3c8] ss:$16 sps:$4 sm:$0xff]   ;;  %v13507_v6 = vld [vmem:[%s18092_s4 + $0x3e4] ss:$16 sps:$4 sm:$0xff]  }
 0x519   :  { %8774 = vmatpush1.bf16.msra.mxu0 %v13421_v8  ;;  %8860 = vmatpush1.bf16.msra.mxu1 %v13424_v9  ;;  %v13505_v8 = vld [vmem:[%s18092_s4 + $0x3e0] ss:$16 sps:$4 sm:$0xff]   ;;  %v13508_v9 = vld [vmem:[%s18092_s4 + $0x3e8] ss:$16 sps:$4 sm:$0xff]  }
 0x51a   :  { %8775 = vmatprep.subr.bf16.mxu0 %v13429_v10  ;;  %8861 = vmatprep.subr.bf16.mxu1 %v13432_v11  ;;  %v7942_v10 = vmax.f32 %v17339_v56, 0.0  ;;  %v13513_v11 = vld [vmem:[%s18093_s7 + $0x4] ss:$16 sps:$4 sm:$0xff]   ;;  %v13514_v56 = vld [vmem:[%s18093_s7 + $0x8] ss:$16 sps:$4 sm:$0xff]  }
 0x51d   :  { %8776 = vmatpush1.bf16.msra.mxu0 %v13427_v12  ;;  %8862 = vmatpush1.bf16.msra.mxu1 %v13430_v13  ;;  %v13516_v12 = vld [vmem:[%s18093_s7 + $0xc] ss:$16 sps:$4 sm:$0xff]   ;;  %v13511_v13 = vld [vmem:[%s18093_s7] ss:$16 sps:$4 sm:$0xff]  }
 0x51e   :  { %8777 = vmatprep.subr.bf16.mxu0 %v13435_v16  ;;  %8863 = vmatprep.subr.bf16.mxu1 %v13438_v17  ;;  %v11470_v16 = vpack.c.bf16 %v13728_v3, %v7942_v10  ;;  %v13519_v17 = vld [vmem:[%s18093_s7 + $0x24] ss:$16 sps:$4 sm:$0xff]   ;;  %v13592_v10 = vld [vmem:[%s18093_s7 + $0x1a8] ss:$16 sps:$4 sm:$0xff]  }
 0x521   :  { %8778 = vmatpush1.bf16.msra.mxu0 %v13433_v20  ;;  %8864 = vmatpush1.bf16.msra.mxu1 %v13436_v15  ;;  %v13522_v20 = vld [vmem:[%s18093_s7 + $0x2c] ss:$16 sps:$4 sm:$0xff]   ;;  %v13517_v15 = vld [vmem:[%s18093_s7 + $0x20] ss:$16 sps:$4 sm:$0xff]  }
 0x522   :  { %8779 = vmatprep.subr.bf16.mxu0 %v13441_v22  ;;  %8865 = vmatprep.subr.bf16.mxu1 %v13444_v23  ;;  %v13520_v22 = vld [vmem:[%s18093_s7 + $0x28] ss:$16 sps:$4 sm:$0xff]   ;;  %v13525_v23 = vld [vmem:[%s18093_s7 + $0x44] ss:$16 sps:$4 sm:$0xff]  }
 0x525   :  { %8780 = vmatpush1.bf16.msra.mxu0 %v13439_v18  ;;  %8866 = vmatpush1.bf16.msra.mxu1 %v13442_v25  ;;  %v13528_v18 = vld [vmem:[%s18093_s7 + $0x4c] ss:$16 sps:$4 sm:$0xff]   ;;  %v13523_v25 = vld [vmem:[%s18093_s7 + $0x40] ss:$16 sps:$4 sm:$0xff]  }
 0x526   :  { %8781 = vmatprep.subr.bf16.mxu0 %v13447_v26  ;;  %8867 = vmatprep.subr.bf16.mxu1 %v13450_v27  ;;  %v13526_v26 = vld [vmem:[%s18093_s7 + $0x48] ss:$16 sps:$4 sm:$0xff]   ;;  %v13531_v27 = vld [vmem:[%s18093_s7 + $0x64] ss:$16 sps:$4 sm:$0xff]  }
 0x529   :  { %8782 = vmatpush1.bf16.msra.mxu0 %v13445_v28  ;;  %8868 = vmatpush1.bf16.msra.mxu1 %v13448_v29  ;;  %v13534_v28 = vld [vmem:[%s18093_s7 + $0x6c] ss:$16 sps:$4 sm:$0xff]   ;;  %v13529_v29 = vld [vmem:[%s18093_s7 + $0x60] ss:$16 sps:$4 sm:$0xff]  }
 0x52a   :  { %8783 = vmatprep.subr.bf16.mxu0 %v13453_v34  ;;  %8869 = vmatprep.subr.bf16.mxu1 %v13456_v35  ;;  %v13532_v34 = vld [vmem:[%s18093_s7 + $0x68] ss:$16 sps:$4 sm:$0xff]   ;;  %v13537_v35 = vld [vmem:[%s18093_s7 + $0x84] ss:$16 sps:$4 sm:$0xff]  }
 0x52d   :  { %8784 = vmatpush1.bf16.msra.mxu0 %v13451_v36  ;;  %8870 = vmatpush1.bf16.msra.mxu1 %v13454_v37  ;;  %v13540_v36 = vld [vmem:[%s18093_s7 + $0x8c] ss:$16 sps:$4 sm:$0xff]   ;;  %v13535_v37 = vld [vmem:[%s18093_s7 + $0x80] ss:$16 sps:$4 sm:$0xff]  }
 0x52e   :  { %8785 = vmatprep.subr.bf16.mxu0 %v13459_v38  ;;  %8871 = vmatprep.subr.bf16.mxu1 %v13462_v39  ;;  %v13538_v38 = vld [vmem:[%s18093_s7 + $0x88] ss:$16 sps:$4 sm:$0xff]   ;;  %v13543_v39 = vld [vmem:[%s18093_s7 + $0xa4] ss:$16 sps:$4 sm:$0xff]  }
 0x531   :  { %8786 = vmatpush1.bf16.msra.mxu0 %v13457_v40  ;;  %8872 = vmatpush1.bf16.msra.mxu1 %v13460_v41  ;;  %v13546_v40 = vld [vmem:[%s18093_s7 + $0xac] ss:$16 sps:$4 sm:$0xff]   ;;  %v13541_v41 = vld [vmem:[%s18093_s7 + $0xa0] ss:$16 sps:$4 sm:$0xff]  }
 0x532   :  { %8787 = vmatprep.subr.bf16.mxu0 %v13465_v42  ;;  %8873 = vmatprep.subr.bf16.mxu1 %v13468_v43  ;;  %v13544_v42 = vld [vmem:[%s18093_s7 + $0xa8] ss:$16 sps:$4 sm:$0xff]   ;;  %v13549_v43 = vld [vmem:[%s18093_s7 + $0xc4] ss:$16 sps:$4 sm:$0xff]  }
 0x535   :  { %8788 = vmatpush1.bf16.msra.mxu0 %v13463_v44  ;;  %8874 = vmatpush1.bf16.msra.mxu1 %v13466_v14  ;;  %v13552_v44 = vld [vmem:[%s18093_s7 + $0xcc] ss:$16 sps:$4 sm:$0xff]   ;;  %v13547_v14 = vld [vmem:[%s18093_s7 + $0xc0] ss:$16 sps:$4 sm:$0xff]  }
 0x536   :  { %8789 = vmatprep.subr.bf16.mxu0 %v13471_v46  ;;  %8875 = vmatprep.subr.bf16.mxu1 %v13474_v19  ;;  %v13550_v46 = vld [vmem:[%s18093_s7 + $0xc8] ss:$16 sps:$4 sm:$0xff]   ;;  %v13555_v19 = vld [vmem:[%s18093_s7 + $0xe4] ss:$16 sps:$4 sm:$0xff]  }
 0x539   :  { %8790 = vmatpush1.bf16.msra.mxu0 %v13469_v24  ;;  %8876 = vmatpush1.bf16.msra.mxu1 %v13472_v47  ;;  %v13558_v24 = vld [vmem:[%s18093_s7 + $0xec] ss:$16 sps:$4 sm:$0xff]   ;;  %v13553_v47 = vld [vmem:[%s18093_s7 + $0xe0] ss:$16 sps:$4 sm:$0xff]  }
 0x53a   :  { %8791 = vmatprep.subr.bf16.mxu0 %v13477_v50  ;;  %8877 = vmatprep.subr.bf16.mxu1 %v13480_v21  ;;  %v13556_v50 = vld [vmem:[%s18093_s7 + $0xe8] ss:$16 sps:$4 sm:$0xff]   ;;  %v13561_v21 = vld [vmem:[%s18093_s7 + $0x104] ss:$16 sps:$4 sm:$0xff]  }
 0x53d   :  { %8792 = vmatpush1.bf16.msra.mxu0 %v13475_v54  ;;  %8878 = vmatpush1.bf16.msra.mxu1 %v13478_v48  ;;  %v13564_v54 = vld [vmem:[%s18093_s7 + $0x10c] ss:$16 sps:$4 sm:$0xff]   ;;  %v13559_v48 = vld [vmem:[%s18093_s7 + $0x100] ss:$16 sps:$4 sm:$0xff]  }
 0x53e   :  { %8793 = vmatprep.subr.bf16.mxu0 %v13483_v58  ;;  %8879 = vmatprep.subr.bf16.mxu1 %v13486_v52  ;;  %v13562_v58 = vld [vmem:[%s18093_s7 + $0x108] ss:$16 sps:$4 sm:$0xff]   ;;  %v13567_v52 = vld [vmem:[%s18093_s7 + $0x124] ss:$16 sps:$4 sm:$0xff]  }
 0x541   :  { %8794 = vmatpush1.bf16.msra.mxu0 %v13481_v53  ;;  %8880 = vmatpush1.bf16.msra.mxu1 %v13484_v59  ;;  %v13570_v53 = vld [vmem:[%s18093_s7 + $0x12c] ss:$16 sps:$4 sm:$0xff]   ;;  %v13565_v59 = vld [vmem:[%s18093_s7 + $0x120] ss:$16 sps:$4 sm:$0xff]  }
 0x542   :  { %8795 = vmatprep.subr.bf16.mxu0 %v13489_v62  ;;  %8881 = vmatprep.subr.bf16.mxu1 %v13492_v57  ;;  %v13568_v62 = vld [vmem:[%s18093_s7 + $0x128] ss:$16 sps:$4 sm:$0xff]   ;;  %v13573_v57 = vld [vmem:[%s18093_s7 + $0x144] ss:$16 sps:$4 sm:$0xff]  }
 0x545   :  { %8796 = vmatpush1.bf16.msra.mxu0 %v13487_v63  ;;  %8882 = vmatpush1.bf16.msra.mxu1 %v13490_v2  ;;  %v13576_v63 = vld [vmem:[%s18093_s7 + $0x14c] ss:$16 sps:$4 sm:$0xff]   ;;  %v13571_v2 = vld [vmem:[%s18093_s7 + $0x140] ss:$16 sps:$4 sm:$0xff]  }
 0x546   :  { %8797 = vmatprep.subr.bf16.mxu0 %v13495_v45  ;;  %8883 = vmatprep.subr.bf16.mxu1 %v13498_v60  ;;  %v13574_v45 = vld [vmem:[%s18093_s7 + $0x148] ss:$16 sps:$4 sm:$0xff]   ;;  %v13579_v60 = vld [vmem:[%s18093_s7 + $0x164] ss:$16 sps:$4 sm:$0xff]  }
 0x549   :  { %8798 = vmatpush1.bf16.msra.mxu0 %v13493_v61  ;;  %8884 = vmatpush1.bf16.msra.mxu1 %v13496_v4  ;;  %v13582_v61 = vld [vmem:[%s18093_s7 + $0x16c] ss:$16 sps:$4 sm:$0xff]   ;;  %v13577_v4 = vld [vmem:[%s18093_s7 + $0x160] ss:$16 sps:$4 sm:$0xff]  }
 0x54a   :  { %8799 = vmatprep.subr.bf16.mxu0 %v13501_v49  ;;  %8885 = vmatprep.subr.bf16.mxu1 %v13504_v55  ;;  %v13580_v49 = vld [vmem:[%s18093_s7 + $0x168] ss:$16 sps:$4 sm:$0xff]   ;;  %v13585_v55 = vld [vmem:[%s18093_s7 + $0x184] ss:$16 sps:$4 sm:$0xff]  }
 0x54d   :  { %8800 = vmatpush1.bf16.msra.mxu0 %v13499_v0  ;;  %8886 = vmatpush1.bf16.msra.mxu1 %v13502_v1  ;;  %v13588_v0 = vld [vmem:[%s18093_s7 + $0x18c] ss:$16 sps:$4 sm:$0xff]   ;;  %v13583_v1 = vld [vmem:[%s18093_s7 + $0x180] ss:$16 sps:$4 sm:$0xff]  }
 0x54e   :  { %8801 = vmatprep.subr.bf16.mxu0 %v13507_v6  ;;  %8887 = vmatprep.subr.bf16.mxu1 %v13510_v7  ;;  %v13586_v6 = vld [vmem:[%s18093_s7 + $0x188] ss:$16 sps:$4 sm:$0xff]   ;;  %v13591_v7 = vld [vmem:[%s18093_s7 + $0x1a4] ss:$16 sps:$4 sm:$0xff]  }
 0x551   :  { %8802 = vmatpush1.bf16.msra.mxu0 %v13505_v8  ;;  %8888 = vmatpush1.bf16.msra.mxu1 %v13508_v9  ;;  %v13594_v8 = vld [vmem:[%s18093_s7 + $0x1ac] ss:$16 sps:$4 sm:$0xff]   ;;  %v13589_v9 = vld [vmem:[%s18093_s7 + $0x1a0] ss:$16 sps:$4 sm:$0xff]  }
 0x552   :  { %9872 = vmatprep.subr.bf16.mxu0 %v13513_v11  ;;  %9958 = vmatprep.subr.bf16.mxu1 %v13516_v12  ;;  %v13597_v11 = vld [vmem:[%s18093_s7 + $0x1c4] ss:$16 sps:$4 sm:$0xff]   ;;  %v13600_v12 = vld [vmem:[%s18093_s7 + $0x1cc] ss:$16 sps:$4 sm:$0xff]  }
 0x554   :  { %11471 = vmatmul.mubr.msk.bf16.vlgmr.msra.gmra.mrb[4].mxu0 %vm17344_vm2, %v11470_v16  ;;  %11483 = vmatmul.mubr.msk.bf16.vlgmr.msra.gmra.mrb[4].mxu1 %vm17344_vm2, %v11470_v16  ;;  %v13603_v16 = vld [vmem:[%s18093_s7 + $0x1e4] ss:$16 sps:$4 sm:$0xff]  }
 0x555   :  { %9873 = vmatpush1.bf16.msra.mxu0 %v13511_v13  ;;  %9959 = vmatpush1.bf16.msra.mxu1 %v13514_v56  ;;  %v13595_v13 = vld [vmem:[%s18093_s7 + $0x1c0] ss:$16 sps:$4 sm:$0xff]   ;;  %v13598_v56 = vld [vmem:[%s18093_s7 + $0x1c8] ss:$16 sps:$4 sm:$0xff]  }
 0x556   :  { %9874 = vmatprep.subr.bf16.mxu0 %v13519_v17  ;;  %9960 = vmatprep.subr.bf16.mxu1 %v13522_v20  ;;  %v13606_v17 = vld [vmem:[%s18093_s7 + $0x1ec] ss:$16 sps:$4 sm:$0xff]   ;;  %v13601_v20 = vld [vmem:[%s18093_s7 + $0x1e0] ss:$16 sps:$4 sm:$0xff]  }
 0x559   :  { %9875 = vmatpush1.bf16.msra.mxu0 %v13517_v15  ;;  %9961 = vmatpush1.bf16.msra.mxu1 %v13520_v22  ;;  %v13604_v15 = vld [vmem:[%s18093_s7 + $0x1e8] ss:$16 sps:$4 sm:$0xff]   ;;  %v13609_v22 = vld [vmem:[%s18093_s7 + $0x204] ss:$16 sps:$4 sm:$0xff]  }
 0x55a   :  { %9876 = vmatprep.subr.bf16.mxu0 %v13525_v23  ;;  %9962 = vmatprep.subr.bf16.mxu1 %v13528_v18  ;;  %v13612_v23 = vld [vmem:[%s18093_s7 + $0x20c] ss:$16 sps:$4 sm:$0xff]  }
 0x55d   :  { %9877 = vmatpush1.bf16.msra.mxu0 %v13523_v25  ;;  %9963 = vmatpush1.bf16.msra.mxu1 %v13526_v26 }
 0x55e   :  { %9878 = vmatprep.subr.bf16.mxu0 %v13531_v27  ;;  %9964 = vmatprep.subr.bf16.mxu1 %v13534_v28 }
 0x561   :  { %9879 = vmatpush1.bf16.msra.mxu0 %v13529_v29  ;;  %9965 = vmatpush1.bf16.msra.mxu1 %v13532_v34 }
 0x562   :  { %9880 = vmatprep.subr.bf16.mxu0 %v13537_v35  ;;  %9966 = vmatprep.subr.bf16.mxu1 %v13540_v36 }
 0x565   :  { %9881 = vmatpush1.bf16.msra.mxu0 %v13535_v37  ;;  %9967 = vmatpush1.bf16.msra.mxu1 %v13538_v38 }
 0x566   :  { %9882 = vmatprep.subr.bf16.mxu0 %v13543_v39  ;;  %9968 = vmatprep.subr.bf16.mxu1 %v13546_v40 }
 0x569   :  { %9883 = vmatpush1.bf16.msra.mxu0 %v13541_v41  ;;  %9969 = vmatpush1.bf16.msra.mxu1 %v13544_v42 }
 0x56a   :  { %9884 = vmatprep.subr.bf16.mxu0 %v13549_v43  ;;  %9970 = vmatprep.subr.bf16.mxu1 %v13552_v44 }
 0x56d   :  { %9885 = vmatpush1.bf16.msra.mxu0 %v13547_v14  ;;  %9971 = vmatpush1.bf16.msra.mxu1 %v13550_v46 }
 0x56e   :  { %9886 = vmatprep.subr.bf16.mxu0 %v13555_v19  ;;  %9972 = vmatprep.subr.bf16.mxu1 %v13558_v24 }
 0x571   :  { %9887 = vmatpush1.bf16.msra.mxu0 %v13553_v47  ;;  %9973 = vmatpush1.bf16.msra.mxu1 %v13556_v50 }
 0x572   :  { %9888 = vmatprep.subr.bf16.mxu0 %v13561_v21  ;;  %9974 = vmatprep.subr.bf16.mxu1 %v13564_v54 }
 0x575   :  { %9889 = vmatpush1.bf16.msra.mxu0 %v13559_v48  ;;  %9975 = vmatpush1.bf16.msra.mxu1 %v13562_v58 }
 0x576   :  { %9890 = vmatprep.subr.bf16.mxu0 %v13567_v52  ;;  %9976 = vmatprep.subr.bf16.mxu1 %v13570_v53 }
 0x579   :  { %9891 = vmatpush1.bf16.msra.mxu0 %v13565_v59  ;;  %9977 = vmatpush1.bf16.msra.mxu1 %v13568_v62 }
 0x57a   :  { %9892 = vmatprep.subr.bf16.mxu0 %v13573_v57  ;;  %9978 = vmatprep.subr.bf16.mxu1 %v13576_v63 }
 0x57d   :  { %9893 = vmatpush1.bf16.msra.mxu0 %v13571_v2  ;;  %9979 = vmatpush1.bf16.msra.mxu1 %v13574_v45 }
 0x57e   :  { %9894 = vmatprep.subr.bf16.mxu0 %v13579_v60  ;;  %9980 = vmatprep.subr.bf16.mxu1 %v13582_v61 }
 0x581   :  { %9895 = vmatpush1.bf16.msra.mxu0 %v13577_v4  ;;  %9981 = vmatpush1.bf16.msra.mxu1 %v13580_v49 }
 0x582   :  { %9896 = vmatprep.subr.bf16.mxu0 %v13585_v55  ;;  %9982 = vmatprep.subr.bf16.mxu1 %v13588_v0 }
 0x585   :  { %9897 = vmatpush1.bf16.msra.mxu0 %v13583_v1  ;;  %9983 = vmatpush1.bf16.msra.mxu1 %v13586_v6 }
 0x586   :  { %9898 = vmatprep.subr.bf16.mxu0 %v13591_v7  ;;  %9984 = vmatprep.subr.bf16.mxu1 %v13594_v8 }
 0x589   :  { %9899 = vmatpush1.bf16.msra.mxu0 %v13589_v9  ;;  %9985 = vmatpush1.bf16.msra.mxu1 %v13592_v10 }
 0x58a   :  { %9900 = vmatprep.subr.bf16.mxu0 %v13597_v11  ;;  %9986 = vmatprep.subr.bf16.mxu1 %v13600_v12 }
 0x58d   :  { %9901 = vmatpush1.bf16.msra.mxu0 %v13595_v13  ;;  %9987 = vmatpush1.bf16.msra.mxu1 %v13598_v56 }
 0x58e   :  { %9902 = vmatprep.subr.bf16.mxu0 %v13603_v16  ;;  %9988 = vmatprep.subr.bf16.mxu1 %v13606_v17 }
 0x591   :  { %9903 = vmatpush1.bf16.msra.mxu0 %v13601_v20  ;;  %9989 = vmatpush1.bf16.msra.mxu1 %v13604_v15 }
 0x592   :  { %9915 = vmatprep.subr.bf16.mxu0 %v13609_v22  ;;  %10001 = vmatprep.subr.bf16.mxu1 %v13612_v23 }
 0x627   :  { %v8805_v18 = vpop.f32.mrb[4].mxu0  ;;  %v8891_v25 = vpop.f32.mrb[4].mxu1 }
 0x628   :  { %v8902_v26 = vsel %vm7752_vm0, %v8805_v18, 0.0  ;;  %v8904_v27 = vsel %vm7752_vm0, %v8891_v25, 0.0  ;;  %v8807_v28 = vpop.f32.mrb[5].mxu0  ;;  %v8893_v29 = vpop.f32.mrb[5].mxu1 }
 0x629   :  { %v8911_v34 = vrot.slane %v8902_v26, 4  ;;  %v8925_v35 = vrot.slane %v8904_v27, 4  ;;  %v8903_v36 = vsel %vm7752_vm0, %v8807_v28, 0.0  ;;  %v8905_v37 = vsel %vm7752_vm0, %v8893_v29, 0.0  ;;  %v8809_v38 = vpop.f32.mrb[6].mxu0  ;;  %v8895_v39 = vpop.f32.mrb[6].mxu1 }
 0x62a   :  { %v8918_v40 = vrot.slane %v8903_v36, 4  ;;  %v8932_v41 = vrot.slane %v8905_v37, 4  ;;  %v8811_v42 = vpop.f32.mrb[7].mxu0  ;;  %v8897_v43 = vpop.f32.mrb[7].mxu1 }
 0x62b   :  { %v8912_v44 = vadd.f32 %v8911_v34, %v8902_v26  ;;  %v8926_v14 = vadd.f32 %v8925_v35, %v8904_v27 }
 0x62c   :  { %v8919_v46 = vadd.f32 %v8918_v40, %v8903_v36  ;;  %v8933_v19 = vadd.f32 %v8932_v41, %v8905_v37 }
 0x62d   :  { %v8913_v24 = vrot.slane %v8912_v44, 2  ;;  %v8927_v47 = vrot.slane %v8926_v14, 2 }
 0x62e   :  { %v8920_v50 = vrot.slane %v8919_v46, 2  ;;  %v8934_v21 = vrot.slane %v8933_v19, 2 }
 0x62f   :  { %v8914_v54 = vadd.f32 %v8913_v24, %v8912_v44  ;;  %v8928_v48 = vadd.f32 %v8927_v47, %v8926_v14 }
 0x630   :  { %v8921_v58 = vadd.f32 %v8920_v50, %v8919_v46  ;;  %v8935_v52 = vadd.f32 %v8934_v21, %v8933_v19 }
 0x631   :  { %v8915_v53 = vrot.slane %v8914_v54, 1  ;;  %v8929_v59 = vrot.slane %v8928_v48, 1 }
 0x632   :  { %v8922_v62 = vrot.slane %v8921_v58, 1  ;;  %v8936_v57 = vrot.slane %v8935_v52, 1 }
 0x633   :  { %v8916_v63 = vadd.f32 %v8915_v53, %v8914_v54  ;;  %v8930_v2 = vadd.f32 %v8929_v59, %v8928_v48 }
 0x634   :  { %v8923_v45 = vadd.f32 %v8922_v62, %v8921_v58  ;;  %v8937_v60 = vadd.f32 %v8936_v57, %v8935_v52  ;;  %v8900_v52 = vld [vmem:[%s18096_s5] sm:$0xf] }
 0x635   :  { %v8938_v61 = vmul.f32 0.5, %v8916_v63  ;;  %v8940_v4 = vmul.f32 0.5, %v8930_v2  ;;  %v9010_v53 = vrot.slane %v8900_v52, %v17310_v30  ;;  %v9018_v59 = vrot.slane %v8900_v52, %v17313_v31  ;;  %v8901_v63 = vld [vmem:[%s18097_s6] sm:$0xf] }
 0x636   :  { %v8939_v49 = vmul.f32 0.5, %v8923_v45  ;;  %v8941_v55 = vmul.f32 0.5, %v8937_v60  ;;  %v9014_v62 = vrot.slane %v8900_v52, %v17316_v32  ;;  %v9022_v2 = vrot.slane %v8900_v52, %v17319_v33  ;;  %v13640_v52 = vld [vmem:[%s18093_s7 + $0x2a8] ss:$16 sps:$4 sm:$0xff]  }
 0x637   :  { %v8942_v0 = vsub.f32 %v8805_v18, %v8938_v61  ;;  %v8944_v1 = vsub.f32 %v8891_v25, %v8940_v4 }
 0x638   :  { %v8943_v6 = vsub.f32 %v8807_v28, %v8939_v49  ;;  %v8945_v7 = vsub.f32 %v8893_v29, %v8941_v55 }
 0x639   :  { %v17763_v8 = vsel %vm7752_vm0, %v8942_v0, 0.0  ;;  %v17767_v9 = vsel %vm7752_vm0, %v8944_v1, 0.0  ;;  %v9059_v0 = vrot.slane %v8901_v63, %v17310_v30 }
 0x63a   :  { %v8958_v10 = vmul.f32 %v17763_v8, %v17763_v8  ;;  %v8960_v11 = vmul.f32 %v17767_v9, %v17767_v9  ;;  %v17775_v12 = vsel %vm7752_vm0, %v8943_v6, 0.0  ;;  %v17779_v13 = vsel %vm7752_vm0, %v8945_v7, 0.0 }
 0x63b   :  { %v8959_v56 = vmul.f32 %v17775_v12, %v17775_v12  ;;  %v8961_v16 = vmul.f32 %v17779_v13, %v17779_v13  ;;  %v9067_v7 = vrot.slane %v8901_v63, %v17313_v31 }
 0x63c   :  { %v8967_v17 = vrot.slane %v8958_v10, 4  ;;  %v8981_v20 = vrot.slane %v8960_v11, 4 }
 0x63d   :  { %v8974_v15 = vrot.slane %v8959_v56, 4  ;;  %v8988_v22 = vrot.slane %v8961_v16, 4 }
 0x63e   :  { %v8968_v23 = vadd.f32 %v8967_v17, %v8958_v10  ;;  %v8982_v18 = vadd.f32 %v8981_v20, %v8960_v11 }
 0x63f   :  { %v8975_v25 = vadd.f32 %v8974_v15, %v8959_v56  ;;  %v8989_v26 = vadd.f32 %v8988_v22, %v8961_v16  ;;  %v9063_v16 = vrot.slane %v8901_v63, %v17316_v32  ;;  %v9071_v15 = vrot.slane %v8901_v63, %v17319_v33  ;;  %v13651_v63 = vld [vmem:[%s18093_s7 + $0x2e4] ss:$16 sps:$4 sm:$0xff]  }
 0x640   :  { %v8969_v27 = vrot.slane %v8968_v23, 2  ;;  %v8983_v28 = vrot.slane %v8982_v18, 2 }
 0x641   :  { %v8976_v29 = vrot.slane %v8975_v25, 2  ;;  %v8990_v34 = vrot.slane %v8989_v26, 2 }
 0x642   :  { %v8970_v35 = vadd.f32 %v8969_v27, %v8968_v23  ;;  %v8984_v36 = vadd.f32 %v8983_v28, %v8982_v18 }
 0x643   :  { %v8977_v37 = vadd.f32 %v8976_v29, %v8975_v25  ;;  %v8991_v38 = vadd.f32 %v8990_v34, %v8989_v26 }
 0x644   :  { %v8971_v39 = vrot.slane %v8970_v35, 1  ;;  %v8985_v40 = vrot.slane %v8984_v36, 1 }
 0x645   :  { %v8978_v41 = vrot.slane %v8977_v37, 1  ;;  %v8992_v42 = vrot.slane %v8991_v38, 1 }
 0x646   :  { %v8972_v43 = vadd.f32 %v8971_v39, %v8970_v35  ;;  %v8986_v44 = vadd.f32 %v8985_v40, %v8984_v36  ;;  %v13610_v35 = vld [vmem:[%s18093_s7 + $0x208] ss:$16 sps:$4 sm:$0xff]   ;;  %v13618_v36 = vld [vmem:[%s18093_s7 + $0x22c] ss:$16 sps:$4 sm:$0xff]   ;;  %v13621_v40 = vld [vmem:[%s18093_s7 + $0x244] ss:$16 sps:$4 sm:$0xff]  }
 0x647   :  { %v8979_v14 = vadd.f32 %v8978_v41, %v8977_v37  ;;  %v8993_v46 = vadd.f32 %v8992_v42, %v8991_v38  ;;  %v13613_v38 = vld [vmem:[%s18093_s7 + $0x220] ss:$16 sps:$4 sm:$0xff]   ;;  %v13616_v39 = vld [vmem:[%s18093_s7 + $0x228] ss:$16 sps:$4 sm:$0xff]   ;;  %v13624_v41 = vld [vmem:[%s18093_s7 + $0x24c] ss:$16 sps:$4 sm:$0xff]  }
 0x648   :  { %v8994_v19 = vmul.f32 0.5, %v8972_v43  ;;  %v8996_v24 = vmul.f32 0.5, %v8986_v44  ;;  %v13619_v42 = vld [vmem:[%s18093_s7 + $0x240] ss:$16 sps:$4 sm:$0xff]   ;;  %v13622_v43 = vld [vmem:[%s18093_s7 + $0x248] ss:$16 sps:$4 sm:$0xff]  }
 0x649   :  { %v8995_v47 = vmul.f32 0.5, %v8979_v14  ;;  %v8997_v50 = vmul.f32 0.5, %v8993_v46  ;;  %v13627_v44 = vld [vmem:[%s18093_s7 + $0x264] ss:$16 sps:$4 sm:$0xff]   ;;  %v13630_v14 = vld [vmem:[%s18093_s7 + $0x26c] ss:$16 sps:$4 sm:$0xff]  }
 0x64a   :  { %v8998_v21 = vadd.f32 1e-05, %v8994_v19  ;;  %v9000_v54 = vadd.f32 1e-05, %v8996_v24  ;;  %v13625_v46 = vld [vmem:[%s18093_s7 + $0x260] ss:$16 sps:$4 sm:$0xff]  }
 0x64b   :  { %v8999_v48 = vadd.f32 1e-05, %v8995_v47  ;;  %v9001_v58 = vadd.f32 1e-05, %v8997_v50  ;;  %v13628_v19 = vld [vmem:[%s18093_s7 + $0x268] ss:$16 sps:$4 sm:$0xff]  }
 0x64c   :  { %13711 = vrsqrt.f32 %v8998_v21  ;;  %v13633_v24 = vld [vmem:[%s18093_s7 + $0x284] ss:$16 sps:$4 sm:$0xff]   ;;  %v13636_v47 = vld [vmem:[%s18093_s7 + $0x28c] ss:$16 sps:$4 sm:$0xff]   ;;  %v13631_v50 = vld [vmem:[%s18093_s7 + $0x280] ss:$16 sps:$4 sm:$0xff]  }
 0x64d   :  { %13713 = vrsqrt.f32 %v9000_v54  ;;  %v13634_v21 = vld [vmem:[%s18093_s7 + $0x288] ss:$16 sps:$4 sm:$0xff]   ;;  %v13639_v54 = vld [vmem:[%s18093_s7 + $0x2a4] ss:$16 sps:$4 sm:$0xff]  }
 0x64e   :  { %13715 = vrsqrt.f32 %v8999_v48  ;;  %v13642_v48 = vld [vmem:[%s18093_s7 + $0x2ac] ss:$16 sps:$4 sm:$0xff]  }
 0x64f   :  { %13717 = vrsqrt.f32 %v9001_v58  ;;  %v13637_v58 = vld [vmem:[%s18093_s7 + $0x2a0] ss:$16 sps:$4 sm:$0xff]  }
 0x656   :  { %v13712_v57 = vpop.eup %13711 }
 0x657   :  { %v13714_v45 = vpop.eup %13713  ;;  %v9027_v60 = vmul.f32 %v13712_v57, %v9010_v53  ;;  %v13645_v53 = vld [vmem:[%s18093_s7 + $0x2c4] ss:$16 sps:$4 sm:$0xff]   ;;  %v13646_v57 = vld [vmem:[%s18093_s7 + $0x2c8] ss:$16 sps:$4 sm:$0xff]  }
 0x658   :  { %v13716_v61 = vpop.eup %13715  ;;  %v9029_v4 = vmul.f32 %v13714_v45, %v9018_v59  ;;  %v13648_v59 = vld [vmem:[%s18093_s7 + $0x2cc] ss:$16 sps:$4 sm:$0xff]   ;;  %v13649_v45 = vld [vmem:[%s18093_s7 + $0x2e0] ss:$16 sps:$4 sm:$0xff]  }
 0x659   :  { %v13718_v49 = vpop.eup %13717  ;;  %v9034_v55 = vrot.slane %v9027_v60, %v17310_v30  ;;  %v9028_v1 = vmul.f32 %v13716_v61, %v9014_v62  ;;  %v13643_v62 = vld [vmem:[%s18093_s7 + $0x2c0] ss:$16 sps:$4 sm:$0xff]   ;;  %v13652_v60 = vld [vmem:[%s18093_s7 + $0x2e8] ss:$16 sps:$4 sm:$0xff]   ;;  %v13657_v61 = vld [vmem:[%s18093_s7 + $0x304] ss:$16 sps:$4 sm:$0xff]  }
 0x65a   :  { %v9042_v6 = vrot.slane %v9029_v4, %v17310_v30  ;;  %v9030_v10 = vmul.f32 %v13718_v49, %v9022_v2  ;;  %v13654_v2 = vld [vmem:[%s18093_s7 + $0x2ec] ss:$16 sps:$4 sm:$0xff]   ;;  %v13655_v49 = vld [vmem:[%s18093_s7 + $0x300] ss:$16 sps:$4 sm:$0xff]  }
 0x65b   :  { %v9047_v11 = vmul.f32 %v9034_v55, %v17763_v8  ;;  %v9038_v56 = vrot.slane %v9028_v1, %v17310_v30  ;;  %v13660_v4 = vld [vmem:[%s18093_s7 + $0x30c] ss:$16 sps:$4 sm:$0xff]   ;;  %v13658_v55 = vld [vmem:[%s18093_s7 + $0x308] ss:$16 sps:$4 sm:$0xff]  }
 0x65c   :  { %v9049_v17 = vmul.f32 %v9042_v6, %v17767_v9  ;;  %v9046_v20 = vrot.slane %v9030_v10, %v17310_v30  ;;  %v13607_v9 = vld [vmem:[%s18093_s7 + $0x200] ss:$16 sps:$4 sm:$0xff]   ;;  %v13666_v1 = vld [vmem:[%s18093_s7 + $0x32c] ss:$16 sps:$4 sm:$0xff]   ;;  %v13669_v10 = vld [vmem:[%s18093_s7 + $0x344] ss:$16 sps:$4 sm:$0xff]  }
 0x65d   :  { %v9076_v22 = vadd.f32 %v9059_v0, %v9047_v11  ;;  %v9048_v23 = vmul.f32 %v9038_v56, %v17775_v12  ;;  %v13663_v0 = vld [vmem:[%s18093_s7 + $0x324] ss:$16 sps:$4 sm:$0xff]   ;;  %v13661_v6 = vld [vmem:[%s18093_s7 + $0x320] ss:$16 sps:$4 sm:$0xff]   ;;  %v13672_v11 = vld [vmem:[%s18093_s7 + $0x34c] ss:$16 sps:$4 sm:$0xff]  }
 0x65e   :  { %v17806_v18 = vadd.f32 %v9067_v7, %v9049_v17  ;;  %v9050_v25 = vmul.f32 %v9046_v20, %v17779_v13  ;;  %v13615_v13 = vld [vmem:[%s18093_s7 + $0x224] ss:$16 sps:$4 sm:$0xff]   ;;  %v13664_v7 = vld [vmem:[%s18093_s7 + $0x328] ss:$16 sps:$4 sm:$0xff]   ;;  %v13667_v56 = vld [vmem:[%s18093_s7 + $0x340] ss:$16 sps:$4 sm:$0xff]  }
 0x65f   :  { %v9077_v26 = vadd.f32 %v9063_v16, %v9048_v23  ;;  %v9084_v27 = vmax.f32 %v9076_v22, 0.0  ;;  %v13670_v16 = vld [vmem:[%s18093_s7 + $0x348] ss:$16 sps:$4 sm:$0xff]   ;;  %v13675_v17 = vld [vmem:[%s18093_s7 + $0x364] ss:$16 sps:$4 sm:$0xff]  }
 0x660   :  { %v9079_v8 = vadd.f32 %v9071_v15, %v9050_v25  ;;  %v13678_v20 = vld [vmem:[%s18093_s7 + $0x36c] ss:$16 sps:$4 sm:$0xff]   ;;  %v13673_v15 = vld [vmem:[%s18093_s7 + $0x360] ss:$16 sps:$4 sm:$0xff]   ;;  %v13676_v22 = vld [vmem:[%s18093_s7 + $0x368] ss:$16 sps:$4 sm:$0xff]  }
 0x661   :  { %v9085_v28 = vmax.f32 %v9077_v26, 0.0  ;;  %v11616_v12 = vpack.c.bf16 %v13728_v3, %v9084_v27  ;;  %v13681_v23 = vld [vmem:[%s18093_s7 + $0x384] ss:$16 sps:$4 sm:$0xff]   ;;  %v13684_v25 = vld [vmem:[%s18093_s7 + $0x38c] ss:$16 sps:$4 sm:$0xff]  }
 0x662   :  { %v9087_v29 = vmax.f32 %v9079_v8, 0.0  ;;  %v13679_v26 = vld [vmem:[%s18093_s7 + $0x380] ss:$16 sps:$4 sm:$0xff]   ;;  %v13682_v27 = vld [vmem:[%s18093_s7 + $0x388] ss:$16 sps:$4 sm:$0xff]  }
 0x663   :  { %v11613_v34 = vpack.c.bf16 %v13728_v3, %v9085_v28  ;;  %v13687_v8 = vld [vmem:[%s18093_s7 + $0x3a4] ss:$16 sps:$4 sm:$0xff]   ;;  %v13690_v28 = vld [vmem:[%s18093_s7 + $0x3ac] ss:$16 sps:$4 sm:$0xff]  }
 0x664   :  { %v11619_v37 = vpack.c.bf16 %v13728_v3, %v9087_v29  ;;  %v13685_v29 = vld [vmem:[%s18093_s7 + $0x3a0] ss:$16 sps:$4 sm:$0xff]  }
 0x665   :  { %11614 = vmatprep.mubr.msk.bf16.mxu0 %vm17344_vm2, %v11613_v34  ;;  %11626 = vmatprep.mubr.msk.bf16.mxu1 %vm17344_vm2, %v11613_v34  ;;  %v13688_v34 = vld [vmem:[%s18093_s7 + $0x3a8] ss:$16 sps:$4 sm:$0xff]  }
 0x666   :  { %11617 = vmatmul.mubr.msk.bf16.vlgmr.msra.gmra.mrb[8].mxu0 %vm17344_vm2, %v11616_v12  ;;  %11629 = vmatmul.mubr.msk.bf16.vlgmr.msra.gmra.mrb[8].mxu1 %vm17344_vm2, %v11616_v12  ;;  %v13691_v12 = vld [vmem:[%s18093_s7 + $0x3c0] ss:$16 sps:$4 sm:$0xff]  }
 0x667   :  { %9916 = vmatpush1.bf16.msra.mxu0 %v13607_v9  ;;  %10002 = vmatpush1.bf16.msra.mxu1 %v13610_v35  ;;  %v13693_v9 = vld [vmem:[%s18093_s7 + $0x3c4] ss:$16 sps:$4 sm:$0xff]   ;;  %v13696_v35 = vld [vmem:[%s18093_s7 + $0x3cc] ss:$16 sps:$4 sm:$0xff]  }
 0x668   :  { %11620 = vmatprep.mubr.msk.bf16.mxu0 %vm17344_vm2, %v11619_v37  ;;  %11632 = vmatprep.mubr.msk.bf16.mxu1 %vm17344_vm2, %v11619_v37  ;;  %v13702_v37 = vld [vmem:[%s18093_s7 + $0x3ec] ss:$16 sps:$4 sm:$0xff]  }
 0x669   :  { %9917 = vmatprep.subr.bf16.mxu0 %v13615_v13  ;;  %10003 = vmatprep.subr.bf16.mxu1 %v13618_v36  ;;  %v13694_v13 = vld [vmem:[%s18093_s7 + $0x3c8] ss:$16 sps:$4 sm:$0xff]   ;;  %v13699_v36 = vld [vmem:[%s18093_s7 + $0x3e4] ss:$16 sps:$4 sm:$0xff]  }
 0x66b   :  { %9918 = vmatpush1.bf16.msra.mxu0 %v13613_v38  ;;  %10004 = vmatpush1.bf16.msra.mxu1 %v13616_v39  ;;  %v13697_v38 = vld [vmem:[%s18093_s7 + $0x3e0] ss:$16 sps:$4 sm:$0xff]   ;;  %v13700_v39 = vld [vmem:[%s18093_s7 + $0x3e8] ss:$16 sps:$4 sm:$0xff]  }
 0x66c   :  { %9919 = vmatprep.subr.bf16.mxu0 %v13621_v40  ;;  %10005 = vmatprep.subr.bf16.mxu1 %v13624_v41  ;;  %v9086_v40 = vmax.f32 %v17806_v18, 0.0 }
 0x66e   :  { %v11622_v41 = vpack.c.bf16 %v13728_v3, %v9086_v40 }
 0x66f   :  { %9920 = vmatpush1.bf16.msra.mxu0 %v13619_v42  ;;  %10006 = vmatpush1.bf16.msra.mxu1 %v13622_v43  ;;  %v13729_v42 = vmov 0.0|0.0  }
 0x670   :  { %9921 = vmatprep.subr.bf16.mxu0 %v13627_v44  ;;  %10007 = vmatprep.subr.bf16.mxu1 %v13630_v14  ;;  %10270 = vst [vmem:[%s18098_s10 + $0x10] sm:$0xff] %v13729_v42  ;;  %10271 = vst [vmem:[%s18098_s10 + $0x18] sm:$0xff] %v13729_v42 }
 0x673   :  { %9922 = vmatpush1.bf16.msra.mxu0 %v13625_v46  ;;  %10008 = vmatpush1.bf16.msra.mxu1 %v13628_v19 }
 0x674   :  { %9923 = vmatprep.subr.bf16.mxu0 %v13633_v24  ;;  %10009 = vmatprep.subr.bf16.mxu1 %v13636_v47 }
 0x677   :  { %9924 = vmatpush1.bf16.msra.mxu0 %v13631_v50  ;;  %10010 = vmatpush1.bf16.msra.mxu1 %v13634_v21 }
 0x678   :  { %9925 = vmatprep.subr.bf16.mxu0 %v13639_v54  ;;  %10011 = vmatprep.subr.bf16.mxu1 %v13642_v48 }
 0x67b   :  { %9926 = vmatpush1.bf16.msra.mxu0 %v13637_v58  ;;  %10012 = vmatpush1.bf16.msra.mxu1 %v13640_v52 }
 0x67c   :  { %9927 = vmatprep.subr.bf16.mxu0 %v13645_v53  ;;  %10013 = vmatprep.subr.bf16.mxu1 %v13648_v59 }
 0x67f   :  { %9928 = vmatpush1.bf16.msra.mxu0 %v13643_v62  ;;  %10014 = vmatpush1.bf16.msra.mxu1 %v13646_v57 }
 0x680   :  { %9929 = vmatprep.subr.bf16.mxu0 %v13651_v63  ;;  %10015 = vmatprep.subr.bf16.mxu1 %v13654_v2 }
 0x683   :  { %9930 = vmatpush1.bf16.msra.mxu0 %v13649_v45  ;;  %10016 = vmatpush1.bf16.msra.mxu1 %v13652_v60 }
 0x684   :  { %9931 = vmatprep.subr.bf16.mxu0 %v13657_v61  ;;  %10017 = vmatprep.subr.bf16.mxu1 %v13660_v4 }
 0x687   :  { %9932 = vmatpush1.bf16.msra.mxu0 %v13655_v49  ;;  %10018 = vmatpush1.bf16.msra.mxu1 %v13658_v55 }
 0x688   :  { %9933 = vmatprep.subr.bf16.mxu0 %v13663_v0  ;;  %10019 = vmatprep.subr.bf16.mxu1 %v13666_v1 }
 0x68b   :  { %9934 = vmatpush1.bf16.msra.mxu0 %v13661_v6  ;;  %10020 = vmatpush1.bf16.msra.mxu1 %v13664_v7 }
 0x68c   :  { %9935 = vmatprep.subr.bf16.mxu0 %v13669_v10  ;;  %10021 = vmatprep.subr.bf16.mxu1 %v13672_v11 }
 0x68f   :  { %9936 = vmatpush1.bf16.msra.mxu0 %v13667_v56  ;;  %10022 = vmatpush1.bf16.msra.mxu1 %v13670_v16 }
 0x690   :  { %9937 = vmatprep.subr.bf16.mxu0 %v13675_v17  ;;  %10023 = vmatprep.subr.bf16.mxu1 %v13678_v20 }
 0x693   :  { %9938 = vmatpush1.bf16.msra.mxu0 %v13673_v15  ;;  %10024 = vmatpush1.bf16.msra.mxu1 %v13676_v22 }
 0x694   :  { %9939 = vmatprep.subr.bf16.mxu0 %v13681_v23  ;;  %10025 = vmatprep.subr.bf16.mxu1 %v13684_v25 }
 0x697   :  { %9940 = vmatpush1.bf16.msra.mxu0 %v13679_v26  ;;  %10026 = vmatpush1.bf16.msra.mxu1 %v13682_v27 }
 0x698   :  { %9941 = vmatprep.subr.bf16.mxu0 %v13687_v8  ;;  %10027 = vmatprep.subr.bf16.mxu1 %v13690_v28 }
 0x69b   :  { %9942 = vmatpush1.bf16.msra.mxu0 %v13685_v29  ;;  %10028 = vmatpush1.bf16.msra.mxu1 %v13688_v34 }
 0x69c   :  { %9943 = vmatprep.subr.bf16.mxu0 %v13693_v9  ;;  %10029 = vmatprep.subr.bf16.mxu1 %v13696_v35 }
 0x69f   :  { %9944 = vmatpush1.bf16.msra.mxu0 %v13691_v12  ;;  %10030 = vmatpush1.bf16.msra.mxu1 %v13694_v13 }
 0x6a0   :  { %9945 = vmatprep.subr.bf16.mxu0 %v13699_v36  ;;  %10031 = vmatprep.subr.bf16.mxu1 %v13702_v37 }
 0x6a3   :  { %9946 = vmatpush1.bf16.msra.mxu0 %v13697_v38  ;;  %10032 = vmatpush1.bf16.msra.mxu1 %v13700_v39 }
 0x6a6   :  { %11623 = vmatmul.mubr.msk.bf16.vlgmr.msra.gmra.mrb[8].mxu0 %vm17344_vm2, %v11622_v41  ;;  %11635 = vmatmul.mubr.msk.bf16.vlgmr.msra.gmra.mrb[8].mxu1 %vm17344_vm2, %v11622_v41 }
 0x779   :  { %v9949_v18 = vpop.f32.mrb[8].mxu0  ;;  %v10035_v43 = vpop.f32.mrb[8].mxu1 }
 0x77a   :  { %v10046_v3 = vsel %vm7752_vm0, %v9949_v18, 0.0  ;;  %v10048_v44 = vsel %vm7752_vm0, %v10035_v43, 0.0  ;;  %v9951_v14 = vpop.f32.mrb[9].mxu0  ;;  %v10037_v51 = vpop.f32.mrb[9].mxu1 }
 0x77b   :  { %v10055_v46 = vrot.slane %v10046_v3, 4  ;;  %v10069_v19 = vrot.slane %v10048_v44, 4  ;;  %v10047_v24 = vsel %vm7752_vm0, %v9951_v14, 0.0  ;;  %v10049_v47 = vsel %vm7752_vm0, %v10037_v51, 0.0  ;;  %v9953_v50 = vpop.f32.mrb[10].mxu0  ;;  %v10039_v21 = vpop.f32.mrb[10].mxu1 }
 0x77c   :  { %v10062_v54 = vrot.slane %v10047_v24, 4  ;;  %v10076_v48 = vrot.slane %v10049_v47, 4  ;;  %v9955_v58 = vpop.f32.mrb[11].mxu0  ;;  %v10041_v52 = vpop.f32.mrb[11].mxu1 }
 0x77d   :  { %v10056_v53 = vadd.f32 %v10055_v46, %v10046_v3  ;;  %v10070_v59 = vadd.f32 %v10069_v19, %v10048_v44 }
 0x77e   :  { %v10063_v62 = vadd.f32 %v10062_v54, %v10047_v24  ;;  %v10077_v57 = vadd.f32 %v10076_v48, %v10049_v47 }
 0x77f   :  { %v10057_v63 = vrot.slane %v10056_v53, 2  ;;  %v10071_v2 = vrot.slane %v10070_v59, 2 }
 0x780   :  { %v10064_v45 = vrot.slane %v10063_v62, 2  ;;  %v10078_v60 = vrot.slane %v10077_v57, 2 }
 0x781   :  { %v10058_v61 = vadd.f32 %v10057_v63, %v10056_v53  ;;  %v10072_v4 = vadd.f32 %v10071_v2, %v10070_v59 }
 0x782   :  { %v10065_v49 = vadd.f32 %v10064_v45, %v10063_v62  ;;  %v10079_v55 = vadd.f32 %v10078_v60, %v10077_v57 }
 0x783   :  { %v10059_v0 = vrot.slane %v10058_v61, 1  ;;  %v10073_v1 = vrot.slane %v10072_v4, 1 }
 0x784   :  { %v10066_v6 = vrot.slane %v10065_v49, 1  ;;  %v10080_v7 = vrot.slane %v10079_v55, 1 }
 0x785   :  { %v10060_v10 = vadd.f32 %v10059_v0, %v10058_v61  ;;  %v10074_v11 = vadd.f32 %v10073_v1, %v10072_v4  ;;  %v10044_v4 = vld [vmem:[%s18099_s8] sm:$0xf] }
 0x786   :  { %v10067_v56 = vadd.f32 %v10066_v6, %v10065_v49  ;;  %v10081_v16 = vadd.f32 %v10080_v7, %v10079_v55  ;;  %v10154_v49 = vrot.slane %v10044_v4, %v17310_v30  ;;  %v10162_v55 = vrot.slane %v10044_v4, %v17313_v31  ;;  %v10045_v6 = vld [vmem:[%s18100_s9] sm:$0xf] }
 0x787   :  { %v10082_v17 = vmul.f32 0.5, %v10060_v10  ;;  %v10084_v20 = vmul.f32 0.5, %v10074_v11  ;;  %v10158_v0 = vrot.slane %v10044_v4, %v17316_v32  ;;  %v10166_v7 = vrot.slane %v10044_v4, %v17319_v33 }
 0x788   :  { %v10083_v15 = vmul.f32 0.5, %v10067_v56  ;;  %v10085_v22 = vmul.f32 0.5, %v10081_v16 }
 0x789   :  { %v10086_v23 = vsub.f32 %v9949_v18, %v10082_v17  ;;  %v10088_v25 = vsub.f32 %v10035_v43, %v10084_v20 }
 0x78a   :  { %v10087_v26 = vsub.f32 %v9951_v14, %v10083_v15  ;;  %v10089_v27 = vsub.f32 %v10037_v51, %v10085_v22  ;;  %v10203_v15 = vrot.slane %v10045_v6, %v17310_v30 }
 0x78b   :  { %v18032_v8 = vsel %vm7752_vm0, %v10086_v23, 0.0  ;;  %v18036_v28 = vsel %vm7752_vm0, %v10088_v25, 0.0  ;;  %v10211_v25 = vrot.slane %v10045_v6, %v17313_v31 }
 0x78c   :  { %v10102_v29 = vmul.f32 %v18032_v8, %v18032_v8  ;;  %v10104_v34 = vmul.f32 %v18036_v28, %v18036_v28  ;;  %v18044_v9 = vsel %vm7752_vm0, %v10087_v26, 0.0  ;;  %v18048_v35 = vsel %vm7752_vm0, %v10089_v27, 0.0 }
 0x78d   :  { %v10103_v12 = vmul.f32 %v18044_v9, %v18044_v9  ;;  %v10105_v13 = vmul.f32 %v18048_v35, %v18048_v35 }
 0x78e   :  { %v10111_v36 = vrot.slane %v10102_v29, 4  ;;  %v10125_v37 = vrot.slane %v10104_v34, 4 }
 0x78f   :  { %v10118_v38 = vrot.slane %v10103_v12, 4  ;;  %v10132_v39 = vrot.slane %v10105_v13, 4 }
 0x790   :  { %v10112_v40 = vadd.f32 %v10111_v36, %v10102_v29  ;;  %v10126_v41 = vadd.f32 %v10125_v37, %v10104_v34  ;;  %v10207_v34 = vrot.slane %v10045_v6, %v17316_v32  ;;  %v10215_v36 = vrot.slane %v10045_v6, %v17319_v33 }
 0x791   :  { %v10119_v42 = vadd.f32 %v10118_v38, %v10103_v12  ;;  %v10133_v18 = vadd.f32 %v10132_v39, %v10105_v13 }
 0x792   :  { %v10113_v43 = vrot.slane %v10112_v40, 2  ;;  %v10127_v3 = vrot.slane %v10126_v41, 2 }
 0x793   :  { %v10120_v44 = vrot.slane %v10119_v42, 2  ;;  %v10134_v14 = vrot.slane %v10133_v18, 2 }
 0x794   :  { %v10114_v51 = vadd.f32 %v10113_v43, %v10112_v40  ;;  %v10128_v46 = vadd.f32 %v10127_v3, %v10126_v41 }
 0x795   :  { %v10121_v19 = vadd.f32 %v10120_v44, %v10119_v42  ;;  %v10135_v24 = vadd.f32 %v10134_v14, %v10133_v18 }
 0x796   :  { %v10115_v47 = vrot.slane %v10114_v51, 1  ;;  %v10129_v50 = vrot.slane %v10128_v46, 1 }
 0x797   :  { %v10122_v21 = vrot.slane %v10121_v19, 1  ;;  %v10136_v54 = vrot.slane %v10135_v24, 1 }
 0x798   :  { %v10116_v48 = vadd.f32 %v10115_v47, %v10114_v51  ;;  %v10130_v58 = vadd.f32 %v10129_v50, %v10128_v46 }
 0x799   :  { %v10123_v52 = vadd.f32 %v10122_v21, %v10121_v19  ;;  %v10137_v53 = vadd.f32 %v10136_v54, %v10135_v24 }
 0x79a   :  { %v10138_v59 = vmul.f32 0.5, %v10116_v48  ;;  %v10140_v62 = vmul.f32 0.5, %v10130_v58 }
 0x79b   :  { %v10139_v57 = vmul.f32 0.5, %v10123_v52  ;;  %v10141_v63 = vmul.f32 0.5, %v10137_v53 }
 0x79c   :  { %v10142_v2 = vadd.f32 1e-05, %v10138_v59  ;;  %v10144_v45 = vadd.f32 1e-05, %v10140_v62 }
 0x79d   :  { %v10143_v60 = vadd.f32 1e-05, %v10139_v57  ;;  %v10145_v61 = vadd.f32 1e-05, %v10141_v63 }
 0x79e   :  { %13719 = vrsqrt.f32 %v10142_v2 }
 0x79f   :  { %13721 = vrsqrt.f32 %v10144_v45 }
 0x7a0   :  { %13723 = vrsqrt.f32 %v10143_v60 }
 0x7a1   :  { %13725 = vrsqrt.f32 %v10145_v61 }
 0x7a8   :  { %v13720_v1 = vpop.eup %13719 }
 0x7a9   :  { %v13722_v10 = vpop.eup %13721  ;;  %v10171_v11 = vmul.f32 %v13720_v1, %v10154_v49 }
 0x7aa   :  { %v13724_v56 = vpop.eup %13723  ;;  %v10173_v16 = vmul.f32 %v13722_v10, %v10162_v55 }
 0x7ab   :  { %v13726_v17 = vpop.eup %13725  ;;  %v10178_v20 = vrot.slane %v10171_v11, %v17310_v30  ;;  %v10172_v22 = vmul.f32 %v13724_v56, %v10158_v0 }
 0x7ac   :  { %v10186_v23 = vrot.slane %v10173_v16, %v17310_v30  ;;  %v10174_v26 = vmul.f32 %v13726_v17, %v10166_v7 }
 0x7ad   :  { %v10191_v27 = vmul.f32 %v10178_v20, %v18032_v8  ;;  %v10182_v29 = vrot.slane %v10172_v22, %v17310_v30 }
 0x7ae   :  { %v10193_v12 = vmul.f32 %v10186_v23, %v18036_v28  ;;  %v10190_v13 = vrot.slane %v10174_v26, %v17310_v30 }
 0x7af   :  { %v10220_v37 = vadd.f32 %v10203_v15, %v10191_v27  ;;  %v10192_v38 = vmul.f32 %v10182_v29, %v18044_v9 }
 0x7b0   :  { %v10222_v39 = vadd.f32 %v10211_v25, %v10193_v12  ;;  %v10194_v40 = vmul.f32 %v10190_v13, %v18048_v35 }
 0x7b1   :  { %v10228_v31 = vmax.f32 %v10220_v37, 0.0  ;;  %v10221_v41 = vadd.f32 %v10207_v34, %v10192_v38 }
 0x7b2   :  { %v10230_v42 = vmax.f32 %v10222_v39, 0.0  ;;  %v10223_v8 = vadd.f32 %v10215_v36, %v10194_v40 }
 0x7b3   :  { %v10236_v18 = vsel %vm7752_vm0, %v10228_v31, 0.0  ;;  %v10229_v32 = vmax.f32 %v10221_v41, 0.0 }
 0x7b4   :  { %v10238_v28 = vsel %vm7752_vm0, %v10230_v42, 0.0  ;;  %v10231_v30 = vmax.f32 %v10223_v8, 0.0 }
 0x7b5   :  { %v10237_v33 = vsel %vm7752_vm0, %v10229_v32, 0.0 }
 0x7b6   :  { %v11640_v43 = vpack.c.bf16 %v10237_v33, %v10236_v18  ;;  %v10239_v9 = vsel %vm7752_vm0, %v10231_v30, 0.0 }
 0x7b7   :  { %v11641_v35 = vpack.c.bf16 %v10239_v9, %v10238_v28 }
 0x7b8   :  { %10268 = vst [vmem:[%s18098_s10] sm:$0xff] %v11640_v43 }
 0x7b9   :  { %10269 = vst [vmem:[%s18098_s10 + $0x8] sm:$0xff] %v11641_v35 }

</bundles_post_ra>
